<compile_context>
chip_gen: v5e
topology: v5e:2x2
jax: 0.10.0
libtpu: 0.0.40
codegen_flags: <defaults>
</compile_context>

<pallas_src>
import functools

import jax
import jax.numpy as jnp
from jax.experimental import pallas as pl
from jax.experimental.pallas import tpu as pltpu

B = 2          # batch
NI = 9         # num_inputs  (external input width)
NO = 8         # num_outputs (external output width)
N = 16         # memory rows
M = 16         # memory width
H = 32         # controller (LSTM) hidden size
T_STEPS = 8    # sequence length processed by the fused kernel

RHO = M + 6              # read-head fc width: k, beta, g, s(3), gamma   = 22
WHO = 3 * M + 6          # write-head fc width: + e, a                   = 54
HO_PAD = 128             # lane-dense fused heads + fc(h) projection width
OFF_R = 0                # read-head addressing params   lanes [0, 32)
OFF_W = 32               # write-head addressing params  lanes [32, 64)
OFF_E = 64               # write-head erase vector       lanes [64, 80)
OFF_A = 80               # write-head add vector         lanes [80, 96)
OFF_FC = 96              # output-fc (h part)            lanes [96, 104)
SSZ = M + 2 * H + 2 * N  # useful lanes in packed small-state slab       = 112
SLAB = 128               # lane-dense packed state slab width


# ----------------------------- kernel helpers (traced inside kernel) ---------

def _sigmoid(x):
    # exact sigmoid via EUP tanh (no VPU divide on the recurrent chain)
    return 0.5 * (jnp.tanh(0.5 * x) + 1.0)


def _softplus(x):
    # numerically stable softplus
    return jnp.maximum(x, 0.0) + jnp.log(1.0 + jnp.exp(-jnp.abs(x)))


def _softmax(x, axis):
    # exact divide: the result feeds the recurrent head-weight state
    m = jnp.max(x, axis=axis, keepdims=True)
    e = jnp.exp(x - m)
    return e / jnp.sum(e, axis=axis, keepdims=True)


# ----------------------------- the fused sequence kernel ---------------------

def ntm_seq_kernel(
    T,           # static: number of steps (bound via functools.partial)
    # inputs
    xs_ref,      # (T*B, NI)   whole input sequence, row t*B+b = x[t, b]
    s0_ref,      # (B, SLAB)   packed initial state [r | h | c | w_r | w_w | pad]
    mem0_ref,    # (B, N, M)   initial memory
    wxi_ref,     # (NI, 4H)    LSTM weight, x part (hoisted out of recurrence)
    wrh_ref,     # (M+H, 4H)   LSTM weight, [read | hidden] recurrent part
    bl_ref,      # (1, 4H)     LSTM bias (folded into the hoisted x-gates)
    wh_ref,      # (H, 128)    fused, lane-aligned [read | write | e | a | fc_h]
    bh_ref,      # (1, 128)
    wfcr_ref,    # (M, NO)     output fc (read part)
    # outputs
    os_ref,      # (T*B, NO)   per-step outputs (row t*B+b)
    sout_ref,    # (B, SLAB)   packed final state
    mem_out_ref, # (B, N, M)   final memory
):
    # ---- unpack initial state into register-carried values ------------------
    s0 = s0_ref[...]
    r = s0[:, 0:M]
    h = s0[:, M:M + H]
    c = s0[:, M + H:M + 2 * H]
    w_r = s0[:, M + 2 * H:M + 2 * H + N]
    w_w = s0[:, M + 2 * H + N:M + 2 * H + 2 * N]
    mem = mem0_ref[...]

    # ---- hoisted x-part of the LSTM gates (one matmul for all T steps) ------
    xg = (jnp.dot(xs_ref[...], wxi_ref[...], preferred_element_type=jnp.float32)
          + bl_ref[...])                                           # (T*B, 4H)
    wrh = wrh_ref[...]
    wh = wh_ref[...]
    bh = bh_ref[...]

    r_steps = []
    fc_steps = []
    # Fully-unrolled static time loop: all slice offsets are compile-time
    # constants and the state stays in vregs across steps.
    for t in range(T):
        # ---- LSTM controller: recurrent part only ----------------------------
        rh = jnp.concatenate([r, h], axis=1)                       # (B, M+H)
        gates = (xg[t * B:(t + 1) * B, :]
                 + jnp.dot(rh, wrh, preferred_element_type=jnp.float32))
        i_g = _sigmoid(gates[:, 0:H])
        f_g = _sigmoid(gates[:, H:2 * H])
        g_g = jnp.tanh(gates[:, 2 * H:3 * H])
        o_g = _sigmoid(gates[:, 3 * H:4 * H])
        c = f_g * c + i_g * g_g
        h = o_g * jnp.tanh(c)                                      # controller out

        # ---- heads + output-fc(h part): one fused, lane-aligned matmul -------
        ho = jnp.dot(h, wh, preferred_element_type=jnp.float32) + bh   # (B, 128)

        # ---- batched read+write addressing (one (2B, N) pass) ----------------
        addr = jnp.concatenate([ho[:, OFF_R:OFF_R + 32],
                                ho[:, OFF_W:OFF_W + 32]], axis=0)   # (2B, 32)
        k = addr[:, 0:M] + 1e-16                                    # (2B, M)
        beta = _softplus(addr[:, M:M + 1])
        g_int = _sigmoid(addr[:, M + 1:M + 2])
        s = _softmax(addr[:, M + 2:M + 5], axis=1)
        gamma = 1.0 + _softplus(addr[:, M + 5:M + 6])
        w_prev = jnp.concatenate([w_r, w_w], axis=0)                # (2B, N)

        mem_eps = mem + 1e-16
        dot_r = jnp.sum(mem_eps * k[0:B][:, None, :], axis=-1)      # (B, N)
        dot_w = jnp.sum(mem_eps * k[B:2 * B][:, None, :], axis=-1)  # (B, N)
        dot = jnp.concatenate([dot_r, dot_w], axis=0)               # (2B, N)
        norm_mem = jnp.sqrt(jnp.sum(mem_eps * mem_eps, axis=-1))    # (B, N), reused
        norm_mem2 = jnp.concatenate([norm_mem, norm_mem], axis=0)   # (2B, N)
        norm_k = jnp.sqrt(jnp.sum(k * k, axis=-1, keepdims=True))   # (2B, 1)
        cos = dot * pl.reciprocal(jnp.maximum(norm_mem2 * norm_k, 1e-8),
                                  approx=True)
        wc = _softmax(beta * cos, axis=1)                           # content
        wg = g_int * wc + (1.0 - g_int) * w_prev                    # interpolate
        # 3-tap circular shift: out[i] = wg[i-1]*s0 + wg[i]*s1 + wg[i+1]*s2
        w_m1 = jnp.concatenate([wg[:, -1:], wg[:, :-1]], axis=1)
        w_p1 = jnp.concatenate([wg[:, 1:], wg[:, :1]], axis=1)
        w_hat = w_m1 * s[:, 0:1] + wg * s[:, 1:2] + w_p1 * s[:, 2:3]
        # sharpen; clamp avoids exp(gamma * log(0)); exact final normalization
        wt = jnp.exp(gamma * jnp.log(jnp.maximum(w_hat, 1e-30)))
        w_all = wt / (jnp.sum(wt, axis=1, keepdims=True) + 1e-16)   # (2B, N)
        w_r = w_all[0:B]
        w_w = w_all[B:2 * B]

        # ---- read head (reads pre-write memory; head order = [read, write]) --
        r = jnp.sum(w_r[:, :, None] * mem, axis=1)                  # (B, M)

        # ---- write head -------------------------------------------------------
        e_w = _sigmoid(ho[:, OFF_E:OFF_E + M])
        a_w = ho[:, OFF_A:OFF_A + M]
        erase = w_w[:, :, None] * e_w[:, None, :]
        add = w_w[:, :, None] * a_w[:, None, :]
        mem = mem * (1.0 - erase) + add

        # collect per-step pieces; the output projection is batched after the loop
        r_steps.append(r)
        fc_steps.append(ho[:, OFF_FC:OFF_FC + NO])

    # ---- batched external output: o = sigmoid(fc(cat([controller_out, read])))
    r_all = jnp.concatenate(r_steps, axis=0)                        # (T*B, M)
    fc_all = jnp.concatenate(fc_steps, axis=0)                      # (T*B, NO)
    os_ref[...] = _sigmoid(
        fc_all + jnp.dot(r_all, wfcr_ref[...], preferred_element_type=jnp.float32))

    # ---- pack final small state into one lane-dense slab --------------------
    pad = jnp.zeros((B, SLAB - SSZ), jnp.float32)
    sout_ref[...] = jnp.concatenate([r, h, c, w_r, w_w, pad], axis=1)
    mem_out_ref[...] = mem


# ----------------------------- wrapper ---------------------------------------

def _fuse_params(params):
    (wxi, wri, whh, b_lstm, w_read, b_read, w_write, b_write,
     wfc_h, wfc_r, b_fc) = params
    wrh = jnp.concatenate([wri, whh], axis=0)                      # (M+H, 4H)
    # fused head/fc weight padded to 128 lanes, groups on aligned offsets
    wh = jnp.zeros((H, HO_PAD), jnp.float32)
    wh = wh.at[:, OFF_R:OFF_R + RHO].set(w_read)
    wh = wh.at[:, OFF_W:OFF_W + RHO].set(w_write[:, 0:RHO])
    wh = wh.at[:, OFF_E:OFF_E + M].set(w_write[:, RHO:RHO + M])
    wh = wh.at[:, OFF_A:OFF_A + M].set(w_write[:, RHO + M:RHO + 2 * M])
    wh = wh.at[:, OFF_FC:OFF_FC + NO].set(wfc_h)
    bh = jnp.zeros((1, HO_PAD), jnp.float32)
    bh = bh.at[:, OFF_R:OFF_R + RHO].set(b_read)
    bh = bh.at[:, OFF_W:OFF_W + RHO].set(b_write[:, 0:RHO])
    bh = bh.at[:, OFF_E:OFF_E + M].set(b_write[:, RHO:RHO + M])
    bh = bh.at[:, OFF_A:OFF_A + M].set(b_write[:, RHO + M:RHO + 2 * M])
    bh = bh.at[:, OFF_FC:OFF_FC + NO].set(b_fc)
    return wxi, wrh, b_lstm, wh, bh, wfc_r


@jax.jit
def ntm_forward_seq(xs, prev_read, h, c, w_r, w_w, mem, params):
    """Run T NTM steps in one fused pallas_call.

    Returns (os[T, B, NO], (read, (h, c), (w_r, w_w), memory)) where each step
    matches the PyTorch NTM.forward semantics.
    """
    T = xs.shape[0]
    wxi, wrh, b_lstm, wh, bh, wfc_r = _fuse_params(params)
    state_in = jnp.concatenate(
        [prev_read, h, c, w_r, w_w, jnp.zeros((B, SLAB - SSZ), jnp.float32)],
        axis=1)                                                    # (B, SLAB)
    xs_flat = xs.reshape(T * B, NI)                                # row t*B+b

    c2 = lambda i: (0, 0)
    c3 = lambda i: (0, 0, 0)
    out_shapes = (
        jax.ShapeDtypeStruct((T * B, NO), jnp.float32),   # per-step outputs
        jax.ShapeDtypeStruct((B, SLAB), jnp.float32),     # packed final state
        jax.ShapeDtypeStruct((B, N, M), jnp.float32),     # final memory
    )
    outs = pl.pallas_call(
        functools.partial(ntm_seq_kernel, T),
        grid=(1,),                                         # single invocation
        out_shape=out_shapes,
        in_specs=[
            pl.BlockSpec((T * B, NI), c2),                 # full input sequence
            pl.BlockSpec((B, SLAB), c2),                   # packed initial state
            pl.BlockSpec((B, N, M), c3),                   # initial memory
            pl.BlockSpec((NI, 4 * H), c2),                 # LSTM weight (x part)
            pl.BlockSpec((M + H, 4 * H), c2),              # LSTM weight ([r|h] part)
            pl.BlockSpec((1, 4 * H), c2),
            pl.BlockSpec((H, HO_PAD), c2),                 # fused heads/fc weight
            pl.BlockSpec((1, HO_PAD), c2),
            pl.BlockSpec((M, NO), c2),                     # output fc (read part)
        ],
        out_specs=(
            pl.BlockSpec((T * B, NO), c2),
            pl.BlockSpec((B, SLAB), c2),
            pl.BlockSpec((B, N, M), c3),
        ),
        compiler_params=pltpu.CompilerParams(
            dimension_semantics=("arbitrary",)),
    )(xs_flat, state_in, mem, wxi, wrh, b_lstm, wh, bh, wfc_r)

    os_flat, state_slab, mem_new = outs
    os = os_flat.reshape(T, B, NO)
    r_new = state_slab[:, 0:M]
    h_new = state_slab[:, M:M + H]
    c_new = state_slab[:, M + H:M + 2 * H]
    wr_new = state_slab[:, M + 2 * H:M + 2 * H + N]
    ww_new = state_slab[:, M + 2 * H + N:M + 2 * H + 2 * N]
    return os, (r_new, (h_new, c_new), (wr_new, ww_new), mem_new)


# ----------------------------- deterministic parameter init ------------------

def _xavier(key, shape):
    fan_in, fan_out = shape
    limit = (6.0 / (fan_in + fan_out)) ** 0.5
    return jax.random.uniform(key, shape, jnp.float32, -limit, limit)


def init_params(key):
    ks = jax.random.split(key, 11)
    wxi = _xavier(ks[0], (NI, 4 * H))          # LSTM W_ih (x part), transposed
    wri = _xavier(ks[1], (M, 4 * H))           # LSTM W_ih (read part), transposed
    whh = _xavier(ks[2], (H, 4 * H))           # LSTM W_hh, transposed
    b_lstm = 0.01 * jax.random.normal(ks[3], (1, 4 * H), jnp.float32)
    w_read = _xavier(ks[4], (H, RHO))          # read head fc: k,beta,g,s,gamma
    b_read = 0.01 * jax.random.normal(ks[5], (1, RHO), jnp.float32)
    w_write = _xavier(ks[6], (H, WHO))         # write head fc: +e,a
    b_write = 0.01 * jax.random.normal(ks[7], (1, WHO), jnp.float32)
    wfc_h = _xavier(ks[8], (H, NO))            # output fc (controller part)
    wfc_r = _xavier(ks[9], (M, NO))            # output fc (read part)
    b_fc = 0.01 * jax.random.normal(ks[10], (1, NO), jnp.float32)
    return (wxi, wri, whh, b_lstm, w_read, b_read, w_write, b_write,
            wfc_h, wfc_r, b_fc)


def init_state(key):
    ks = jax.random.split(key, 4)
    prev_read = jnp.tile(0.01 * jax.random.normal(ks[0], (1, M), jnp.float32), (B, 1))
    h0 = jnp.tile(0.05 * jax.random.normal(ks[1], (1, H), jnp.float32), (B, 1))
    c0 = jnp.tile(0.05 * jax.random.normal(ks[2], (1, H), jnp.float32), (B, 1))
    w_r0 = jnp.zeros((B, N), jnp.float32)   # matches reference head create_new_state
    w_w0 = jnp.zeros((B, N), jnp.float32)
    mem0 = jnp.tile(
        jax.random.uniform(ks[3], (1, N, M), jnp.float32, -0.05, 0.05), (B, 1, 1))
    return prev_read, h0, c0, w_r0, w_w0, mem0


# ----------------------------- main -------------------------------------------

if __name__ == "__main__":
    key = jax.random.PRNGKey(0)
    k_par, k_state, k_x = jax.random.split(key, 3)

    params = init_params(k_par)
    prev_read, h0, c0, w_r0, w_w0, mem0 = init_state(k_state)
    xs = jax.random.normal(k_x, (T_STEPS, B, NI), jnp.float32)

    os, (r_new, (h_new, c_new), (wr_new, ww_new), mem_new) = ntm_forward_seq(
        xs, prev_read, h0, c0, w_r0, w_w0, mem0, params)
    jax.block_until_ready((os, r_new, h_new, c_new, wr_new, ww_new, mem_new))

    assert os.shape == (T_STEPS, B, NO)
    assert r_new.shape == (B, M)
    assert h_new.shape == (B, H) and c_new.shape == (B, H)
    assert wr_new.shape == (B, N) and ww_new.shape == (B, N)
    assert mem_new.shape == (B, N, M)
    assert bool(jnp.all(jnp.isfinite(os)))
    assert bool(jnp.all(jnp.isfinite(mem_new)))
    assert bool(jnp.all((os >= 0.0) & (os <= 1.0)))
    # head weights are distributions (exact normalization in-kernel)
    assert bool(jnp.all(jnp.abs(jnp.sum(wr_new, axis=1) - 1.0) < 1e-3))
    assert bool(jnp.all(jnp.abs(jnp.sum(ww_new, axis=1) - 1.0) < 1e-3))

    print("KERNEL_OK")
</pallas_src>

<mosaic_0001>
module attributes {stable_mosaic.version = 11 : i64} {
  func.func @ntm_seq_kernel(%arg0: i32, %arg1: memref<16x9xf32, #tpu.memory_space<vmem>>, %arg2: memref<2x128xf32, #tpu.memory_space<vmem>>, %arg3: memref<2x16x16xf32, #tpu.memory_space<vmem>>, %arg4: memref<9x128xf32, #tpu.memory_space<vmem>>, %arg5: memref<48x128xf32, #tpu.memory_space<vmem>>, %arg6: memref<1x128xf32, #tpu.memory_space<vmem>>, %arg7: memref<32x128xf32, #tpu.memory_space<vmem>>, %arg8: memref<1x128xf32, #tpu.memory_space<vmem>>, %arg9: memref<16x8xf32, #tpu.memory_space<vmem>>, %arg10: memref<16x8xf32, #tpu.memory_space<vmem>>, %arg11: memref<2x128xf32, #tpu.memory_space<vmem>>, %arg12: memref<2x16x16xf32, #tpu.memory_space<vmem>>) attributes {dimension_semantics = [#tpu.dimension_semantics<arbitrary>], iteration_bounds = array<i64: 1>, scalar_prefetch = 0 : i64, scratch_operands = 0 : i64, tpu.core_type = #tpu.core_type<tc>, window_params = [{pipeline_mode = #tpu.pipeline_mode<synchronous>, transform_indices = @transform_0, window_bounds = array<i64: 16, 9>}, {pipeline_mode = #tpu.pipeline_mode<synchronous>, transform_indices = @transform_1, window_bounds = array<i64: 2, 128>}, {pipeline_mode = #tpu.pipeline_mode<synchronous>, transform_indices = @transform_2, window_bounds = array<i64: 2, 16, 16>}, {pipeline_mode = #tpu.pipeline_mode<synchronous>, transform_indices = @transform_3, window_bounds = array<i64: 9, 128>}, {pipeline_mode = #tpu.pipeline_mode<synchronous>, transform_indices = @transform_4, window_bounds = array<i64: 48, 128>}, {pipeline_mode = #tpu.pipeline_mode<synchronous>, transform_indices = @transform_5, window_bounds = array<i64: 1, 128>}, {pipeline_mode = #tpu.pipeline_mode<synchronous>, transform_indices = @transform_6, window_bounds = array<i64: 32, 128>}, {pipeline_mode = #tpu.pipeline_mode<synchronous>, transform_indices = @transform_7, window_bounds = array<i64: 1, 128>}, {pipeline_mode = #tpu.pipeline_mode<synchronous>, transform_indices = @transform_8, window_bounds = array<i64: 16, 8>}, {pipeline_mode = #tpu.pipeline_mode<synchronous>, transform_indices = @transform_9, window_bounds = array<i64: 16, 8>}, {pipeline_mode = #tpu.pipeline_mode<synchronous>, transform_indices = @transform_10, window_bounds = array<i64: 2, 128>}, {pipeline_mode = #tpu.pipeline_mode<synchronous>, transform_indices = @transform_11, window_bounds = array<i64: 2, 16, 16>}]} {
    %c0 = arith.constant 0 : index
    %c0_0 = arith.constant 0 : index
    %0 = vector.load %arg2[%c0, %c0_0] : memref<2x128xf32, #tpu.memory_space<vmem>>, vector<2x128xf32>
    %1 = vector.extract_strided_slice %0 {offsets = [0, 0], sizes = [2, 16], strides = [1, 1]} : vector<2x128xf32> to vector<2x16xf32>
    %2 = vector.extract_strided_slice %0 {offsets = [0, 16], sizes = [2, 32], strides = [1, 1]} : vector<2x128xf32> to vector<2x32xf32>
    %3 = vector.extract_strided_slice %0 {offsets = [0, 48], sizes = [2, 32], strides = [1, 1]} : vector<2x128xf32> to vector<2x32xf32>
    %4 = vector.extract_strided_slice %0 {offsets = [0, 80], sizes = [2, 16], strides = [1, 1]} : vector<2x128xf32> to vector<2x16xf32>
    %5 = vector.extract_strided_slice %0 {offsets = [0, 96], sizes = [2, 16], strides = [1, 1]} : vector<2x128xf32> to vector<2x16xf32>
    %c0_1 = arith.constant 0 : index
    %c0_2 = arith.constant 0 : index
    %c0_3 = arith.constant 0 : index
    %6 = vector.load %arg3[%c0_1, %c0_2, %c0_3] : memref<2x16x16xf32, #tpu.memory_space<vmem>>, vector<2x16x16xf32>
    %c0_4 = arith.constant 0 : index
    %c0_5 = arith.constant 0 : index
    %7 = vector.load %arg1[%c0_4, %c0_5] : memref<16x9xf32, #tpu.memory_space<vmem>>, vector<16x9xf32>
    %c0_6 = arith.constant 0 : index
    %c0_7 = arith.constant 0 : index
    %8 = vector.load %arg4[%c0_6, %c0_7] : memref<9x128xf32, #tpu.memory_space<vmem>>, vector<9x128xf32>
    %cst = arith.constant dense<0.000000e+00> : vector<16x128xf32>
    %9 = tpu.matmul %7, %8, %cst {dimension_numbers = #tpu.dot_dimension_numbers<[1], [0], [0], [1], [0, 0, 1, 1], [], []>} : vector<16x9xf32>, vector<9x128xf32>, vector<16x128xf32> -> vector<16x128xf32>
    %c0_8 = arith.constant 0 : index
    %c0_9 = arith.constant 0 : index
    %10 = vector.load %arg6[%c0_8, %c0_9] : memref<1x128xf32, #tpu.memory_space<vmem>>, vector<1x128xf32>
    %11 = vector.broadcast %10 : vector<1x128xf32> to vector<16x128xf32>
    %12 = arith.addf %9, %11 : vector<16x128xf32>
    %c0_10 = arith.constant 0 : index
    %c0_11 = arith.constant 0 : index
    %13 = vector.load %arg5[%c0_10, %c0_11] : memref<48x128xf32, #tpu.memory_space<vmem>>, vector<48x128xf32>
    %c0_12 = arith.constant 0 : index
    %c0_13 = arith.constant 0 : index
    %14 = vector.load %arg7[%c0_12, %c0_13] : memref<32x128xf32, #tpu.memory_space<vmem>>, vector<32x128xf32>
    %c0_14 = arith.constant 0 : index
    %c0_15 = arith.constant 0 : index
    %15 = vector.load %arg8[%c0_14, %c0_15] : memref<1x128xf32, #tpu.memory_space<vmem>>, vector<1x128xf32>
    %16 = tpu.concatenate %1, %2 in 1 : vector<2x16xf32>, vector<2x32xf32> -> vector<2x48xf32>
    %17 = vector.extract_strided_slice %12 {offsets = [0, 0], sizes = [2, 128], strides = [1, 1]} : vector<16x128xf32> to vector<2x128xf32>
    %cst_16 = arith.constant dense<0.000000e+00> : vector<2x128xf32>
    %18 = tpu.matmul %16, %13, %cst_16 {dimension_numbers = #tpu.dot_dimension_numbers<[1], [0], [0], [1], [0, 0, 1, 1], [], []>} : vector<2x48xf32>, vector<48x128xf32>, vector<2x128xf32> -> vector<2x128xf32>
    %19 = arith.addf %17, %18 : vector<2x128xf32>
    %20 = vector.extract_strided_slice %19 {offsets = [0, 0], sizes = [2, 32], strides = [1, 1]} : vector<2x128xf32> to vector<2x32xf32>
    %cst_17 = arith.constant 5.000000e-01 : f32
    %21 = vector.broadcast %cst_17 : f32 to vector<2x32xf32>
    %22 = arith.mulf %21, %20 : vector<2x32xf32>
    %23 = math.tanh %22 : vector<2x32xf32>
    %cst_18 = arith.constant 1.000000e+00 : f32
    %24 = vector.broadcast %cst_18 : f32 to vector<2x32xf32>
    %25 = arith.addf %23, %24 : vector<2x32xf32>
    %cst_19 = arith.constant 5.000000e-01 : f32
    %26 = vector.broadcast %cst_19 : f32 to vector<2x32xf32>
    %27 = arith.mulf %26, %25 : vector<2x32xf32>
    %28 = vector.extract_strided_slice %19 {offsets = [0, 32], sizes = [2, 32], strides = [1, 1]} : vector<2x128xf32> to vector<2x32xf32>
    %cst_20 = arith.constant 5.000000e-01 : f32
    %29 = vector.broadcast %cst_20 : f32 to vector<2x32xf32>
    %30 = arith.mulf %29, %28 : vector<2x32xf32>
    %31 = math.tanh %30 : vector<2x32xf32>
    %cst_21 = arith.constant 1.000000e+00 : f32
    %32 = vector.broadcast %cst_21 : f32 to vector<2x32xf32>
    %33 = arith.addf %31, %32 : vector<2x32xf32>
    %cst_22 = arith.constant 5.000000e-01 : f32
    %34 = vector.broadcast %cst_22 : f32 to vector<2x32xf32>
    %35 = arith.mulf %34, %33 : vector<2x32xf32>
    %36 = vector.extract_strided_slice %19 {offsets = [0, 64], sizes = [2, 32], strides = [1, 1]} : vector<2x128xf32> to vector<2x32xf32>
    %37 = math.tanh %36 : vector<2x32xf32>
    %38 = vector.extract_strided_slice %19 {offsets = [0, 96], sizes = [2, 32], strides = [1, 1]} : vector<2x128xf32> to vector<2x32xf32>
    %cst_23 = arith.constant 5.000000e-01 : f32
    %39 = vector.broadcast %cst_23 : f32 to vector<2x32xf32>
    %40 = arith.mulf %39, %38 : vector<2x32xf32>
    %41 = math.tanh %40 : vector<2x32xf32>
    %cst_24 = arith.constant 1.000000e+00 : f32
    %42 = vector.broadcast %cst_24 : f32 to vector<2x32xf32>
    %43 = arith.addf %41, %42 : vector<2x32xf32>
    %cst_25 = arith.constant 5.000000e-01 : f32
    %44 = vector.broadcast %cst_25 : f32 to vector<2x32xf32>
    %45 = arith.mulf %44, %43 : vector<2x32xf32>
    %46 = arith.mulf %35, %3 : vector<2x32xf32>
    %47 = arith.mulf %27, %37 : vector<2x32xf32>
    %48 = arith.addf %46, %47 : vector<2x32xf32>
    %49 = math.tanh %48 : vector<2x32xf32>
    %50 = arith.mulf %45, %49 : vector<2x32xf32>
    %cst_26 = arith.constant dense<0.000000e+00> : vector<2x128xf32>
    %51 = tpu.matmul %50, %14, %cst_26 {dimension_numbers = #tpu.dot_dimension_numbers<[1], [0], [0], [1], [0, 0, 1, 1], [], []>} : vector<2x32xf32>, vector<32x128xf32>, vector<2x128xf32> -> vector<2x128xf32>
    %52 = vector.broadcast %15 : vector<1x128xf32> to vector<2x128xf32>
    %53 = arith.addf %51, %52 : vector<2x128xf32>
    %54 = vector.extract_strided_slice %53 {offsets = [0, 0], sizes = [2, 32], strides = [1, 1]} : vector<2x128xf32> to vector<2x32xf32>
    %55 = vector.extract_strided_slice %53 {offsets = [0, 32], sizes = [2, 32], strides = [1, 1]} : vector<2x128xf32> to vector<2x32xf32>
    %56 = tpu.concatenate %54, %55 in 0 : vector<2x32xf32>, vector<2x32xf32> -> vector<4x32xf32>
    %57 = vector.extract_strided_slice %56 {offsets = [0, 0], sizes = [4, 16], strides = [1, 1]} : vector<4x32xf32> to vector<4x16xf32>
    %cst_27 = arith.constant 1.000000e-16 : f32
    %58 = vector.broadcast %cst_27 : f32 to vector<4x16xf32>
    %59 = arith.addf %57, %58 : vector<4x16xf32>
    %60 = vector.extract_strided_slice %56 {offsets = [0, 16], sizes = [4, 1], strides = [1, 1]} : vector<4x32xf32> to vector<4x1xf32>
    %cst_28 = arith.constant 0.000000e+00 : f32
    %61 = vector.broadcast %cst_28 : f32 to vector<4x1xf32>
    %62 = arith.maximumf %60, %61 : vector<4x1xf32>
    %63 = math.absf %60 : vector<4x1xf32>
    %cst_29 = arith.constant 0.000000e+00 : f32
    %64 = vector.broadcast %cst_29 : f32 to vector<4x1xf32>
    %65 = arith.subf %64, %63 : vector<4x1xf32>
    %66 = math.exp %65 : vector<4x1xf32>
    %cst_30 = arith.constant 1.000000e+00 : f32
    %67 = vector.broadcast %cst_30 : f32 to vector<4x1xf32>
    %68 = arith.addf %67, %66 : vector<4x1xf32>
    %69 = math.log %68 : vector<4x1xf32>
    %70 = arith.addf %62, %69 : vector<4x1xf32>
    %71 = vector.extract_strided_slice %56 {offsets = [0, 17], sizes = [4, 1], strides = [1, 1]} : vector<4x32xf32> to vector<4x1xf32>
    %cst_31 = arith.constant 5.000000e-01 : f32
    %72 = vector.broadcast %cst_31 : f32 to vector<4x1xf32>
    %73 = arith.mulf %72, %71 : vector<4x1xf32>
    %74 = math.tanh %73 : vector<4x1xf32>
    %cst_32 = arith.constant 1.000000e+00 : f32
    %75 = vector.broadcast %cst_32 : f32 to vector<4x1xf32>
    %76 = arith.addf %74, %75 : vector<4x1xf32>
    %cst_33 = arith.constant 5.000000e-01 : f32
    %77 = vector.broadcast %cst_33 : f32 to vector<4x1xf32>
    %78 = arith.mulf %77, %76 : vector<4x1xf32>
    %79 = vector.extract_strided_slice %56 {offsets = [0, 18], sizes = [4, 3], strides = [1, 1]} : vector<4x32xf32> to vector<4x3xf32>
    %cst_34 = arith.constant dense<0xFF800000> : vector<4xf32>
    %80 = vector.multi_reduction <maximumf>, %79, %cst_34 [1] : vector<4x3xf32> to vector<4xf32>
    %81 = vector.shape_cast %80 : vector<4xf32> to vector<4x1xf32>
    %82 = vector.broadcast %81 : vector<4x1xf32> to vector<4x3xf32>
    %83 = arith.subf %79, %82 : vector<4x3xf32>
    %84 = math.exp %83 : vector<4x3xf32>
    %cst_35 = arith.constant dense<0.000000e+00> : vector<4xf32>
    %85 = vector.multi_reduction <add>, %84, %cst_35 [1] : vector<4x3xf32> to vector<4xf32>
    %86 = vector.shape_cast %85 : vector<4xf32> to vector<4x1xf32>
    %87 = vector.broadcast %86 : vector<4x1xf32> to vector<4x3xf32>
    %88 = arith.divf %84, %87 : vector<4x3xf32>
    %89 = vector.extract_strided_slice %56 {offsets = [0, 21], sizes = [4, 1], strides = [1, 1]} : vector<4x32xf32> to vector<4x1xf32>
    %cst_36 = arith.constant 0.000000e+00 : f32
    %90 = vector.broadcast %cst_36 : f32 to vector<4x1xf32>
    %91 = arith.maximumf %89, %90 : vector<4x1xf32>
    %92 = math.absf %89 : vector<4x1xf32>
    %cst_37 = arith.constant 0.000000e+00 : f32
    %93 = vector.broadcast %cst_37 : f32 to vector<4x1xf32>
    %94 = arith.subf %93, %92 : vector<4x1xf32>
    %95 = math.exp %94 : vector<4x1xf32>
    %cst_38 = arith.constant 1.000000e+00 : f32
    %96 = vector.broadcast %cst_38 : f32 to vector<4x1xf32>
    %97 = arith.addf %96, %95 : vector<4x1xf32>
    %98 = math.log %97 : vector<4x1xf32>
    %99 = arith.addf %91, %98 : vector<4x1xf32>
    %cst_39 = arith.constant 1.000000e+00 : f32
    %100 = vector.broadcast %cst_39 : f32 to vector<4x1xf32>
    %101 = arith.addf %100, %99 : vector<4x1xf32>
    %102 = tpu.concatenate %4, %5 in 0 : vector<2x16xf32>, vector<2x16xf32> -> vector<4x16xf32>
    %cst_40 = arith.constant 1.000000e-16 : f32
    %103 = vector.broadcast %cst_40 : f32 to vector<2x16x16xf32>
    %104 = arith.addf %6, %103 : vector<2x16x16xf32>
    %105 = vector.extract_strided_slice %59 {offsets = [0, 0], sizes = [2, 16], strides = [1, 1]} : vector<4x16xf32> to vector<2x16xf32>
    %106 = vector.shape_cast %105 : vector<2x16xf32> to vector<2x1x16xf32>
    %107 = vector.broadcast %106 : vector<2x1x16xf32> to vector<2x16x16xf32>
    %108 = arith.mulf %104, %107 : vector<2x16x16xf32>
    %cst_41 = arith.constant dense<0.000000e+00> : vector<2x16xf32>
    %109 = vector.multi_reduction <add>, %108, %cst_41 [2] : vector<2x16x16xf32> to vector<2x16xf32>
    %110 = vector.extract_strided_slice %59 {offsets = [2, 0], sizes = [2, 16], strides = [1, 1]} : vector<4x16xf32> to vector<2x16xf32>
    %111 = vector.shape_cast %110 : vector<2x16xf32> to vector<2x1x16xf32>
    %112 = vector.broadcast %111 : vector<2x1x16xf32> to vector<2x16x16xf32>
    %113 = arith.mulf %104, %112 : vector<2x16x16xf32>
    %cst_42 = arith.constant dense<0.000000e+00> : vector<2x16xf32>
    %114 = vector.multi_reduction <add>, %113, %cst_42 [2] : vector<2x16x16xf32> to vector<2x16xf32>
    %115 = tpu.concatenate %109, %114 in 0 : vector<2x16xf32>, vector<2x16xf32> -> vector<4x16xf32>
    %116 = arith.mulf %104, %104 : vector<2x16x16xf32>
    %cst_43 = arith.constant dense<0.000000e+00> : vector<2x16xf32>
    %117 = vector.multi_reduction <add>, %116, %cst_43 [2] : vector<2x16x16xf32> to vector<2x16xf32>
    %118 = math.sqrt %117 : vector<2x16xf32>
    %119 = tpu.concatenate %118, %118 in 0 : vector<2x16xf32>, vector<2x16xf32> -> vector<4x16xf32>
    %120 = arith.mulf %59, %59 : vector<4x16xf32>
    %cst_44 = arith.constant dense<0.000000e+00> : vector<4xf32>
    %121 = vector.multi_reduction <add>, %120, %cst_44 [1] : vector<4x16xf32> to vector<4xf32>
    %122 = vector.shape_cast %121 : vector<4xf32> to vector<4x1xf32>
    %123 = math.sqrt %122 : vector<4x1xf32>
    %124 = vector.broadcast %123 : vector<4x1xf32> to vector<4x16xf32>
    %125 = arith.mulf %119, %124 : vector<4x16xf32>
    %cst_45 = arith.constant 9.99999993E-9 : f32
    %126 = vector.broadcast %cst_45 : f32 to vector<4x16xf32>
    %127 = arith.maximumf %125, %126 : vector<4x16xf32>
    %128 = tpu.reciprocal %127 {approx = true} : vector<4x16xf32> -> vector<4x16xf32>
    %129 = arith.mulf %115, %128 : vector<4x16xf32>
    %130 = vector.broadcast %70 : vector<4x1xf32> to vector<4x16xf32>
    %131 = arith.mulf %130, %129 : vector<4x16xf32>
    %cst_46 = arith.constant dense<0xFF800000> : vector<4xf32>
    %132 = vector.multi_reduction <maximumf>, %131, %cst_46 [1] : vector<4x16xf32> to vector<4xf32>
    %133 = vector.shape_cast %132 : vector<4xf32> to vector<4x1xf32>
    %134 = vector.broadcast %133 : vector<4x1xf32> to vector<4x16xf32>
    %135 = arith.subf %131, %134 : vector<4x16xf32>
    %136 = math.exp %135 : vector<4x16xf32>
    %cst_47 = arith.constant dense<0.000000e+00> : vector<4xf32>
    %137 = vector.multi_reduction <add>, %136, %cst_47 [1] : vector<4x16xf32> to vector<4xf32>
    %138 = vector.shape_cast %137 : vector<4xf32> to vector<4x1xf32>
    %139 = vector.broadcast %138 : vector<4x1xf32> to vector<4x16xf32>
    %140 = arith.divf %136, %139 : vector<4x16xf32>
    %141 = vector.broadcast %78 : vector<4x1xf32> to vector<4x16xf32>
    %142 = arith.mulf %141, %140 : vector<4x16xf32>
    %cst_48 = arith.constant 1.000000e+00 : f32
    %143 = vector.broadcast %cst_48 : f32 to vector<4x1xf32>
    %144 = arith.subf %143, %78 : vector<4x1xf32>
    %145 = vector.broadcast %144 : vector<4x1xf32> to vector<4x16xf32>
    %146 = arith.mulf %145, %102 : vector<4x16xf32>
    %147 = arith.addf %142, %146 : vector<4x16xf32>
    %148 = vector.extract_strided_slice %147 {offsets = [0, 15], sizes = [4, 1], strides = [1, 1]} : vector<4x16xf32> to vector<4x1xf32>
    %149 = vector.extract_strided_slice %147 {offsets = [0, 0], sizes = [4, 15], strides = [1, 1]} : vector<4x16xf32> to vector<4x15xf32>
    %150 = tpu.concatenate %148, %149 in 1 : vector<4x1xf32>, vector<4x15xf32> -> vector<4x16xf32>
    %151 = vector.extract_strided_slice %147 {offsets = [0, 1], sizes = [4, 15], strides = [1, 1]} : vector<4x16xf32> to vector<4x15xf32>
    %152 = vector.extract_strided_slice %147 {offsets = [0, 0], sizes = [4, 1], strides = [1, 1]} : vector<4x16xf32> to vector<4x1xf32>
    %153 = tpu.concatenate %151, %152 in 1 : vector<4x15xf32>, vector<4x1xf32> -> vector<4x16xf32>
    %154 = vector.extract_strided_slice %88 {offsets = [0, 0], sizes = [4, 1], strides = [1, 1]} : vector<4x3xf32> to vector<4x1xf32>
    %155 = vector.broadcast %154 : vector<4x1xf32> to vector<4x16xf32>
    %156 = arith.mulf %150, %155 : vector<4x16xf32>
    %157 = vector.extract_strided_slice %88 {offsets = [0, 1], sizes = [4, 1], strides = [1, 1]} : vector<4x3xf32> to vector<4x1xf32>
    %158 = vector.broadcast %157 : vector<4x1xf32> to vector<4x16xf32>
    %159 = arith.mulf %147, %158 : vector<4x16xf32>
    %160 = arith.addf %156, %159 : vector<4x16xf32>
    %161 = vector.extract_strided_slice %88 {offsets = [0, 2], sizes = [4, 1], strides = [1, 1]} : vector<4x3xf32> to vector<4x1xf32>
    %162 = vector.broadcast %161 : vector<4x1xf32> to vector<4x16xf32>
    %163 = arith.mulf %153, %162 : vector<4x16xf32>
    %164 = arith.addf %160, %163 : vector<4x16xf32>
    %cst_49 = arith.constant 1.000000e-30 : f32
    %165 = vector.broadcast %cst_49 : f32 to vector<4x16xf32>
    %166 = arith.maximumf %164, %165 : vector<4x16xf32>
    %167 = math.log %166 : vector<4x16xf32>
    %168 = vector.broadcast %101 : vector<4x1xf32> to vector<4x16xf32>
    %169 = arith.mulf %168, %167 : vector<4x16xf32>
    %170 = math.exp %169 : vector<4x16xf32>
    %cst_50 = arith.constant dense<0.000000e+00> : vector<4xf32>
    %171 = vector.multi_reduction <add>, %170, %cst_50 [1] : vector<4x16xf32> to vector<4xf32>
    %172 = vector.shape_cast %171 : vector<4xf32> to vector<4x1xf32>
    %cst_51 = arith.constant 1.000000e-16 : f32
    %173 = vector.broadcast %cst_51 : f32 to vector<4x1xf32>
    %174 = arith.addf %172, %173 : vector<4x1xf32>
    %175 = vector.broadcast %174 : vector<4x1xf32> to vector<4x16xf32>
    %176 = arith.divf %170, %175 : vector<4x16xf32>
    %177 = vector.extract_strided_slice %176 {offsets = [0, 0], sizes = [2, 16], strides = [1, 1]} : vector<4x16xf32> to vector<2x16xf32>
    %178 = vector.extract_strided_slice %176 {offsets = [2, 0], sizes = [2, 16], strides = [1, 1]} : vector<4x16xf32> to vector<2x16xf32>
    %179 = vector.shape_cast %177 : vector<2x16xf32> to vector<2x16x1xf32>
    %180 = vector.broadcast %179 : vector<2x16x1xf32> to vector<2x16x16xf32>
    %181 = arith.mulf %180, %6 : vector<2x16x16xf32>
    %cst_52 = arith.constant dense<0.000000e+00> : vector<2x16xf32>
    %182 = vector.multi_reduction <add>, %181, %cst_52 [1] : vector<2x16x16xf32> to vector<2x16xf32>
    %183 = vector.extract_strided_slice %53 {offsets = [0, 64], sizes = [2, 16], strides = [1, 1]} : vector<2x128xf32> to vector<2x16xf32>
    %cst_53 = arith.constant 5.000000e-01 : f32
    %184 = vector.broadcast %cst_53 : f32 to vector<2x16xf32>
    %185 = arith.mulf %184, %183 : vector<2x16xf32>
    %186 = math.tanh %185 : vector<2x16xf32>
    %cst_54 = arith.constant 1.000000e+00 : f32
    %187 = vector.broadcast %cst_54 : f32 to vector<2x16xf32>
    %188 = arith.addf %186, %187 : vector<2x16xf32>
    %cst_55 = arith.constant 5.000000e-01 : f32
    %189 = vector.broadcast %cst_55 : f32 to vector<2x16xf32>
    %190 = arith.mulf %189, %188 : vector<2x16xf32>
    %191 = vector.extract_strided_slice %53 {offsets = [0, 80], sizes = [2, 16], strides = [1, 1]} : vector<2x128xf32> to vector<2x16xf32>
    %192 = vector.shape_cast %178 : vector<2x16xf32> to vector<2x16x1xf32>
    %193 = vector.shape_cast %190 : vector<2x16xf32> to vector<2x1x16xf32>
    %194 = vector.broadcast %192 : vector<2x16x1xf32> to vector<2x16x16xf32>
    %195 = vector.broadcast %193 : vector<2x1x16xf32> to vector<2x16x16xf32>
    %196 = arith.mulf %194, %195 : vector<2x16x16xf32>
    %197 = vector.shape_cast %178 : vector<2x16xf32> to vector<2x16x1xf32>
    %198 = vector.shape_cast %191 : vector<2x16xf32> to vector<2x1x16xf32>
    %199 = vector.broadcast %197 : vector<2x16x1xf32> to vector<2x16x16xf32>
    %200 = vector.broadcast %198 : vector<2x1x16xf32> to vector<2x16x16xf32>
    %201 = arith.mulf %199, %200 : vector<2x16x16xf32>
    %cst_56 = arith.constant 1.000000e+00 : f32
    %202 = vector.broadcast %cst_56 : f32 to vector<2x16x16xf32>
    %203 = arith.subf %202, %196 : vector<2x16x16xf32>
    %204 = arith.mulf %6, %203 : vector<2x16x16xf32>
    %205 = arith.addf %204, %201 : vector<2x16x16xf32>
    %206 = vector.extract_strided_slice %53 {offsets = [0, 96], sizes = [2, 8], strides = [1, 1]} : vector<2x128xf32> to vector<2x8xf32>
    %207 = tpu.concatenate %182, %50 in 1 : vector<2x16xf32>, vector<2x32xf32> -> vector<2x48xf32>
    %208 = vector.extract_strided_slice %12 {offsets = [2, 0], sizes = [2, 128], strides = [1, 1]} : vector<16x128xf32> to vector<2x128xf32>
    %cst_57 = arith.constant dense<0.000000e+00> : vector<2x128xf32>
    %209 = tpu.matmul %207, %13, %cst_57 {dimension_numbers = #tpu.dot_dimension_numbers<[1], [0], [0], [1], [0, 0, 1, 1], [], []>} : vector<2x48xf32>, vector<48x128xf32>, vector<2x128xf32> -> vector<2x128xf32>
    %210 = arith.addf %208, %209 : vector<2x128xf32>
    %211 = vector.extract_strided_slice %210 {offsets = [0, 0], sizes = [2, 32], strides = [1, 1]} : vector<2x128xf32> to vector<2x32xf32>
    %cst_58 = arith.constant 5.000000e-01 : f32
    %212 = vector.broadcast %cst_58 : f32 to vector<2x32xf32>
    %213 = arith.mulf %212, %211 : vector<2x32xf32>
    %214 = math.tanh %213 : vector<2x32xf32>
    %cst_59 = arith.constant 1.000000e+00 : f32
    %215 = vector.broadcast %cst_59 : f32 to vector<2x32xf32>
    %216 = arith.addf %214, %215 : vector<2x32xf32>
    %cst_60 = arith.constant 5.000000e-01 : f32
    %217 = vector.broadcast %cst_60 : f32 to vector<2x32xf32>
    %218 = arith.mulf %217, %216 : vector<2x32xf32>
    %219 = vector.extract_strided_slice %210 {offsets = [0, 32], sizes = [2, 32], strides = [1, 1]} : vector<2x128xf32> to vector<2x32xf32>
    %cst_61 = arith.constant 5.000000e-01 : f32
    %220 = vector.broadcast %cst_61 : f32 to vector<2x32xf32>
    %221 = arith.mulf %220, %219 : vector<2x32xf32>
    %222 = math.tanh %221 : vector<2x32xf32>
    %cst_62 = arith.constant 1.000000e+00 : f32
    %223 = vector.broadcast %cst_62 : f32 to vector<2x32xf32>
    %224 = arith.addf %222, %223 : vector<2x32xf32>
    %cst_63 = arith.constant 5.000000e-01 : f32
    %225 = vector.broadcast %cst_63 : f32 to vector<2x32xf32>
    %226 = arith.mulf %225, %224 : vector<2x32xf32>
    %227 = vector.extract_strided_slice %210 {offsets = [0, 64], sizes = [2, 32], strides = [1, 1]} : vector<2x128xf32> to vector<2x32xf32>
    %228 = math.tanh %227 : vector<2x32xf32>
    %229 = vector.extract_strided_slice %210 {offsets = [0, 96], sizes = [2, 32], strides = [1, 1]} : vector<2x128xf32> to vector<2x32xf32>
    %cst_64 = arith.constant 5.000000e-01 : f32
    %230 = vector.broadcast %cst_64 : f32 to vector<2x32xf32>
    %231 = arith.mulf %230, %229 : vector<2x32xf32>
    %232 = math.tanh %231 : vector<2x32xf32>
    %cst_65 = arith.constant 1.000000e+00 : f32
    %233 = vector.broadcast %cst_65 : f32 to vector<2x32xf32>
    %234 = arith.addf %232, %233 : vector<2x32xf32>
    %cst_66 = arith.constant 5.000000e-01 : f32
    %235 = vector.broadcast %cst_66 : f32 to vector<2x32xf32>
    %236 = arith.mulf %235, %234 : vector<2x32xf32>
    %237 = arith.mulf %226, %48 : vector<2x32xf32>
    %238 = arith.mulf %218, %228 : vector<2x32xf32>
    %239 = arith.addf %237, %238 : vector<2x32xf32>
    %240 = math.tanh %239 : vector<2x32xf32>
    %241 = arith.mulf %236, %240 : vector<2x32xf32>
    %cst_67 = arith.constant dense<0.000000e+00> : vector<2x128xf32>
    %242 = tpu.matmul %241, %14, %cst_67 {dimension_numbers = #tpu.dot_dimension_numbers<[1], [0], [0], [1], [0, 0, 1, 1], [], []>} : vector<2x32xf32>, vector<32x128xf32>, vector<2x128xf32> -> vector<2x128xf32>
    %243 = vector.broadcast %15 : vector<1x128xf32> to vector<2x128xf32>
    %244 = arith.addf %242, %243 : vector<2x128xf32>
    %245 = vector.extract_strided_slice %244 {offsets = [0, 0], sizes = [2, 32], strides = [1, 1]} : vector<2x128xf32> to vector<2x32xf32>
    %246 = vector.extract_strided_slice %244 {offsets = [0, 32], sizes = [2, 32], strides = [1, 1]} : vector<2x128xf32> to vector<2x32xf32>
    %247 = tpu.concatenate %245, %246 in 0 : vector<2x32xf32>, vector<2x32xf32> -> vector<4x32xf32>
    %248 = vector.extract_strided_slice %247 {offsets = [0, 0], sizes = [4, 16], strides = [1, 1]} : vector<4x32xf32> to vector<4x16xf32>
    %cst_68 = arith.constant 1.000000e-16 : f32
    %249 = vector.broadcast %cst_68 : f32 to vector<4x16xf32>
    %250 = arith.addf %248, %249 : vector<4x16xf32>
    %251 = vector.extract_strided_slice %247 {offsets = [0, 16], sizes = [4, 1], strides = [1, 1]} : vector<4x32xf32> to vector<4x1xf32>
    %cst_69 = arith.constant 0.000000e+00 : f32
    %252 = vector.broadcast %cst_69 : f32 to vector<4x1xf32>
    %253 = arith.maximumf %251, %252 : vector<4x1xf32>
    %254 = math.absf %251 : vector<4x1xf32>
    %cst_70 = arith.constant 0.000000e+00 : f32
    %255 = vector.broadcast %cst_70 : f32 to vector<4x1xf32>
    %256 = arith.subf %255, %254 : vector<4x1xf32>
    %257 = math.exp %256 : vector<4x1xf32>
    %cst_71 = arith.constant 1.000000e+00 : f32
    %258 = vector.broadcast %cst_71 : f32 to vector<4x1xf32>
    %259 = arith.addf %258, %257 : vector<4x1xf32>
    %260 = math.log %259 : vector<4x1xf32>
    %261 = arith.addf %253, %260 : vector<4x1xf32>
    %262 = vector.extract_strided_slice %247 {offsets = [0, 17], sizes = [4, 1], strides = [1, 1]} : vector<4x32xf32> to vector<4x1xf32>
    %cst_72 = arith.constant 5.000000e-01 : f32
    %263 = vector.broadcast %cst_72 : f32 to vector<4x1xf32>
    %264 = arith.mulf %263, %262 : vector<4x1xf32>
    %265 = math.tanh %264 : vector<4x1xf32>
    %cst_73 = arith.constant 1.000000e+00 : f32
    %266 = vector.broadcast %cst_73 : f32 to vector<4x1xf32>
    %267 = arith.addf %265, %266 : vector<4x1xf32>
    %cst_74 = arith.constant 5.000000e-01 : f32
    %268 = vector.broadcast %cst_74 : f32 to vector<4x1xf32>
    %269 = arith.mulf %268, %267 : vector<4x1xf32>
    %270 = vector.extract_strided_slice %247 {offsets = [0, 18], sizes = [4, 3], strides = [1, 1]} : vector<4x32xf32> to vector<4x3xf32>
    %cst_75 = arith.constant dense<0xFF800000> : vector<4xf32>
    %271 = vector.multi_reduction <maximumf>, %270, %cst_75 [1] : vector<4x3xf32> to vector<4xf32>
    %272 = vector.shape_cast %271 : vector<4xf32> to vector<4x1xf32>
    %273 = vector.broadcast %272 : vector<4x1xf32> to vector<4x3xf32>
    %274 = arith.subf %270, %273 : vector<4x3xf32>
    %275 = math.exp %274 : vector<4x3xf32>
    %cst_76 = arith.constant dense<0.000000e+00> : vector<4xf32>
    %276 = vector.multi_reduction <add>, %275, %cst_76 [1] : vector<4x3xf32> to vector<4xf32>
    %277 = vector.shape_cast %276 : vector<4xf32> to vector<4x1xf32>
    %278 = vector.broadcast %277 : vector<4x1xf32> to vector<4x3xf32>
    %279 = arith.divf %275, %278 : vector<4x3xf32>
    %280 = vector.extract_strided_slice %247 {offsets = [0, 21], sizes = [4, 1], strides = [1, 1]} : vector<4x32xf32> to vector<4x1xf32>
    %cst_77 = arith.constant 0.000000e+00 : f32
    %281 = vector.broadcast %cst_77 : f32 to vector<4x1xf32>
    %282 = arith.maximumf %280, %281 : vector<4x1xf32>
    %283 = math.absf %280 : vector<4x1xf32>
    %cst_78 = arith.constant 0.000000e+00 : f32
    %284 = vector.broadcast %cst_78 : f32 to vector<4x1xf32>
    %285 = arith.subf %284, %283 : vector<4x1xf32>
    %286 = math.exp %285 : vector<4x1xf32>
    %cst_79 = arith.constant 1.000000e+00 : f32
    %287 = vector.broadcast %cst_79 : f32 to vector<4x1xf32>
    %288 = arith.addf %287, %286 : vector<4x1xf32>
    %289 = math.log %288 : vector<4x1xf32>
    %290 = arith.addf %282, %289 : vector<4x1xf32>
    %cst_80 = arith.constant 1.000000e+00 : f32
    %291 = vector.broadcast %cst_80 : f32 to vector<4x1xf32>
    %292 = arith.addf %291, %290 : vector<4x1xf32>
    %293 = tpu.concatenate %177, %178 in 0 : vector<2x16xf32>, vector<2x16xf32> -> vector<4x16xf32>
    %cst_81 = arith.constant 1.000000e-16 : f32
    %294 = vector.broadcast %cst_81 : f32 to vector<2x16x16xf32>
    %295 = arith.addf %205, %294 : vector<2x16x16xf32>
    %296 = vector.extract_strided_slice %250 {offsets = [0, 0], sizes = [2, 16], strides = [1, 1]} : vector<4x16xf32> to vector<2x16xf32>
    %297 = vector.shape_cast %296 : vector<2x16xf32> to vector<2x1x16xf32>
    %298 = vector.broadcast %297 : vector<2x1x16xf32> to vector<2x16x16xf32>
    %299 = arith.mulf %295, %298 : vector<2x16x16xf32>
    %cst_82 = arith.constant dense<0.000000e+00> : vector<2x16xf32>
    %300 = vector.multi_reduction <add>, %299, %cst_82 [2] : vector<2x16x16xf32> to vector<2x16xf32>
    %301 = vector.extract_strided_slice %250 {offsets = [2, 0], sizes = [2, 16], strides = [1, 1]} : vector<4x16xf32> to vector<2x16xf32>
    %302 = vector.shape_cast %301 : vector<2x16xf32> to vector<2x1x16xf32>
    %303 = vector.broadcast %302 : vector<2x1x16xf32> to vector<2x16x16xf32>
    %304 = arith.mulf %295, %303 : vector<2x16x16xf32>
    %cst_83 = arith.constant dense<0.000000e+00> : vector<2x16xf32>
    %305 = vector.multi_reduction <add>, %304, %cst_83 [2] : vector<2x16x16xf32> to vector<2x16xf32>
    %306 = tpu.concatenate %300, %305 in 0 : vector<2x16xf32>, vector<2x16xf32> -> vector<4x16xf32>
    %307 = arith.mulf %295, %295 : vector<2x16x16xf32>
    %cst_84 = arith.constant dense<0.000000e+00> : vector<2x16xf32>
    %308 = vector.multi_reduction <add>, %307, %cst_84 [2] : vector<2x16x16xf32> to vector<2x16xf32>
    %309 = math.sqrt %308 : vector<2x16xf32>
    %310 = tpu.concatenate %309, %309 in 0 : vector<2x16xf32>, vector<2x16xf32> -> vector<4x16xf32>
    %311 = arith.mulf %250, %250 : vector<4x16xf32>
    %cst_85 = arith.constant dense<0.000000e+00> : vector<4xf32>
    %312 = vector.multi_reduction <add>, %311, %cst_85 [1] : vector<4x16xf32> to vector<4xf32>
    %313 = vector.shape_cast %312 : vector<4xf32> to vector<4x1xf32>
    %314 = math.sqrt %313 : vector<4x1xf32>
    %315 = vector.broadcast %314 : vector<4x1xf32> to vector<4x16xf32>
    %316 = arith.mulf %310, %315 : vector<4x16xf32>
    %cst_86 = arith.constant 9.99999993E-9 : f32
    %317 = vector.broadcast %cst_86 : f32 to vector<4x16xf32>
    %318 = arith.maximumf %316, %317 : vector<4x16xf32>
    %319 = tpu.reciprocal %318 {approx = true} : vector<4x16xf32> -> vector<4x16xf32>
    %320 = arith.mulf %306, %319 : vector<4x16xf32>
    %321 = vector.broadcast %261 : vector<4x1xf32> to vector<4x16xf32>
    %322 = arith.mulf %321, %320 : vector<4x16xf32>
    %cst_87 = arith.constant dense<0xFF800000> : vector<4xf32>
    %323 = vector.multi_reduction <maximumf>, %322, %cst_87 [1] : vector<4x16xf32> to vector<4xf32>
    %324 = vector.shape_cast %323 : vector<4xf32> to vector<4x1xf32>
    %325 = vector.broadcast %324 : vector<4x1xf32> to vector<4x16xf32>
    %326 = arith.subf %322, %325 : vector<4x16xf32>
    %327 = math.exp %326 : vector<4x16xf32>
    %cst_88 = arith.constant dense<0.000000e+00> : vector<4xf32>
    %328 = vector.multi_reduction <add>, %327, %cst_88 [1] : vector<4x16xf32> to vector<4xf32>
    %329 = vector.shape_cast %328 : vector<4xf32> to vector<4x1xf32>
    %330 = vector.broadcast %329 : vector<4x1xf32> to vector<4x16xf32>
    %331 = arith.divf %327, %330 : vector<4x16xf32>
    %332 = vector.broadcast %269 : vector<4x1xf32> to vector<4x16xf32>
    %333 = arith.mulf %332, %331 : vector<4x16xf32>
    %cst_89 = arith.constant 1.000000e+00 : f32
    %334 = vector.broadcast %cst_89 : f32 to vector<4x1xf32>
    %335 = arith.subf %334, %269 : vector<4x1xf32>
    %336 = vector.broadcast %335 : vector<4x1xf32> to vector<4x16xf32>
    %337 = arith.mulf %336, %293 : vector<4x16xf32>
    %338 = arith.addf %333, %337 : vector<4x16xf32>
    %339 = vector.extract_strided_slice %338 {offsets = [0, 15], sizes = [4, 1], strides = [1, 1]} : vector<4x16xf32> to vector<4x1xf32>
    %340 = vector.extract_strided_slice %338 {offsets = [0, 0], sizes = [4, 15], strides = [1, 1]} : vector<4x16xf32> to vector<4x15xf32>
    %341 = tpu.concatenate %339, %340 in 1 : vector<4x1xf32>, vector<4x15xf32> -> vector<4x16xf32>
    %342 = vector.extract_strided_slice %338 {offsets = [0, 1], sizes = [4, 15], strides = [1, 1]} : vector<4x16xf32> to vector<4x15xf32>
    %343 = vector.extract_strided_slice %338 {offsets = [0, 0], sizes = [4, 1], strides = [1, 1]} : vector<4x16xf32> to vector<4x1xf32>
    %344 = tpu.concatenate %342, %343 in 1 : vector<4x15xf32>, vector<4x1xf32> -> vector<4x16xf32>
    %345 = vector.extract_strided_slice %279 {offsets = [0, 0], sizes = [4, 1], strides = [1, 1]} : vector<4x3xf32> to vector<4x1xf32>
    %346 = vector.broadcast %345 : vector<4x1xf32> to vector<4x16xf32>
    %347 = arith.mulf %341, %346 : vector<4x16xf32>
    %348 = vector.extract_strided_slice %279 {offsets = [0, 1], sizes = [4, 1], strides = [1, 1]} : vector<4x3xf32> to vector<4x1xf32>
    %349 = vector.broadcast %348 : vector<4x1xf32> to vector<4x16xf32>
    %350 = arith.mulf %338, %349 : vector<4x16xf32>
    %351 = arith.addf %347, %350 : vector<4x16xf32>
    %352 = vector.extract_strided_slice %279 {offsets = [0, 2], sizes = [4, 1], strides = [1, 1]} : vector<4x3xf32> to vector<4x1xf32>
    %353 = vector.broadcast %352 : vector<4x1xf32> to vector<4x16xf32>
    %354 = arith.mulf %344, %353 : vector<4x16xf32>
    %355 = arith.addf %351, %354 : vector<4x16xf32>
    %cst_90 = arith.constant 1.000000e-30 : f32
    %356 = vector.broadcast %cst_90 : f32 to vector<4x16xf32>
    %357 = arith.maximumf %355, %356 : vector<4x16xf32>
    %358 = math.log %357 : vector<4x16xf32>
    %359 = vector.broadcast %292 : vector<4x1xf32> to vector<4x16xf32>
    %360 = arith.mulf %359, %358 : vector<4x16xf32>
    %361 = math.exp %360 : vector<4x16xf32>
    %cst_91 = arith.constant dense<0.000000e+00> : vector<4xf32>
    %362 = vector.multi_reduction <add>, %361, %cst_91 [1] : vector<4x16xf32> to vector<4xf32>
    %363 = vector.shape_cast %362 : vector<4xf32> to vector<4x1xf32>
    %cst_92 = arith.constant 1.000000e-16 : f32
    %364 = vector.broadcast %cst_92 : f32 to vector<4x1xf32>
    %365 = arith.addf %363, %364 : vector<4x1xf32>
    %366 = vector.broadcast %365 : vector<4x1xf32> to vector<4x16xf32>
    %367 = arith.divf %361, %366 : vector<4x16xf32>
    %368 = vector.extract_strided_slice %367 {offsets = [0, 0], sizes = [2, 16], strides = [1, 1]} : vector<4x16xf32> to vector<2x16xf32>
    %369 = vector.extract_strided_slice %367 {offsets = [2, 0], sizes = [2, 16], strides = [1, 1]} : vector<4x16xf32> to vector<2x16xf32>
    %370 = vector.shape_cast %368 : vector<2x16xf32> to vector<2x16x1xf32>
    %371 = vector.broadcast %370 : vector<2x16x1xf32> to vector<2x16x16xf32>
    %372 = arith.mulf %371, %205 : vector<2x16x16xf32>
    %cst_93 = arith.constant dense<0.000000e+00> : vector<2x16xf32>
    %373 = vector.multi_reduction <add>, %372, %cst_93 [1] : vector<2x16x16xf32> to vector<2x16xf32>
    %374 = vector.extract_strided_slice %244 {offsets = [0, 64], sizes = [2, 16], strides = [1, 1]} : vector<2x128xf32> to vector<2x16xf32>
    %cst_94 = arith.constant 5.000000e-01 : f32
    %375 = vector.broadcast %cst_94 : f32 to vector<2x16xf32>
    %376 = arith.mulf %375, %374 : vector<2x16xf32>
    %377 = math.tanh %376 : vector<2x16xf32>
    %cst_95 = arith.constant 1.000000e+00 : f32
    %378 = vector.broadcast %cst_95 : f32 to vector<2x16xf32>
    %379 = arith.addf %377, %378 : vector<2x16xf32>
    %cst_96 = arith.constant 5.000000e-01 : f32
    %380 = vector.broadcast %cst_96 : f32 to vector<2x16xf32>
    %381 = arith.mulf %380, %379 : vector<2x16xf32>
    %382 = vector.extract_strided_slice %244 {offsets = [0, 80], sizes = [2, 16], strides = [1, 1]} : vector<2x128xf32> to vector<2x16xf32>
    %383 = vector.shape_cast %369 : vector<2x16xf32> to vector<2x16x1xf32>
    %384 = vector.shape_cast %381 : vector<2x16xf32> to vector<2x1x16xf32>
    %385 = vector.broadcast %383 : vector<2x16x1xf32> to vector<2x16x16xf32>
    %386 = vector.broadcast %384 : vector<2x1x16xf32> to vector<2x16x16xf32>
    %387 = arith.mulf %385, %386 : vector<2x16x16xf32>
    %388 = vector.shape_cast %369 : vector<2x16xf32> to vector<2x16x1xf32>
    %389 = vector.shape_cast %382 : vector<2x16xf32> to vector<2x1x16xf32>
    %390 = vector.broadcast %388 : vector<2x16x1xf32> to vector<2x16x16xf32>
    %391 = vector.broadcast %389 : vector<2x1x16xf32> to vector<2x16x16xf32>
    %392 = arith.mulf %390, %391 : vector<2x16x16xf32>
    %cst_97 = arith.constant 1.000000e+00 : f32
    %393 = vector.broadcast %cst_97 : f32 to vector<2x16x16xf32>
    %394 = arith.subf %393, %387 : vector<2x16x16xf32>
    %395 = arith.mulf %205, %394 : vector<2x16x16xf32>
    %396 = arith.addf %395, %392 : vector<2x16x16xf32>
    %397 = vector.extract_strided_slice %244 {offsets = [0, 96], sizes = [2, 8], strides = [1, 1]} : vector<2x128xf32> to vector<2x8xf32>
    %398 = tpu.concatenate %373, %241 in 1 : vector<2x16xf32>, vector<2x32xf32> -> vector<2x48xf32>
    %399 = vector.extract_strided_slice %12 {offsets = [4, 0], sizes = [2, 128], strides = [1, 1]} : vector<16x128xf32> to vector<2x128xf32>
    %cst_98 = arith.constant dense<0.000000e+00> : vector<2x128xf32>
    %400 = tpu.matmul %398, %13, %cst_98 {dimension_numbers = #tpu.dot_dimension_numbers<[1], [0], [0], [1], [0, 0, 1, 1], [], []>} : vector<2x48xf32>, vector<48x128xf32>, vector<2x128xf32> -> vector<2x128xf32>
    %401 = arith.addf %399, %400 : vector<2x128xf32>
    %402 = vector.extract_strided_slice %401 {offsets = [0, 0], sizes = [2, 32], strides = [1, 1]} : vector<2x128xf32> to vector<2x32xf32>
    %cst_99 = arith.constant 5.000000e-01 : f32
    %403 = vector.broadcast %cst_99 : f32 to vector<2x32xf32>
    %404 = arith.mulf %403, %402 : vector<2x32xf32>
    %405 = math.tanh %404 : vector<2x32xf32>
    %cst_100 = arith.constant 1.000000e+00 : f32
    %406 = vector.broadcast %cst_100 : f32 to vector<2x32xf32>
    %407 = arith.addf %405, %406 : vector<2x32xf32>
    %cst_101 = arith.constant 5.000000e-01 : f32
    %408 = vector.broadcast %cst_101 : f32 to vector<2x32xf32>
    %409 = arith.mulf %408, %407 : vector<2x32xf32>
    %410 = vector.extract_strided_slice %401 {offsets = [0, 32], sizes = [2, 32], strides = [1, 1]} : vector<2x128xf32> to vector<2x32xf32>
    %cst_102 = arith.constant 5.000000e-01 : f32
    %411 = vector.broadcast %cst_102 : f32 to vector<2x32xf32>
    %412 = arith.mulf %411, %410 : vector<2x32xf32>
    %413 = math.tanh %412 : vector<2x32xf32>
    %cst_103 = arith.constant 1.000000e+00 : f32
    %414 = vector.broadcast %cst_103 : f32 to vector<2x32xf32>
    %415 = arith.addf %413, %414 : vector<2x32xf32>
    %cst_104 = arith.constant 5.000000e-01 : f32
    %416 = vector.broadcast %cst_104 : f32 to vector<2x32xf32>
    %417 = arith.mulf %416, %415 : vector<2x32xf32>
    %418 = vector.extract_strided_slice %401 {offsets = [0, 64], sizes = [2, 32], strides = [1, 1]} : vector<2x128xf32> to vector<2x32xf32>
    %419 = math.tanh %418 : vector<2x32xf32>
    %420 = vector.extract_strided_slice %401 {offsets = [0, 96], sizes = [2, 32], strides = [1, 1]} : vector<2x128xf32> to vector<2x32xf32>
    %cst_105 = arith.constant 5.000000e-01 : f32
    %421 = vector.broadcast %cst_105 : f32 to vector<2x32xf32>
    %422 = arith.mulf %421, %420 : vector<2x32xf32>
    %423 = math.tanh %422 : vector<2x32xf32>
    %cst_106 = arith.constant 1.000000e+00 : f32
    %424 = vector.broadcast %cst_106 : f32 to vector<2x32xf32>
    %425 = arith.addf %423, %424 : vector<2x32xf32>
    %cst_107 = arith.constant 5.000000e-01 : f32
    %426 = vector.broadcast %cst_107 : f32 to vector<2x32xf32>
    %427 = arith.mulf %426, %425 : vector<2x32xf32>
    %428 = arith.mulf %417, %239 : vector<2x32xf32>
    %429 = arith.mulf %409, %419 : vector<2x32xf32>
    %430 = arith.addf %428, %429 : vector<2x32xf32>
    %431 = math.tanh %430 : vector<2x32xf32>
    %432 = arith.mulf %427, %431 : vector<2x32xf32>
    %cst_108 = arith.constant dense<0.000000e+00> : vector<2x128xf32>
    %433 = tpu.matmul %432, %14, %cst_108 {dimension_numbers = #tpu.dot_dimension_numbers<[1], [0], [0], [1], [0, 0, 1, 1], [], []>} : vector<2x32xf32>, vector<32x128xf32>, vector<2x128xf32> -> vector<2x128xf32>
    %434 = vector.broadcast %15 : vector<1x128xf32> to vector<2x128xf32>
    %435 = arith.addf %433, %434 : vector<2x128xf32>
    %436 = vector.extract_strided_slice %435 {offsets = [0, 0], sizes = [2, 32], strides = [1, 1]} : vector<2x128xf32> to vector<2x32xf32>
    %437 = vector.extract_strided_slice %435 {offsets = [0, 32], sizes = [2, 32], strides = [1, 1]} : vector<2x128xf32> to vector<2x32xf32>
    %438 = tpu.concatenate %436, %437 in 0 : vector<2x32xf32>, vector<2x32xf32> -> vector<4x32xf32>
    %439 = vector.extract_strided_slice %438 {offsets = [0, 0], sizes = [4, 16], strides = [1, 1]} : vector<4x32xf32> to vector<4x16xf32>
    %cst_109 = arith.constant 1.000000e-16 : f32
    %440 = vector.broadcast %cst_109 : f32 to vector<4x16xf32>
    %441 = arith.addf %439, %440 : vector<4x16xf32>
    %442 = vector.extract_strided_slice %438 {offsets = [0, 16], sizes = [4, 1], strides = [1, 1]} : vector<4x32xf32> to vector<4x1xf32>
    %cst_110 = arith.constant 0.000000e+00 : f32
    %443 = vector.broadcast %cst_110 : f32 to vector<4x1xf32>
    %444 = arith.maximumf %442, %443 : vector<4x1xf32>
    %445 = math.absf %442 : vector<4x1xf32>
    %cst_111 = arith.constant 0.000000e+00 : f32
    %446 = vector.broadcast %cst_111 : f32 to vector<4x1xf32>
    %447 = arith.subf %446, %445 : vector<4x1xf32>
    %448 = math.exp %447 : vector<4x1xf32>
    %cst_112 = arith.constant 1.000000e+00 : f32
    %449 = vector.broadcast %cst_112 : f32 to vector<4x1xf32>
    %450 = arith.addf %449, %448 : vector<4x1xf32>
    %451 = math.log %450 : vector<4x1xf32>
    %452 = arith.addf %444, %451 : vector<4x1xf32>
    %453 = vector.extract_strided_slice %438 {offsets = [0, 17], sizes = [4, 1], strides = [1, 1]} : vector<4x32xf32> to vector<4x1xf32>
    %cst_113 = arith.constant 5.000000e-01 : f32
    %454 = vector.broadcast %cst_113 : f32 to vector<4x1xf32>
    %455 = arith.mulf %454, %453 : vector<4x1xf32>
    %456 = math.tanh %455 : vector<4x1xf32>
    %cst_114 = arith.constant 1.000000e+00 : f32
    %457 = vector.broadcast %cst_114 : f32 to vector<4x1xf32>
    %458 = arith.addf %456, %457 : vector<4x1xf32>
    %cst_115 = arith.constant 5.000000e-01 : f32
    %459 = vector.broadcast %cst_115 : f32 to vector<4x1xf32>
    %460 = arith.mulf %459, %458 : vector<4x1xf32>
    %461 = vector.extract_strided_slice %438 {offsets = [0, 18], sizes = [4, 3], strides = [1, 1]} : vector<4x32xf32> to vector<4x3xf32>
    %cst_116 = arith.constant dense<0xFF800000> : vector<4xf32>
    %462 = vector.multi_reduction <maximumf>, %461, %cst_116 [1] : vector<4x3xf32> to vector<4xf32>
    %463 = vector.shape_cast %462 : vector<4xf32> to vector<4x1xf32>
    %464 = vector.broadcast %463 : vector<4x1xf32> to vector<4x3xf32>
    %465 = arith.subf %461, %464 : vector<4x3xf32>
    %466 = math.exp %465 : vector<4x3xf32>
    %cst_117 = arith.constant dense<0.000000e+00> : vector<4xf32>
    %467 = vector.multi_reduction <add>, %466, %cst_117 [1] : vector<4x3xf32> to vector<4xf32>
    %468 = vector.shape_cast %467 : vector<4xf32> to vector<4x1xf32>
    %469 = vector.broadcast %468 : vector<4x1xf32> to vector<4x3xf32>
    %470 = arith.divf %466, %469 : vector<4x3xf32>
    %471 = vector.extract_strided_slice %438 {offsets = [0, 21], sizes = [4, 1], strides = [1, 1]} : vector<4x32xf32> to vector<4x1xf32>
    %cst_118 = arith.constant 0.000000e+00 : f32
    %472 = vector.broadcast %cst_118 : f32 to vector<4x1xf32>
    %473 = arith.maximumf %471, %472 : vector<4x1xf32>
    %474 = math.absf %471 : vector<4x1xf32>
    %cst_119 = arith.constant 0.000000e+00 : f32
    %475 = vector.broadcast %cst_119 : f32 to vector<4x1xf32>
    %476 = arith.subf %475, %474 : vector<4x1xf32>
    %477 = math.exp %476 : vector<4x1xf32>
    %cst_120 = arith.constant 1.000000e+00 : f32
    %478 = vector.broadcast %cst_120 : f32 to vector<4x1xf32>
    %479 = arith.addf %478, %477 : vector<4x1xf32>
    %480 = math.log %479 : vector<4x1xf32>
    %481 = arith.addf %473, %480 : vector<4x1xf32>
    %cst_121 = arith.constant 1.000000e+00 : f32
    %482 = vector.broadcast %cst_121 : f32 to vector<4x1xf32>
    %483 = arith.addf %482, %481 : vector<4x1xf32>
    %484 = tpu.concatenate %368, %369 in 0 : vector<2x16xf32>, vector<2x16xf32> -> vector<4x16xf32>
    %cst_122 = arith.constant 1.000000e-16 : f32
    %485 = vector.broadcast %cst_122 : f32 to vector<2x16x16xf32>
    %486 = arith.addf %396, %485 : vector<2x16x16xf32>
    %487 = vector.extract_strided_slice %441 {offsets = [0, 0], sizes = [2, 16], strides = [1, 1]} : vector<4x16xf32> to vector<2x16xf32>
    %488 = vector.shape_cast %487 : vector<2x16xf32> to vector<2x1x16xf32>
    %489 = vector.broadcast %488 : vector<2x1x16xf32> to vector<2x16x16xf32>
    %490 = arith.mulf %486, %489 : vector<2x16x16xf32>
    %cst_123 = arith.constant dense<0.000000e+00> : vector<2x16xf32>
    %491 = vector.multi_reduction <add>, %490, %cst_123 [2] : vector<2x16x16xf32> to vector<2x16xf32>
    %492 = vector.extract_strided_slice %441 {offsets = [2, 0], sizes = [2, 16], strides = [1, 1]} : vector<4x16xf32> to vector<2x16xf32>
    %493 = vector.shape_cast %492 : vector<2x16xf32> to vector<2x1x16xf32>
    %494 = vector.broadcast %493 : vector<2x1x16xf32> to vector<2x16x16xf32>
    %495 = arith.mulf %486, %494 : vector<2x16x16xf32>
    %cst_124 = arith.constant dense<0.000000e+00> : vector<2x16xf32>
    %496 = vector.multi_reduction <add>, %495, %cst_124 [2] : vector<2x16x16xf32> to vector<2x16xf32>
    %497 = tpu.concatenate %491, %496 in 0 : vector<2x16xf32>, vector<2x16xf32> -> vector<4x16xf32>
    %498 = arith.mulf %486, %486 : vector<2x16x16xf32>
    %cst_125 = arith.constant dense<0.000000e+00> : vector<2x16xf32>
    %499 = vector.multi_reduction <add>, %498, %cst_125 [2] : vector<2x16x16xf32> to vector<2x16xf32>
    %500 = math.sqrt %499 : vector<2x16xf32>
    %501 = tpu.concatenate %500, %500 in 0 : vector<2x16xf32>, vector<2x16xf32> -> vector<4x16xf32>
    %502 = arith.mulf %441, %441 : vector<4x16xf32>
    %cst_126 = arith.constant dense<0.000000e+00> : vector<4xf32>
    %503 = vector.multi_reduction <add>, %502, %cst_126 [1] : vector<4x16xf32> to vector<4xf32>
    %504 = vector.shape_cast %503 : vector<4xf32> to vector<4x1xf32>
    %505 = math.sqrt %504 : vector<4x1xf32>
    %506 = vector.broadcast %505 : vector<4x1xf32> to vector<4x16xf32>
    %507 = arith.mulf %501, %506 : vector<4x16xf32>
    %cst_127 = arith.constant 9.99999993E-9 : f32
    %508 = vector.broadcast %cst_127 : f32 to vector<4x16xf32>
    %509 = arith.maximumf %507, %508 : vector<4x16xf32>
    %510 = tpu.reciprocal %509 {approx = true} : vector<4x16xf32> -> vector<4x16xf32>
    %511 = arith.mulf %497, %510 : vector<4x16xf32>
    %512 = vector.broadcast %452 : vector<4x1xf32> to vector<4x16xf32>
    %513 = arith.mulf %512, %511 : vector<4x16xf32>
    %cst_128 = arith.constant dense<0xFF800000> : vector<4xf32>
    %514 = vector.multi_reduction <maximumf>, %513, %cst_128 [1] : vector<4x16xf32> to vector<4xf32>
    %515 = vector.shape_cast %514 : vector<4xf32> to vector<4x1xf32>
    %516 = vector.broadcast %515 : vector<4x1xf32> to vector<4x16xf32>
    %517 = arith.subf %513, %516 : vector<4x16xf32>
    %518 = math.exp %517 : vector<4x16xf32>
    %cst_129 = arith.constant dense<0.000000e+00> : vector<4xf32>
    %519 = vector.multi_reduction <add>, %518, %cst_129 [1] : vector<4x16xf32> to vector<4xf32>
    %520 = vector.shape_cast %519 : vector<4xf32> to vector<4x1xf32>
    %521 = vector.broadcast %520 : vector<4x1xf32> to vector<4x16xf32>
    %522 = arith.divf %518, %521 : vector<4x16xf32>
    %523 = vector.broadcast %460 : vector<4x1xf32> to vector<4x16xf32>
    %524 = arith.mulf %523, %522 : vector<4x16xf32>
    %cst_130 = arith.constant 1.000000e+00 : f32
    %525 = vector.broadcast %cst_130 : f32 to vector<4x1xf32>
    %526 = arith.subf %525, %460 : vector<4x1xf32>
    %527 = vector.broadcast %526 : vector<4x1xf32> to vector<4x16xf32>
    %528 = arith.mulf %527, %484 : vector<4x16xf32>
    %529 = arith.addf %524, %528 : vector<4x16xf32>
    %530 = vector.extract_strided_slice %529 {offsets = [0, 15], sizes = [4, 1], strides = [1, 1]} : vector<4x16xf32> to vector<4x1xf32>
    %531 = vector.extract_strided_slice %529 {offsets = [0, 0], sizes = [4, 15], strides = [1, 1]} : vector<4x16xf32> to vector<4x15xf32>
    %532 = tpu.concatenate %530, %531 in 1 : vector<4x1xf32>, vector<4x15xf32> -> vector<4x16xf32>
    %533 = vector.extract_strided_slice %529 {offsets = [0, 1], sizes = [4, 15], strides = [1, 1]} : vector<4x16xf32> to vector<4x15xf32>
    %534 = vector.extract_strided_slice %529 {offsets = [0, 0], sizes = [4, 1], strides = [1, 1]} : vector<4x16xf32> to vector<4x1xf32>
    %535 = tpu.concatenate %533, %534 in 1 : vector<4x15xf32>, vector<4x1xf32> -> vector<4x16xf32>
    %536 = vector.extract_strided_slice %470 {offsets = [0, 0], sizes = [4, 1], strides = [1, 1]} : vector<4x3xf32> to vector<4x1xf32>
    %537 = vector.broadcast %536 : vector<4x1xf32> to vector<4x16xf32>
    %538 = arith.mulf %532, %537 : vector<4x16xf32>
    %539 = vector.extract_strided_slice %470 {offsets = [0, 1], sizes = [4, 1], strides = [1, 1]} : vector<4x3xf32> to vector<4x1xf32>
    %540 = vector.broadcast %539 : vector<4x1xf32> to vector<4x16xf32>
    %541 = arith.mulf %529, %540 : vector<4x16xf32>
    %542 = arith.addf %538, %541 : vector<4x16xf32>
    %543 = vector.extract_strided_slice %470 {offsets = [0, 2], sizes = [4, 1], strides = [1, 1]} : vector<4x3xf32> to vector<4x1xf32>
    %544 = vector.broadcast %543 : vector<4x1xf32> to vector<4x16xf32>
    %545 = arith.mulf %535, %544 : vector<4x16xf32>
    %546 = arith.addf %542, %545 : vector<4x16xf32>
    %cst_131 = arith.constant 1.000000e-30 : f32
    %547 = vector.broadcast %cst_131 : f32 to vector<4x16xf32>
    %548 = arith.maximumf %546, %547 : vector<4x16xf32>
    %549 = math.log %548 : vector<4x16xf32>
    %550 = vector.broadcast %483 : vector<4x1xf32> to vector<4x16xf32>
    %551 = arith.mulf %550, %549 : vector<4x16xf32>
    %552 = math.exp %551 : vector<4x16xf32>
    %cst_132 = arith.constant dense<0.000000e+00> : vector<4xf32>
    %553 = vector.multi_reduction <add>, %552, %cst_132 [1] : vector<4x16xf32> to vector<4xf32>
    %554 = vector.shape_cast %553 : vector<4xf32> to vector<4x1xf32>
    %cst_133 = arith.constant 1.000000e-16 : f32
    %555 = vector.broadcast %cst_133 : f32 to vector<4x1xf32>
    %556 = arith.addf %554, %555 : vector<4x1xf32>
    %557 = vector.broadcast %556 : vector<4x1xf32> to vector<4x16xf32>
    %558 = arith.divf %552, %557 : vector<4x16xf32>
    %559 = vector.extract_strided_slice %558 {offsets = [0, 0], sizes = [2, 16], strides = [1, 1]} : vector<4x16xf32> to vector<2x16xf32>
    %560 = vector.extract_strided_slice %558 {offsets = [2, 0], sizes = [2, 16], strides = [1, 1]} : vector<4x16xf32> to vector<2x16xf32>
    %561 = vector.shape_cast %559 : vector<2x16xf32> to vector<2x16x1xf32>
    %562 = vector.broadcast %561 : vector<2x16x1xf32> to vector<2x16x16xf32>
    %563 = arith.mulf %562, %396 : vector<2x16x16xf32>
    %cst_134 = arith.constant dense<0.000000e+00> : vector<2x16xf32>
    %564 = vector.multi_reduction <add>, %563, %cst_134 [1] : vector<2x16x16xf32> to vector<2x16xf32>
    %565 = vector.extract_strided_slice %435 {offsets = [0, 64], sizes = [2, 16], strides = [1, 1]} : vector<2x128xf32> to vector<2x16xf32>
    %cst_135 = arith.constant 5.000000e-01 : f32
    %566 = vector.broadcast %cst_135 : f32 to vector<2x16xf32>
    %567 = arith.mulf %566, %565 : vector<2x16xf32>
    %568 = math.tanh %567 : vector<2x16xf32>
    %cst_136 = arith.constant 1.000000e+00 : f32
    %569 = vector.broadcast %cst_136 : f32 to vector<2x16xf32>
    %570 = arith.addf %568, %569 : vector<2x16xf32>
    %cst_137 = arith.constant 5.000000e-01 : f32
    %571 = vector.broadcast %cst_137 : f32 to vector<2x16xf32>
    %572 = arith.mulf %571, %570 : vector<2x16xf32>
    %573 = vector.extract_strided_slice %435 {offsets = [0, 80], sizes = [2, 16], strides = [1, 1]} : vector<2x128xf32> to vector<2x16xf32>
    %574 = vector.shape_cast %560 : vector<2x16xf32> to vector<2x16x1xf32>
    %575 = vector.shape_cast %572 : vector<2x16xf32> to vector<2x1x16xf32>
    %576 = vector.broadcast %574 : vector<2x16x1xf32> to vector<2x16x16xf32>
    %577 = vector.broadcast %575 : vector<2x1x16xf32> to vector<2x16x16xf32>
    %578 = arith.mulf %576, %577 : vector<2x16x16xf32>
    %579 = vector.shape_cast %560 : vector<2x16xf32> to vector<2x16x1xf32>
    %580 = vector.shape_cast %573 : vector<2x16xf32> to vector<2x1x16xf32>
    %581 = vector.broadcast %579 : vector<2x16x1xf32> to vector<2x16x16xf32>
    %582 = vector.broadcast %580 : vector<2x1x16xf32> to vector<2x16x16xf32>
    %583 = arith.mulf %581, %582 : vector<2x16x16xf32>
    %cst_138 = arith.constant 1.000000e+00 : f32
    %584 = vector.broadcast %cst_138 : f32 to vector<2x16x16xf32>
    %585 = arith.subf %584, %578 : vector<2x16x16xf32>
    %586 = arith.mulf %396, %585 : vector<2x16x16xf32>
    %587 = arith.addf %586, %583 : vector<2x16x16xf32>
    %588 = vector.extract_strided_slice %435 {offsets = [0, 96], sizes = [2, 8], strides = [1, 1]} : vector<2x128xf32> to vector<2x8xf32>
    %589 = tpu.concatenate %564, %432 in 1 : vector<2x16xf32>, vector<2x32xf32> -> vector<2x48xf32>
    %590 = vector.extract_strided_slice %12 {offsets = [6, 0], sizes = [2, 128], strides = [1, 1]} : vector<16x128xf32> to vector<2x128xf32>
    %cst_139 = arith.constant dense<0.000000e+00> : vector<2x128xf32>
    %591 = tpu.matmul %589, %13, %cst_139 {dimension_numbers = #tpu.dot_dimension_numbers<[1], [0], [0], [1], [0, 0, 1, 1], [], []>} : vector<2x48xf32>, vector<48x128xf32>, vector<2x128xf32> -> vector<2x128xf32>
    %592 = arith.addf %590, %591 : vector<2x128xf32>
    %593 = vector.extract_strided_slice %592 {offsets = [0, 0], sizes = [2, 32], strides = [1, 1]} : vector<2x128xf32> to vector<2x32xf32>
    %cst_140 = arith.constant 5.000000e-01 : f32
    %594 = vector.broadcast %cst_140 : f32 to vector<2x32xf32>
    %595 = arith.mulf %594, %593 : vector<2x32xf32>
    %596 = math.tanh %595 : vector<2x32xf32>
    %cst_141 = arith.constant 1.000000e+00 : f32
    %597 = vector.broadcast %cst_141 : f32 to vector<2x32xf32>
    %598 = arith.addf %596, %597 : vector<2x32xf32>
    %cst_142 = arith.constant 5.000000e-01 : f32
    %599 = vector.broadcast %cst_142 : f32 to vector<2x32xf32>
    %600 = arith.mulf %599, %598 : vector<2x32xf32>
    %601 = vector.extract_strided_slice %592 {offsets = [0, 32], sizes = [2, 32], strides = [1, 1]} : vector<2x128xf32> to vector<2x32xf32>
    %cst_143 = arith.constant 5.000000e-01 : f32
    %602 = vector.broadcast %cst_143 : f32 to vector<2x32xf32>
    %603 = arith.mulf %602, %601 : vector<2x32xf32>
    %604 = math.tanh %603 : vector<2x32xf32>
    %cst_144 = arith.constant 1.000000e+00 : f32
    %605 = vector.broadcast %cst_144 : f32 to vector<2x32xf32>
    %606 = arith.addf %604, %605 : vector<2x32xf32>
    %cst_145 = arith.constant 5.000000e-01 : f32
    %607 = vector.broadcast %cst_145 : f32 to vector<2x32xf32>
    %608 = arith.mulf %607, %606 : vector<2x32xf32>
    %609 = vector.extract_strided_slice %592 {offsets = [0, 64], sizes = [2, 32], strides = [1, 1]} : vector<2x128xf32> to vector<2x32xf32>
    %610 = math.tanh %609 : vector<2x32xf32>
    %611 = vector.extract_strided_slice %592 {offsets = [0, 96], sizes = [2, 32], strides = [1, 1]} : vector<2x128xf32> to vector<2x32xf32>
    %cst_146 = arith.constant 5.000000e-01 : f32
    %612 = vector.broadcast %cst_146 : f32 to vector<2x32xf32>
    %613 = arith.mulf %612, %611 : vector<2x32xf32>
    %614 = math.tanh %613 : vector<2x32xf32>
    %cst_147 = arith.constant 1.000000e+00 : f32
    %615 = vector.broadcast %cst_147 : f32 to vector<2x32xf32>
    %616 = arith.addf %614, %615 : vector<2x32xf32>
    %cst_148 = arith.constant 5.000000e-01 : f32
    %617 = vector.broadcast %cst_148 : f32 to vector<2x32xf32>
    %618 = arith.mulf %617, %616 : vector<2x32xf32>
    %619 = arith.mulf %608, %430 : vector<2x32xf32>
    %620 = arith.mulf %600, %610 : vector<2x32xf32>
    %621 = arith.addf %619, %620 : vector<2x32xf32>
    %622 = math.tanh %621 : vector<2x32xf32>
    %623 = arith.mulf %618, %622 : vector<2x32xf32>
    %cst_149 = arith.constant dense<0.000000e+00> : vector<2x128xf32>
    %624 = tpu.matmul %623, %14, %cst_149 {dimension_numbers = #tpu.dot_dimension_numbers<[1], [0], [0], [1], [0, 0, 1, 1], [], []>} : vector<2x32xf32>, vector<32x128xf32>, vector<2x128xf32> -> vector<2x128xf32>
    %625 = vector.broadcast %15 : vector<1x128xf32> to vector<2x128xf32>
    %626 = arith.addf %624, %625 : vector<2x128xf32>
    %627 = vector.extract_strided_slice %626 {offsets = [0, 0], sizes = [2, 32], strides = [1, 1]} : vector<2x128xf32> to vector<2x32xf32>
    %628 = vector.extract_strided_slice %626 {offsets = [0, 32], sizes = [2, 32], strides = [1, 1]} : vector<2x128xf32> to vector<2x32xf32>
    %629 = tpu.concatenate %627, %628 in 0 : vector<2x32xf32>, vector<2x32xf32> -> vector<4x32xf32>
    %630 = vector.extract_strided_slice %629 {offsets = [0, 0], sizes = [4, 16], strides = [1, 1]} : vector<4x32xf32> to vector<4x16xf32>
    %cst_150 = arith.constant 1.000000e-16 : f32
    %631 = vector.broadcast %cst_150 : f32 to vector<4x16xf32>
    %632 = arith.addf %630, %631 : vector<4x16xf32>
    %633 = vector.extract_strided_slice %629 {offsets = [0, 16], sizes = [4, 1], strides = [1, 1]} : vector<4x32xf32> to vector<4x1xf32>
    %cst_151 = arith.constant 0.000000e+00 : f32
    %634 = vector.broadcast %cst_151 : f32 to vector<4x1xf32>
    %635 = arith.maximumf %633, %634 : vector<4x1xf32>
    %636 = math.absf %633 : vector<4x1xf32>
    %cst_152 = arith.constant 0.000000e+00 : f32
    %637 = vector.broadcast %cst_152 : f32 to vector<4x1xf32>
    %638 = arith.subf %637, %636 : vector<4x1xf32>
    %639 = math.exp %638 : vector<4x1xf32>
    %cst_153 = arith.constant 1.000000e+00 : f32
    %640 = vector.broadcast %cst_153 : f32 to vector<4x1xf32>
    %641 = arith.addf %640, %639 : vector<4x1xf32>
    %642 = math.log %641 : vector<4x1xf32>
    %643 = arith.addf %635, %642 : vector<4x1xf32>
    %644 = vector.extract_strided_slice %629 {offsets = [0, 17], sizes = [4, 1], strides = [1, 1]} : vector<4x32xf32> to vector<4x1xf32>
    %cst_154 = arith.constant 5.000000e-01 : f32
    %645 = vector.broadcast %cst_154 : f32 to vector<4x1xf32>
    %646 = arith.mulf %645, %644 : vector<4x1xf32>
    %647 = math.tanh %646 : vector<4x1xf32>
    %cst_155 = arith.constant 1.000000e+00 : f32
    %648 = vector.broadcast %cst_155 : f32 to vector<4x1xf32>
    %649 = arith.addf %647, %648 : vector<4x1xf32>
    %cst_156 = arith.constant 5.000000e-01 : f32
    %650 = vector.broadcast %cst_156 : f32 to vector<4x1xf32>
    %651 = arith.mulf %650, %649 : vector<4x1xf32>
    %652 = vector.extract_strided_slice %629 {offsets = [0, 18], sizes = [4, 3], strides = [1, 1]} : vector<4x32xf32> to vector<4x3xf32>
    %cst_157 = arith.constant dense<0xFF800000> : vector<4xf32>
    %653 = vector.multi_reduction <maximumf>, %652, %cst_157 [1] : vector<4x3xf32> to vector<4xf32>
    %654 = vector.shape_cast %653 : vector<4xf32> to vector<4x1xf32>
    %655 = vector.broadcast %654 : vector<4x1xf32> to vector<4x3xf32>
    %656 = arith.subf %652, %655 : vector<4x3xf32>
    %657 = math.exp %656 : vector<4x3xf32>
    %cst_158 = arith.constant dense<0.000000e+00> : vector<4xf32>
    %658 = vector.multi_reduction <add>, %657, %cst_158 [1] : vector<4x3xf32> to vector<4xf32>
    %659 = vector.shape_cast %658 : vector<4xf32> to vector<4x1xf32>
    %660 = vector.broadcast %659 : vector<4x1xf32> to vector<4x3xf32>
    %661 = arith.divf %657, %660 : vector<4x3xf32>
    %662 = vector.extract_strided_slice %629 {offsets = [0, 21], sizes = [4, 1], strides = [1, 1]} : vector<4x32xf32> to vector<4x1xf32>
    %cst_159 = arith.constant 0.000000e+00 : f32
    %663 = vector.broadcast %cst_159 : f32 to vector<4x1xf32>
    %664 = arith.maximumf %662, %663 : vector<4x1xf32>
    %665 = math.absf %662 : vector<4x1xf32>
    %cst_160 = arith.constant 0.000000e+00 : f32
    %666 = vector.broadcast %cst_160 : f32 to vector<4x1xf32>
    %667 = arith.subf %666, %665 : vector<4x1xf32>
    %668 = math.exp %667 : vector<4x1xf32>
    %cst_161 = arith.constant 1.000000e+00 : f32
    %669 = vector.broadcast %cst_161 : f32 to vector<4x1xf32>
    %670 = arith.addf %669, %668 : vector<4x1xf32>
    %671 = math.log %670 : vector<4x1xf32>
    %672 = arith.addf %664, %671 : vector<4x1xf32>
    %cst_162 = arith.constant 1.000000e+00 : f32
    %673 = vector.broadcast %cst_162 : f32 to vector<4x1xf32>
    %674 = arith.addf %673, %672 : vector<4x1xf32>
    %675 = tpu.concatenate %559, %560 in 0 : vector<2x16xf32>, vector<2x16xf32> -> vector<4x16xf32>
    %cst_163 = arith.constant 1.000000e-16 : f32
    %676 = vector.broadcast %cst_163 : f32 to vector<2x16x16xf32>
    %677 = arith.addf %587, %676 : vector<2x16x16xf32>
    %678 = vector.extract_strided_slice %632 {offsets = [0, 0], sizes = [2, 16], strides = [1, 1]} : vector<4x16xf32> to vector<2x16xf32>
    %679 = vector.shape_cast %678 : vector<2x16xf32> to vector<2x1x16xf32>
    %680 = vector.broadcast %679 : vector<2x1x16xf32> to vector<2x16x16xf32>
    %681 = arith.mulf %677, %680 : vector<2x16x16xf32>
    %cst_164 = arith.constant dense<0.000000e+00> : vector<2x16xf32>
    %682 = vector.multi_reduction <add>, %681, %cst_164 [2] : vector<2x16x16xf32> to vector<2x16xf32>
    %683 = vector.extract_strided_slice %632 {offsets = [2, 0], sizes = [2, 16], strides = [1, 1]} : vector<4x16xf32> to vector<2x16xf32>
    %684 = vector.shape_cast %683 : vector<2x16xf32> to vector<2x1x16xf32>
    %685 = vector.broadcast %684 : vector<2x1x16xf32> to vector<2x16x16xf32>
    %686 = arith.mulf %677, %685 : vector<2x16x16xf32>
    %cst_165 = arith.constant dense<0.000000e+00> : vector<2x16xf32>
    %687 = vector.multi_reduction <add>, %686, %cst_165 [2] : vector<2x16x16xf32> to vector<2x16xf32>
    %688 = tpu.concatenate %682, %687 in 0 : vector<2x16xf32>, vector<2x16xf32> -> vector<4x16xf32>
    %689 = arith.mulf %677, %677 : vector<2x16x16xf32>
    %cst_166 = arith.constant dense<0.000000e+00> : vector<2x16xf32>
    %690 = vector.multi_reduction <add>, %689, %cst_166 [2] : vector<2x16x16xf32> to vector<2x16xf32>
    %691 = math.sqrt %690 : vector<2x16xf32>
    %692 = tpu.concatenate %691, %691 in 0 : vector<2x16xf32>, vector<2x16xf32> -> vector<4x16xf32>
    %693 = arith.mulf %632, %632 : vector<4x16xf32>
    %cst_167 = arith.constant dense<0.000000e+00> : vector<4xf32>
    %694 = vector.multi_reduction <add>, %693, %cst_167 [1] : vector<4x16xf32> to vector<4xf32>
    %695 = vector.shape_cast %694 : vector<4xf32> to vector<4x1xf32>
    %696 = math.sqrt %695 : vector<4x1xf32>
    %697 = vector.broadcast %696 : vector<4x1xf32> to vector<4x16xf32>
    %698 = arith.mulf %692, %697 : vector<4x16xf32>
    %cst_168 = arith.constant 9.99999993E-9 : f32
    %699 = vector.broadcast %cst_168 : f32 to vector<4x16xf32>
    %700 = arith.maximumf %698, %699 : vector<4x16xf32>
    %701 = tpu.reciprocal %700 {approx = true} : vector<4x16xf32> -> vector<4x16xf32>
    %702 = arith.mulf %688, %701 : vector<4x16xf32>
    %703 = vector.broadcast %643 : vector<4x1xf32> to vector<4x16xf32>
    %704 = arith.mulf %703, %702 : vector<4x16xf32>
    %cst_169 = arith.constant dense<0xFF800000> : vector<4xf32>
    %705 = vector.multi_reduction <maximumf>, %704, %cst_169 [1] : vector<4x16xf32> to vector<4xf32>
    %706 = vector.shape_cast %705 : vector<4xf32> to vector<4x1xf32>
    %707 = vector.broadcast %706 : vector<4x1xf32> to vector<4x16xf32>
    %708 = arith.subf %704, %707 : vector<4x16xf32>
    %709 = math.exp %708 : vector<4x16xf32>
    %cst_170 = arith.constant dense<0.000000e+00> : vector<4xf32>
    %710 = vector.multi_reduction <add>, %709, %cst_170 [1] : vector<4x16xf32> to vector<4xf32>
    %711 = vector.shape_cast %710 : vector<4xf32> to vector<4x1xf32>
    %712 = vector.broadcast %711 : vector<4x1xf32> to vector<4x16xf32>
    %713 = arith.divf %709, %712 : vector<4x16xf32>
    %714 = vector.broadcast %651 : vector<4x1xf32> to vector<4x16xf32>
    %715 = arith.mulf %714, %713 : vector<4x16xf32>
    %cst_171 = arith.constant 1.000000e+00 : f32
    %716 = vector.broadcast %cst_171 : f32 to vector<4x1xf32>
    %717 = arith.subf %716, %651 : vector<4x1xf32>
    %718 = vector.broadcast %717 : vector<4x1xf32> to vector<4x16xf32>
    %719 = arith.mulf %718, %675 : vector<4x16xf32>
    %720 = arith.addf %715, %719 : vector<4x16xf32>
    %721 = vector.extract_strided_slice %720 {offsets = [0, 15], sizes = [4, 1], strides = [1, 1]} : vector<4x16xf32> to vector<4x1xf32>
    %722 = vector.extract_strided_slice %720 {offsets = [0, 0], sizes = [4, 15], strides = [1, 1]} : vector<4x16xf32> to vector<4x15xf32>
    %723 = tpu.concatenate %721, %722 in 1 : vector<4x1xf32>, vector<4x15xf32> -> vector<4x16xf32>
    %724 = vector.extract_strided_slice %720 {offsets = [0, 1], sizes = [4, 15], strides = [1, 1]} : vector<4x16xf32> to vector<4x15xf32>
    %725 = vector.extract_strided_slice %720 {offsets = [0, 0], sizes = [4, 1], strides = [1, 1]} : vector<4x16xf32> to vector<4x1xf32>
    %726 = tpu.concatenate %724, %725 in 1 : vector<4x15xf32>, vector<4x1xf32> -> vector<4x16xf32>
    %727 = vector.extract_strided_slice %661 {offsets = [0, 0], sizes = [4, 1], strides = [1, 1]} : vector<4x3xf32> to vector<4x1xf32>
    %728 = vector.broadcast %727 : vector<4x1xf32> to vector<4x16xf32>
    %729 = arith.mulf %723, %728 : vector<4x16xf32>
    %730 = vector.extract_strided_slice %661 {offsets = [0, 1], sizes = [4, 1], strides = [1, 1]} : vector<4x3xf32> to vector<4x1xf32>
    %731 = vector.broadcast %730 : vector<4x1xf32> to vector<4x16xf32>
    %732 = arith.mulf %720, %731 : vector<4x16xf32>
    %733 = arith.addf %729, %732 : vector<4x16xf32>
    %734 = vector.extract_strided_slice %661 {offsets = [0, 2], sizes = [4, 1], strides = [1, 1]} : vector<4x3xf32> to vector<4x1xf32>
    %735 = vector.broadcast %734 : vector<4x1xf32> to vector<4x16xf32>
    %736 = arith.mulf %726, %735 : vector<4x16xf32>
    %737 = arith.addf %733, %736 : vector<4x16xf32>
    %cst_172 = arith.constant 1.000000e-30 : f32
    %738 = vector.broadcast %cst_172 : f32 to vector<4x16xf32>
    %739 = arith.maximumf %737, %738 : vector<4x16xf32>
    %740 = math.log %739 : vector<4x16xf32>
    %741 = vector.broadcast %674 : vector<4x1xf32> to vector<4x16xf32>
    %742 = arith.mulf %741, %740 : vector<4x16xf32>
    %743 = math.exp %742 : vector<4x16xf32>
    %cst_173 = arith.constant dense<0.000000e+00> : vector<4xf32>
    %744 = vector.multi_reduction <add>, %743, %cst_173 [1] : vector<4x16xf32> to vector<4xf32>
    %745 = vector.shape_cast %744 : vector<4xf32> to vector<4x1xf32>
    %cst_174 = arith.constant 1.000000e-16 : f32
    %746 = vector.broadcast %cst_174 : f32 to vector<4x1xf32>
    %747 = arith.addf %745, %746 : vector<4x1xf32>
    %748 = vector.broadcast %747 : vector<4x1xf32> to vector<4x16xf32>
    %749 = arith.divf %743, %748 : vector<4x16xf32>
    %750 = vector.extract_strided_slice %749 {offsets = [0, 0], sizes = [2, 16], strides = [1, 1]} : vector<4x16xf32> to vector<2x16xf32>
    %751 = vector.extract_strided_slice %749 {offsets = [2, 0], sizes = [2, 16], strides = [1, 1]} : vector<4x16xf32> to vector<2x16xf32>
    %752 = vector.shape_cast %750 : vector<2x16xf32> to vector<2x16x1xf32>
    %753 = vector.broadcast %752 : vector<2x16x1xf32> to vector<2x16x16xf32>
    %754 = arith.mulf %753, %587 : vector<2x16x16xf32>
    %cst_175 = arith.constant dense<0.000000e+00> : vector<2x16xf32>
    %755 = vector.multi_reduction <add>, %754, %cst_175 [1] : vector<2x16x16xf32> to vector<2x16xf32>
    %756 = vector.extract_strided_slice %626 {offsets = [0, 64], sizes = [2, 16], strides = [1, 1]} : vector<2x128xf32> to vector<2x16xf32>
    %cst_176 = arith.constant 5.000000e-01 : f32
    %757 = vector.broadcast %cst_176 : f32 to vector<2x16xf32>
    %758 = arith.mulf %757, %756 : vector<2x16xf32>
    %759 = math.tanh %758 : vector<2x16xf32>
    %cst_177 = arith.constant 1.000000e+00 : f32
    %760 = vector.broadcast %cst_177 : f32 to vector<2x16xf32>
    %761 = arith.addf %759, %760 : vector<2x16xf32>
    %cst_178 = arith.constant 5.000000e-01 : f32
    %762 = vector.broadcast %cst_178 : f32 to vector<2x16xf32>
    %763 = arith.mulf %762, %761 : vector<2x16xf32>
    %764 = vector.extract_strided_slice %626 {offsets = [0, 80], sizes = [2, 16], strides = [1, 1]} : vector<2x128xf32> to vector<2x16xf32>
    %765 = vector.shape_cast %751 : vector<2x16xf32> to vector<2x16x1xf32>
    %766 = vector.shape_cast %763 : vector<2x16xf32> to vector<2x1x16xf32>
    %767 = vector.broadcast %765 : vector<2x16x1xf32> to vector<2x16x16xf32>
    %768 = vector.broadcast %766 : vector<2x1x16xf32> to vector<2x16x16xf32>
    %769 = arith.mulf %767, %768 : vector<2x16x16xf32>
    %770 = vector.shape_cast %751 : vector<2x16xf32> to vector<2x16x1xf32>
    %771 = vector.shape_cast %764 : vector<2x16xf32> to vector<2x1x16xf32>
    %772 = vector.broadcast %770 : vector<2x16x1xf32> to vector<2x16x16xf32>
    %773 = vector.broadcast %771 : vector<2x1x16xf32> to vector<2x16x16xf32>
    %774 = arith.mulf %772, %773 : vector<2x16x16xf32>
    %cst_179 = arith.constant 1.000000e+00 : f32
    %775 = vector.broadcast %cst_179 : f32 to vector<2x16x16xf32>
    %776 = arith.subf %775, %769 : vector<2x16x16xf32>
    %777 = arith.mulf %587, %776 : vector<2x16x16xf32>
    %778 = arith.addf %777, %774 : vector<2x16x16xf32>
    %779 = vector.extract_strided_slice %626 {offsets = [0, 96], sizes = [2, 8], strides = [1, 1]} : vector<2x128xf32> to vector<2x8xf32>
    %780 = tpu.concatenate %755, %623 in 1 : vector<2x16xf32>, vector<2x32xf32> -> vector<2x48xf32>
    %781 = vector.extract_strided_slice %12 {offsets = [8, 0], sizes = [2, 128], strides = [1, 1]} : vector<16x128xf32> to vector<2x128xf32>
    %cst_180 = arith.constant dense<0.000000e+00> : vector<2x128xf32>
    %782 = tpu.matmul %780, %13, %cst_180 {dimension_numbers = #tpu.dot_dimension_numbers<[1], [0], [0], [1], [0, 0, 1, 1], [], []>} : vector<2x48xf32>, vector<48x128xf32>, vector<2x128xf32> -> vector<2x128xf32>
    %783 = arith.addf %781, %782 : vector<2x128xf32>
    %784 = vector.extract_strided_slice %783 {offsets = [0, 0], sizes = [2, 32], strides = [1, 1]} : vector<2x128xf32> to vector<2x32xf32>
    %cst_181 = arith.constant 5.000000e-01 : f32
    %785 = vector.broadcast %cst_181 : f32 to vector<2x32xf32>
    %786 = arith.mulf %785, %784 : vector<2x32xf32>
    %787 = math.tanh %786 : vector<2x32xf32>
    %cst_182 = arith.constant 1.000000e+00 : f32
    %788 = vector.broadcast %cst_182 : f32 to vector<2x32xf32>
    %789 = arith.addf %787, %788 : vector<2x32xf32>
    %cst_183 = arith.constant 5.000000e-01 : f32
    %790 = vector.broadcast %cst_183 : f32 to vector<2x32xf32>
    %791 = arith.mulf %790, %789 : vector<2x32xf32>
    %792 = vector.extract_strided_slice %783 {offsets = [0, 32], sizes = [2, 32], strides = [1, 1]} : vector<2x128xf32> to vector<2x32xf32>
    %cst_184 = arith.constant 5.000000e-01 : f32
    %793 = vector.broadcast %cst_184 : f32 to vector<2x32xf32>
    %794 = arith.mulf %793, %792 : vector<2x32xf32>
    %795 = math.tanh %794 : vector<2x32xf32>
    %cst_185 = arith.constant 1.000000e+00 : f32
    %796 = vector.broadcast %cst_185 : f32 to vector<2x32xf32>
    %797 = arith.addf %795, %796 : vector<2x32xf32>
    %cst_186 = arith.constant 5.000000e-01 : f32
    %798 = vector.broadcast %cst_186 : f32 to vector<2x32xf32>
    %799 = arith.mulf %798, %797 : vector<2x32xf32>
    %800 = vector.extract_strided_slice %783 {offsets = [0, 64], sizes = [2, 32], strides = [1, 1]} : vector<2x128xf32> to vector<2x32xf32>
    %801 = math.tanh %800 : vector<2x32xf32>
    %802 = vector.extract_strided_slice %783 {offsets = [0, 96], sizes = [2, 32], strides = [1, 1]} : vector<2x128xf32> to vector<2x32xf32>
    %cst_187 = arith.constant 5.000000e-01 : f32
    %803 = vector.broadcast %cst_187 : f32 to vector<2x32xf32>
    %804 = arith.mulf %803, %802 : vector<2x32xf32>
    %805 = math.tanh %804 : vector<2x32xf32>
    %cst_188 = arith.constant 1.000000e+00 : f32
    %806 = vector.broadcast %cst_188 : f32 to vector<2x32xf32>
    %807 = arith.addf %805, %806 : vector<2x32xf32>
    %cst_189 = arith.constant 5.000000e-01 : f32
    %808 = vector.broadcast %cst_189 : f32 to vector<2x32xf32>
    %809 = arith.mulf %808, %807 : vector<2x32xf32>
    %810 = arith.mulf %799, %621 : vector<2x32xf32>
    %811 = arith.mulf %791, %801 : vector<2x32xf32>
    %812 = arith.addf %810, %811 : vector<2x32xf32>
    %813 = math.tanh %812 : vector<2x32xf32>
    %814 = arith.mulf %809, %813 : vector<2x32xf32>
    %cst_190 = arith.constant dense<0.000000e+00> : vector<2x128xf32>
    %815 = tpu.matmul %814, %14, %cst_190 {dimension_numbers = #tpu.dot_dimension_numbers<[1], [0], [0], [1], [0, 0, 1, 1], [], []>} : vector<2x32xf32>, vector<32x128xf32>, vector<2x128xf32> -> vector<2x128xf32>
    %816 = vector.broadcast %15 : vector<1x128xf32> to vector<2x128xf32>
    %817 = arith.addf %815, %816 : vector<2x128xf32>
    %818 = vector.extract_strided_slice %817 {offsets = [0, 0], sizes = [2, 32], strides = [1, 1]} : vector<2x128xf32> to vector<2x32xf32>
    %819 = vector.extract_strided_slice %817 {offsets = [0, 32], sizes = [2, 32], strides = [1, 1]} : vector<2x128xf32> to vector<2x32xf32>
    %820 = tpu.concatenate %818, %819 in 0 : vector<2x32xf32>, vector<2x32xf32> -> vector<4x32xf32>
    %821 = vector.extract_strided_slice %820 {offsets = [0, 0], sizes = [4, 16], strides = [1, 1]} : vector<4x32xf32> to vector<4x16xf32>
    %cst_191 = arith.constant 1.000000e-16 : f32
    %822 = vector.broadcast %cst_191 : f32 to vector<4x16xf32>
    %823 = arith.addf %821, %822 : vector<4x16xf32>
    %824 = vector.extract_strided_slice %820 {offsets = [0, 16], sizes = [4, 1], strides = [1, 1]} : vector<4x32xf32> to vector<4x1xf32>
    %cst_192 = arith.constant 0.000000e+00 : f32
    %825 = vector.broadcast %cst_192 : f32 to vector<4x1xf32>
    %826 = arith.maximumf %824, %825 : vector<4x1xf32>
    %827 = math.absf %824 : vector<4x1xf32>
    %cst_193 = arith.constant 0.000000e+00 : f32
    %828 = vector.broadcast %cst_193 : f32 to vector<4x1xf32>
    %829 = arith.subf %828, %827 : vector<4x1xf32>
    %830 = math.exp %829 : vector<4x1xf32>
    %cst_194 = arith.constant 1.000000e+00 : f32
    %831 = vector.broadcast %cst_194 : f32 to vector<4x1xf32>
    %832 = arith.addf %831, %830 : vector<4x1xf32>
    %833 = math.log %832 : vector<4x1xf32>
    %834 = arith.addf %826, %833 : vector<4x1xf32>
    %835 = vector.extract_strided_slice %820 {offsets = [0, 17], sizes = [4, 1], strides = [1, 1]} : vector<4x32xf32> to vector<4x1xf32>
    %cst_195 = arith.constant 5.000000e-01 : f32
    %836 = vector.broadcast %cst_195 : f32 to vector<4x1xf32>
    %837 = arith.mulf %836, %835 : vector<4x1xf32>
    %838 = math.tanh %837 : vector<4x1xf32>
    %cst_196 = arith.constant 1.000000e+00 : f32
    %839 = vector.broadcast %cst_196 : f32 to vector<4x1xf32>
    %840 = arith.addf %838, %839 : vector<4x1xf32>
    %cst_197 = arith.constant 5.000000e-01 : f32
    %841 = vector.broadcast %cst_197 : f32 to vector<4x1xf32>
    %842 = arith.mulf %841, %840 : vector<4x1xf32>
    %843 = vector.extract_strided_slice %820 {offsets = [0, 18], sizes = [4, 3], strides = [1, 1]} : vector<4x32xf32> to vector<4x3xf32>
    %cst_198 = arith.constant dense<0xFF800000> : vector<4xf32>
    %844 = vector.multi_reduction <maximumf>, %843, %cst_198 [1] : vector<4x3xf32> to vector<4xf32>
    %845 = vector.shape_cast %844 : vector<4xf32> to vector<4x1xf32>
    %846 = vector.broadcast %845 : vector<4x1xf32> to vector<4x3xf32>
    %847 = arith.subf %843, %846 : vector<4x3xf32>
    %848 = math.exp %847 : vector<4x3xf32>
    %cst_199 = arith.constant dense<0.000000e+00> : vector<4xf32>
    %849 = vector.multi_reduction <add>, %848, %cst_199 [1] : vector<4x3xf32> to vector<4xf32>
    %850 = vector.shape_cast %849 : vector<4xf32> to vector<4x1xf32>
    %851 = vector.broadcast %850 : vector<4x1xf32> to vector<4x3xf32>
    %852 = arith.divf %848, %851 : vector<4x3xf32>
    %853 = vector.extract_strided_slice %820 {offsets = [0, 21], sizes = [4, 1], strides = [1, 1]} : vector<4x32xf32> to vector<4x1xf32>
    %cst_200 = arith.constant 0.000000e+00 : f32
    %854 = vector.broadcast %cst_200 : f32 to vector<4x1xf32>
    %855 = arith.maximumf %853, %854 : vector<4x1xf32>
    %856 = math.absf %853 : vector<4x1xf32>
    %cst_201 = arith.constant 0.000000e+00 : f32
    %857 = vector.broadcast %cst_201 : f32 to vector<4x1xf32>
    %858 = arith.subf %857, %856 : vector<4x1xf32>
    %859 = math.exp %858 : vector<4x1xf32>
    %cst_202 = arith.constant 1.000000e+00 : f32
    %860 = vector.broadcast %cst_202 : f32 to vector<4x1xf32>
    %861 = arith.addf %860, %859 : vector<4x1xf32>
    %862 = math.log %861 : vector<4x1xf32>
    %863 = arith.addf %855, %862 : vector<4x1xf32>
    %cst_203 = arith.constant 1.000000e+00 : f32
    %864 = vector.broadcast %cst_203 : f32 to vector<4x1xf32>
    %865 = arith.addf %864, %863 : vector<4x1xf32>
    %866 = tpu.concatenate %750, %751 in 0 : vector<2x16xf32>, vector<2x16xf32> -> vector<4x16xf32>
    %cst_204 = arith.constant 1.000000e-16 : f32
    %867 = vector.broadcast %cst_204 : f32 to vector<2x16x16xf32>
    %868 = arith.addf %778, %867 : vector<2x16x16xf32>
    %869 = vector.extract_strided_slice %823 {offsets = [0, 0], sizes = [2, 16], strides = [1, 1]} : vector<4x16xf32> to vector<2x16xf32>
    %870 = vector.shape_cast %869 : vector<2x16xf32> to vector<2x1x16xf32>
    %871 = vector.broadcast %870 : vector<2x1x16xf32> to vector<2x16x16xf32>
    %872 = arith.mulf %868, %871 : vector<2x16x16xf32>
    %cst_205 = arith.constant dense<0.000000e+00> : vector<2x16xf32>
    %873 = vector.multi_reduction <add>, %872, %cst_205 [2] : vector<2x16x16xf32> to vector<2x16xf32>
    %874 = vector.extract_strided_slice %823 {offsets = [2, 0], sizes = [2, 16], strides = [1, 1]} : vector<4x16xf32> to vector<2x16xf32>
    %875 = vector.shape_cast %874 : vector<2x16xf32> to vector<2x1x16xf32>
    %876 = vector.broadcast %875 : vector<2x1x16xf32> to vector<2x16x16xf32>
    %877 = arith.mulf %868, %876 : vector<2x16x16xf32>
    %cst_206 = arith.constant dense<0.000000e+00> : vector<2x16xf32>
    %878 = vector.multi_reduction <add>, %877, %cst_206 [2] : vector<2x16x16xf32> to vector<2x16xf32>
    %879 = tpu.concatenate %873, %878 in 0 : vector<2x16xf32>, vector<2x16xf32> -> vector<4x16xf32>
    %880 = arith.mulf %868, %868 : vector<2x16x16xf32>
    %cst_207 = arith.constant dense<0.000000e+00> : vector<2x16xf32>
    %881 = vector.multi_reduction <add>, %880, %cst_207 [2] : vector<2x16x16xf32> to vector<2x16xf32>
    %882 = math.sqrt %881 : vector<2x16xf32>
    %883 = tpu.concatenate %882, %882 in 0 : vector<2x16xf32>, vector<2x16xf32> -> vector<4x16xf32>
    %884 = arith.mulf %823, %823 : vector<4x16xf32>
    %cst_208 = arith.constant dense<0.000000e+00> : vector<4xf32>
    %885 = vector.multi_reduction <add>, %884, %cst_208 [1] : vector<4x16xf32> to vector<4xf32>
    %886 = vector.shape_cast %885 : vector<4xf32> to vector<4x1xf32>
    %887 = math.sqrt %886 : vector<4x1xf32>
    %888 = vector.broadcast %887 : vector<4x1xf32> to vector<4x16xf32>
    %889 = arith.mulf %883, %888 : vector<4x16xf32>
    %cst_209 = arith.constant 9.99999993E-9 : f32
    %890 = vector.broadcast %cst_209 : f32 to vector<4x16xf32>
    %891 = arith.maximumf %889, %890 : vector<4x16xf32>
    %892 = tpu.reciprocal %891 {approx = true} : vector<4x16xf32> -> vector<4x16xf32>
    %893 = arith.mulf %879, %892 : vector<4x16xf32>
    %894 = vector.broadcast %834 : vector<4x1xf32> to vector<4x16xf32>
    %895 = arith.mulf %894, %893 : vector<4x16xf32>
    %cst_210 = arith.constant dense<0xFF800000> : vector<4xf32>
    %896 = vector.multi_reduction <maximumf>, %895, %cst_210 [1] : vector<4x16xf32> to vector<4xf32>
    %897 = vector.shape_cast %896 : vector<4xf32> to vector<4x1xf32>
    %898 = vector.broadcast %897 : vector<4x1xf32> to vector<4x16xf32>
    %899 = arith.subf %895, %898 : vector<4x16xf32>
    %900 = math.exp %899 : vector<4x16xf32>
    %cst_211 = arith.constant dense<0.000000e+00> : vector<4xf32>
    %901 = vector.multi_reduction <add>, %900, %cst_211 [1] : vector<4x16xf32> to vector<4xf32>
    %902 = vector.shape_cast %901 : vector<4xf32> to vector<4x1xf32>
    %903 = vector.broadcast %902 : vector<4x1xf32> to vector<4x16xf32>
    %904 = arith.divf %900, %903 : vector<4x16xf32>
    %905 = vector.broadcast %842 : vector<4x1xf32> to vector<4x16xf32>
    %906 = arith.mulf %905, %904 : vector<4x16xf32>
    %cst_212 = arith.constant 1.000000e+00 : f32
    %907 = vector.broadcast %cst_212 : f32 to vector<4x1xf32>
    %908 = arith.subf %907, %842 : vector<4x1xf32>
    %909 = vector.broadcast %908 : vector<4x1xf32> to vector<4x16xf32>
    %910 = arith.mulf %909, %866 : vector<4x16xf32>
    %911 = arith.addf %906, %910 : vector<4x16xf32>
    %912 = vector.extract_strided_slice %911 {offsets = [0, 15], sizes = [4, 1], strides = [1, 1]} : vector<4x16xf32> to vector<4x1xf32>
    %913 = vector.extract_strided_slice %911 {offsets = [0, 0], sizes = [4, 15], strides = [1, 1]} : vector<4x16xf32> to vector<4x15xf32>
    %914 = tpu.concatenate %912, %913 in 1 : vector<4x1xf32>, vector<4x15xf32> -> vector<4x16xf32>
    %915 = vector.extract_strided_slice %911 {offsets = [0, 1], sizes = [4, 15], strides = [1, 1]} : vector<4x16xf32> to vector<4x15xf32>
    %916 = vector.extract_strided_slice %911 {offsets = [0, 0], sizes = [4, 1], strides = [1, 1]} : vector<4x16xf32> to vector<4x1xf32>
    %917 = tpu.concatenate %915, %916 in 1 : vector<4x15xf32>, vector<4x1xf32> -> vector<4x16xf32>
    %918 = vector.extract_strided_slice %852 {offsets = [0, 0], sizes = [4, 1], strides = [1, 1]} : vector<4x3xf32> to vector<4x1xf32>
    %919 = vector.broadcast %918 : vector<4x1xf32> to vector<4x16xf32>
    %920 = arith.mulf %914, %919 : vector<4x16xf32>
    %921 = vector.extract_strided_slice %852 {offsets = [0, 1], sizes = [4, 1], strides = [1, 1]} : vector<4x3xf32> to vector<4x1xf32>
    %922 = vector.broadcast %921 : vector<4x1xf32> to vector<4x16xf32>
    %923 = arith.mulf %911, %922 : vector<4x16xf32>
    %924 = arith.addf %920, %923 : vector<4x16xf32>
    %925 = vector.extract_strided_slice %852 {offsets = [0, 2], sizes = [4, 1], strides = [1, 1]} : vector<4x3xf32> to vector<4x1xf32>
    %926 = vector.broadcast %925 : vector<4x1xf32> to vector<4x16xf32>
    %927 = arith.mulf %917, %926 : vector<4x16xf32>
    %928 = arith.addf %924, %927 : vector<4x16xf32>
    %cst_213 = arith.constant 1.000000e-30 : f32
    %929 = vector.broadcast %cst_213 : f32 to vector<4x16xf32>
    %930 = arith.maximumf %928, %929 : vector<4x16xf32>
    %931 = math.log %930 : vector<4x16xf32>
    %932 = vector.broadcast %865 : vector<4x1xf32> to vector<4x16xf32>
    %933 = arith.mulf %932, %931 : vector<4x16xf32>
    %934 = math.exp %933 : vector<4x16xf32>
    %cst_214 = arith.constant dense<0.000000e+00> : vector<4xf32>
    %935 = vector.multi_reduction <add>, %934, %cst_214 [1] : vector<4x16xf32> to vector<4xf32>
    %936 = vector.shape_cast %935 : vector<4xf32> to vector<4x1xf32>
    %cst_215 = arith.constant 1.000000e-16 : f32
    %937 = vector.broadcast %cst_215 : f32 to vector<4x1xf32>
    %938 = arith.addf %936, %937 : vector<4x1xf32>
    %939 = vector.broadcast %938 : vector<4x1xf32> to vector<4x16xf32>
    %940 = arith.divf %934, %939 : vector<4x16xf32>
    %941 = vector.extract_strided_slice %940 {offsets = [0, 0], sizes = [2, 16], strides = [1, 1]} : vector<4x16xf32> to vector<2x16xf32>
    %942 = vector.extract_strided_slice %940 {offsets = [2, 0], sizes = [2, 16], strides = [1, 1]} : vector<4x16xf32> to vector<2x16xf32>
    %943 = vector.shape_cast %941 : vector<2x16xf32> to vector<2x16x1xf32>
    %944 = vector.broadcast %943 : vector<2x16x1xf32> to vector<2x16x16xf32>
    %945 = arith.mulf %944, %778 : vector<2x16x16xf32>
    %cst_216 = arith.constant dense<0.000000e+00> : vector<2x16xf32>
    %946 = vector.multi_reduction <add>, %945, %cst_216 [1] : vector<2x16x16xf32> to vector<2x16xf32>
    %947 = vector.extract_strided_slice %817 {offsets = [0, 64], sizes = [2, 16], strides = [1, 1]} : vector<2x128xf32> to vector<2x16xf32>
    %cst_217 = arith.constant 5.000000e-01 : f32
    %948 = vector.broadcast %cst_217 : f32 to vector<2x16xf32>
    %949 = arith.mulf %948, %947 : vector<2x16xf32>
    %950 = math.tanh %949 : vector<2x16xf32>
    %cst_218 = arith.constant 1.000000e+00 : f32
    %951 = vector.broadcast %cst_218 : f32 to vector<2x16xf32>
    %952 = arith.addf %950, %951 : vector<2x16xf32>
    %cst_219 = arith.constant 5.000000e-01 : f32
    %953 = vector.broadcast %cst_219 : f32 to vector<2x16xf32>
    %954 = arith.mulf %953, %952 : vector<2x16xf32>
    %955 = vector.extract_strided_slice %817 {offsets = [0, 80], sizes = [2, 16], strides = [1, 1]} : vector<2x128xf32> to vector<2x16xf32>
    %956 = vector.shape_cast %942 : vector<2x16xf32> to vector<2x16x1xf32>
    %957 = vector.shape_cast %954 : vector<2x16xf32> to vector<2x1x16xf32>
    %958 = vector.broadcast %956 : vector<2x16x1xf32> to vector<2x16x16xf32>
    %959 = vector.broadcast %957 : vector<2x1x16xf32> to vector<2x16x16xf32>
    %960 = arith.mulf %958, %959 : vector<2x16x16xf32>
    %961 = vector.shape_cast %942 : vector<2x16xf32> to vector<2x16x1xf32>
    %962 = vector.shape_cast %955 : vector<2x16xf32> to vector<2x1x16xf32>
    %963 = vector.broadcast %961 : vector<2x16x1xf32> to vector<2x16x16xf32>
    %964 = vector.broadcast %962 : vector<2x1x16xf32> to vector<2x16x16xf32>
    %965 = arith.mulf %963, %964 : vector<2x16x16xf32>
    %cst_220 = arith.constant 1.000000e+00 : f32
    %966 = vector.broadcast %cst_220 : f32 to vector<2x16x16xf32>
    %967 = arith.subf %966, %960 : vector<2x16x16xf32>
    %968 = arith.mulf %778, %967 : vector<2x16x16xf32>
    %969 = arith.addf %968, %965 : vector<2x16x16xf32>
    %970 = vector.extract_strided_slice %817 {offsets = [0, 96], sizes = [2, 8], strides = [1, 1]} : vector<2x128xf32> to vector<2x8xf32>
    %971 = tpu.concatenate %946, %814 in 1 : vector<2x16xf32>, vector<2x32xf32> -> vector<2x48xf32>
    %972 = vector.extract_strided_slice %12 {offsets = [10, 0], sizes = [2, 128], strides = [1, 1]} : vector<16x128xf32> to vector<2x128xf32>
    %cst_221 = arith.constant dense<0.000000e+00> : vector<2x128xf32>
    %973 = tpu.matmul %971, %13, %cst_221 {dimension_numbers = #tpu.dot_dimension_numbers<[1], [0], [0], [1], [0, 0, 1, 1], [], []>} : vector<2x48xf32>, vector<48x128xf32>, vector<2x128xf32> -> vector<2x128xf32>
    %974 = arith.addf %972, %973 : vector<2x128xf32>
    %975 = vector.extract_strided_slice %974 {offsets = [0, 0], sizes = [2, 32], strides = [1, 1]} : vector<2x128xf32> to vector<2x32xf32>
    %cst_222 = arith.constant 5.000000e-01 : f32
    %976 = vector.broadcast %cst_222 : f32 to vector<2x32xf32>
    %977 = arith.mulf %976, %975 : vector<2x32xf32>
    %978 = math.tanh %977 : vector<2x32xf32>
    %cst_223 = arith.constant 1.000000e+00 : f32
    %979 = vector.broadcast %cst_223 : f32 to vector<2x32xf32>
    %980 = arith.addf %978, %979 : vector<2x32xf32>
    %cst_224 = arith.constant 5.000000e-01 : f32
    %981 = vector.broadcast %cst_224 : f32 to vector<2x32xf32>
    %982 = arith.mulf %981, %980 : vector<2x32xf32>
    %983 = vector.extract_strided_slice %974 {offsets = [0, 32], sizes = [2, 32], strides = [1, 1]} : vector<2x128xf32> to vector<2x32xf32>
    %cst_225 = arith.constant 5.000000e-01 : f32
    %984 = vector.broadcast %cst_225 : f32 to vector<2x32xf32>
    %985 = arith.mulf %984, %983 : vector<2x32xf32>
    %986 = math.tanh %985 : vector<2x32xf32>
    %cst_226 = arith.constant 1.000000e+00 : f32
    %987 = vector.broadcast %cst_226 : f32 to vector<2x32xf32>
    %988 = arith.addf %986, %987 : vector<2x32xf32>
    %cst_227 = arith.constant 5.000000e-01 : f32
    %989 = vector.broadcast %cst_227 : f32 to vector<2x32xf32>
    %990 = arith.mulf %989, %988 : vector<2x32xf32>
    %991 = vector.extract_strided_slice %974 {offsets = [0, 64], sizes = [2, 32], strides = [1, 1]} : vector<2x128xf32> to vector<2x32xf32>
    %992 = math.tanh %991 : vector<2x32xf32>
    %993 = vector.extract_strided_slice %974 {offsets = [0, 96], sizes = [2, 32], strides = [1, 1]} : vector<2x128xf32> to vector<2x32xf32>
    %cst_228 = arith.constant 5.000000e-01 : f32
    %994 = vector.broadcast %cst_228 : f32 to vector<2x32xf32>
    %995 = arith.mulf %994, %993 : vector<2x32xf32>
    %996 = math.tanh %995 : vector<2x32xf32>
    %cst_229 = arith.constant 1.000000e+00 : f32
    %997 = vector.broadcast %cst_229 : f32 to vector<2x32xf32>
    %998 = arith.addf %996, %997 : vector<2x32xf32>
    %cst_230 = arith.constant 5.000000e-01 : f32
    %999 = vector.broadcast %cst_230 : f32 to vector<2x32xf32>
    %1000 = arith.mulf %999, %998 : vector<2x32xf32>
    %1001 = arith.mulf %990, %812 : vector<2x32xf32>
    %1002 = arith.mulf %982, %992 : vector<2x32xf32>
    %1003 = arith.addf %1001, %1002 : vector<2x32xf32>
    %1004 = math.tanh %1003 : vector<2x32xf32>
    %1005 = arith.mulf %1000, %1004 : vector<2x32xf32>
    %cst_231 = arith.constant dense<0.000000e+00> : vector<2x128xf32>
    %1006 = tpu.matmul %1005, %14, %cst_231 {dimension_numbers = #tpu.dot_dimension_numbers<[1], [0], [0], [1], [0, 0, 1, 1], [], []>} : vector<2x32xf32>, vector<32x128xf32>, vector<2x128xf32> -> vector<2x128xf32>
    %1007 = vector.broadcast %15 : vector<1x128xf32> to vector<2x128xf32>
    %1008 = arith.addf %1006, %1007 : vector<2x128xf32>
    %1009 = vector.extract_strided_slice %1008 {offsets = [0, 0], sizes = [2, 32], strides = [1, 1]} : vector<2x128xf32> to vector<2x32xf32>
    %1010 = vector.extract_strided_slice %1008 {offsets = [0, 32], sizes = [2, 32], strides = [1, 1]} : vector<2x128xf32> to vector<2x32xf32>
    %1011 = tpu.concatenate %1009, %1010 in 0 : vector<2x32xf32>, vector<2x32xf32> -> vector<4x32xf32>
    %1012 = vector.extract_strided_slice %1011 {offsets = [0, 0], sizes = [4, 16], strides = [1, 1]} : vector<4x32xf32> to vector<4x16xf32>
    %cst_232 = arith.constant 1.000000e-16 : f32
    %1013 = vector.broadcast %cst_232 : f32 to vector<4x16xf32>
    %1014 = arith.addf %1012, %1013 : vector<4x16xf32>
    %1015 = vector.extract_strided_slice %1011 {offsets = [0, 16], sizes = [4, 1], strides = [1, 1]} : vector<4x32xf32> to vector<4x1xf32>
    %cst_233 = arith.constant 0.000000e+00 : f32
    %1016 = vector.broadcast %cst_233 : f32 to vector<4x1xf32>
    %1017 = arith.maximumf %1015, %1016 : vector<4x1xf32>
    %1018 = math.absf %1015 : vector<4x1xf32>
    %cst_234 = arith.constant 0.000000e+00 : f32
    %1019 = vector.broadcast %cst_234 : f32 to vector<4x1xf32>
    %1020 = arith.subf %1019, %1018 : vector<4x1xf32>
    %1021 = math.exp %1020 : vector<4x1xf32>
    %cst_235 = arith.constant 1.000000e+00 : f32
    %1022 = vector.broadcast %cst_235 : f32 to vector<4x1xf32>
    %1023 = arith.addf %1022, %1021 : vector<4x1xf32>
    %1024 = math.log %1023 : vector<4x1xf32>
    %1025 = arith.addf %1017, %1024 : vector<4x1xf32>
    %1026 = vector.extract_strided_slice %1011 {offsets = [0, 17], sizes = [4, 1], strides = [1, 1]} : vector<4x32xf32> to vector<4x1xf32>
    %cst_236 = arith.constant 5.000000e-01 : f32
    %1027 = vector.broadcast %cst_236 : f32 to vector<4x1xf32>
    %1028 = arith.mulf %1027, %1026 : vector<4x1xf32>
    %1029 = math.tanh %1028 : vector<4x1xf32>
    %cst_237 = arith.constant 1.000000e+00 : f32
    %1030 = vector.broadcast %cst_237 : f32 to vector<4x1xf32>
    %1031 = arith.addf %1029, %1030 : vector<4x1xf32>
    %cst_238 = arith.constant 5.000000e-01 : f32
    %1032 = vector.broadcast %cst_238 : f32 to vector<4x1xf32>
    %1033 = arith.mulf %1032, %1031 : vector<4x1xf32>
    %1034 = vector.extract_strided_slice %1011 {offsets = [0, 18], sizes = [4, 3], strides = [1, 1]} : vector<4x32xf32> to vector<4x3xf32>
    %cst_239 = arith.constant dense<0xFF800000> : vector<4xf32>
    %1035 = vector.multi_reduction <maximumf>, %1034, %cst_239 [1] : vector<4x3xf32> to vector<4xf32>
    %1036 = vector.shape_cast %1035 : vector<4xf32> to vector<4x1xf32>
    %1037 = vector.broadcast %1036 : vector<4x1xf32> to vector<4x3xf32>
    %1038 = arith.subf %1034, %1037 : vector<4x3xf32>
    %1039 = math.exp %1038 : vector<4x3xf32>
    %cst_240 = arith.constant dense<0.000000e+00> : vector<4xf32>
    %1040 = vector.multi_reduction <add>, %1039, %cst_240 [1] : vector<4x3xf32> to vector<4xf32>
    %1041 = vector.shape_cast %1040 : vector<4xf32> to vector<4x1xf32>
    %1042 = vector.broadcast %1041 : vector<4x1xf32> to vector<4x3xf32>
    %1043 = arith.divf %1039, %1042 : vector<4x3xf32>
    %1044 = vector.extract_strided_slice %1011 {offsets = [0, 21], sizes = [4, 1], strides = [1, 1]} : vector<4x32xf32> to vector<4x1xf32>
    %cst_241 = arith.constant 0.000000e+00 : f32
    %1045 = vector.broadcast %cst_241 : f32 to vector<4x1xf32>
    %1046 = arith.maximumf %1044, %1045 : vector<4x1xf32>
    %1047 = math.absf %1044 : vector<4x1xf32>
    %cst_242 = arith.constant 0.000000e+00 : f32
    %1048 = vector.broadcast %cst_242 : f32 to vector<4x1xf32>
    %1049 = arith.subf %1048, %1047 : vector<4x1xf32>
    %1050 = math.exp %1049 : vector<4x1xf32>
    %cst_243 = arith.constant 1.000000e+00 : f32
    %1051 = vector.broadcast %cst_243 : f32 to vector<4x1xf32>
    %1052 = arith.addf %1051, %1050 : vector<4x1xf32>
    %1053 = math.log %1052 : vector<4x1xf32>
    %1054 = arith.addf %1046, %1053 : vector<4x1xf32>
    %cst_244 = arith.constant 1.000000e+00 : f32
    %1055 = vector.broadcast %cst_244 : f32 to vector<4x1xf32>
    %1056 = arith.addf %1055, %1054 : vector<4x1xf32>
    %1057 = tpu.concatenate %941, %942 in 0 : vector<2x16xf32>, vector<2x16xf32> -> vector<4x16xf32>
    %cst_245 = arith.constant 1.000000e-16 : f32
    %1058 = vector.broadcast %cst_245 : f32 to vector<2x16x16xf32>
    %1059 = arith.addf %969, %1058 : vector<2x16x16xf32>
    %1060 = vector.extract_strided_slice %1014 {offsets = [0, 0], sizes = [2, 16], strides = [1, 1]} : vector<4x16xf32> to vector<2x16xf32>
    %1061 = vector.shape_cast %1060 : vector<2x16xf32> to vector<2x1x16xf32>
    %1062 = vector.broadcast %1061 : vector<2x1x16xf32> to vector<2x16x16xf32>
    %1063 = arith.mulf %1059, %1062 : vector<2x16x16xf32>
    %cst_246 = arith.constant dense<0.000000e+00> : vector<2x16xf32>
    %1064 = vector.multi_reduction <add>, %1063, %cst_246 [2] : vector<2x16x16xf32> to vector<2x16xf32>
    %1065 = vector.extract_strided_slice %1014 {offsets = [2, 0], sizes = [2, 16], strides = [1, 1]} : vector<4x16xf32> to vector<2x16xf32>
    %1066 = vector.shape_cast %1065 : vector<2x16xf32> to vector<2x1x16xf32>
    %1067 = vector.broadcast %1066 : vector<2x1x16xf32> to vector<2x16x16xf32>
    %1068 = arith.mulf %1059, %1067 : vector<2x16x16xf32>
    %cst_247 = arith.constant dense<0.000000e+00> : vector<2x16xf32>
    %1069 = vector.multi_reduction <add>, %1068, %cst_247 [2] : vector<2x16x16xf32> to vector<2x16xf32>
    %1070 = tpu.concatenate %1064, %1069 in 0 : vector<2x16xf32>, vector<2x16xf32> -> vector<4x16xf32>
    %1071 = arith.mulf %1059, %1059 : vector<2x16x16xf32>
    %cst_248 = arith.constant dense<0.000000e+00> : vector<2x16xf32>
    %1072 = vector.multi_reduction <add>, %1071, %cst_248 [2] : vector<2x16x16xf32> to vector<2x16xf32>
    %1073 = math.sqrt %1072 : vector<2x16xf32>
    %1074 = tpu.concatenate %1073, %1073 in 0 : vector<2x16xf32>, vector<2x16xf32> -> vector<4x16xf32>
    %1075 = arith.mulf %1014, %1014 : vector<4x16xf32>
    %cst_249 = arith.constant dense<0.000000e+00> : vector<4xf32>
    %1076 = vector.multi_reduction <add>, %1075, %cst_249 [1] : vector<4x16xf32> to vector<4xf32>
    %1077 = vector.shape_cast %1076 : vector<4xf32> to vector<4x1xf32>
    %1078 = math.sqrt %1077 : vector<4x1xf32>
    %1079 = vector.broadcast %1078 : vector<4x1xf32> to vector<4x16xf32>
    %1080 = arith.mulf %1074, %1079 : vector<4x16xf32>
    %cst_250 = arith.constant 9.99999993E-9 : f32
    %1081 = vector.broadcast %cst_250 : f32 to vector<4x16xf32>
    %1082 = arith.maximumf %1080, %1081 : vector<4x16xf32>
    %1083 = tpu.reciprocal %1082 {approx = true} : vector<4x16xf32> -> vector<4x16xf32>
    %1084 = arith.mulf %1070, %1083 : vector<4x16xf32>
    %1085 = vector.broadcast %1025 : vector<4x1xf32> to vector<4x16xf32>
    %1086 = arith.mulf %1085, %1084 : vector<4x16xf32>
    %cst_251 = arith.constant dense<0xFF800000> : vector<4xf32>
    %1087 = vector.multi_reduction <maximumf>, %1086, %cst_251 [1] : vector<4x16xf32> to vector<4xf32>
    %1088 = vector.shape_cast %1087 : vector<4xf32> to vector<4x1xf32>
    %1089 = vector.broadcast %1088 : vector<4x1xf32> to vector<4x16xf32>
    %1090 = arith.subf %1086, %1089 : vector<4x16xf32>
    %1091 = math.exp %1090 : vector<4x16xf32>
    %cst_252 = arith.constant dense<0.000000e+00> : vector<4xf32>
    %1092 = vector.multi_reduction <add>, %1091, %cst_252 [1] : vector<4x16xf32> to vector<4xf32>
    %1093 = vector.shape_cast %1092 : vector<4xf32> to vector<4x1xf32>
    %1094 = vector.broadcast %1093 : vector<4x1xf32> to vector<4x16xf32>
    %1095 = arith.divf %1091, %1094 : vector<4x16xf32>
    %1096 = vector.broadcast %1033 : vector<4x1xf32> to vector<4x16xf32>
    %1097 = arith.mulf %1096, %1095 : vector<4x16xf32>
    %cst_253 = arith.constant 1.000000e+00 : f32
    %1098 = vector.broadcast %cst_253 : f32 to vector<4x1xf32>
    %1099 = arith.subf %1098, %1033 : vector<4x1xf32>
    %1100 = vector.broadcast %1099 : vector<4x1xf32> to vector<4x16xf32>
    %1101 = arith.mulf %1100, %1057 : vector<4x16xf32>
    %1102 = arith.addf %1097, %1101 : vector<4x16xf32>
    %1103 = vector.extract_strided_slice %1102 {offsets = [0, 15], sizes = [4, 1], strides = [1, 1]} : vector<4x16xf32> to vector<4x1xf32>
    %1104 = vector.extract_strided_slice %1102 {offsets = [0, 0], sizes = [4, 15], strides = [1, 1]} : vector<4x16xf32> to vector<4x15xf32>
    %1105 = tpu.concatenate %1103, %1104 in 1 : vector<4x1xf32>, vector<4x15xf32> -> vector<4x16xf32>
    %1106 = vector.extract_strided_slice %1102 {offsets = [0, 1], sizes = [4, 15], strides = [1, 1]} : vector<4x16xf32> to vector<4x15xf32>
    %1107 = vector.extract_strided_slice %1102 {offsets = [0, 0], sizes = [4, 1], strides = [1, 1]} : vector<4x16xf32> to vector<4x1xf32>
    %1108 = tpu.concatenate %1106, %1107 in 1 : vector<4x15xf32>, vector<4x1xf32> -> vector<4x16xf32>
    %1109 = vector.extract_strided_slice %1043 {offsets = [0, 0], sizes = [4, 1], strides = [1, 1]} : vector<4x3xf32> to vector<4x1xf32>
    %1110 = vector.broadcast %1109 : vector<4x1xf32> to vector<4x16xf32>
    %1111 = arith.mulf %1105, %1110 : vector<4x16xf32>
    %1112 = vector.extract_strided_slice %1043 {offsets = [0, 1], sizes = [4, 1], strides = [1, 1]} : vector<4x3xf32> to vector<4x1xf32>
    %1113 = vector.broadcast %1112 : vector<4x1xf32> to vector<4x16xf32>
    %1114 = arith.mulf %1102, %1113 : vector<4x16xf32>
    %1115 = arith.addf %1111, %1114 : vector<4x16xf32>
    %1116 = vector.extract_strided_slice %1043 {offsets = [0, 2], sizes = [4, 1], strides = [1, 1]} : vector<4x3xf32> to vector<4x1xf32>
    %1117 = vector.broadcast %1116 : vector<4x1xf32> to vector<4x16xf32>
    %1118 = arith.mulf %1108, %1117 : vector<4x16xf32>
    %1119 = arith.addf %1115, %1118 : vector<4x16xf32>
    %cst_254 = arith.constant 1.000000e-30 : f32
    %1120 = vector.broadcast %cst_254 : f32 to vector<4x16xf32>
    %1121 = arith.maximumf %1119, %1120 : vector<4x16xf32>
    %1122 = math.log %1121 : vector<4x16xf32>
    %1123 = vector.broadcast %1056 : vector<4x1xf32> to vector<4x16xf32>
    %1124 = arith.mulf %1123, %1122 : vector<4x16xf32>
    %1125 = math.exp %1124 : vector<4x16xf32>
    %cst_255 = arith.constant dense<0.000000e+00> : vector<4xf32>
    %1126 = vector.multi_reduction <add>, %1125, %cst_255 [1] : vector<4x16xf32> to vector<4xf32>
    %1127 = vector.shape_cast %1126 : vector<4xf32> to vector<4x1xf32>
    %cst_256 = arith.constant 1.000000e-16 : f32
    %1128 = vector.broadcast %cst_256 : f32 to vector<4x1xf32>
    %1129 = arith.addf %1127, %1128 : vector<4x1xf32>
    %1130 = vector.broadcast %1129 : vector<4x1xf32> to vector<4x16xf32>
    %1131 = arith.divf %1125, %1130 : vector<4x16xf32>
    %1132 = vector.extract_strided_slice %1131 {offsets = [0, 0], sizes = [2, 16], strides = [1, 1]} : vector<4x16xf32> to vector<2x16xf32>
    %1133 = vector.extract_strided_slice %1131 {offsets = [2, 0], sizes = [2, 16], strides = [1, 1]} : vector<4x16xf32> to vector<2x16xf32>
    %1134 = vector.shape_cast %1132 : vector<2x16xf32> to vector<2x16x1xf32>
    %1135 = vector.broadcast %1134 : vector<2x16x1xf32> to vector<2x16x16xf32>
    %1136 = arith.mulf %1135, %969 : vector<2x16x16xf32>
    %cst_257 = arith.constant dense<0.000000e+00> : vector<2x16xf32>
    %1137 = vector.multi_reduction <add>, %1136, %cst_257 [1] : vector<2x16x16xf32> to vector<2x16xf32>
    %1138 = vector.extract_strided_slice %1008 {offsets = [0, 64], sizes = [2, 16], strides = [1, 1]} : vector<2x128xf32> to vector<2x16xf32>
    %cst_258 = arith.constant 5.000000e-01 : f32
    %1139 = vector.broadcast %cst_258 : f32 to vector<2x16xf32>
    %1140 = arith.mulf %1139, %1138 : vector<2x16xf32>
    %1141 = math.tanh %1140 : vector<2x16xf32>
    %cst_259 = arith.constant 1.000000e+00 : f32
    %1142 = vector.broadcast %cst_259 : f32 to vector<2x16xf32>
    %1143 = arith.addf %1141, %1142 : vector<2x16xf32>
    %cst_260 = arith.constant 5.000000e-01 : f32
    %1144 = vector.broadcast %cst_260 : f32 to vector<2x16xf32>
    %1145 = arith.mulf %1144, %1143 : vector<2x16xf32>
    %1146 = vector.extract_strided_slice %1008 {offsets = [0, 80], sizes = [2, 16], strides = [1, 1]} : vector<2x128xf32> to vector<2x16xf32>
    %1147 = vector.shape_cast %1133 : vector<2x16xf32> to vector<2x16x1xf32>
    %1148 = vector.shape_cast %1145 : vector<2x16xf32> to vector<2x1x16xf32>
    %1149 = vector.broadcast %1147 : vector<2x16x1xf32> to vector<2x16x16xf32>
    %1150 = vector.broadcast %1148 : vector<2x1x16xf32> to vector<2x16x16xf32>
    %1151 = arith.mulf %1149, %1150 : vector<2x16x16xf32>
    %1152 = vector.shape_cast %1133 : vector<2x16xf32> to vector<2x16x1xf32>
    %1153 = vector.shape_cast %1146 : vector<2x16xf32> to vector<2x1x16xf32>
    %1154 = vector.broadcast %1152 : vector<2x16x1xf32> to vector<2x16x16xf32>
    %1155 = vector.broadcast %1153 : vector<2x1x16xf32> to vector<2x16x16xf32>
    %1156 = arith.mulf %1154, %1155 : vector<2x16x16xf32>
    %cst_261 = arith.constant 1.000000e+00 : f32
    %1157 = vector.broadcast %cst_261 : f32 to vector<2x16x16xf32>
    %1158 = arith.subf %1157, %1151 : vector<2x16x16xf32>
    %1159 = arith.mulf %969, %1158 : vector<2x16x16xf32>
    %1160 = arith.addf %1159, %1156 : vector<2x16x16xf32>
    %1161 = vector.extract_strided_slice %1008 {offsets = [0, 96], sizes = [2, 8], strides = [1, 1]} : vector<2x128xf32> to vector<2x8xf32>
    %1162 = tpu.concatenate %1137, %1005 in 1 : vector<2x16xf32>, vector<2x32xf32> -> vector<2x48xf32>
    %1163 = vector.extract_strided_slice %12 {offsets = [12, 0], sizes = [2, 128], strides = [1, 1]} : vector<16x128xf32> to vector<2x128xf32>
    %cst_262 = arith.constant dense<0.000000e+00> : vector<2x128xf32>
    %1164 = tpu.matmul %1162, %13, %cst_262 {dimension_numbers = #tpu.dot_dimension_numbers<[1], [0], [0], [1], [0, 0, 1, 1], [], []>} : vector<2x48xf32>, vector<48x128xf32>, vector<2x128xf32> -> vector<2x128xf32>
    %1165 = arith.addf %1163, %1164 : vector<2x128xf32>
    %1166 = vector.extract_strided_slice %1165 {offsets = [0, 0], sizes = [2, 32], strides = [1, 1]} : vector<2x128xf32> to vector<2x32xf32>
    %cst_263 = arith.constant 5.000000e-01 : f32
    %1167 = vector.broadcast %cst_263 : f32 to vector<2x32xf32>
    %1168 = arith.mulf %1167, %1166 : vector<2x32xf32>
    %1169 = math.tanh %1168 : vector<2x32xf32>
    %cst_264 = arith.constant 1.000000e+00 : f32
    %1170 = vector.broadcast %cst_264 : f32 to vector<2x32xf32>
    %1171 = arith.addf %1169, %1170 : vector<2x32xf32>
    %cst_265 = arith.constant 5.000000e-01 : f32
    %1172 = vector.broadcast %cst_265 : f32 to vector<2x32xf32>
    %1173 = arith.mulf %1172, %1171 : vector<2x32xf32>
    %1174 = vector.extract_strided_slice %1165 {offsets = [0, 32], sizes = [2, 32], strides = [1, 1]} : vector<2x128xf32> to vector<2x32xf32>
    %cst_266 = arith.constant 5.000000e-01 : f32
    %1175 = vector.broadcast %cst_266 : f32 to vector<2x32xf32>
    %1176 = arith.mulf %1175, %1174 : vector<2x32xf32>
    %1177 = math.tanh %1176 : vector<2x32xf32>
    %cst_267 = arith.constant 1.000000e+00 : f32
    %1178 = vector.broadcast %cst_267 : f32 to vector<2x32xf32>
    %1179 = arith.addf %1177, %1178 : vector<2x32xf32>
    %cst_268 = arith.constant 5.000000e-01 : f32
    %1180 = vector.broadcast %cst_268 : f32 to vector<2x32xf32>
    %1181 = arith.mulf %1180, %1179 : vector<2x32xf32>
    %1182 = vector.extract_strided_slice %1165 {offsets = [0, 64], sizes = [2, 32], strides = [1, 1]} : vector<2x128xf32> to vector<2x32xf32>
    %1183 = math.tanh %1182 : vector<2x32xf32>
    %1184 = vector.extract_strided_slice %1165 {offsets = [0, 96], sizes = [2, 32], strides = [1, 1]} : vector<2x128xf32> to vector<2x32xf32>
    %cst_269 = arith.constant 5.000000e-01 : f32
    %1185 = vector.broadcast %cst_269 : f32 to vector<2x32xf32>
    %1186 = arith.mulf %1185, %1184 : vector<2x32xf32>
    %1187 = math.tanh %1186 : vector<2x32xf32>
    %cst_270 = arith.constant 1.000000e+00 : f32
    %1188 = vector.broadcast %cst_270 : f32 to vector<2x32xf32>
    %1189 = arith.addf %1187, %1188 : vector<2x32xf32>
    %cst_271 = arith.constant 5.000000e-01 : f32
    %1190 = vector.broadcast %cst_271 : f32 to vector<2x32xf32>
    %1191 = arith.mulf %1190, %1189 : vector<2x32xf32>
    %1192 = arith.mulf %1181, %1003 : vector<2x32xf32>
    %1193 = arith.mulf %1173, %1183 : vector<2x32xf32>
    %1194 = arith.addf %1192, %1193 : vector<2x32xf32>
    %1195 = math.tanh %1194 : vector<2x32xf32>
    %1196 = arith.mulf %1191, %1195 : vector<2x32xf32>
    %cst_272 = arith.constant dense<0.000000e+00> : vector<2x128xf32>
    %1197 = tpu.matmul %1196, %14, %cst_272 {dimension_numbers = #tpu.dot_dimension_numbers<[1], [0], [0], [1], [0, 0, 1, 1], [], []>} : vector<2x32xf32>, vector<32x128xf32>, vector<2x128xf32> -> vector<2x128xf32>
    %1198 = vector.broadcast %15 : vector<1x128xf32> to vector<2x128xf32>
    %1199 = arith.addf %1197, %1198 : vector<2x128xf32>
    %1200 = vector.extract_strided_slice %1199 {offsets = [0, 0], sizes = [2, 32], strides = [1, 1]} : vector<2x128xf32> to vector<2x32xf32>
    %1201 = vector.extract_strided_slice %1199 {offsets = [0, 32], sizes = [2, 32], strides = [1, 1]} : vector<2x128xf32> to vector<2x32xf32>
    %1202 = tpu.concatenate %1200, %1201 in 0 : vector<2x32xf32>, vector<2x32xf32> -> vector<4x32xf32>
    %1203 = vector.extract_strided_slice %1202 {offsets = [0, 0], sizes = [4, 16], strides = [1, 1]} : vector<4x32xf32> to vector<4x16xf32>
    %cst_273 = arith.constant 1.000000e-16 : f32
    %1204 = vector.broadcast %cst_273 : f32 to vector<4x16xf32>
    %1205 = arith.addf %1203, %1204 : vector<4x16xf32>
    %1206 = vector.extract_strided_slice %1202 {offsets = [0, 16], sizes = [4, 1], strides = [1, 1]} : vector<4x32xf32> to vector<4x1xf32>
    %cst_274 = arith.constant 0.000000e+00 : f32
    %1207 = vector.broadcast %cst_274 : f32 to vector<4x1xf32>
    %1208 = arith.maximumf %1206, %1207 : vector<4x1xf32>
    %1209 = math.absf %1206 : vector<4x1xf32>
    %cst_275 = arith.constant 0.000000e+00 : f32
    %1210 = vector.broadcast %cst_275 : f32 to vector<4x1xf32>
    %1211 = arith.subf %1210, %1209 : vector<4x1xf32>
    %1212 = math.exp %1211 : vector<4x1xf32>
    %cst_276 = arith.constant 1.000000e+00 : f32
    %1213 = vector.broadcast %cst_276 : f32 to vector<4x1xf32>
    %1214 = arith.addf %1213, %1212 : vector<4x1xf32>
    %1215 = math.log %1214 : vector<4x1xf32>
    %1216 = arith.addf %1208, %1215 : vector<4x1xf32>
    %1217 = vector.extract_strided_slice %1202 {offsets = [0, 17], sizes = [4, 1], strides = [1, 1]} : vector<4x32xf32> to vector<4x1xf32>
    %cst_277 = arith.constant 5.000000e-01 : f32
    %1218 = vector.broadcast %cst_277 : f32 to vector<4x1xf32>
    %1219 = arith.mulf %1218, %1217 : vector<4x1xf32>
    %1220 = math.tanh %1219 : vector<4x1xf32>
    %cst_278 = arith.constant 1.000000e+00 : f32
    %1221 = vector.broadcast %cst_278 : f32 to vector<4x1xf32>
    %1222 = arith.addf %1220, %1221 : vector<4x1xf32>
    %cst_279 = arith.constant 5.000000e-01 : f32
    %1223 = vector.broadcast %cst_279 : f32 to vector<4x1xf32>
    %1224 = arith.mulf %1223, %1222 : vector<4x1xf32>
    %1225 = vector.extract_strided_slice %1202 {offsets = [0, 18], sizes = [4, 3], strides = [1, 1]} : vector<4x32xf32> to vector<4x3xf32>
    %cst_280 = arith.constant dense<0xFF800000> : vector<4xf32>
    %1226 = vector.multi_reduction <maximumf>, %1225, %cst_280 [1] : vector<4x3xf32> to vector<4xf32>
    %1227 = vector.shape_cast %1226 : vector<4xf32> to vector<4x1xf32>
    %1228 = vector.broadcast %1227 : vector<4x1xf32> to vector<4x3xf32>
    %1229 = arith.subf %1225, %1228 : vector<4x3xf32>
    %1230 = math.exp %1229 : vector<4x3xf32>
    %cst_281 = arith.constant dense<0.000000e+00> : vector<4xf32>
    %1231 = vector.multi_reduction <add>, %1230, %cst_281 [1] : vector<4x3xf32> to vector<4xf32>
    %1232 = vector.shape_cast %1231 : vector<4xf32> to vector<4x1xf32>
    %1233 = vector.broadcast %1232 : vector<4x1xf32> to vector<4x3xf32>
    %1234 = arith.divf %1230, %1233 : vector<4x3xf32>
    %1235 = vector.extract_strided_slice %1202 {offsets = [0, 21], sizes = [4, 1], strides = [1, 1]} : vector<4x32xf32> to vector<4x1xf32>
    %cst_282 = arith.constant 0.000000e+00 : f32
    %1236 = vector.broadcast %cst_282 : f32 to vector<4x1xf32>
    %1237 = arith.maximumf %1235, %1236 : vector<4x1xf32>
    %1238 = math.absf %1235 : vector<4x1xf32>
    %cst_283 = arith.constant 0.000000e+00 : f32
    %1239 = vector.broadcast %cst_283 : f32 to vector<4x1xf32>
    %1240 = arith.subf %1239, %1238 : vector<4x1xf32>
    %1241 = math.exp %1240 : vector<4x1xf32>
    %cst_284 = arith.constant 1.000000e+00 : f32
    %1242 = vector.broadcast %cst_284 : f32 to vector<4x1xf32>
    %1243 = arith.addf %1242, %1241 : vector<4x1xf32>
    %1244 = math.log %1243 : vector<4x1xf32>
    %1245 = arith.addf %1237, %1244 : vector<4x1xf32>
    %cst_285 = arith.constant 1.000000e+00 : f32
    %1246 = vector.broadcast %cst_285 : f32 to vector<4x1xf32>
    %1247 = arith.addf %1246, %1245 : vector<4x1xf32>
    %1248 = tpu.concatenate %1132, %1133 in 0 : vector<2x16xf32>, vector<2x16xf32> -> vector<4x16xf32>
    %cst_286 = arith.constant 1.000000e-16 : f32
    %1249 = vector.broadcast %cst_286 : f32 to vector<2x16x16xf32>
    %1250 = arith.addf %1160, %1249 : vector<2x16x16xf32>
    %1251 = vector.extract_strided_slice %1205 {offsets = [0, 0], sizes = [2, 16], strides = [1, 1]} : vector<4x16xf32> to vector<2x16xf32>
    %1252 = vector.shape_cast %1251 : vector<2x16xf32> to vector<2x1x16xf32>
    %1253 = vector.broadcast %1252 : vector<2x1x16xf32> to vector<2x16x16xf32>
    %1254 = arith.mulf %1250, %1253 : vector<2x16x16xf32>
    %cst_287 = arith.constant dense<0.000000e+00> : vector<2x16xf32>
    %1255 = vector.multi_reduction <add>, %1254, %cst_287 [2] : vector<2x16x16xf32> to vector<2x16xf32>
    %1256 = vector.extract_strided_slice %1205 {offsets = [2, 0], sizes = [2, 16], strides = [1, 1]} : vector<4x16xf32> to vector<2x16xf32>
    %1257 = vector.shape_cast %1256 : vector<2x16xf32> to vector<2x1x16xf32>
    %1258 = vector.broadcast %1257 : vector<2x1x16xf32> to vector<2x16x16xf32>
    %1259 = arith.mulf %1250, %1258 : vector<2x16x16xf32>
    %cst_288 = arith.constant dense<0.000000e+00> : vector<2x16xf32>
    %1260 = vector.multi_reduction <add>, %1259, %cst_288 [2] : vector<2x16x16xf32> to vector<2x16xf32>
    %1261 = tpu.concatenate %1255, %1260 in 0 : vector<2x16xf32>, vector<2x16xf32> -> vector<4x16xf32>
    %1262 = arith.mulf %1250, %1250 : vector<2x16x16xf32>
    %cst_289 = arith.constant dense<0.000000e+00> : vector<2x16xf32>
    %1263 = vector.multi_reduction <add>, %1262, %cst_289 [2] : vector<2x16x16xf32> to vector<2x16xf32>
    %1264 = math.sqrt %1263 : vector<2x16xf32>
    %1265 = tpu.concatenate %1264, %1264 in 0 : vector<2x16xf32>, vector<2x16xf32> -> vector<4x16xf32>
    %1266 = arith.mulf %1205, %1205 : vector<4x16xf32>
    %cst_290 = arith.constant dense<0.000000e+00> : vector<4xf32>
    %1267 = vector.multi_reduction <add>, %1266, %cst_290 [1] : vector<4x16xf32> to vector<4xf32>
    %1268 = vector.shape_cast %1267 : vector<4xf32> to vector<4x1xf32>
    %1269 = math.sqrt %1268 : vector<4x1xf32>
    %1270 = vector.broadcast %1269 : vector<4x1xf32> to vector<4x16xf32>
    %1271 = arith.mulf %1265, %1270 : vector<4x16xf32>
    %cst_291 = arith.constant 9.99999993E-9 : f32
    %1272 = vector.broadcast %cst_291 : f32 to vector<4x16xf32>
    %1273 = arith.maximumf %1271, %1272 : vector<4x16xf32>
    %1274 = tpu.reciprocal %1273 {approx = true} : vector<4x16xf32> -> vector<4x16xf32>
    %1275 = arith.mulf %1261, %1274 : vector<4x16xf32>
    %1276 = vector.broadcast %1216 : vector<4x1xf32> to vector<4x16xf32>
    %1277 = arith.mulf %1276, %1275 : vector<4x16xf32>
    %cst_292 = arith.constant dense<0xFF800000> : vector<4xf32>
    %1278 = vector.multi_reduction <maximumf>, %1277, %cst_292 [1] : vector<4x16xf32> to vector<4xf32>
    %1279 = vector.shape_cast %1278 : vector<4xf32> to vector<4x1xf32>
    %1280 = vector.broadcast %1279 : vector<4x1xf32> to vector<4x16xf32>
    %1281 = arith.subf %1277, %1280 : vector<4x16xf32>
    %1282 = math.exp %1281 : vector<4x16xf32>
    %cst_293 = arith.constant dense<0.000000e+00> : vector<4xf32>
    %1283 = vector.multi_reduction <add>, %1282, %cst_293 [1] : vector<4x16xf32> to vector<4xf32>
    %1284 = vector.shape_cast %1283 : vector<4xf32> to vector<4x1xf32>
    %1285 = vector.broadcast %1284 : vector<4x1xf32> to vector<4x16xf32>
    %1286 = arith.divf %1282, %1285 : vector<4x16xf32>
    %1287 = vector.broadcast %1224 : vector<4x1xf32> to vector<4x16xf32>
    %1288 = arith.mulf %1287, %1286 : vector<4x16xf32>
    %cst_294 = arith.constant 1.000000e+00 : f32
    %1289 = vector.broadcast %cst_294 : f32 to vector<4x1xf32>
    %1290 = arith.subf %1289, %1224 : vector<4x1xf32>
    %1291 = vector.broadcast %1290 : vector<4x1xf32> to vector<4x16xf32>
    %1292 = arith.mulf %1291, %1248 : vector<4x16xf32>
    %1293 = arith.addf %1288, %1292 : vector<4x16xf32>
    %1294 = vector.extract_strided_slice %1293 {offsets = [0, 15], sizes = [4, 1], strides = [1, 1]} : vector<4x16xf32> to vector<4x1xf32>
    %1295 = vector.extract_strided_slice %1293 {offsets = [0, 0], sizes = [4, 15], strides = [1, 1]} : vector<4x16xf32> to vector<4x15xf32>
    %1296 = tpu.concatenate %1294, %1295 in 1 : vector<4x1xf32>, vector<4x15xf32> -> vector<4x16xf32>
    %1297 = vector.extract_strided_slice %1293 {offsets = [0, 1], sizes = [4, 15], strides = [1, 1]} : vector<4x16xf32> to vector<4x15xf32>
    %1298 = vector.extract_strided_slice %1293 {offsets = [0, 0], sizes = [4, 1], strides = [1, 1]} : vector<4x16xf32> to vector<4x1xf32>
    %1299 = tpu.concatenate %1297, %1298 in 1 : vector<4x15xf32>, vector<4x1xf32> -> vector<4x16xf32>
    %1300 = vector.extract_strided_slice %1234 {offsets = [0, 0], sizes = [4, 1], strides = [1, 1]} : vector<4x3xf32> to vector<4x1xf32>
    %1301 = vector.broadcast %1300 : vector<4x1xf32> to vector<4x16xf32>
    %1302 = arith.mulf %1296, %1301 : vector<4x16xf32>
    %1303 = vector.extract_strided_slice %1234 {offsets = [0, 1], sizes = [4, 1], strides = [1, 1]} : vector<4x3xf32> to vector<4x1xf32>
    %1304 = vector.broadcast %1303 : vector<4x1xf32> to vector<4x16xf32>
    %1305 = arith.mulf %1293, %1304 : vector<4x16xf32>
    %1306 = arith.addf %1302, %1305 : vector<4x16xf32>
    %1307 = vector.extract_strided_slice %1234 {offsets = [0, 2], sizes = [4, 1], strides = [1, 1]} : vector<4x3xf32> to vector<4x1xf32>
    %1308 = vector.broadcast %1307 : vector<4x1xf32> to vector<4x16xf32>
    %1309 = arith.mulf %1299, %1308 : vector<4x16xf32>
    %1310 = arith.addf %1306, %1309 : vector<4x16xf32>
    %cst_295 = arith.constant 1.000000e-30 : f32
    %1311 = vector.broadcast %cst_295 : f32 to vector<4x16xf32>
    %1312 = arith.maximumf %1310, %1311 : vector<4x16xf32>
    %1313 = math.log %1312 : vector<4x16xf32>
    %1314 = vector.broadcast %1247 : vector<4x1xf32> to vector<4x16xf32>
    %1315 = arith.mulf %1314, %1313 : vector<4x16xf32>
    %1316 = math.exp %1315 : vector<4x16xf32>
    %cst_296 = arith.constant dense<0.000000e+00> : vector<4xf32>
    %1317 = vector.multi_reduction <add>, %1316, %cst_296 [1] : vector<4x16xf32> to vector<4xf32>
    %1318 = vector.shape_cast %1317 : vector<4xf32> to vector<4x1xf32>
    %cst_297 = arith.constant 1.000000e-16 : f32
    %1319 = vector.broadcast %cst_297 : f32 to vector<4x1xf32>
    %1320 = arith.addf %1318, %1319 : vector<4x1xf32>
    %1321 = vector.broadcast %1320 : vector<4x1xf32> to vector<4x16xf32>
    %1322 = arith.divf %1316, %1321 : vector<4x16xf32>
    %1323 = vector.extract_strided_slice %1322 {offsets = [0, 0], sizes = [2, 16], strides = [1, 1]} : vector<4x16xf32> to vector<2x16xf32>
    %1324 = vector.extract_strided_slice %1322 {offsets = [2, 0], sizes = [2, 16], strides = [1, 1]} : vector<4x16xf32> to vector<2x16xf32>
    %1325 = vector.shape_cast %1323 : vector<2x16xf32> to vector<2x16x1xf32>
    %1326 = vector.broadcast %1325 : vector<2x16x1xf32> to vector<2x16x16xf32>
    %1327 = arith.mulf %1326, %1160 : vector<2x16x16xf32>
    %cst_298 = arith.constant dense<0.000000e+00> : vector<2x16xf32>
    %1328 = vector.multi_reduction <add>, %1327, %cst_298 [1] : vector<2x16x16xf32> to vector<2x16xf32>
    %1329 = vector.extract_strided_slice %1199 {offsets = [0, 64], sizes = [2, 16], strides = [1, 1]} : vector<2x128xf32> to vector<2x16xf32>
    %cst_299 = arith.constant 5.000000e-01 : f32
    %1330 = vector.broadcast %cst_299 : f32 to vector<2x16xf32>
    %1331 = arith.mulf %1330, %1329 : vector<2x16xf32>
    %1332 = math.tanh %1331 : vector<2x16xf32>
    %cst_300 = arith.constant 1.000000e+00 : f32
    %1333 = vector.broadcast %cst_300 : f32 to vector<2x16xf32>
    %1334 = arith.addf %1332, %1333 : vector<2x16xf32>
    %cst_301 = arith.constant 5.000000e-01 : f32
    %1335 = vector.broadcast %cst_301 : f32 to vector<2x16xf32>
    %1336 = arith.mulf %1335, %1334 : vector<2x16xf32>
    %1337 = vector.extract_strided_slice %1199 {offsets = [0, 80], sizes = [2, 16], strides = [1, 1]} : vector<2x128xf32> to vector<2x16xf32>
    %1338 = vector.shape_cast %1324 : vector<2x16xf32> to vector<2x16x1xf32>
    %1339 = vector.shape_cast %1336 : vector<2x16xf32> to vector<2x1x16xf32>
    %1340 = vector.broadcast %1338 : vector<2x16x1xf32> to vector<2x16x16xf32>
    %1341 = vector.broadcast %1339 : vector<2x1x16xf32> to vector<2x16x16xf32>
    %1342 = arith.mulf %1340, %1341 : vector<2x16x16xf32>
    %1343 = vector.shape_cast %1324 : vector<2x16xf32> to vector<2x16x1xf32>
    %1344 = vector.shape_cast %1337 : vector<2x16xf32> to vector<2x1x16xf32>
    %1345 = vector.broadcast %1343 : vector<2x16x1xf32> to vector<2x16x16xf32>
    %1346 = vector.broadcast %1344 : vector<2x1x16xf32> to vector<2x16x16xf32>
    %1347 = arith.mulf %1345, %1346 : vector<2x16x16xf32>
    %cst_302 = arith.constant 1.000000e+00 : f32
    %1348 = vector.broadcast %cst_302 : f32 to vector<2x16x16xf32>
    %1349 = arith.subf %1348, %1342 : vector<2x16x16xf32>
    %1350 = arith.mulf %1160, %1349 : vector<2x16x16xf32>
    %1351 = arith.addf %1350, %1347 : vector<2x16x16xf32>
    %1352 = vector.extract_strided_slice %1199 {offsets = [0, 96], sizes = [2, 8], strides = [1, 1]} : vector<2x128xf32> to vector<2x8xf32>
    %1353 = tpu.concatenate %1328, %1196 in 1 : vector<2x16xf32>, vector<2x32xf32> -> vector<2x48xf32>
    %1354 = vector.extract_strided_slice %12 {offsets = [14, 0], sizes = [2, 128], strides = [1, 1]} : vector<16x128xf32> to vector<2x128xf32>
    %cst_303 = arith.constant dense<0.000000e+00> : vector<2x128xf32>
    %1355 = tpu.matmul %1353, %13, %cst_303 {dimension_numbers = #tpu.dot_dimension_numbers<[1], [0], [0], [1], [0, 0, 1, 1], [], []>} : vector<2x48xf32>, vector<48x128xf32>, vector<2x128xf32> -> vector<2x128xf32>
    %1356 = arith.addf %1354, %1355 : vector<2x128xf32>
    %1357 = vector.extract_strided_slice %1356 {offsets = [0, 0], sizes = [2, 32], strides = [1, 1]} : vector<2x128xf32> to vector<2x32xf32>
    %cst_304 = arith.constant 5.000000e-01 : f32
    %1358 = vector.broadcast %cst_304 : f32 to vector<2x32xf32>
    %1359 = arith.mulf %1358, %1357 : vector<2x32xf32>
    %1360 = math.tanh %1359 : vector<2x32xf32>
    %cst_305 = arith.constant 1.000000e+00 : f32
    %1361 = vector.broadcast %cst_305 : f32 to vector<2x32xf32>
    %1362 = arith.addf %1360, %1361 : vector<2x32xf32>
    %cst_306 = arith.constant 5.000000e-01 : f32
    %1363 = vector.broadcast %cst_306 : f32 to vector<2x32xf32>
    %1364 = arith.mulf %1363, %1362 : vector<2x32xf32>
    %1365 = vector.extract_strided_slice %1356 {offsets = [0, 32], sizes = [2, 32], strides = [1, 1]} : vector<2x128xf32> to vector<2x32xf32>
    %cst_307 = arith.constant 5.000000e-01 : f32
    %1366 = vector.broadcast %cst_307 : f32 to vector<2x32xf32>
    %1367 = arith.mulf %1366, %1365 : vector<2x32xf32>
    %1368 = math.tanh %1367 : vector<2x32xf32>
    %cst_308 = arith.constant 1.000000e+00 : f32
    %1369 = vector.broadcast %cst_308 : f32 to vector<2x32xf32>
    %1370 = arith.addf %1368, %1369 : vector<2x32xf32>
    %cst_309 = arith.constant 5.000000e-01 : f32
    %1371 = vector.broadcast %cst_309 : f32 to vector<2x32xf32>
    %1372 = arith.mulf %1371, %1370 : vector<2x32xf32>
    %1373 = vector.extract_strided_slice %1356 {offsets = [0, 64], sizes = [2, 32], strides = [1, 1]} : vector<2x128xf32> to vector<2x32xf32>
    %1374 = math.tanh %1373 : vector<2x32xf32>
    %1375 = vector.extract_strided_slice %1356 {offsets = [0, 96], sizes = [2, 32], strides = [1, 1]} : vector<2x128xf32> to vector<2x32xf32>
    %cst_310 = arith.constant 5.000000e-01 : f32
    %1376 = vector.broadcast %cst_310 : f32 to vector<2x32xf32>
    %1377 = arith.mulf %1376, %1375 : vector<2x32xf32>
    %1378 = math.tanh %1377 : vector<2x32xf32>
    %cst_311 = arith.constant 1.000000e+00 : f32
    %1379 = vector.broadcast %cst_311 : f32 to vector<2x32xf32>
    %1380 = arith.addf %1378, %1379 : vector<2x32xf32>
    %cst_312 = arith.constant 5.000000e-01 : f32
    %1381 = vector.broadcast %cst_312 : f32 to vector<2x32xf32>
    %1382 = arith.mulf %1381, %1380 : vector<2x32xf32>
    %1383 = arith.mulf %1372, %1194 : vector<2x32xf32>
    %1384 = arith.mulf %1364, %1374 : vector<2x32xf32>
    %1385 = arith.addf %1383, %1384 : vector<2x32xf32>
    %1386 = math.tanh %1385 : vector<2x32xf32>
    %1387 = arith.mulf %1382, %1386 : vector<2x32xf32>
    %cst_313 = arith.constant dense<0.000000e+00> : vector<2x128xf32>
    %1388 = tpu.matmul %1387, %14, %cst_313 {dimension_numbers = #tpu.dot_dimension_numbers<[1], [0], [0], [1], [0, 0, 1, 1], [], []>} : vector<2x32xf32>, vector<32x128xf32>, vector<2x128xf32> -> vector<2x128xf32>
    %1389 = vector.broadcast %15 : vector<1x128xf32> to vector<2x128xf32>
    %1390 = arith.addf %1388, %1389 : vector<2x128xf32>
    %1391 = vector.extract_strided_slice %1390 {offsets = [0, 0], sizes = [2, 32], strides = [1, 1]} : vector<2x128xf32> to vector<2x32xf32>
    %1392 = vector.extract_strided_slice %1390 {offsets = [0, 32], sizes = [2, 32], strides = [1, 1]} : vector<2x128xf32> to vector<2x32xf32>
    %1393 = tpu.concatenate %1391, %1392 in 0 : vector<2x32xf32>, vector<2x32xf32> -> vector<4x32xf32>
    %1394 = vector.extract_strided_slice %1393 {offsets = [0, 0], sizes = [4, 16], strides = [1, 1]} : vector<4x32xf32> to vector<4x16xf32>
    %cst_314 = arith.constant 1.000000e-16 : f32
    %1395 = vector.broadcast %cst_314 : f32 to vector<4x16xf32>
    %1396 = arith.addf %1394, %1395 : vector<4x16xf32>
    %1397 = vector.extract_strided_slice %1393 {offsets = [0, 16], sizes = [4, 1], strides = [1, 1]} : vector<4x32xf32> to vector<4x1xf32>
    %cst_315 = arith.constant 0.000000e+00 : f32
    %1398 = vector.broadcast %cst_315 : f32 to vector<4x1xf32>
    %1399 = arith.maximumf %1397, %1398 : vector<4x1xf32>
    %1400 = math.absf %1397 : vector<4x1xf32>
    %cst_316 = arith.constant 0.000000e+00 : f32
    %1401 = vector.broadcast %cst_316 : f32 to vector<4x1xf32>
    %1402 = arith.subf %1401, %1400 : vector<4x1xf32>
    %1403 = math.exp %1402 : vector<4x1xf32>
    %cst_317 = arith.constant 1.000000e+00 : f32
    %1404 = vector.broadcast %cst_317 : f32 to vector<4x1xf32>
    %1405 = arith.addf %1404, %1403 : vector<4x1xf32>
    %1406 = math.log %1405 : vector<4x1xf32>
    %1407 = arith.addf %1399, %1406 : vector<4x1xf32>
    %1408 = vector.extract_strided_slice %1393 {offsets = [0, 17], sizes = [4, 1], strides = [1, 1]} : vector<4x32xf32> to vector<4x1xf32>
    %cst_318 = arith.constant 5.000000e-01 : f32
    %1409 = vector.broadcast %cst_318 : f32 to vector<4x1xf32>
    %1410 = arith.mulf %1409, %1408 : vector<4x1xf32>
    %1411 = math.tanh %1410 : vector<4x1xf32>
    %cst_319 = arith.constant 1.000000e+00 : f32
    %1412 = vector.broadcast %cst_319 : f32 to vector<4x1xf32>
    %1413 = arith.addf %1411, %1412 : vector<4x1xf32>
    %cst_320 = arith.constant 5.000000e-01 : f32
    %1414 = vector.broadcast %cst_320 : f32 to vector<4x1xf32>
    %1415 = arith.mulf %1414, %1413 : vector<4x1xf32>
    %1416 = vector.extract_strided_slice %1393 {offsets = [0, 18], sizes = [4, 3], strides = [1, 1]} : vector<4x32xf32> to vector<4x3xf32>
    %cst_321 = arith.constant dense<0xFF800000> : vector<4xf32>
    %1417 = vector.multi_reduction <maximumf>, %1416, %cst_321 [1] : vector<4x3xf32> to vector<4xf32>
    %1418 = vector.shape_cast %1417 : vector<4xf32> to vector<4x1xf32>
    %1419 = vector.broadcast %1418 : vector<4x1xf32> to vector<4x3xf32>
    %1420 = arith.subf %1416, %1419 : vector<4x3xf32>
    %1421 = math.exp %1420 : vector<4x3xf32>
    %cst_322 = arith.constant dense<0.000000e+00> : vector<4xf32>
    %1422 = vector.multi_reduction <add>, %1421, %cst_322 [1] : vector<4x3xf32> to vector<4xf32>
    %1423 = vector.shape_cast %1422 : vector<4xf32> to vector<4x1xf32>
    %1424 = vector.broadcast %1423 : vector<4x1xf32> to vector<4x3xf32>
    %1425 = arith.divf %1421, %1424 : vector<4x3xf32>
    %1426 = vector.extract_strided_slice %1393 {offsets = [0, 21], sizes = [4, 1], strides = [1, 1]} : vector<4x32xf32> to vector<4x1xf32>
    %cst_323 = arith.constant 0.000000e+00 : f32
    %1427 = vector.broadcast %cst_323 : f32 to vector<4x1xf32>
    %1428 = arith.maximumf %1426, %1427 : vector<4x1xf32>
    %1429 = math.absf %1426 : vector<4x1xf32>
    %cst_324 = arith.constant 0.000000e+00 : f32
    %1430 = vector.broadcast %cst_324 : f32 to vector<4x1xf32>
    %1431 = arith.subf %1430, %1429 : vector<4x1xf32>
    %1432 = math.exp %1431 : vector<4x1xf32>
    %cst_325 = arith.constant 1.000000e+00 : f32
    %1433 = vector.broadcast %cst_325 : f32 to vector<4x1xf32>
    %1434 = arith.addf %1433, %1432 : vector<4x1xf32>
    %1435 = math.log %1434 : vector<4x1xf32>
    %1436 = arith.addf %1428, %1435 : vector<4x1xf32>
    %cst_326 = arith.constant 1.000000e+00 : f32
    %1437 = vector.broadcast %cst_326 : f32 to vector<4x1xf32>
    %1438 = arith.addf %1437, %1436 : vector<4x1xf32>
    %1439 = tpu.concatenate %1323, %1324 in 0 : vector<2x16xf32>, vector<2x16xf32> -> vector<4x16xf32>
    %cst_327 = arith.constant 1.000000e-16 : f32
    %1440 = vector.broadcast %cst_327 : f32 to vector<2x16x16xf32>
    %1441 = arith.addf %1351, %1440 : vector<2x16x16xf32>
    %1442 = vector.extract_strided_slice %1396 {offsets = [0, 0], sizes = [2, 16], strides = [1, 1]} : vector<4x16xf32> to vector<2x16xf32>
    %1443 = vector.shape_cast %1442 : vector<2x16xf32> to vector<2x1x16xf32>
    %1444 = vector.broadcast %1443 : vector<2x1x16xf32> to vector<2x16x16xf32>
    %1445 = arith.mulf %1441, %1444 : vector<2x16x16xf32>
    %cst_328 = arith.constant dense<0.000000e+00> : vector<2x16xf32>
    %1446 = vector.multi_reduction <add>, %1445, %cst_328 [2] : vector<2x16x16xf32> to vector<2x16xf32>
    %1447 = vector.extract_strided_slice %1396 {offsets = [2, 0], sizes = [2, 16], strides = [1, 1]} : vector<4x16xf32> to vector<2x16xf32>
    %1448 = vector.shape_cast %1447 : vector<2x16xf32> to vector<2x1x16xf32>
    %1449 = vector.broadcast %1448 : vector<2x1x16xf32> to vector<2x16x16xf32>
    %1450 = arith.mulf %1441, %1449 : vector<2x16x16xf32>
    %cst_329 = arith.constant dense<0.000000e+00> : vector<2x16xf32>
    %1451 = vector.multi_reduction <add>, %1450, %cst_329 [2] : vector<2x16x16xf32> to vector<2x16xf32>
    %1452 = tpu.concatenate %1446, %1451 in 0 : vector<2x16xf32>, vector<2x16xf32> -> vector<4x16xf32>
    %1453 = arith.mulf %1441, %1441 : vector<2x16x16xf32>
    %cst_330 = arith.constant dense<0.000000e+00> : vector<2x16xf32>
    %1454 = vector.multi_reduction <add>, %1453, %cst_330 [2] : vector<2x16x16xf32> to vector<2x16xf32>
    %1455 = math.sqrt %1454 : vector<2x16xf32>
    %1456 = tpu.concatenate %1455, %1455 in 0 : vector<2x16xf32>, vector<2x16xf32> -> vector<4x16xf32>
    %1457 = arith.mulf %1396, %1396 : vector<4x16xf32>
    %cst_331 = arith.constant dense<0.000000e+00> : vector<4xf32>
    %1458 = vector.multi_reduction <add>, %1457, %cst_331 [1] : vector<4x16xf32> to vector<4xf32>
    %1459 = vector.shape_cast %1458 : vector<4xf32> to vector<4x1xf32>
    %1460 = math.sqrt %1459 : vector<4x1xf32>
    %1461 = vector.broadcast %1460 : vector<4x1xf32> to vector<4x16xf32>
    %1462 = arith.mulf %1456, %1461 : vector<4x16xf32>
    %cst_332 = arith.constant 9.99999993E-9 : f32
    %1463 = vector.broadcast %cst_332 : f32 to vector<4x16xf32>
    %1464 = arith.maximumf %1462, %1463 : vector<4x16xf32>
    %1465 = tpu.reciprocal %1464 {approx = true} : vector<4x16xf32> -> vector<4x16xf32>
    %1466 = arith.mulf %1452, %1465 : vector<4x16xf32>
    %1467 = vector.broadcast %1407 : vector<4x1xf32> to vector<4x16xf32>
    %1468 = arith.mulf %1467, %1466 : vector<4x16xf32>
    %cst_333 = arith.constant dense<0xFF800000> : vector<4xf32>
    %1469 = vector.multi_reduction <maximumf>, %1468, %cst_333 [1] : vector<4x16xf32> to vector<4xf32>
    %1470 = vector.shape_cast %1469 : vector<4xf32> to vector<4x1xf32>
    %1471 = vector.broadcast %1470 : vector<4x1xf32> to vector<4x16xf32>
    %1472 = arith.subf %1468, %1471 : vector<4x16xf32>
    %1473 = math.exp %1472 : vector<4x16xf32>
    %cst_334 = arith.constant dense<0.000000e+00> : vector<4xf32>
    %1474 = vector.multi_reduction <add>, %1473, %cst_334 [1] : vector<4x16xf32> to vector<4xf32>
    %1475 = vector.shape_cast %1474 : vector<4xf32> to vector<4x1xf32>
    %1476 = vector.broadcast %1475 : vector<4x1xf32> to vector<4x16xf32>
    %1477 = arith.divf %1473, %1476 : vector<4x16xf32>
    %1478 = vector.broadcast %1415 : vector<4x1xf32> to vector<4x16xf32>
    %1479 = arith.mulf %1478, %1477 : vector<4x16xf32>
    %cst_335 = arith.constant 1.000000e+00 : f32
    %1480 = vector.broadcast %cst_335 : f32 to vector<4x1xf32>
    %1481 = arith.subf %1480, %1415 : vector<4x1xf32>
    %1482 = vector.broadcast %1481 : vector<4x1xf32> to vector<4x16xf32>
    %1483 = arith.mulf %1482, %1439 : vector<4x16xf32>
    %1484 = arith.addf %1479, %1483 : vector<4x16xf32>
    %1485 = vector.extract_strided_slice %1484 {offsets = [0, 15], sizes = [4, 1], strides = [1, 1]} : vector<4x16xf32> to vector<4x1xf32>
    %1486 = vector.extract_strided_slice %1484 {offsets = [0, 0], sizes = [4, 15], strides = [1, 1]} : vector<4x16xf32> to vector<4x15xf32>
    %1487 = tpu.concatenate %1485, %1486 in 1 : vector<4x1xf32>, vector<4x15xf32> -> vector<4x16xf32>
    %1488 = vector.extract_strided_slice %1484 {offsets = [0, 1], sizes = [4, 15], strides = [1, 1]} : vector<4x16xf32> to vector<4x15xf32>
    %1489 = vector.extract_strided_slice %1484 {offsets = [0, 0], sizes = [4, 1], strides = [1, 1]} : vector<4x16xf32> to vector<4x1xf32>
    %1490 = tpu.concatenate %1488, %1489 in 1 : vector<4x15xf32>, vector<4x1xf32> -> vector<4x16xf32>
    %1491 = vector.extract_strided_slice %1425 {offsets = [0, 0], sizes = [4, 1], strides = [1, 1]} : vector<4x3xf32> to vector<4x1xf32>
    %1492 = vector.broadcast %1491 : vector<4x1xf32> to vector<4x16xf32>
    %1493 = arith.mulf %1487, %1492 : vector<4x16xf32>
    %1494 = vector.extract_strided_slice %1425 {offsets = [0, 1], sizes = [4, 1], strides = [1, 1]} : vector<4x3xf32> to vector<4x1xf32>
    %1495 = vector.broadcast %1494 : vector<4x1xf32> to vector<4x16xf32>
    %1496 = arith.mulf %1484, %1495 : vector<4x16xf32>
    %1497 = arith.addf %1493, %1496 : vector<4x16xf32>
    %1498 = vector.extract_strided_slice %1425 {offsets = [0, 2], sizes = [4, 1], strides = [1, 1]} : vector<4x3xf32> to vector<4x1xf32>
    %1499 = vector.broadcast %1498 : vector<4x1xf32> to vector<4x16xf32>
    %1500 = arith.mulf %1490, %1499 : vector<4x16xf32>
    %1501 = arith.addf %1497, %1500 : vector<4x16xf32>
    %cst_336 = arith.constant 1.000000e-30 : f32
    %1502 = vector.broadcast %cst_336 : f32 to vector<4x16xf32>
    %1503 = arith.maximumf %1501, %1502 : vector<4x16xf32>
    %1504 = math.log %1503 : vector<4x16xf32>
    %1505 = vector.broadcast %1438 : vector<4x1xf32> to vector<4x16xf32>
    %1506 = arith.mulf %1505, %1504 : vector<4x16xf32>
    %1507 = math.exp %1506 : vector<4x16xf32>
    %cst_337 = arith.constant dense<0.000000e+00> : vector<4xf32>
    %1508 = vector.multi_reduction <add>, %1507, %cst_337 [1] : vector<4x16xf32> to vector<4xf32>
    %1509 = vector.shape_cast %1508 : vector<4xf32> to vector<4x1xf32>
    %cst_338 = arith.constant 1.000000e-16 : f32
    %1510 = vector.broadcast %cst_338 : f32 to vector<4x1xf32>
    %1511 = arith.addf %1509, %1510 : vector<4x1xf32>
    %1512 = vector.broadcast %1511 : vector<4x1xf32> to vector<4x16xf32>
    %1513 = arith.divf %1507, %1512 : vector<4x16xf32>
    %1514 = vector.extract_strided_slice %1513 {offsets = [0, 0], sizes = [2, 16], strides = [1, 1]} : vector<4x16xf32> to vector<2x16xf32>
    %1515 = vector.extract_strided_slice %1513 {offsets = [2, 0], sizes = [2, 16], strides = [1, 1]} : vector<4x16xf32> to vector<2x16xf32>
    %1516 = vector.shape_cast %1514 : vector<2x16xf32> to vector<2x16x1xf32>
    %1517 = vector.broadcast %1516 : vector<2x16x1xf32> to vector<2x16x16xf32>
    %1518 = arith.mulf %1517, %1351 : vector<2x16x16xf32>
    %cst_339 = arith.constant dense<0.000000e+00> : vector<2x16xf32>
    %1519 = vector.multi_reduction <add>, %1518, %cst_339 [1] : vector<2x16x16xf32> to vector<2x16xf32>
    %1520 = vector.extract_strided_slice %1390 {offsets = [0, 64], sizes = [2, 16], strides = [1, 1]} : vector<2x128xf32> to vector<2x16xf32>
    %cst_340 = arith.constant 5.000000e-01 : f32
    %1521 = vector.broadcast %cst_340 : f32 to vector<2x16xf32>
    %1522 = arith.mulf %1521, %1520 : vector<2x16xf32>
    %1523 = math.tanh %1522 : vector<2x16xf32>
    %cst_341 = arith.constant 1.000000e+00 : f32
    %1524 = vector.broadcast %cst_341 : f32 to vector<2x16xf32>
    %1525 = arith.addf %1523, %1524 : vector<2x16xf32>
    %cst_342 = arith.constant 5.000000e-01 : f32
    %1526 = vector.broadcast %cst_342 : f32 to vector<2x16xf32>
    %1527 = arith.mulf %1526, %1525 : vector<2x16xf32>
    %1528 = vector.extract_strided_slice %1390 {offsets = [0, 80], sizes = [2, 16], strides = [1, 1]} : vector<2x128xf32> to vector<2x16xf32>
    %1529 = vector.shape_cast %1515 : vector<2x16xf32> to vector<2x16x1xf32>
    %1530 = vector.shape_cast %1527 : vector<2x16xf32> to vector<2x1x16xf32>
    %1531 = vector.broadcast %1529 : vector<2x16x1xf32> to vector<2x16x16xf32>
    %1532 = vector.broadcast %1530 : vector<2x1x16xf32> to vector<2x16x16xf32>
    %1533 = arith.mulf %1531, %1532 : vector<2x16x16xf32>
    %1534 = vector.shape_cast %1515 : vector<2x16xf32> to vector<2x16x1xf32>
    %1535 = vector.shape_cast %1528 : vector<2x16xf32> to vector<2x1x16xf32>
    %1536 = vector.broadcast %1534 : vector<2x16x1xf32> to vector<2x16x16xf32>
    %1537 = vector.broadcast %1535 : vector<2x1x16xf32> to vector<2x16x16xf32>
    %1538 = arith.mulf %1536, %1537 : vector<2x16x16xf32>
    %cst_343 = arith.constant 1.000000e+00 : f32
    %1539 = vector.broadcast %cst_343 : f32 to vector<2x16x16xf32>
    %1540 = arith.subf %1539, %1533 : vector<2x16x16xf32>
    %1541 = arith.mulf %1351, %1540 : vector<2x16x16xf32>
    %1542 = arith.addf %1541, %1538 : vector<2x16x16xf32>
    %1543 = vector.extract_strided_slice %1390 {offsets = [0, 96], sizes = [2, 8], strides = [1, 1]} : vector<2x128xf32> to vector<2x8xf32>
    %1544 = tpu.concatenate %182, %373, %564, %755, %946, %1137, %1328, %1519 in 0 : vector<2x16xf32>, vector<2x16xf32>, vector<2x16xf32>, vector<2x16xf32>, vector<2x16xf32>, vector<2x16xf32>, vector<2x16xf32>, vector<2x16xf32> -> vector<16x16xf32>
    %1545 = tpu.concatenate %206, %397, %588, %779, %970, %1161, %1352, %1543 in 0 : vector<2x8xf32>, vector<2x8xf32>, vector<2x8xf32>, vector<2x8xf32>, vector<2x8xf32>, vector<2x8xf32>, vector<2x8xf32>, vector<2x8xf32> -> vector<16x8xf32>
    %c0_344 = arith.constant 0 : index
    %c0_345 = arith.constant 0 : index
    %1546 = vector.load %arg9[%c0_344, %c0_345] : memref<16x8xf32, #tpu.memory_space<vmem>>, vector<16x8xf32>
    %cst_346 = arith.constant dense<0.000000e+00> : vector<16x8xf32>
    %1547 = tpu.matmul %1544, %1546, %cst_346 {dimension_numbers = #tpu.dot_dimension_numbers<[1], [0], [0], [1], [0, 0, 1, 1], [], []>} : vector<16x16xf32>, vector<16x8xf32>, vector<16x8xf32> -> vector<16x8xf32>
    %1548 = arith.addf %1545, %1547 : vector<16x8xf32>
    %cst_347 = arith.constant 5.000000e-01 : f32
    %1549 = vector.broadcast %cst_347 : f32 to vector<16x8xf32>
    %1550 = arith.mulf %1549, %1548 : vector<16x8xf32>
    %1551 = math.tanh %1550 : vector<16x8xf32>
    %cst_348 = arith.constant 1.000000e+00 : f32
    %1552 = vector.broadcast %cst_348 : f32 to vector<16x8xf32>
    %1553 = arith.addf %1551, %1552 : vector<16x8xf32>
    %cst_349 = arith.constant 5.000000e-01 : f32
    %1554 = vector.broadcast %cst_349 : f32 to vector<16x8xf32>
    %1555 = arith.mulf %1554, %1553 : vector<16x8xf32>
    %c0_350 = arith.constant 0 : index
    %c0_351 = arith.constant 0 : index
    %1556 = vector.load %arg10[%c0_350, %c0_351] : memref<16x8xf32, #tpu.memory_space<vmem>>, vector<16x8xf32>
    tpu.vector_store %arg10[%c0_350, %c0_351], %1555 {strides = array<i32>} : memref<16x8xf32, #tpu.memory_space<vmem>>, vector<16x8xf32>,
    %cst_352 = arith.constant 0.000000e+00 : f32
    %1557 = vector.broadcast %cst_352 : f32 to vector<2x16xf32>
    %1558 = tpu.concatenate %1519, %1387, %1385, %1514, %1515, %1557 in 1 : vector<2x16xf32>, vector<2x32xf32>, vector<2x32xf32>, vector<2x16xf32>, vector<2x16xf32>, vector<2x16xf32> -> vector<2x128xf32>
    %c0_353 = arith.constant 0 : index
    %c0_354 = arith.constant 0 : index
    %1559 = vector.load %arg11[%c0_353, %c0_354] : memref<2x128xf32, #tpu.memory_space<vmem>>, vector<2x128xf32>
    tpu.vector_store %arg11[%c0_353, %c0_354], %1558 {strides = array<i32>} : memref<2x128xf32, #tpu.memory_space<vmem>>, vector<2x128xf32>,
    %c0_355 = arith.constant 0 : index
    %c0_356 = arith.constant 0 : index
    %c0_357 = arith.constant 0 : index
    %1560 = vector.load %arg12[%c0_355, %c0_356, %c0_357] : memref<2x16x16xf32, #tpu.memory_space<vmem>>, vector<2x16x16xf32>
    tpu.vector_store %arg12[%c0_355, %c0_356, %c0_357], %1542 {strides = array<i32>} : memref<2x16x16xf32, #tpu.memory_space<vmem>>, vector<2x16x16xf32>,
    return
  }
  func.func @transform_0(%arg0: i32) -> (i32, i32) {
    %c0_i32 = arith.constant 0 : i32
    %c0_i32_0 = arith.constant 0 : i32
    %c0_i32_1 = arith.constant 0 : i32
    return %c0_i32, %c0_i32_0 : i32, i32
  }
  func.func @transform_1(%arg0: i32) -> (i32, i32) {
    %c0_i32 = arith.constant 0 : i32
    %c0_i32_0 = arith.constant 0 : i32
    %c0_i32_1 = arith.constant 0 : i32
    return %c0_i32, %c0_i32_0 : i32, i32
  }
  func.func @transform_2(%arg0: i32) -> (i32, i32, i32) {
    %c0_i32 = arith.constant 0 : i32
    %c0_i32_0 = arith.constant 0 : i32
    %c0_i32_1 = arith.constant 0 : i32
    %c0_i32_2 = arith.constant 0 : i32
    return %c0_i32, %c0_i32_0, %c0_i32_1 : i32, i32, i32
  }
  func.func @transform_3(%arg0: i32) -> (i32, i32) {
    %c0_i32 = arith.constant 0 : i32
    %c0_i32_0 = arith.constant 0 : i32
    %c0_i32_1 = arith.constant 0 : i32
    return %c0_i32, %c0_i32_0 : i32, i32
  }
  func.func @transform_4(%arg0: i32) -> (i32, i32) {
    %c0_i32 = arith.constant 0 : i32
    %c0_i32_0 = arith.constant 0 : i32
    %c0_i32_1 = arith.constant 0 : i32
    return %c0_i32, %c0_i32_0 : i32, i32
  }
  func.func @transform_5(%arg0: i32) -> (i32, i32) {
    %c0_i32 = arith.constant 0 : i32
    %c0_i32_0 = arith.constant 0 : i32
    %c0_i32_1 = arith.constant 0 : i32
    return %c0_i32, %c0_i32_0 : i32, i32
  }
  func.func @transform_6(%arg0: i32) -> (i32, i32) {
    %c0_i32 = arith.constant 0 : i32
    %c0_i32_0 = arith.constant 0 : i32
    %c0_i32_1 = arith.constant 0 : i32
    return %c0_i32, %c0_i32_0 : i32, i32
  }
  func.func @transform_7(%arg0: i32) -> (i32, i32) {
    %c0_i32 = arith.constant 0 : i32
    %c0_i32_0 = arith.constant 0 : i32
    %c0_i32_1 = arith.constant 0 : i32
    return %c0_i32, %c0_i32_0 : i32, i32
  }
  func.func @transform_8(%arg0: i32) -> (i32, i32) {
    %c0_i32 = arith.constant 0 : i32
    %c0_i32_0 = arith.constant 0 : i32
    %c0_i32_1 = arith.constant 0 : i32
    return %c0_i32, %c0_i32_0 : i32, i32
  }
  func.func @transform_9(%arg0: i32) -> (i32, i32) {
    %c0_i32 = arith.constant 0 : i32
    %c0_i32_0 = arith.constant 0 : i32
    %c0_i32_1 = arith.constant 0 : i32
    return %c0_i32, %c0_i32_0 : i32, i32
  }
  func.func @transform_10(%arg0: i32) -> (i32, i32) {
    %c0_i32 = arith.constant 0 : i32
    %c0_i32_0 = arith.constant 0 : i32
    %c0_i32_1 = arith.constant 0 : i32
    return %c0_i32, %c0_i32_0 : i32, i32
  }
  func.func @transform_11(%arg0: i32) -> (i32, i32, i32) {
    %c0_i32 = arith.constant 0 : i32
    %c0_i32_0 = arith.constant 0 : i32
    %c0_i32_1 = arith.constant 0 : i32
    %c0_i32_2 = arith.constant 0 : i32
    return %c0_i32, %c0_i32_0, %c0_i32_1 : i32, i32, i32
  }
}

</mosaic_0001>

<bundles_post_ra>
// kernel: ntm_forward_seq.1
= control target key start
LH: loop header
LB: loop body
LE: loop exit
PB: predicated region body
PF: predicated region fallthrough
CT: control target
= control target key end

     0   :  { %17 = vsyncpa [#allocation3], 0  ;;  %vm57_vm0 = vcmask 1040384   ;;  %vm50_vm1 = vcmask 72704   ;;  %s6996_s0 = inlined_call_operand.vmem [shape: f32[16,9], index: 0, kind: input, shape index: {}]   ;;  %s6997_s1 = inlined_call_operand.vmem [shape: f32[2,128], index: 1, kind: input, shape index: {}]   ;;  %s6998_s2 = inlined_call_operand.vmem [shape: f32[2,16,16], index: 2, kind: input, shape index: {}]   ;;  %s6999_s3 = inlined_call_operand.vmem [shape: f32[9,128], index: 3, kind: input, shape index: {}]   ;;  %s7000_s4 = inlined_call_operand.vmem [shape: f32[48,128], index: 4, kind: input, shape index: {}]   ;;  %s7001_s5 = inlined_call_operand.vmem [shape: f32[1,128], index: 5, kind: input, shape index: {}]   ;;  %s7002_s6 = inlined_call_operand.vmem [shape: f32[32,128], index: 6, kind: input, shape index: {}]   ;;  %s7003_s7 = inlined_call_operand.vmem [shape: f32[1,128], index: 7, kind: input, shape index: {}]   ;;  %s7004_s8 = inlined_call_operand.vmem [shape: f32[16,8], index: 8, kind: input, shape index: {}]   ;;  %s7005_s9 = inlined_call_operand.hbm [shape: f32[16,8], index: 9, kind: output, shape index: {0}]   ;;  %s7006_s10 = inlined_call_operand.vmem [shape: f32[2,128], index: 10, kind: output, shape index: {1}]   ;;  %s7007_s11 = inlined_call_operand.hbm [shape: f32[2,16,16], index: 11, kind: output, shape index: {2}]  }
   0x1   :  { %v45_v0 = vld [vmem:[%s6999_s3 + $0x8] sm:$0x1]  ;;  %v44_v1 = vld [vmem:[%s6999_s3] sm:$0xff] }
   0x2   :  { %4741 = vmatpush.msk.msra.mxu1 %vm57_vm0, %v45_v0  ;;  %v42_v2 = vld [vmem:[%s6996_s0] sm:$0xff]  ;;  %v89_v3 = vld [vmem:[%s7000_s4 + $0x28] sm:$0xff] }
   0x3   :  { %689 = vmatpush.msra.mxu3 %v89_v3  ;;  %1247 = vmatpush.msra.mxu0 %v89_v3  ;;  %v88_v4 = vld [vmem:[%s7000_s4 + $0x20] sm:$0xff] }
   0x4   :  { %76 = vmatpush.msra.mxu1 %v44_v1 }
   0x5   :  { %4742 = vmatmul.msk.f32.vlgmr.msra.gmra.mxu1 %vm50_vm1, %v42_v2  ;;  %690 = vmatpush.msra.mxu3 %v88_v4 }
   0x6   :  { %18 = vsyncpa [#allocation5], 0  ;;  %109 = vmatpush.msrb.mxu1 %v89_v3  ;;  %v87_v5 = vld [vmem:[%s7000_s4 + $0x18] sm:$0xff]  ;;  %1248 = vmatpush.msra.mxu0 %v88_v4  ;;  %v86_v6 = vld [vmem:[%s7000_s4 + $0x10] sm:$0xff]  ;;  %vm95_vm2 = vcmask 392192   ;;  %s5285_s20 = smov 112  }
   0x7   :  { %691 = vmatpush.msra.mxu3 %v87_v5  ;;  %v43_v7 = vld [vmem:[%s6996_s0 + $0x8] sm:$0xff]  ;;  %v84_v9 = vld [vmem:[%s7000_s4] sm:$0xff]  ;;  %v5424_v30 = vld [vmem:[%s7002_s6 + $0x18] sm:$0xff]  ;;  %vm7010_vm3 = vcmask 261120   ;;  %s5287_s30 = smov 96   ;;  %vm245_vm4 = vcmask 130048  }
   0x8   :  { %110 = vmatpush.msrb.mxu1 %v88_v4  ;;  %1249 = vmatpush.msra.mxu0 %v87_v5  ;;  %v85_v8 = vld [vmem:[%s7000_s4 + $0x8] sm:$0xff]  ;;  %v5401_v10 = vld [vmem:[%s6997_s1] sm:$0x3]  ;;  %s5284_s1 = smov 64   ;;  %v5429_v31 = vld [vmem:[%s7002_s6 + $0x10] sm:$0xff]  ;;  %vm179_vm5 = vcmask 1041408  }
   0x9   :  { %692 = vmatpush.msra.mxu3 %v86_v6  ;;  %v4883_v12 = vld [vmem:[%s7001_s5] ss:$0 sm:$0xff]  ;;  %s5286_s5 = smov 32   ;;  %166 = vmatpush.msra.mxu2 %v5424_v30  ;;  %v5436_v32 = vld [vmem:[%s7002_s6 + $0x8] sm:$0xff]  ;;  %v5493_v49 = vld [vmem:[%s6998_s2 + $0x10] sm:$0xff]  ;;  %v5288_v60 = vmov 16  }
   0xa   :  { %111 = vmatpush.msrb.mxu1 %v87_v5  ;;  %1250 = vmatpush.msra.mxu0 %v86_v6  ;;  %v5443_v33 = vld [vmem:[%s7002_s6] sm:$0xff]  ;;  %v5484_v42 = vld [vmem:[%s6998_s2 + $0x8] sm:$0xff]  ;;  %v233_v50 = vadd.f32 1e-16, %v5493_v49  ;;  %v5499_v52 = vld [vmem:[%s6998_s2 + $0x18] sm:$0xff]  ;;  %vm394_vm6 = vcmask 125952  }
   0xb   :  { %693 = vmatpush.msra.mxu3 %v85_v8  ;;  %167 = vmatpush.msra.mxu2 %v5429_v31  ;;  %v5469_v37 = vld [vmem:[%s7003_s7] ss:$0 sm:$0xff]  ;;  %v232_v44 = vadd.f32 1e-16, %v5484_v42  ;;  %v234_v54 = vadd.f32 1e-16, %v5499_v52 }
   0xc   :  { %112 = vmatpush.msrb.mxu1 %v86_v6  ;;  %1251 = vmatpush.msra.mxu0 %v85_v8  ;;  %v5479_v41 = vld [vmem:[%s6998_s2] sm:$0xff]  ;;  %v316_v51 = vmul.f32 %v233_v50, %v233_v50  ;;  %vm7009_vm7 = vcmask 167056   ;;  %vm7015_vm0 = vcmask 130112   ;;  %s5290_s2 = smov 110   ;;  %s5291_s19 = smov 48  }
   0xd   :  { %4743 = vmatmul.msk.f32.gmra.mxu1 %vm50_vm1, %v43_v7  ;;  %694 = vmatpush.msra.mxu3 %v84_v9  ;;  %v231_v43 = vadd.f32 1e-16, %v5479_v41  ;;  %v315_v46 = vmul.f32 %v232_v44, %v232_v44  ;;  %v317_v55 = vmul.f32 %v234_v54, %v234_v54  ;;  %vm297_vm1 = vcmask 1041409   ;;  %s5296_s21 = smov 113   ;;  %s5297_s22 = smov 1  }
   0xe   :  { %113 = vmatpush.msrb.mxu1 %v85_v8  ;;  %1252 = vmatpush.msra.mxu0 %v84_v9  ;;  %v324_v53 = vsel %vm245_vm4, %v316_v51, 0.0  ;;  %s5298_s23 = smov 127   ;;  %s5304_s27 = smov 128  }
   0xf   :  { %1805 = vmatpush.msrb.mxu3 %v89_v3  ;;  %168 = vmatpush.msra.mxu2 %v5436_v32  ;;  %v314_v45 = vmul.f32 %v231_v43, %v231_v43  ;;  %v321_v48 = vsel %vm245_vm4, %v315_v46, 0.0  ;;  %v327_v56 = vsel %vm245_vm4, %v317_v55, 0.0  ;;  %s5305_s28 = smov 8  }
  0x10   :  { %2363 = vmatpush.msrb.mxu0 %v89_v3  ;;  %114 = vmatpush.msrb.mxu1 %v84_v9 }
  0x11   :  { %1806 = vmatpush.msrb.mxu3 %v88_v4  ;;  %169 = vmatpush.msra.mxu2 %v5443_v33  ;;  %v318_v47 = vsel %vm245_vm4, %v314_v45, 0.0 }
  0x12   :  { %2364 = vmatpush.msrb.mxu0 %v88_v4  ;;  %1304 = vmatpush.msra.mxu1 %v5424_v30 }
  0x13   :  { %1807 = vmatpush.msrb.mxu3 %v87_v5  ;;  %746 = vmatpush.msrb.mxu2 %v5424_v30 }
  0x14   :  { %2365 = vmatpush.msrb.mxu0 %v87_v5  ;;  %1305 = vmatpush.msra.mxu1 %v5429_v31 }
  0x15   :  { %4744 = vmatmul.msk.f32.vlgmr.msrb.gmra.mxu1 %vm95_vm2, %v5401_v10  ;;  %1808 = vmatpush.msrb.mxu3 %v86_v6 }
  0x16   :  { %2366 = vmatpush.msrb.mxu0 %v86_v6  ;;  %1306 = vmatpush.msra.mxu1 %v5436_v32 }
  0x17   :  { %1809 = vmatpush.msrb.mxu3 %v85_v8  ;;  %747 = vmatpush.msrb.mxu2 %v5429_v31 }
  0x18   :  { %2367 = vmatpush.msrb.mxu0 %v85_v8  ;;  %1307 = vmatpush.msra.mxu1 %v5443_v33 }
  0x19   :  { %1810 = vmatpush.msrb.mxu3 %v84_v9  ;;  %748 = vmatpush.msrb.mxu2 %v5436_v32 }
  0x1a   :  { %2368 = vmatpush.msrb.mxu0 %v84_v9  ;;  %2416 = vmatpush.msrb.mxu1 %v5424_v30 }
  0x1b   :  { %749 = vmatpush.msrb.mxu2 %v5443_v33  ;;  %4784 = vset.pattern.permute.xlu0 %v5288_v60 }
  0x1c   :  { %2417 = vmatpush.msrb.mxu1 %v5429_v31 }
  0x1e   :  { %2418 = vmatpush.msrb.mxu1 %v5436_v32 }
  0x20   :  { %2419 = vmatpush.msrb.mxu1 %v5443_v33 }
  0x82   :  { %v78_v11 = vpop.f32.mrf.mxu1 }
  0x83   :  { %v5410_v15 = vadd.f32 %v4883_v12, %v78_v11 }
  0x8a   :  { %v81_v13 = vpop.f32.mrf.mxu1 }
  0x8b   :  { %v5408_v14 = vadd.f32 %v4883_v12, %v81_v13 }
  0x92   :  { %v116_v16 = vpop.f32.mrf.mxu1 }
  0x93   :  { %v119_v17 = vadd.f32 %v116_v16, %v5410_v15 }
  0x95   :  { %4885 = vtanh.f32 %v119_v17  ;;  %v120_v19 = vmul.f32 0.5, %v119_v17 }
  0x97   :  { %4887 = vtanh.f32 %v120_v19 }
  0x9b   :  { %v4886_v18 = vpop.eup %4885 }
  0x9c   :  { %130 = vrot.lane.b32.xlu0 %v4886_v18, %s5284_s1 }
  0x9d   :  { %v4888_v20 = vpop.eup %4887 }
  0x9e   :  { %v122_v21 = vadd.f32 1.0, %v4888_v20 }
  0xa0   :  { %v123_v22 = vmul.f32 0.5, %v122_v21 }
  0xa4   :  { %125 = vrot.lane.b32.xlu0 %v5401_v10, %s5285_s20 }
  0xce   :  { %319 = vadd.xlane.f32.xlu0 %v318_v47 }
 0x10e   :  { %v131_v23 = vpop.permute.xlu0 %130 }
 0x10f   :  { %v133_v24 = vmul.f32 %v131_v23, %v123_v22 }
 0x111   :  { %135 = vrot.lane.b32.xlu1 %v133_v24, %s5286_s5 }
 0x116   :  { %v126_v25 = vpop.permute.xlu0 %125 }
 0x117   :  { %v128_v26 = vmul.f32 %v126_v25, %v123_v22 }
 0x141   :  { %v320_v46 = vpop.xlane.xlu0 %319 }
 0x142   :  { %vm337_vm8 = vcmp.eq.f32.partialorder %v320_v46, inf  ;;  %vm339_vm10 = vcmp.eq.f32.partialorder %v320_v46, 0.0 }
 0x183   :  { %v136_v27 = vpop.permute.xlu1 %135 }
 0x184   :  { %v5417_v28 = vadd.f32 %v136_v27, %v128_v26 }
 0x186   :  { %4889 = vtanh.f32 %v5417_v28 }
 0x18c   :  { %v4890_v29 = vpop.eup %4889 }
 0x18d   :  { %141 = vrot.lane.b32.xlu1 %v4890_v29, %s5284_s1 }
 0x1b7   :  { %322 = vadd.xlane.f32.xlu1 %v321_v48 }
 0x1ff   :  { %v142_v34 = vpop.permute.xlu1 %141 }
 0x200   :  { %v5457_v35 = vmul.f32 %v142_v34, %v123_v22 }
 0x202   :  { %149 = vrot.lane.b32.xlu2 %v5457_v35, %s5286_s5 }
 0x22a   :  { %v5528_v47 = vpop.xlane.xlu1 %322 }
 0x22b   :  { %vm349_vm12 = vcmp.eq.f32.partialorder %v5528_v47, inf  ;;  %vm351_vm13 = vcmp.eq.f32.partialorder %v5528_v47, 0.0 }
 0x25c   :  { %v150_v36 = vpop.permute.xlu2 %149 }
 0x25d   :  { %4745 = vmatmul.msk.f32.vlgmr.msra.gmra.mxu2 %vm7010_vm3, %v150_v36 }
 0x25e   :  { %1862 = vmatpush.msra.mxu2 %v5424_v30 }
 0x260   :  { %1863 = vmatpush.msra.mxu2 %v5429_v31 }
 0x262   :  { %1864 = vmatpush.msra.mxu2 %v5436_v32 }
 0x264   :  { %1865 = vmatpush.msra.mxu2 %v5443_v33 }
 0x2e0   :  { %v171_v38 = vpop.f32.mrf.mxu2 }
 0x2e1   :  { %v5472_v39 = vadd.f32 %v5469_v37, %v171_v38 }
 0x2e3   :  { %v175_v40 = vrot.slane %v5472_v39, 6 }
 0x2e5   :  { %176 = vrot.lane.b32.xlu2 %v175_v40, %s5287_s30 }
 0x30e   :  { %325 = vadd.xlane.f32.xlu2 %v324_v53 }
 0x316   :  { %328 = vadd.xlane.f32.xlu2 %v327_v56 }
 0x33f   :  { %v177_v57 = vpop.permute.xlu2 %176 }
 0x340   :  { %v5506_v58 = vsel %vm179_vm5, %v5472_v39, %v177_v57 }
 0x341   :  { %v181_v59 = vadd.f32 1e-16, %v5506_v58  ;;  %v183_v61 = vand.u32 2147483647, %v5506_v58  ;;  %v196_v36 = vsel %vm7009_vm7, %v5506_v58, -inf }
 0x343   :  { %v393_v62 = vmul.f32 %v181_v59, %v181_v59  ;;  %258 = vst [vmem:[#allocation1] sm:$0xff] %v181_v59  ;;  %v237_v63 = vperm.slane %v181_v59, 0  ;;  %v236_v0 = vrot.slane %v181_v59, 1  ;;  %v184_v5 = vsub.f32 0.0, %v183_v61 }
 0x345   :  { %v395_v1 = vsel %vm394_vm6, %v393_v62, 0.0  ;;  %v242_v2 = vmul.f32 %v237_v63, %v232_v44  ;;  %v241_v3 = vmul.f32 %v237_v63, %v231_v43  ;;  %v238_v4 = vperm.slane %v236_v0, 0 }
 0x346   :  { %396 = vadd.xlane.f32.xlu0 %v395_v1  ;;  %v185_v11 = vmul.f32 1.442695, %v184_v5 }
 0x347   :  { %v249_v6 = vsel %vm245_vm4, %v242_v2, 0.0  ;;  %v246_v7 = vsel %vm245_vm4, %v241_v3, 0.0  ;;  %v243_v8 = vmul.f32 %v238_v4, %v233_v50  ;;  %v244_v13 = vmul.f32 %v238_v4, %v234_v54 }
 0x348   :  { %250 = vadd.xlane.f32.xlu2 %v249_v6  ;;  %247 = vadd.xlane.f32.xlu1 %v246_v7  ;;  %4891 = vpow2.f32 %v185_v11 }
 0x349   :  { %v252_v17 = vsel %vm245_vm4, %v243_v8, 0.0  ;;  %v255_v20 = vsel %vm245_vm4, %v244_v13, 0.0 }
 0x34a   :  { %v260_v9 = vld [vmem:[#allocation1 + $0x2] ss:$9 sm:$0xff] }
 0x34b   :  { %v263_v12 = vperm.slane %v260_v9, 0  ;;  %v262_v16 = vld [vmem:[#allocation1 + $0x3] ss:$9 sm:$0xff] }
 0x34c   :  { %v264_v21 = vperm.slane %v262_v16, 0  ;;  %v287_v16 = vlaneseq }
 0x34d   :  { %v267_v18 = vmul.f32 %v263_v12, %v231_v43  ;;  %v268_v22 = vmul.f32 %v263_v12, %v232_v44  ;;  %v182_v43 = vmax.f32 %v5506_v58, 0.0 }
 0x34e   :  { %253 = vadd.xlane.f32.xlu0 %v252_v17  ;;  %v270_v23 = vmul.f32 %v264_v21, %v234_v54  ;;  %v269_v24 = vmul.f32 %v264_v21, %v233_v50  ;;  %v4892_v25 = vpop.eup %4891 }
 0x34f   :  { %v271_v19 = vsel %vm245_vm4, %v267_v18, 0.0  ;;  %v274_v26 = vsel %vm245_vm4, %v268_v22, 0.0  ;;  %v187_v34 = vadd.f32 1.0, %v4892_v25  ;;  %v352_v25 = vand.u32 2147483648, %v5528_v47 }
 0x350   :  { %272 = vadd.xlane.f32.xlu2 %v271_v19  ;;  %256 = vadd.xlane.f32.xlu1 %v255_v20  ;;  %v280_v27 = vsel %vm245_vm4, %v270_v23, 0.0  ;;  %v277_v29 = vsel %vm245_vm4, %v269_v24, 0.0  ;;  %v340_v24 = vand.u32 2147483648, %v320_v46 }
 0x351   :  { %4893 = vlog2.f32 %v187_v34 }
 0x352   :  { %4895 = vrsqrt.f32 %v320_v46 }
 0x353   :  { %4897 = vrsqrt.f32 %v5528_v47 }
 0x356   :  { %275 = vadd.xlane.f32.xlu0 %v274_v26  ;;  %v5545_v26 = vand.u32 127, %v287_v16 }
 0x357   :  { %v4894_v38 = vpop.eup %4893 }
 0x358   :  { %281 = vadd.xlane.f32.xlu2 %v280_v27  ;;  %278 = vadd.xlane.f32.xlu1 %v277_v29  ;;  %v189_v40 = vmul.f32 0.6931472, %v4894_v38  ;;  %v4896_v50 = vpop.eup %4895 }
 0x359   :  { %v4898_v51 = vpop.eup %4897  ;;  %v331_v55 = vmul.f32 %v4896_v50, %v320_v46 }
 0x35a   :  { %v5523_v44 = vadd.f32 %v189_v40, %v182_v43  ;;  %v343_v59 = vmul.f32 %v4898_v51, %v5528_v47 }
 0x35b   :  { %v332_v61 = vmul.f32 %v4896_v50, %v331_v55 }
 0x35c   :  { %v344_v0 = vmul.f32 %v4898_v51, %v343_v59 }
 0x35d   :  { %v333_v1 = vmul.f32 0.5, %v332_v61 }
 0x35e   :  { %v345_v4 = vmul.f32 0.5, %v344_v0 }
 0x35f   :  { %v334_v5 = vsub.f32 1.5, %v333_v1 }
 0x360   :  { %197 = vmax.xlane.f32.xlu1 %v196_v36  ;;  %v346_v8 = vsub.f32 1.5, %v345_v4 }
 0x361   :  { %v335_v9 = vmul.f32 %v4896_v50, %v334_v5 }
 0x362   :  { %v347_v13 = vmul.f32 %v4898_v51, %v346_v8  ;;  %v5554_v51 = vadd.s32 4294967288, %v5545_v26 }
 0x363   :  { %v336_v17 = vmul.f32 %v335_v9, %v320_v46 }
 0x364   :  { %v348_v21 = vmul.f32 %v347_v13, %v5528_v47 }
 0x365   :  { %v338_v29 = vsel %vm337_vm8, %v320_v46, %v336_v17  ;;  %vm310_vm8 = vcmask 1043459  }
 0x366   :  { %v350_v40 = vsel %vm349_vm12, %v5528_v47, %v348_v21  ;;  %v341_v50 = vsel %vm339_vm10, %v340_v24, %v338_v29 }
 0x367   :  { %v353_v55 = vsel %vm351_vm13, %v352_v25, %v350_v40  ;;  %v191_v25 = vmul.f32 0.5, %v5506_v58 }
 0x368   :  { %v383_v46 = vperm.slane %v353_v55, %v5554_v51 }
 0x36a   :  { %416 = vperm.xlu0 %4784, %v5523_v44  }
 0x381   :  { %v5526_v45 = vpop.xlane.xlu2 %325 }
 0x382   :  { %4899 = vrsqrt.f32 %v5526_v45  ;;  %vm361_vm9 = vcmp.eq.f32.partialorder %v5526_v45, inf  ;;  %vm363_vm14 = vcmp.eq.f32.partialorder %v5526_v45, 0.0  ;;  %v364_v27 = vand.u32 2147483648, %v5526_v45 }
 0x388   :  { %v4900_v53 = vpop.eup %4899 }
 0x389   :  { %v329_v48 = vpop.xlane.xlu2 %328  ;;  %v355_v56 = vmul.f32 %v4900_v53, %v5526_v45 }
 0x38a   :  { %4901 = vrsqrt.f32 %v329_v48  ;;  %vm373_vm11 = vcmp.eq.f32.partialorder %v329_v48, inf  ;;  %v376_v34 = vand.u32 2147483648, %v329_v48  ;;  %vm375_vm15 = vcmp.eq.f32.partialorder %v329_v48, 0.0 }
 0x38b   :  { %v356_v62 = vmul.f32 %v4900_v53, %v355_v56 }
 0x38d   :  { %v357_v2 = vmul.f32 0.5, %v356_v62  ;;  %v382_v62 = vperm.slane %v341_v50, %v5545_v26 }
 0x38f   :  { %v358_v6 = vsub.f32 1.5, %v357_v2  ;;  %v384_v2 = vsel %vm7015_vm0, %v383_v46, %v382_v62 }
 0x390   :  { %v4902_v54 = vpop.eup %4901 }
 0x391   :  { %v367_v57 = vmul.f32 %v4902_v54, %v329_v48  ;;  %v359_v11 = vmul.f32 %v4900_v53, %v358_v6 }
 0x393   :  { %v368_v63 = vmul.f32 %v4902_v54, %v367_v57  ;;  %v360_v19 = vmul.f32 %v359_v11, %v5526_v45  ;;  %v5289_v57 = vmov 17  }
 0x394   :  { %4785 = vset.pattern.permute.xlu1 %v5289_v57 }
 0x395   :  { %v369_v3 = vmul.f32 0.5, %v368_v63  ;;  %v362_v36 = vsel %vm361_vm9, %v5526_v45, %v360_v19 }
 0x396   :  { %v365_v53 = vsel %vm363_vm14, %v364_v27, %v362_v36 }
 0x397   :  { %v370_v7 = vsub.f32 1.5, %v369_v3  ;;  %v385_v63 = vperm.slane %v365_v53, %v5545_v26 }
 0x399   :  { %v371_v12 = vmul.f32 %v4902_v54, %v370_v7 }
 0x39b   :  { %v372_v20 = vmul.f32 %v371_v12, %v329_v48 }
 0x39d   :  { %v374_v38 = vsel %vm373_vm11, %v329_v48, %v372_v20  ;;  %vm7008_vm11 = vcmask 19456  }
 0x39e   :  { %v377_v54 = vsel %vm375_vm15, %v376_v34, %v374_v38 }
 0x39f   :  { %v386_v0 = vperm.slane %v377_v54, %v5554_v51 }
 0x3a1   :  { %v387_v3 = vsel %vm7015_vm0, %v386_v0, %v385_v63 }
 0x3a2   :  { %v388_v7 = vsel %vm297_vm1, %v387_v3, %v384_v2  ;;  %v390_v8 = vsel %vm310_vm8, %v387_v3, %v384_v2  ;;  %v226_v3 = vrot.slane %v5401_v10, 6 }
 0x3a3   :  { %v392_v19 = vsel %vm179_vm5, %v388_v7, %v390_v8 }
 0x3b9   :  { %v397_v18 = vpop.xlane.xlu0 %396 }
 0x3ba   :  { %4903 = vrsqrt.f32 %v397_v18  ;;  %vm405_vm9 = vcmp.eq.f32.partialorder %v397_v18, inf  ;;  %v408_v11 = vand.u32 2147483648, %v397_v18  ;;  %vm407_vm10 = vcmp.eq.f32.partialorder %v397_v18, 0.0 }
 0x3bb   :  { %v5538_v22 = vpop.xlane.xlu2 %250  ;;  %v5540_v23 = vpop.xlane.xlu1 %247 }
 0x3bc   :  { %v291_v36 = vperm.slane %v5538_v22, %v5554_v51 }
 0x3c0   :  { %v4904_v43 = vpop.eup %4903 }
 0x3c1   :  { %v399_v56 = vmul.f32 %v4904_v43, %v397_v18  ;;  %v254_v61 = vpop.xlane.xlu0 %253 }
 0x3c2   :  { %v294_v38 = vperm.slane %v254_v61, %v5545_v26 }
 0x3c3   :  { %v400_v45 = vmul.f32 %v4904_v43, %v399_v56  ;;  %v273_v59 = vpop.xlane.xlu2 %272  ;;  %v257_v48 = vpop.xlane.xlu1 %256 }
 0x3c4   :  { %v295_v27 = vperm.slane %v257_v48, %v5554_v51  ;;  %v304_v40 = vperm.slane %v273_v59, %v5545_v26 }
 0x3c5   :  { %v401_v1 = vmul.f32 0.5, %v400_v45 }
 0x3c6   :  { %v296_v54 = vsel %vm7015_vm0, %v295_v27, %v294_v38 }
 0x3c7   :  { %v402_v47 = vsub.f32 1.5, %v401_v1 }
 0x3c9   :  { %v403_v4 = vmul.f32 %v4904_v43, %v402_v47  ;;  %v276_v13 = vpop.xlane.xlu0 %275 }
 0x3ca   :  { %v305_v29 = vperm.slane %v276_v13, %v5554_v51 }
 0x3cb   :  { %v279_v5 = vpop.xlane.xlu1 %278  ;;  %v404_v6 = vmul.f32 %v403_v4, %v397_v18  ;;  %v282_v9 = vpop.xlane.xlu2 %281 }
 0x3cc   :  { %v308_v20 = vperm.slane %v282_v9, %v5554_v51  ;;  %v307_v21 = vperm.slane %v279_v5, %v5545_v26  ;;  %v306_v55 = vsel %vm7015_vm0, %v305_v29, %v304_v40 }
 0x3cd   :  { %v406_v12 = vsel %vm405_vm9, %v397_v18, %v404_v6  ;;  %v289_v18 = vperm.slane %v5540_v23, %v5545_v26 }
 0x3ce   :  { %v409_v17 = vsel %vm407_vm10, %v408_v11, %v406_v12  ;;  %v309_v43 = vsel %vm7015_vm0, %v308_v20, %v307_v21  ;;  %v5292_v20 = vmov 19   ;;  %v5293_v21 = vmov 18  }
 0x3cf   :  { %v410_v24 = vmul.f32 %v409_v17, %v392_v19  ;;  %v311_v22 = vsel %vm310_vm8, %v309_v43, %v306_v55  ;;  %v293_v23 = vsel %vm7015_vm0, %v291_v36, %v289_v18  ;;  %4787 = vset.pattern.permute.xlu2 %v5292_v20 }
 0x3d0   :  { %v298_v45 = vsel %vm297_vm1, %v296_v54, %v293_v23 }
 0x3d1   :  { %v411_v34 = vmax.f32 %v410_v24, 1e-08  ;;  %v313_v48 = vsel %vm179_vm5, %v298_v45, %v311_v22 }
 0x3d3   :  { %v198_v50 = vpop.xlane.xlu1 %197  ;;  %4905 = vrcp.f32 %v411_v34 }
 0x3d4   :  { %v199_v53 = vsub.f32 %v5506_v58, %v198_v50  ;;  %4907 = vtanh.f32 %v191_v25 }
 0x3d6   :  { %v200_v56 = vmul.f32 1.442695, %v199_v53 }
 0x3d8   :  { %4909 = vpow2.f32 %v200_v56 }
 0x3d9   :  { %v4906_v59 = vpop.eup %4905 }
 0x3da   :  { %v4908_v61 = vpop.eup %4907  ;;  %v413_v62 = vmul.f32 %v4906_v59, %v313_v48 }
 0x3db   :  { %v193_v63 = vadd.f32 1.0, %v4908_v61 }
 0x3dc   :  { %v417_v46 = vpop.permute.xlu0 %416 }
 0x3dd   :  { %v419_v58 = vmul.f32 %v417_v46, %v413_v62  ;;  %v194_v47 = vmul.f32 0.5, %v193_v63  ;;  %v5294_v46 = vmov 20  }
 0x3de   :  { %v4910_v0 = vpop.eup %4909 }
 0x3df   :  { %203 = vrot.lane.b32.xlu1 %v4910_v0, %s5290_s2  ;;  %v420_v1 = vsel %vm394_vm6, %v419_v58, -inf  ;;  %v450_v2 = vsub.f32 1.0, %v194_v47 }
 0x3e0   :  { %421 = vmax.xlane.f32.xlu2 %v420_v1 }
 0x3e7   :  { %453 = vperm.xlu1 %4785, %v450_v2   ;;  %v225_v2 = vadd.f32 1.0, %v5523_v44 }
 0x3ef   :  { %446 = vperm.xlu1 %4785, %v194_v47  }
 0x3f7   :  { %4786 = vset.pattern.permute.xlu1 %v5293_v21 }
 0x3f8   :  { %227 = vrot.lane.b32.xlu2 %v226_v3, %s5285_s20  ;;  %s5295_s20 = smov 15   ;;  %v5299_v3 = vmov 21  }
 0x451   :  { %v204_v4 = vpop.permute.xlu1 %203 }
 0x452   :  { %v207_v5 = vsel %vm7008_vm11, %v204_v4, 0.0 }
 0x453   :  { %v422_v6 = vpop.xlane.xlu2 %421  ;;  %208 = vadd.xlane.f32.xlu0 %v207_v5 }
 0x454   :  { %v423_v7 = vsub.f32 %v419_v58, %v422_v6 }
 0x456   :  { %v424_v8 = vmul.f32 1.442695, %v423_v7 }
 0x458   :  { %4911 = vpow2.f32 %v424_v8 }
 0x459   :  { %v454_v11 = vpop.permute.xlu1 %453 }
 0x45b   :  { %v228_v9 = vpop.permute.xlu2 %227 }
 0x45c   :  { %v230_v12 = vsel %vm179_vm5, %v5401_v10, %v228_v9 }
 0x45d   :  { %v456_v13 = vmul.f32 %v454_v11, %v230_v12 }
 0x45e   :  { %v4912_v17 = vpop.eup %4911 }
 0x45f   :  { %458 = vrot.lane.b32.xlu1 %v456_v13, %s5291_s19  ;;  %v426_v19 = vsel %vm394_vm6, %v4912_v17, 0.0 }
 0x460   :  { %427 = vadd.xlane.f32.xlu2 %v426_v19 }
 0x461   :  { %v447_v59 = vpop.permute.xlu1 %446 }
 0x4c6   :  { %v209_v24 = vpop.xlane.xlu0 %208 }
 0x4c7   :  { %4913 = vrcp.f32 %v209_v24  ;;  %v221_v34 = vand.u32 2147483648, %v209_v24  ;;  %v219_v18 = vand.u32 2147483647, %v209_v24  ;;  %vm215_vm13 = vweird.f32 %v209_v24 }
 0x4c9   :  { %v222_v40 = vor.u32 1.1754944e-38, %v221_v34  ;;  %vm220_vm15 = vcmp.eq.f32.partialorder %v219_v18, 8.507059e+37 }
 0x4cd   :  { %v4914_v25 = vpop.eup %4913 }
 0x4ce   :  { %v211_v27 = vmul.f32 %v4914_v25, %v209_v24  ;;  %vm216_vm12 = vweird.f32 %v4914_v25 }
 0x4cf   :  { %vm217_vm14 = vmor %vm215_vm13, %vm216_vm12  ;;  %vm477_vm13 = vcmask 121856  }
 0x4d0   :  { %v212_v29 = vsub.f32 1.0, %v211_v27 }
 0x4d1   :  { %v459_v1 = vpop.permute.xlu1 %458 }
 0x4d2   :  { %v213_v10 = vmul.f32 %v4914_v25, %v212_v29 }
 0x4d3   :  { %v428_v36 = vpop.xlane.xlu2 %427 }
 0x4d4   :  { %4915 = vrcp.f32 %v428_v36  ;;  %v214_v38 = vadd.f32 %v4914_v25, %v213_v10  ;;  %v440_v22 = vand.u32 2147483648, %v428_v36  ;;  %v438_v45 = vand.u32 2147483647, %v428_v36 }
 0x4d5   :  { %vm434_vm10 = vweird.f32 %v428_v36 }
 0x4d6   :  { %v218_v43 = vsel %vm217_vm14, %v4914_v25, %v214_v38  ;;  %v441_v61 = vor.u32 1.1754944e-38, %v440_v22  ;;  %vm439_vm12 = vcmp.eq.f32.partialorder %v438_v45, 8.507059e+37 }
 0x4d7   :  { %v223_v50 = vsel %vm220_vm15, %v222_v40, %v218_v43  ;;  %v5609_v43 = vshrl.u32 %v287_v16, 7 }
 0x4d8   :  { %v224_v53 = vmul.f32 %v4910_v0, %v223_v50 }
 0x4d9   :  { %v5612_v50 = vadd.s32 8, %v5609_v43 }
 0x4da   :  { %v4916_v54 = vpop.eup %4915  ;;  %486 = vperm.xlu2 %4787, %v224_v53   ;;  %481 = vperm.xlu1 %4786, %v224_v53  }
 0x4db   :  { %v430_v55 = vmul.f32 %v4916_v54, %v428_v36  ;;  %vm435_vm9 = vweird.f32 %v4916_v54  ;;  %4793 = vset.pattern.permute.xlu0 %v5612_v50 }
 0x4dc   :  { %vm436_vm11 = vmor %vm434_vm10, %vm435_vm9 }
 0x4dd   :  { %v431_v56 = vsub.f32 1.0, %v430_v55 }
 0x4df   :  { %v432_v23 = vmul.f32 %v4916_v54, %v431_v56 }
 0x4e1   :  { %v433_v48 = vadd.f32 %v4916_v54, %v432_v23 }
 0x4e2   :  { %4788 = vset.pattern.permute.xlu1 %v5294_v46  ;;  %4790 = vset.pattern.permute.xlu2 %v5609_v43 }
 0x4e3   :  { %v437_v62 = vsel %vm436_vm11, %v4916_v54, %v433_v48  ;;  %vm469_vm11 = vcmask 7168  }
 0x4e4   :  { %v442_v58 = vsel %vm439_vm12, %v441_v61, %v437_v62 }
 0x4e5   :  { %v443_v63 = vmul.f32 %v4912_v17, %v442_v58 }
 0x4e7   :  { %v449_v0 = vmul.f32 %v447_v59, %v443_v63 }
 0x4e9   :  { %v461_v47 = vadd.f32 %v459_v1, %v449_v0 }
 0x4eb   :  { %474 = vrot.lane.b32.xlu0 %v461_v47, %s5295_s20  ;;  %463 = vrot.lane.b32.xlu1 %v461_v47, %s5296_s21 }
 0x4f3   :  { %466 = vrot.lane.b32.xlu1 %v461_v47, %s5297_s22 }
 0x4fb   :  { %471 = vrot.lane.b32.xlu1 %v461_v47, %s5298_s23 }
 0x503   :  { %492 = vperm.xlu1 %4788, %v224_v53  }
 0x50b   :  { %4789 = vset.pattern.permute.xlu1 %v5299_v3 }
 0x50c   :  { %502 = vperm.xlu1 %4789, %v225_v2  }
 0x514   :  { %4791 = vset.pattern.permute.xlu1 %v5612_v50 }
 0x534   :  { %v487_v9 = vpop.permute.xlu2 %486 }
 0x535   :  { %v489_v12 = vmul.f32 %v487_v9, %v461_v47 }
 0x54c   :  { %v482_v4 = vpop.permute.xlu1 %481 }
 0x55d   :  { %v464_v5 = vpop.permute.xlu1 %463  ;;  %v475_v13 = vpop.permute.xlu0 %474 }
 0x565   :  { %v467_v6 = vpop.permute.xlu1 %466 }
 0x566   :  { %v470_v8 = vsel %vm469_vm11, %v464_v5, %v467_v6 }
 0x567   :  { %v484_v11 = vmul.f32 %v482_v4, %v470_v8 }
 0x569   :  { %v490_v44 = vadd.f32 %v489_v12, %v484_v11 }
 0x56d   :  { %v472_v7 = vpop.permute.xlu1 %471 }
 0x56e   :  { %v478_v17 = vsel %vm477_vm13, %v472_v7, %v475_v13 }
 0x575   :  { %v493_v19 = vpop.permute.xlu1 %492 }
 0x576   :  { %v495_v24 = vmul.f32 %v493_v19, %v478_v17 }
 0x578   :  { %v496_v25 = vadd.f32 %v495_v24, %v490_v44 }
 0x57a   :  { %v497_v27 = vmax.f32 %v496_v25, 1e-30 }
 0x57c   :  { %4917 = vlog2.f32 %v497_v27 }
 0x57e   :  { %v503_v34 = vpop.permute.xlu1 %502 }
 0x582   :  { %v4918_v29 = vpop.eup %4917 }
 0x583   :  { %v499_v10 = vmul.f32 0.6931472, %v4918_v29 }
 0x585   :  { %v505_v36 = vmul.f32 %v503_v34, %v499_v10 }
 0x587   :  { %v506_v18 = vmul.f32 1.442695, %v505_v36 }
 0x589   :  { %4919 = vpow2.f32 %v506_v18 }
 0x58f   :  { %v4920_v38 = vpop.eup %4919 }
 0x590   :  { %v508_v40 = vsel %vm394_vm6, %v4920_v38, 0.0 }
 0x591   :  { %509 = vadd.xlane.f32.xlu0 %v508_v40 }
 0x604   :  { %v510_v53 = vpop.xlane.xlu0 %509 }
 0x605   :  { %v511_v54 = vadd.f32 1e-16, %v510_v53 }
 0x607   :  { %4921 = vrcp.f32 %v511_v54  ;;  %v523_v23 = vand.u32 2147483648, %v511_v54  ;;  %v521_v16 = vand.u32 2147483647, %v511_v54  ;;  %vm517_vm15 = vweird.f32 %v511_v54 }
 0x609   :  { %v524_v48 = vor.u32 1.1754944e-38, %v523_v23  ;;  %vm522_vm10 = vcmp.eq.f32.partialorder %v521_v16, 8.507059e+37 }
 0x60d   :  { %v4922_v55 = vpop.eup %4921 }
 0x60e   :  { %v513_v56 = vmul.f32 %v4922_v55, %v511_v54  ;;  %vm518_vm14 = vweird.f32 %v4922_v55 }
 0x60f   :  { %vm519_vm9 = vmor %vm517_vm15, %vm518_vm14 }
 0x610   :  { %v514_v22 = vsub.f32 1.0, %v513_v56 }
 0x612   :  { %v515_v45 = vmul.f32 %v4922_v55, %v514_v22 }
 0x614   :  { %v516_v59 = vadd.f32 %v4922_v55, %v515_v45 }
 0x616   :  { %v520_v61 = vsel %vm519_vm9, %v4922_v55, %v516_v59 }
 0x617   :  { %v525_v62 = vsel %vm522_vm10, %v524_v48, %v520_v61 }
 0x618   :  { %v5617_v58 = vmul.f32 %v4920_v38, %v525_v62 }
 0x61a   :  { %v579_v63 = vperm.slane %v5617_v58, 2  ;;  %v527_v0 = vperm.slane %v5617_v58, 0  ;;  %v540_v1 = vperm.slane %v5617_v58, 1 }
 0x61c   :  { %590 = vperm.xlu0 %4793, %v579_v63   ;;  %538 = vperm.xlu1 %4791, %v527_v0  }
 0x61d   :  { %532 = vperm.xlu2 %4790, %v527_v0  }
 0x624   :  { %551 = vperm.xlu1 %4791, %v540_v1   ;;  %4797 = vset.pattern.permute.xlu0 %v5289_v57 }
 0x625   :  { %545 = vperm.xlu2 %4790, %v540_v1  }
 0x62c   :  { %4792 = vset.pattern.permute.xlu1 %v5609_v43 }
 0x62d   :  { %672 = vrot.lane.b32.xlu2 %v5457_v35, %s5291_s19 }
 0x677   :  { %v533_v47 = vpop.permute.xlu2 %532 }
 0x678   :  { %v553_v2 = vmul.f32 %v533_v47, %v5479_v41 }
 0x67a   :  { %v557_v6 = vsel %vm245_vm4, %v553_v2, 0.0  ;;  %v575_v2 = vmul.f32 0.5, %v5472_v39 }
 0x67f   :  { %v546_v8 = vpop.permute.xlu2 %545 }
 0x680   :  { %v555_v12 = vmul.f32 %v546_v8, %v5493_v49 }
 0x682   :  { %v566_v35 = vsel %vm245_vm4, %v555_v12, 0.0 }
 0x687   :  { %v673_v54 = vpop.permute.xlu2 %672 }
 0x68e   :  { %v539_v4 = vpop.permute.xlu1 %538 }
 0x68f   :  { %v554_v5 = vmul.f32 %v539_v4, %v5484_v42 }
 0x691   :  { %v558_v7 = vsel %vm245_vm4, %v554_v5, 0.0 }
 0x692   :  { %v559_v9 = vadd.f32 %v558_v7, %v557_v6  ;;  %v592_v6 = vperm.slane %v5617_v58, 3  ;;  %v591_v7 = vpop.permute.xlu0 %590 }
 0x694   :  { %v560_v11 = vrot.slane %v559_v9, 4 }
 0x696   :  { %v561_v13 = vadd.f32 %v560_v11, %v559_v9  ;;  %v552_v17 = vpop.permute.xlu1 %551 }
 0x697   :  { %v556_v19 = vmul.f32 %v552_v17, %v5499_v52 }
 0x698   :  { %v562_v24 = vrot.slane %v561_v13, 2 }
 0x699   :  { %v567_v44 = vsel %vm245_vm4, %v556_v19, 0.0 }
 0x69a   :  { %v568_v25 = vadd.f32 %v567_v44, %v566_v35  ;;  %v563_v29 = vadd.f32 %v562_v24, %v561_v13 }
 0x69c   :  { %v569_v27 = vrot.slane %v568_v25, 4  ;;  %v564_v18 = vrot.slane %v563_v29, 1 }
 0x69e   :  { %v570_v10 = vadd.f32 %v569_v27, %v568_v25  ;;  %v565_v40 = vadd.f32 %v564_v18, %v563_v29 }
 0x6a0   :  { %v571_v34 = vrot.slane %v570_v10, 2 }
 0x6a2   :  { %v572_v36 = vadd.f32 %v571_v34, %v570_v10  ;;  %v616_v10 = vperm.slane %v5472_v39, 0 }
 0x6a4   :  { %v573_v38 = vrot.slane %v572_v36, 1  ;;  %v621_v34 = vmul.f32 %v616_v10, %v591_v7 }
 0x6a6   :  { %v574_v53 = vadd.f32 %v573_v38, %v572_v36  ;;  %v615_v36 = vrot.slane %v5472_v39, 1 }
 0x6a8   :  { %v5637_v55 = vsel %vm297_vm1, %v574_v53, %v565_v40  ;;  %v617_v18 = vperm.slane %v615_v36, 0  ;;  %v5678_v53 = vld [vmem:[%s7000_s4 + $0x28] sm:$0xff] }
 0x6a9   :  { %v675_v56 = vsel %vm245_vm4, %v5637_v55, %v673_v54  ;;  %v5684_v54 = vld [vmem:[%s7000_s4 + $0x20] sm:$0xff] }
 0x6aa   :  { %4746 = vmatmul.msk.f32.vlgmr.msra.gmra.mxu3 %vm95_vm2, %v675_v56  ;;  %v5690_v56 = vld [vmem:[%s7000_s4 + $0x18] sm:$0xff] }
 0x6ab   :  { %2974 = vmatpush.msra.mxu3 %v5424_v30 }
 0x6ad   :  { %2975 = vmatpush.msra.mxu3 %v5429_v31  ;;  %v709_v31 = vrot.slane %v5417_v28, 6 }
 0x6af   :  { %2976 = vmatpush.msra.mxu3 %v5436_v32 }
 0x6b1   :  { %2977 = vmatpush.msra.mxu3 %v5443_v33 }
 0x72d   :  { %v696_v22 = vpop.f32.mrf.mxu3 }
 0x72e   :  { %v700_v23 = vrot.slane %v696_v22, 6 }
 0x730   :  { %v702_v45 = vadd.f32 %v700_v23, %v5410_v15  ;;  %v5696_v23 = vld [vmem:[%s7000_s4 + $0x10] sm:$0xff] }
 0x732   :  { %4923 = vtanh.f32 %v702_v45  ;;  %v703_v59 = vmul.f32 0.5, %v702_v45 }
 0x734   :  { %4925 = vtanh.f32 %v703_v59 }
 0x738   :  { %v4924_v16 = vpop.eup %4923 }
 0x739   :  { %713 = vrot.lane.b32.xlu1 %v4924_v16, %s5284_s1  ;;  %v5702_v16 = vld [vmem:[%s7000_s4 + $0x8] sm:$0xff] }
 0x73a   :  { %v4926_v48 = vpop.eup %4925 }
 0x73b   :  { %v705_v61 = vadd.f32 1.0, %v4926_v48  ;;  %v5708_v48 = vld [vmem:[%s7000_s4] sm:$0xff] }
 0x73d   :  { %v706_v62 = vmul.f32 0.5, %v705_v61 }
 0x73f   :  { %v711_v32 = vmul.f32 %v709_v31, %v706_v62 }
 0x7ab   :  { %v714_v30 = vpop.permute.xlu1 %713 }
 0x7ac   :  { %v716_v0 = vmul.f32 %v714_v30, %v706_v62 }
 0x7ae   :  { %718 = vrot.lane.b32.xlu2 %v716_v0, %s5286_s5 }
 0x808   :  { %v719_v33 = vpop.permute.xlu2 %718 }
 0x809   :  { %v5650_v1 = vadd.f32 %v719_v33, %v711_v32 }
 0x80b   :  { %4927 = vtanh.f32 %v5650_v1 }
 0x80c   :  { %4929 = vtanh.f32 %v575_v2 }
 0x811   :  { %v4928_v47 = vpop.eup %4927 }
 0x812   :  { %724 = vrot.lane.b32.xlu1 %v4928_v47, %s5284_s1  ;;  %v4930_v4 = vpop.eup %4929 }
 0x813   :  { %v577_v5 = vadd.f32 1.0, %v4930_v4 }
 0x815   :  { %v578_v28 = vmul.f32 0.5, %v577_v5 }
 0x817   :  { %v607_v8 = vperm.slane %v578_v28, 0  ;;  %v606_v44 = vrot.slane %v578_v28, 1 }
 0x819   :  { %v612_v9 = vmul.f32 %v607_v8, %v591_v7  ;;  %v608_v24 = vperm.slane %v606_v44, 0 }
 0x81a   :  { %584 = vperm.xlu1 %4792, %v579_v63  }
 0x81b   :  { %v625_v11 = vsub.f32 1.0, %v612_v9 }
 0x822   :  { %4794 = vset.pattern.permute.xlu1 %v5612_v50 }
 0x82a   :  { %603 = vperm.xlu1 %4794, %v592_v6  }
 0x832   :  { %634 = vrot.lane.b32.xlu1 %v625_v11, %s5284_s1 }
 0x833   :  { %4795 = vset.pattern.permute.xlu1 %v5288_v60 }
 0x884   :  { %v725_v12 = vpop.permute.xlu1 %724 }
 0x885   :  { %v5661_v13 = vmul.f32 %v725_v12, %v706_v62 }
 0x887   :  { %v729_v63 = vrot.slane %v5661_v13, 2 }
 0x889   :  { %730 = vrot.lane.b32.xlu2 %v729_v63, %s5286_s5 }
 0x88c   :  { %v585_v17 = vpop.permute.xlu1 %584 }
 0x88d   :  { %v611_v19 = vmul.f32 %v607_v8, %v585_v17  ;;  %v620_v61 = vmul.f32 %v616_v10, %v585_v17 }
 0x88f   :  { %v624_v35 = vsub.f32 1.0, %v611_v19 }
 0x891   :  { %597 = vperm.xlu2 %4790, %v592_v6  }
 0x899   :  { %632 = vrot.lane.b32.xlu2 %v624_v35, %s5284_s1 }
 0x89a   :  { %4799 = vset.pattern.permute.xlu2 %v5292_v20 }
 0x89c   :  { %v604_v25 = vpop.permute.xlu1 %603 }
 0x89d   :  { %v614_v27 = vmul.f32 %v608_v24, %v604_v25  ;;  %v623_v38 = vmul.f32 %v617_v18, %v604_v25 }
 0x89f   :  { %v627_v29 = vsub.f32 1.0, %v614_v27 }
 0x8a1   :  { %638 = vrot.lane.b32.xlu1 %v627_v29, %s5284_s1 }
 0x8a4   :  { %v635_v30 = vpop.permute.xlu1 %634 }
 0x8a5   :  { %v645_v31 = vmul.f32 %v635_v30, %v5484_v42 }
 0x8a9   :  { %654 = vrot.lane.b32.xlu1 %v621_v34, %s5291_s19 }
 0x8b1   :  { %658 = vrot.lane.b32.xlu1 %v623_v38, %s5291_s19 }
 0x8e3   :  { %v731_v40 = vpop.permute.xlu2 %730 }
 0x8e4   :  { %4747 = vmatmul.msk.f32.vlgmr.msrb.gmra.mxu2 %vm7010_vm3, %v731_v40 }
 0x8e5   :  { %2917 = vmatpush.msrb.mxu2 %v5678_v53 }
 0x8e7   :  { %2918 = vmatpush.msrb.mxu2 %v5684_v54 }
 0x8e9   :  { %2919 = vmatpush.msrb.mxu2 %v5690_v56 }
 0x8eb   :  { %v598_v22 = vpop.permute.xlu2 %597  ;;  %2920 = vmatpush.msrb.mxu2 %v5696_v23 }
 0x8ec   :  { %v613_v45 = vmul.f32 %v608_v24, %v598_v22  ;;  %v622_v62 = vmul.f32 %v617_v18, %v598_v22 }
 0x8ed   :  { %2921 = vmatpush.msrb.mxu2 %v5702_v16 }
 0x8ee   :  { %v626_v59 = vsub.f32 1.0, %v613_v45 }
 0x8ef   :  { %2922 = vmatpush.msrb.mxu2 %v5708_v48 }
 0x8f0   :  { %636 = vrot.lane.b32.xlu2 %v626_v59, %s5284_s1 }
 0x8f3   :  { %v633_v5 = vpop.permute.xlu2 %632 }
 0x8f4   :  { %v644_v6 = vmul.f32 %v633_v5, %v5479_v41 }
 0x8f8   :  { %652 = vrot.lane.b32.xlu2 %v620_v61, %s5291_s19 }
 0x900   :  { %656 = vrot.lane.b32.xlu2 %v622_v62, %s5291_s19 }
 0x913   :  { %v639_v0 = vpop.permute.xlu1 %638 }
 0x914   :  { %v647_v42 = vmul.f32 %v639_v0, %v5499_v52 }
 0x91b   :  { %v655_v32 = vpop.permute.xlu1 %654 }
 0x91c   :  { %v5715_v33 = vadd.f32 %v655_v32, %v645_v31 }
 0x91e   :  { %v5718_v47 = vadd.f32 1e-16, %v5715_v33 }
 0x920   :  { %v880_v2 = vmul.f32 %v5718_v47, %v5718_v47 }
 0x922   :  { %v886_v4 = vsel %vm245_vm4, %v880_v2, 0.0 }
 0x923   :  { %887 = vadd.xlane.f32.xlu1 %v886_v4  ;;  %v659_v7 = vpop.permute.xlu1 %658 }
 0x924   :  { %v5727_v11 = vadd.f32 %v659_v7, %v647_v42 }
 0x926   :  { %v806_v19 = vadd.f32 1e-16, %v5727_v11 }
 0x928   :  { %v882_v44 = vmul.f32 %v806_v19, %v806_v19 }
 0x92a   :  { %v892_v24 = vsel %vm245_vm4, %v882_v44, 0.0 }
 0x94a   :  { %v637_v28 = vpop.permute.xlu2 %636 }
 0x94b   :  { %v646_v29 = vmul.f32 %v637_v28, %v5493_v49 }
 0x952   :  { %v653_v8 = vpop.permute.xlu2 %652 }
 0x953   :  { %v5725_v9 = vadd.f32 %v653_v8, %v644_v6 }
 0x955   :  { %v803_v12 = vadd.f32 1e-16, %v5725_v9 }
 0x957   :  { %v879_v17 = vmul.f32 %v803_v12, %v803_v12 }
 0x959   :  { %v883_v35 = vsel %vm245_vm4, %v879_v17, 0.0 }
 0x95a   :  { %884 = vadd.xlane.f32.xlu2 %v883_v35  ;;  %v657_v27 = vpop.permute.xlu2 %656 }
 0x95b   :  { %v5741_v10 = vadd.f32 %v657_v27, %v646_v29 }
 0x95d   :  { %v805_v34 = vadd.f32 1e-16, %v5741_v10 }
 0x95f   :  { %v881_v36 = vmul.f32 %v805_v34, %v805_v34 }
 0x961   :  { %v889_v18 = vsel %vm245_vm4, %v881_v36, 0.0 }
 0x962   :  { %893 = vadd.xlane.f32.xlu2 %v892_v24 }
 0x967   :  { %v751_v41 = vpop.f32.mrf.mxu2 }
 0x968   :  { %v5734_v25 = vadd.f32 %v5469_v37, %v751_v41 }
 0x96a   :  { %v755_v52 = vrot.slane %v5734_v25, 6 }
 0x96c   :  { %756 = vrot.lane.b32.xlu0 %v755_v52, %s5287_s30 }
 0x996   :  { %890 = vadd.xlane.f32.xlu0 %v889_v18 }
 0x9de   :  { %v757_v38 = vpop.permute.xlu0 %756 }
 0x9df   :  { %v5747_v37 = vsel %vm179_vm5, %v5734_v25, %v757_v38 }
 0x9e0   :  { %v760_v40 = vadd.f32 1e-16, %v5747_v37  ;;  %v762_v0 = vand.u32 2147483647, %v5747_v37 }
 0x9e2   :  { %829 = vst [vmem:[#allocation1] sm:$0xff] %v760_v40  ;;  %v958_v22 = vmul.f32 %v760_v40, %v760_v40  ;;  %v809_v45 = vperm.slane %v760_v40, 0  ;;  %v808_v59 = vrot.slane %v760_v40, 1  ;;  %v763_v6 = vsub.f32 0.0, %v762_v0 }
 0x9e4   :  { %v959_v49 = vsel %vm394_vm6, %v958_v22, 0.0  ;;  %v814_v61 = vmul.f32 %v809_v45, %v5718_v47  ;;  %v813_v62 = vmul.f32 %v809_v45, %v803_v12  ;;  %v810_v30 = vperm.slane %v808_v59, 0 }
 0x9e5   :  { %960 = vadd.xlane.f32.xlu1 %v959_v49  ;;  %v764_v24 = vmul.f32 1.442695, %v763_v6  ;;  %v774_v22 = vsel %vm7009_vm7, %v5747_v37, -inf  ;;  %v761_v45 = vmax.f32 %v5747_v37, 0.0 }
 0x9e6   :  { %v820_v31 = vsel %vm245_vm4, %v814_v61, 0.0  ;;  %v817_v32 = vsel %vm245_vm4, %v813_v62, 0.0  ;;  %v815_v2 = vmul.f32 %v810_v30, %v805_v34  ;;  %v816_v28 = vmul.f32 %v810_v30, %v806_v19  ;;  %v885_v30 = vpop.xlane.xlu2 %884 }
 0x9e7   :  { %821 = vadd.xlane.f32.xlu0 %v820_v31  ;;  %818 = vadd.xlane.f32.xlu2 %v817_v32  ;;  %4931 = vpow2.f32 %v764_v24  ;;  %v888_v32 = vpop.xlane.xlu1 %887  ;;  %vm902_vm14 = vcmp.eq.f32.partialorder %v885_v30, inf  ;;  %vm904_vm7 = vcmp.eq.f32.partialorder %v885_v30, 0.0 }
 0x9e8   :  { %v823_v8 = vsel %vm245_vm4, %v815_v2, 0.0  ;;  %v826_v35 = vsel %vm245_vm4, %v816_v28, 0.0  ;;  %vm914_vm9 = vcmp.eq.f32.partialorder %v888_v32, inf }
 0x9e9   :  { %v831_v4 = vld [vmem:[#allocation1 + $0x2] ss:$9 sm:$0xff] }
 0x9ea   :  { %v834_v5 = vperm.slane %v831_v4, 0  ;;  %v833_v7 = vld [vmem:[#allocation1 + $0x3] ss:$9 sm:$0xff] }
 0x9eb   :  { %v835_v44 = vperm.slane %v833_v7, 0 }
 0x9ec   :  { %v838_v42 = vmul.f32 %v834_v5, %v803_v12  ;;  %v839_v41 = vmul.f32 %v834_v5, %v5718_v47  ;;  %v770_v47 = vmul.f32 0.5, %v5747_v37 }
 0x9ed   :  { %824 = vadd.xlane.f32.xlu1 %v823_v8  ;;  %v841_v27 = vmul.f32 %v835_v44, %v806_v19  ;;  %v840_v29 = vmul.f32 %v835_v44, %v805_v34  ;;  %v4932_v38 = vpop.eup %4931 }
 0x9ee   :  { %v842_v17 = vsel %vm245_vm4, %v838_v42, 0.0  ;;  %v845_v36 = vsel %vm245_vm4, %v839_v41, 0.0  ;;  %v766_v40 = vadd.f32 1.0, %v4932_v38  ;;  %v894_v31 = vpop.xlane.xlu2 %893 }
 0x9ef   :  { %843 = vadd.xlane.f32.xlu0 %v842_v17  ;;  %827 = vadd.xlane.f32.xlu2 %v826_v35  ;;  %v851_v18 = vsel %vm245_vm4, %v841_v27, 0.0  ;;  %v848_v12 = vsel %vm245_vm4, %v840_v29, 0.0  ;;  %vm938_vm15 = vcmp.eq.f32.partialorder %v894_v31, inf  ;;  %vm940_vm3 = vcmp.eq.f32.partialorder %v894_v31, 0.0 }
 0x9f0   :  { %4933 = vlog2.f32 %v766_v40 }
 0x9f1   :  { %4935 = vtanh.f32 %v770_v47 }
 0x9f5   :  { %846 = vadd.xlane.f32.xlu1 %v845_v36 }
 0x9f6   :  { %v4934_v19 = vpop.eup %4933 }
 0x9f7   :  { %852 = vadd.xlane.f32.xlu0 %v851_v18  ;;  %849 = vadd.xlane.f32.xlu2 %v848_v12  ;;  %v768_v34 = vmul.f32 0.6931472, %v4934_v19  ;;  %v4936_v49 = vpop.eup %4935 }
 0x9f8   :  { %v772_v61 = vadd.f32 1.0, %v4936_v49 }
 0x9f9   :  { %v5766_v59 = vadd.f32 %v768_v34, %v761_v45 }
 0x9fa   :  { %v5769_v62 = vmul.f32 0.5, %v772_v61 }
 0x9ff   :  { %775 = vmax.xlane.f32.xlu2 %v774_v22 }
 0xa09   :  { %v891_v0 = vpop.xlane.xlu0 %890 }
 0xa0a   :  { %4937 = vrsqrt.f32 %v891_v0  ;;  %vm926_vm12 = vcmp.eq.f32.partialorder %v891_v0, inf  ;;  %vm928_vm10 = vcmp.eq.f32.partialorder %v891_v0, 0.0 }
 0xa0b   :  { %4939 = vrsqrt.f32 %v885_v30 }
 0xa0c   :  { %4941 = vrsqrt.f32 %v894_v31 }
 0xa0d   :  { %4943 = vrsqrt.f32 %v888_v32 }
 0xa0e   :  { %980 = vperm.xlu1 %4795, %v5766_v59  }
 0xa10   :  { %v4938_v2 = vpop.eup %4937 }
 0xa11   :  { %v4940_v4 = vpop.eup %4939  ;;  %v920_v28 = vmul.f32 %v4938_v2, %v891_v0 }
 0xa12   :  { %v4942_v5 = vpop.eup %4941  ;;  %v896_v7 = vmul.f32 %v4940_v4, %v885_v30 }
 0xa13   :  { %v4944_v6 = vpop.eup %4943  ;;  %v932_v8 = vmul.f32 %v4942_v5, %v894_v31  ;;  %v921_v17 = vmul.f32 %v4938_v2, %v920_v28 }
 0xa14   :  { %v908_v42 = vmul.f32 %v4944_v6, %v888_v32  ;;  %v897_v35 = vmul.f32 %v4940_v4, %v896_v7 }
 0xa15   :  { %v933_v44 = vmul.f32 %v4942_v5, %v932_v8  ;;  %v922_v41 = vmul.f32 0.5, %v921_v17 }
 0xa16   :  { %4796 = vset.pattern.permute.xlu1 %v5289_v57  ;;  %v909_v24 = vmul.f32 %v4944_v6, %v908_v42  ;;  %v898_v27 = vmul.f32 0.5, %v897_v35  ;;  %v929_v35 = vand.u32 2147483648, %v891_v0 }
 0xa17   :  { %1010 = vperm.xlu1 %4796, %v5769_v62   ;;  %v934_v29 = vmul.f32 0.5, %v933_v44  ;;  %v923_v18 = vsub.f32 1.5, %v922_v41 }
 0xa18   :  { %v910_v36 = vmul.f32 0.5, %v909_v24  ;;  %v899_v12 = vsub.f32 1.5, %v898_v27 }
 0xa19   :  { %v935_v38 = vsub.f32 1.5, %v934_v29  ;;  %v924_v22 = vmul.f32 %v4938_v2, %v923_v18  ;;  %v917_v29 = vand.u32 2147483648, %v888_v32 }
 0xa1a   :  { %v911_v40 = vsub.f32 1.5, %v910_v36  ;;  %v900_v47 = vmul.f32 %v4940_v4, %v899_v12 }
 0xa1b   :  { %v936_v19 = vmul.f32 %v4942_v5, %v935_v38  ;;  %v925_v49 = vmul.f32 %v924_v22, %v891_v0  ;;  %v905_v5 = vand.u32 2147483648, %v885_v30 }
 0xa1c   :  { %v912_v45 = vmul.f32 %v4944_v6, %v911_v40  ;;  %v901_v28 = vmul.f32 %v900_v47, %v885_v30  ;;  %v941_v6 = vand.u32 2147483648, %v894_v31 }
 0xa1d   :  { %v937_v7 = vmul.f32 %v936_v19, %v894_v31  ;;  %v927_v42 = vsel %vm926_vm12, %v891_v0, %v925_v49  ;;  %vm916_vm12 = vcmp.eq.f32.partialorder %v888_v32, 0.0 }
 0xa1e   :  { %v913_v8 = vmul.f32 %v912_v45, %v888_v32  ;;  %v903_v2 = vsel %vm902_vm14, %v885_v30, %v901_v28  ;;  %v930_v24 = vsel %vm928_vm10, %v929_v35, %v927_v42  ;;  %vm7016_vm14 = vcmask 19456  }
 0xa1f   :  { %4798 = vset.pattern.permute.xlu1 %v5293_v21  ;;  %v939_v4 = vsel %vm938_vm15, %v894_v31, %v937_v7  ;;  %v906_v36 = vsel %vm904_vm7, %v905_v5, %v903_v2  ;;  %v950_v40 = vperm.slane %v930_v24, %v5545_v26 }
 0xa20   :  { %v915_v27 = vsel %vm914_vm9, %v888_v32, %v913_v8  ;;  %v942_v18 = vsel %vm940_vm3, %v941_v6, %v939_v4  ;;  %v947_v19 = vperm.slane %v906_v36, %v5545_v26 }
 0xa21   :  { %v918_v22 = vsel %vm916_vm12, %v917_v29, %v915_v27  ;;  %v951_v0 = vperm.slane %v942_v18, %v5554_v51 }
 0xa22   :  { %v948_v28 = vperm.slane %v918_v22, %v5554_v51 }
 0xa23   :  { %v952_v30 = vsel %vm7015_vm0, %v951_v0, %v950_v40 }
 0xa24   :  { %v949_v8 = vsel %vm7015_vm0, %v948_v28, %v947_v19 }
 0xa25   :  { %v953_v32 = vsel %vm297_vm1, %v952_v30, %v949_v8  ;;  %v955_v35 = vsel %vm310_vm8, %v952_v30, %v949_v8 }
 0xa26   :  { %v957_v6 = vsel %vm179_vm5, %v953_v32, %v955_v35 }
 0xa58   :  { %v961_v34 = vpop.xlane.xlu1 %960 }
 0xa59   :  { %4945 = vrsqrt.f32 %v961_v34  ;;  %vm969_vm3 = vcmp.eq.f32.partialorder %v961_v34, inf  ;;  %v972_v4 = vand.u32 2147483648, %v961_v34  ;;  %vm971_vm7 = vcmp.eq.f32.partialorder %v961_v34, 0.0 }
 0xa5a   :  { %v5774_v61 = vpop.xlane.xlu2 %818  ;;  %v5776_v17 = vpop.xlane.xlu0 %821 }
 0xa5b   :  { %v858_v0 = vperm.slane %v5774_v61, %v5545_v26 }
 0xa5f   :  { %v4946_v44 = vpop.eup %4945 }
 0xa60   :  { %v963_v41 = vmul.f32 %v4946_v44, %v961_v34  ;;  %v825_v7 = vpop.xlane.xlu1 %824 }
 0xa62   :  { %v964_v12 = vmul.f32 %v4946_v44, %v963_v41  ;;  %v828_v38 = vpop.xlane.xlu2 %827  ;;  %v844_v49 = vpop.xlane.xlu0 %843 }
 0xa64   :  { %v965_v47 = vmul.f32 0.5, %v964_v12 }
 0xa66   :  { %v966_v45 = vsub.f32 1.5, %v965_v47  ;;  %v862_v47 = vperm.slane %v828_v38, %v5554_v51 }
 0xa68   :  { %v967_v31 = vmul.f32 %v4946_v44, %v966_v45  ;;  %v847_v36 = vpop.xlane.xlu1 %846  ;;  %v861_v45 = vperm.slane %v825_v7, %v5545_v26 }
 0xa69   :  { %v871_v19 = vperm.slane %v847_v36, %v5554_v51 }
 0xa6a   :  { %v850_v42 = vpop.xlane.xlu2 %849  ;;  %v968_v2 = vmul.f32 %v967_v31, %v961_v34  ;;  %v853_v27 = vpop.xlane.xlu0 %852  ;;  %v863_v30 = vsel %vm7015_vm0, %v862_v47, %v861_v45 }
 0xa6b   :  { %v874_v12 = vperm.slane %v853_v27, %v5554_v51  ;;  %v873_v40 = vperm.slane %v850_v42, %v5545_v26 }
 0xa6c   :  { %v970_v5 = vsel %vm969_vm3, %v961_v34, %v968_v2  ;;  %v859_v34 = vperm.slane %v5776_v17, %v5554_v51 }
 0xa6d   :  { %v973_v24 = vsel %vm971_vm7, %v972_v4, %v970_v5  ;;  %v875_v28 = vsel %vm7015_vm0, %v874_v12, %v873_v40 }
 0xa6e   :  { %v974_v41 = vmul.f32 %v973_v24, %v957_v6  ;;  %v860_v42 = vsel %vm7015_vm0, %v859_v34, %v858_v0 }
 0xa6f   :  { %v864_v32 = vsel %vm297_vm1, %v863_v30, %v860_v42 }
 0xa70   :  { %v975_v44 = vmax.f32 %v974_v41, 1e-08 }
 0xa72   :  { %v776_v29 = vpop.xlane.xlu2 %775  ;;  %4947 = vrcp.f32 %v975_v44  ;;  %v1014_v44 = vsub.f32 1.0, %v5769_v62 }
 0xa73   :  { %v777_v18 = vsub.f32 %v5747_v37, %v776_v29  ;;  %v870_v37 = vperm.slane %v844_v49, %v5545_v26 }
 0xa75   :  { %v778_v22 = vmul.f32 1.442695, %v777_v18  ;;  %v872_v38 = vsel %vm7015_vm0, %v871_v19, %v870_v37 }
 0xa76   :  { %v876_v31 = vsel %vm310_vm8, %v875_v28, %v872_v38 }
 0xa77   :  { %4949 = vpow2.f32 %v778_v22  ;;  %v878_v61 = vsel %vm179_vm5, %v864_v32, %v876_v31 }
 0xa78   :  { %v4948_v8 = vpop.eup %4947 }
 0xa79   :  { %v977_v7 = vmul.f32 %v4948_v8, %v878_v61 }
 0xa7d   :  { %v4950_v17 = vpop.eup %4949 }
 0xa7e   :  { %781 = vrot.lane.b32.xlu2 %v4950_v17, %s5290_s2 }
 0xa80   :  { %v981_v49 = vpop.permute.xlu1 %980 }
 0xa81   :  { %v983_v35 = vmul.f32 %v981_v49, %v977_v7 }
 0xa83   :  { %v984_v2 = vsel %vm394_vm6, %v983_v35, -inf }
 0xa84   :  { %985 = vmax.xlane.f32.xlu0 %v984_v2 }
 0xa89   :  { %v1011_v2 = vpop.permute.xlu1 %1010 }
 0xad8   :  { %v782_v4 = vpop.permute.xlu2 %781 }
 0xad9   :  { %v784_v5 = vsel %vm7016_vm14, %v782_v4, 0.0 }
 0xada   :  { %785 = vadd.xlane.f32.xlu0 %v784_v5 }
 0xaf7   :  { %v986_v6 = vpop.xlane.xlu0 %985 }
 0xaf8   :  { %v987_v24 = vsub.f32 %v983_v35, %v986_v6 }
 0xafa   :  { %v988_v41 = vmul.f32 1.442695, %v987_v24 }
 0xafc   :  { %4951 = vpow2.f32 %v988_v41  ;;  %v802_v41 = vadd.f32 1.0, %v5766_v59 }
 0xb02   :  { %v4952_v27 = vpop.eup %4951 }
 0xb03   :  { %v990_v29 = vsel %vm394_vm6, %v4952_v27, 0.0 }
 0xb04   :  { %991 = vadd.xlane.f32.xlu0 %v990_v29 }
 0xb18   :  { %1017 = vperm.xlu0 %4797, %v1014_v44  }
 0xb20   :  { %4803 = vset.pattern.permute.xlu0 %v5612_v50 }
 0xb4d   :  { %v786_v36 = vpop.xlane.xlu0 %785 }
 0xb4e   :  { %4953 = vrcp.f32 %v786_v36  ;;  %v798_v22 = vand.u32 2147483648, %v786_v36  ;;  %v796_v19 = vand.u32 2147483647, %v786_v36  ;;  %vm792_vm9 = vweird.f32 %v786_v36 }
 0xb50   :  { %v799_v0 = vor.u32 1.1754944e-38, %v798_v22  ;;  %vm797_vm12 = vcmp.eq.f32.partialorder %v796_v19, 8.507059e+37 }
 0xb54   :  { %v4954_v18 = vpop.eup %4953 }
 0xb55   :  { %v788_v12 = vmul.f32 %v4954_v18, %v786_v36  ;;  %vm793_vm15 = vweird.f32 %v4954_v18 }
 0xb56   :  { %vm794_vm10 = vmor %vm792_vm9, %vm793_vm15 }
 0xb57   :  { %v789_v40 = vsub.f32 1.0, %v788_v12 }
 0xb59   :  { %v790_v47 = vmul.f32 %v4954_v18, %v789_v40 }
 0xb5b   :  { %v791_v34 = vadd.f32 %v4954_v18, %v790_v47 }
 0xb5d   :  { %v795_v45 = vsel %vm794_vm10, %v4954_v18, %v791_v34 }
 0xb5e   :  { %v800_v37 = vsel %vm797_vm12, %v799_v0, %v795_v45 }
 0xb5f   :  { %v801_v62 = vmul.f32 %v4950_v17, %v800_v37 }
 0xb61   :  { %1044 = vperm.xlu2 %4799, %v801_v62   ;;  %1039 = vperm.xlu1 %4798, %v801_v62  }
 0xb69   :  { %4801 = vset.pattern.permute.xlu2 %v5299_v3  ;;  %4800 = vset.pattern.permute.xlu1 %v5294_v46 }
 0xb77   :  { %v992_v28 = vpop.xlane.xlu0 %991 }
 0xb78   :  { %4955 = vrcp.f32 %v992_v28  ;;  %v1004_v8 = vand.u32 2147483648, %v992_v28  ;;  %v1002_v32 = vand.u32 2147483647, %v992_v28  ;;  %vm998_vm7 = vweird.f32 %v992_v28 }
 0xb7a   :  { %v1005_v7 = vor.u32 1.1754944e-38, %v1004_v8  ;;  %vm1003_vm15 = vcmp.eq.f32.partialorder %v1002_v32, 8.507059e+37 }
 0xb7e   :  { %v4956_v30 = vpop.eup %4955 }
 0xb7f   :  { %v994_v38 = vmul.f32 %v4956_v30, %v992_v28  ;;  %vm999_vm3 = vweird.f32 %v4956_v30 }
 0xb80   :  { %vm1000_vm14 = vmor %vm998_vm7, %vm999_vm3  ;;  %vm7017_vm7 = vcmask 261120  }
 0xb81   :  { %v995_v31 = vsub.f32 1.0, %v994_v38 }
 0xb83   :  { %v996_v42 = vmul.f32 %v4956_v30, %v995_v31 }
 0xb85   :  { %v997_v61 = vadd.f32 %v4956_v30, %v996_v42 }
 0xb87   :  { %v1001_v17 = vsel %vm1000_vm14, %v4956_v30, %v997_v61  ;;  %vm7018_vm14 = vcmask 167056  }
 0xb88   :  { %v1006_v49 = vsel %vm1003_vm15, %v1005_v7, %v1001_v17 }
 0xb89   :  { %v1007_v35 = vmul.f32 %v4952_v27, %v1006_v49 }
 0xb8a   :  { %v1018_v4 = vpop.permute.xlu0 %1017 }
 0xb8b   :  { %v1013_v5 = vmul.f32 %v1011_v2, %v1007_v35  ;;  %v1020_v6 = vmul.f32 %v1018_v4, %v5617_v58 }
 0xb8d   :  { %v1021_v24 = vadd.f32 %v1020_v6, %v1013_v5 }
 0xb8f   :  { %1026 = vrot.lane.b32.xlu2 %v1021_v24, %s5297_s22  ;;  %1023 = vrot.lane.b32.xlu1 %v1021_v24, %s5296_s21 }
 0xb97   :  { %1033 = vrot.lane.b32.xlu2 %v1021_v24, %s5295_s20  ;;  %1030 = vrot.lane.b32.xlu1 %v1021_v24, %s5298_s23 }
 0xb9f   :  { %1060 = vperm.xlu2 %4801, %v802_v41   ;;  %1050 = vperm.xlu1 %4800, %v801_v62  }
 0xba7   :  { %4802 = vset.pattern.permute.xlu2 %v5609_v43  ;;  %4805 = vset.pattern.permute.xlu1 %v5609_v43 }
 0xbbb   :  { %v1045_v29 = vpop.permute.xlu2 %1044 }
 0xbbc   :  { %v1047_v40 = vmul.f32 %v1045_v29, %v1021_v24 }
 0xbd3   :  { %v1040_v27 = vpop.permute.xlu1 %1039 }
 0xbe9   :  { %v1027_v44 = vpop.permute.xlu2 %1026 }
 0xbf1   :  { %v1034_v22 = vpop.permute.xlu2 %1033 }
 0xbf9   :  { %v1061_v28 = vpop.permute.xlu2 %1060 }
 0xc01   :  { %v1024_v58 = vpop.permute.xlu1 %1023 }
 0xc02   :  { %v1029_v18 = vsel %vm469_vm11, %v1024_v58, %v1027_v44 }
 0xc03   :  { %v1042_v12 = vmul.f32 %v1040_v27, %v1029_v18 }
 0xc05   :  { %v1048_v59 = vadd.f32 %v1047_v40, %v1042_v12 }
 0xc09   :  { %v1031_v36 = vpop.permute.xlu1 %1030 }
 0xc0a   :  { %v1036_v47 = vsel %vm477_vm13, %v1031_v36, %v1034_v22 }
 0xc11   :  { %v1051_v19 = vpop.permute.xlu1 %1050 }
 0xc12   :  { %v1053_v34 = vmul.f32 %v1051_v19, %v1036_v47 }
 0xc14   :  { %v1054_v0 = vadd.f32 %v1053_v34, %v1048_v59 }
 0xc16   :  { %v1055_v45 = vmax.f32 %v1054_v0, 1e-30 }
 0xc18   :  { %4957 = vlog2.f32 %v1055_v45 }
 0xc1e   :  { %v4958_v37 = vpop.eup %4957 }
 0xc1f   :  { %v1057_v62 = vmul.f32 0.6931472, %v4958_v37 }
 0xc21   :  { %v1063_v30 = vmul.f32 %v1061_v28, %v1057_v62 }
 0xc23   :  { %v1064_v38 = vmul.f32 1.442695, %v1063_v30 }
 0xc25   :  { %4959 = vpow2.f32 %v1064_v38 }
 0xc2b   :  { %v4960_v31 = vpop.eup %4959 }
 0xc2c   :  { %v1066_v8 = vsel %vm394_vm6, %v4960_v31, 0.0 }
 0xc2d   :  { %1067 = vadd.xlane.f32.xlu1 %v1066_v8 }
 0xca0   :  { %v1068_v42 = vpop.xlane.xlu1 %1067 }
 0xca1   :  { %v1069_v32 = vadd.f32 1e-16, %v1068_v42 }
 0xca3   :  { %4961 = vrcp.f32 %v1069_v32  ;;  %v1081_v49 = vand.u32 2147483648, %v1069_v32  ;;  %v1079_v2 = vand.u32 2147483647, %v1069_v32  ;;  %vm1075_vm10 = vweird.f32 %v1069_v32 }
 0xca5   :  { %v1082_v5 = vor.u32 1.1754944e-38, %v1081_v49  ;;  %vm1080_vm3 = vcmp.eq.f32.partialorder %v1079_v2, 8.507059e+37 }
 0xca9   :  { %v4962_v61 = vpop.eup %4961 }
 0xcaa   :  { %v1071_v7 = vmul.f32 %v4962_v61, %v1069_v32  ;;  %vm1076_vm9 = vweird.f32 %v4962_v61 }
 0xcab   :  { %vm1077_vm12 = vmor %vm1075_vm10, %vm1076_vm9 }
 0xcac   :  { %v1072_v17 = vsub.f32 1.0, %v1071_v7 }
 0xcae   :  { %v1073_v35 = vmul.f32 %v4962_v61, %v1072_v17 }
 0xcb0   :  { %v1074_v4 = vadd.f32 %v4962_v61, %v1073_v35 }
 0xcb2   :  { %v1078_v6 = vsel %vm1077_vm12, %v4962_v61, %v1074_v4 }
 0xcb3   :  { %v1083_v24 = vsel %vm1080_vm3, %v1082_v5, %v1078_v6  ;;  %v5215_v5 = vld [vmem:[%s7002_s6 + $0x18] sm:$0xff]  ;;  %v5216_v6 = vld [vmem:[%s7002_s6 + $0x10] sm:$0xff] }
 0xcb4   :  { %v5824_v41 = vmul.f32 %v4960_v31, %v1083_v24  ;;  %v5217_v24 = vld [vmem:[%s7002_s6 + $0x8] sm:$0xff] }
 0xcb6   :  { %v1137_v27 = vperm.slane %v5824_v41, 2  ;;  %v1085_v29 = vperm.slane %v5824_v41, 0  ;;  %v1098_v58 = vperm.slane %v5824_v41, 1 }
 0xcb8   :  { %1142 = vperm.xlu1 %4805, %v1137_v27   ;;  %1096 = vperm.xlu0 %4803, %v1085_v29  }
 0xcb9   :  { %1090 = vperm.xlu2 %4802, %v1085_v29   ;;  %v5218_v29 = vld [vmem:[%s7002_s6] sm:$0xff] }
 0xcc0   :  { %1230 = vrot.lane.b32.xlu0 %v729_v63, %s5291_s19  ;;  %4809 = vset.pattern.permute.xlu1 %v5289_v57 }
 0xcc1   :  { %1103 = vperm.xlu2 %4802, %v1098_v58   ;;  %4806 = vset.pattern.permute.xlu0 %v5609_v43 }
 0xcc9   :  { %4804 = vset.pattern.permute.xlu2 %v5612_v50 }
 0xcd1   :  { %1109 = vperm.xlu2 %4804, %v1098_v58  }
 0xd13   :  { %v1091_v44 = vpop.permute.xlu2 %1090 }
 0xd14   :  { %v1111_v18 = vmul.f32 %v1091_v44, %v5725_v9 }
 0xd16   :  { %v1115_v63 = vsel %vm245_vm4, %v1111_v18, 0.0 }
 0xd1b   :  { %v1104_v36 = vpop.permute.xlu2 %1103 }
 0xd1c   :  { %v1113_v12 = vmul.f32 %v1104_v36, %v5741_v10 }
 0xd1e   :  { %v1124_v59 = vsel %vm245_vm4, %v1113_v12, 0.0 }
 0xd2a   :  { %v1097_v40 = vpop.permute.xlu0 %1096 }
 0xd2b   :  { %v1112_v22 = vmul.f32 %v1097_v40, %v5715_v33  ;;  %v1110_v47 = vpop.permute.xlu2 %1109 }
 0xd2c   :  { %v1114_v13 = vmul.f32 %v1110_v47, %v5727_v11 }
 0xd2d   :  { %v1116_v19 = vsel %vm245_vm4, %v1112_v22, 0.0 }
 0xd2e   :  { %v1117_v34 = vadd.f32 %v1116_v19, %v1115_v63  ;;  %v1125_v0 = vsel %vm245_vm4, %v1114_v13, 0.0  ;;  %v1267_v19 = vrot.slane %v5650_v1, 6  ;;  %v1150_v1 = vperm.slane %v5824_v41, 3 }
 0xd2f   :  { %v1126_v45 = vadd.f32 %v1125_v0, %v1124_v59 }
 0xd30   :  { %v1118_v37 = vrot.slane %v1117_v34, 4 }
 0xd31   :  { %v1127_v62 = vrot.slane %v1126_v45, 4 }
 0xd32   :  { %v1119_v28 = vadd.f32 %v1118_v37, %v1117_v34  ;;  %v1231_v49 = vpop.permute.xlu0 %1230 }
 0xd33   :  { %v1128_v30 = vadd.f32 %v1127_v62, %v1126_v45  ;;  %v1133_v45 = vmul.f32 0.5, %v5734_v25 }
 0xd34   :  { %v1120_v38 = vrot.slane %v1119_v28, 2 }
 0xd35   :  { %v1129_v31 = vrot.slane %v1128_v30, 2 }
 0xd36   :  { %v1121_v8 = vadd.f32 %v1120_v38, %v1119_v28  ;;  %v1143_v38 = vpop.permute.xlu1 %1142 }
 0xd37   :  { %v1130_v42 = vadd.f32 %v1129_v31, %v1128_v30 }
 0xd38   :  { %v1122_v32 = vrot.slane %v1121_v8, 1 }
 0xd39   :  { %v1131_v61 = vrot.slane %v1130_v42, 1 }
 0xd3a   :  { %v1123_v7 = vadd.f32 %v1122_v32, %v1121_v8 }
 0xd3b   :  { %v1132_v17 = vadd.f32 %v1131_v61, %v1130_v42 }
 0xd3d   :  { %v1228_v35 = vsel %vm297_vm1, %v1132_v17, %v1123_v7  ;;  %v5847_v2 = vsel %vm310_vm8, %v1132_v17, %v1123_v7 }
 0xd3e   :  { %v1233_v4 = vsel %vm245_vm4, %v1228_v35, %v1231_v49 }
 0xd3f   :  { %4748 = vmatmul.msk.f32.vlgmr.msra.gmra.mxu0 %vm95_vm2, %v1233_v4 }
 0xd40   :  { %3532 = vmatpush.msra.mxu0 %v5215_v5 }
 0xd42   :  { %3533 = vmatpush.msra.mxu0 %v5216_v6 }
 0xd44   :  { %3534 = vmatpush.msra.mxu0 %v5217_v24 }
 0xd46   :  { %3535 = vmatpush.msra.mxu0 %v5218_v29  ;;  %v1174_v29 = vperm.slane %v5734_v25, 0 }
 0xdbc   :  { %v1254_v58 = vpop.f32.mrf.mxu0 }
 0xdbd   :  { %v1258_v44 = vrot.slane %v1254_v58, 4  ;;  %v1178_v58 = vmul.f32 %v1174_v29, %v1143_v38 }
 0xdbf   :  { %v1260_v36 = vadd.f32 %v1258_v44, %v5410_v15  ;;  %v1173_v44 = vrot.slane %v5734_v25, 1 }
 0xdc1   :  { %4963 = vtanh.f32 %v1260_v36  ;;  %v1261_v12 = vmul.f32 0.5, %v1260_v36  ;;  %v1175_v36 = vperm.slane %v1173_v44, 0 }
 0xdc3   :  { %4965 = vtanh.f32 %v1261_v12 }
 0xdc7   :  { %v4964_v18 = vpop.eup %4963 }
 0xdc8   :  { %1271 = vrot.lane.b32.xlu2 %v4964_v18, %s5284_s1 }
 0xdc9   :  { %v4966_v40 = vpop.eup %4965 }
 0xdca   :  { %v1263_v22 = vadd.f32 1.0, %v4966_v40 }
 0xdcc   :  { %v1264_v47 = vmul.f32 0.5, %v1263_v22 }
 0xdce   :  { %v1269_v59 = vmul.f32 %v1267_v19, %v1264_v47 }
 0xe22   :  { %v1272_v13 = vpop.permute.xlu2 %1271 }
 0xe23   :  { %v1274_v63 = vmul.f32 %v1272_v13, %v1264_v47 }
 0xe25   :  { %1276 = vrot.lane.b32.xlu0 %v1274_v63, %s5286_s5 }
 0xe97   :  { %v1277_v34 = vpop.permute.xlu0 %1276 }
 0xe98   :  { %v5867_v0 = vadd.f32 %v1277_v34, %v1269_v59 }
 0xe9a   :  { %4967 = vtanh.f32 %v5867_v0 }
 0xe9b   :  { %4969 = vtanh.f32 %v1133_v45 }
 0xea0   :  { %v4968_v37 = vpop.eup %4967 }
 0xea1   :  { %1282 = vrot.lane.b32.xlu2 %v4968_v37, %s5284_s1  ;;  %v4970_v62 = vpop.eup %4969 }
 0xea2   :  { %v1135_v28 = vadd.f32 1.0, %v4970_v62 }
 0xea4   :  { %v1136_v30 = vmul.f32 0.5, %v1135_v28 }
 0xea6   :  { %v1165_v31 = vperm.slane %v1136_v30, 0  ;;  %v1164_v17 = vrot.slane %v1136_v30, 1 }
 0xea8   :  { %v1169_v8 = vmul.f32 %v1165_v31, %v1143_v38  ;;  %v1166_v35 = vperm.slane %v1164_v17, 0  ;;  %v5913_v38 = vld [vmem:[%s7003_s7] ss:$0 sm:$0xff] }
 0xea9   :  { %1148 = vperm.xlu2 %4804, %v1137_v27  }
 0xeaa   :  { %v1182_v42 = vsub.f32 1.0, %v1169_v8 }
 0xeb1   :  { %1161 = vperm.xlu2 %4804, %v1150_v1  }
 0xeb9   :  { %1190 = vrot.lane.b32.xlu2 %v1182_v42, %s5284_s1 }
 0xeba   :  { %4808 = vset.pattern.permute.xlu2 %v5289_v57 }
 0xefb   :  { %v1283_v32 = vpop.permute.xlu2 %1282 }
 0xefc   :  { %v5877_v61 = vmul.f32 %v1283_v32, %v1264_v47 }
 0xefe   :  { %v1287_v7 = vrot.slane %v5877_v61, 4 }
 0xf00   :  { %1288 = vrot.lane.b32.xlu0 %v1287_v7, %s5286_s5 }
 0xf03   :  { %v1149_v27 = vpop.permute.xlu2 %1148 }
 0xf04   :  { %v1170_v49 = vmul.f32 %v1165_v31, %v1149_v27  ;;  %v1179_v63 = vmul.f32 %v1174_v29, %v1149_v27 }
 0xf06   :  { %v1183_v6 = vsub.f32 1.0, %v1170_v49 }
 0xf08   :  { %1155 = vperm.xlu0 %4806, %v1150_v1  }
 0xf0b   :  { %v1162_v4 = vpop.permute.xlu2 %1161 }
 0xf0c   :  { %v1172_v5 = vmul.f32 %v1166_v35, %v1162_v4  ;;  %v1181_v18 = vmul.f32 %v1175_v36, %v1162_v4 }
 0xf0e   :  { %v1185_v24 = vsub.f32 1.0, %v1172_v5 }
 0xf10   :  { %1192 = vrot.lane.b32.xlu0 %v1183_v6, %s5284_s1  ;;  %1196 = vrot.lane.b32.xlu2 %v1185_v24, %s5284_s1 }
 0xf11   :  { %4807 = vset.pattern.permute.xlu0 %v5288_v60 }
 0xf18   :  { %1210 = vrot.lane.b32.xlu0 %v1178_v58, %s5291_s19 }
 0xf20   :  { %1216 = vrot.lane.b32.xlu0 %v1181_v18, %s5291_s19 }
 0xf72   :  { %v1289_v12 = vpop.permute.xlu0 %1288 }
 0xf73   :  { %4749 = vmatmul.msk.f32.vlgmr.msra.gmra.mxu1 %vm7017_vm7, %v1289_v12 }
 0xf74   :  { %3475 = vmatpush.msra.mxu1 %v5678_v53 }
 0xf76   :  { %3476 = vmatpush.msra.mxu1 %v5684_v54  ;;  %v1191_v54 = vpop.permute.xlu2 %1190 }
 0xf77   :  { %v1202_v19 = vmul.f32 %v1191_v54, %v5725_v9 }
 0xf78   :  { %3477 = vmatpush.msra.mxu1 %v5690_v56 }
 0xf7a   :  { %v1156_v40 = vpop.permute.xlu0 %1155  ;;  %3478 = vmatpush.msra.mxu1 %v5696_v23 }
 0xf7b   :  { %v1171_v22 = vmul.f32 %v1166_v35, %v1156_v40  ;;  %v1180_v47 = vmul.f32 %v1175_v36, %v1156_v40 }
 0xf7c   :  { %3479 = vmatpush.msra.mxu1 %v5702_v16 }
 0xf7d   :  { %1214 = vrot.lane.b32.xlu2 %v1180_v47, %s5291_s19  ;;  %v1184_v13 = vsub.f32 1.0, %v1171_v22 }
 0xf7e   :  { %3480 = vmatpush.msra.mxu1 %v5708_v48  ;;  %v1197_v59 = vpop.permute.xlu2 %1196 }
 0xf7f   :  { %1194 = vrot.lane.b32.xlu1 %v1184_v13, %s5284_s1  ;;  %v1205_v45 = vmul.f32 %v1197_v59, %v5727_v11 }
 0xf82   :  { %v1193_v53 = vpop.permute.xlu0 %1192 }
 0xf83   :  { %v1203_v42 = vmul.f32 %v1193_v53, %v5715_v33 }
 0xf87   :  { %1212 = vrot.lane.b32.xlu1 %v1179_v63, %s5291_s19 }
 0xf8a   :  { %v1211_v56 = vpop.permute.xlu0 %1210 }
 0xf8b   :  { %v5901_v23 = vadd.f32 %v1211_v56, %v1202_v19 }
 0xf8d   :  { %v1361_v16 = vadd.f32 1e-16, %v5901_v23 }
 0xf8f   :  { %v1437_v48 = vmul.f32 %v1361_v16, %v1361_v16 }
 0xf91   :  { %v1441_v28 = vsel %vm245_vm4, %v1437_v48, 0.0 }
 0xf92   :  { %v1217_v34 = vpop.permute.xlu0 %1216 }
 0xf93   :  { %v5905_v37 = vadd.f32 %v1217_v34, %v1205_v45 }
 0xf95   :  { %v1364_v62 = vadd.f32 1e-16, %v5905_v37 }
 0xf97   :  { %v1440_v30 = vmul.f32 %v1364_v62, %v1364_v62 }
 0xf99   :  { %v1450_v1 = vsel %vm245_vm4, %v1440_v30, 0.0 }
 0xfa6   :  { %1442 = vadd.xlane.f32.xlu2 %v1441_v28 }
 0xfae   :  { %1451 = vadd.xlane.f32.xlu2 %v1450_v1 }
 0xfd7   :  { %v1215_v5 = vpop.permute.xlu2 %1214 }
 0xff0   :  { %v1309_v9 = vpop.f32.mrf.mxu1 }
 0xff1   :  { %v5916_v11 = vadd.f32 %v5913_v38, %v1309_v9  ;;  %v1195_v31 = vpop.permute.xlu1 %1194 }
 0xff2   :  { %v1204_v4 = vmul.f32 %v1195_v31, %v5741_v10 }
 0xff3   :  { %v1313_v8 = vrot.slane %v5916_v11, 6 }
 0xff4   :  { %v5926_v6 = vadd.f32 %v1215_v5, %v1204_v4 }
 0xff5   :  { %1314 = vrot.lane.b32.xlu1 %v1313_v8, %s5287_s30 }
 0xff6   :  { %v1363_v24 = vadd.f32 1e-16, %v5926_v6 }
 0xff8   :  { %v1439_v29 = vmul.f32 %v1363_v24, %v1363_v24 }
 0xff9   :  { %v1213_v32 = vpop.permute.xlu1 %1212 }
 0xffa   :  { %v5921_v27 = vadd.f32 %v1213_v32, %v1203_v42  ;;  %v1447_v58 = vsel %vm245_vm4, %v1439_v29, 0.0 }
 0xffc   :  { %v1362_v17 = vadd.f32 1e-16, %v5921_v27 }
 0xffe   :  { %v1438_v49 = vmul.f32 %v1362_v17, %v1362_v17 }
0x1000   :  { %v1444_v35 = vsel %vm245_vm4, %v1438_v49, 0.0 }
0x1001   :  { %1445 = vadd.xlane.f32.xlu0 %v1444_v35 }
0x101f   :  { %1448 = vadd.xlane.f32.xlu1 %v1447_v58 }
0x1067   :  { %v1315_v33 = vpop.permute.xlu1 %1314 }
0x1068   :  { %v5932_v44 = vsel %vm179_vm5, %v5916_v11, %v1315_v33 }
0x1069   :  { %v1318_v36 = vadd.f32 1e-16, %v5932_v44  ;;  %v1320_v18 = vand.u32 2147483647, %v5932_v44  ;;  %v1332_v58 = vsel %vm7018_vm14, %v5932_v44, -inf }
0x106b   :  { %1387 = vst [vmem:[#allocation1] sm:$0xff] %v1318_v36  ;;  %v1516_v10 = vmul.f32 %v1318_v36, %v1318_v36  ;;  %v1367_v12 = vperm.slane %v1318_v36, 0  ;;  %v1366_v40 = vrot.slane %v1318_v36, 1  ;;  %v1321_v53 = vsub.f32 0.0, %v1320_v18  ;;  %v5952_v36 = vpop.xlane.xlu2 %1442 }
0x106c   :  { %vm1460_vm12 = vcmp.eq.f32.partialorder %v5952_v36, inf }
0x106d   :  { %v1517_v22 = vsel %vm394_vm6, %v1516_v10, 0.0  ;;  %v1372_v47 = vmul.f32 %v1367_v12, %v1362_v17  ;;  %v1371_v13 = vmul.f32 %v1367_v12, %v1361_v16  ;;  %v1368_v63 = vperm.slane %v1366_v40, 0 }
0x106e   :  { %1518 = vadd.xlane.f32.xlu0 %v1517_v22  ;;  %v1322_v34 = vmul.f32 1.442695, %v1321_v53 }
0x106f   :  { %v1378_v54 = vsel %vm245_vm4, %v1372_v47, 0.0  ;;  %v1375_v56 = vsel %vm245_vm4, %v1371_v13, 0.0  ;;  %v1373_v19 = vmul.f32 %v1368_v63, %v1363_v24  ;;  %v1374_v48 = vmul.f32 %v1368_v63, %v1364_v62 }
0x1070   :  { %1379 = vadd.xlane.f32.xlu2 %v1378_v54  ;;  %1376 = vadd.xlane.f32.xlu1 %v1375_v56  ;;  %4971 = vpow2.f32 %v1322_v34 }
0x1071   :  { %v1381_v30 = vsel %vm245_vm4, %v1373_v19, 0.0  ;;  %v1384_v9 = vsel %vm245_vm4, %v1374_v48, 0.0 }
0x1072   :  { %v1389_v59 = vld [vmem:[#allocation1 + $0x2] ss:$9 sm:$0xff] }
0x1073   :  { %v1392_v45 = vperm.slane %v1389_v59, 0  ;;  %v1391_v28 = vld [vmem:[#allocation1 + $0x3] ss:$9 sm:$0xff]  ;;  %v1452_v10 = vpop.xlane.xlu2 %1451 }
0x1074   :  { %v1393_v31 = vperm.slane %v1391_v28, 0  ;;  %v1446_v12 = vpop.xlane.xlu0 %1445  ;;  %vm1496_vm9 = vcmp.eq.f32.partialorder %v1452_v10, inf  ;;  %vm1498_vm7 = vcmp.eq.f32.partialorder %v1452_v10, 0.0 }
0x1075   :  { %v1396_v1 = vmul.f32 %v1392_v45, %v1361_v16  ;;  %v1397_v42 = vmul.f32 %v1392_v45, %v1362_v17  ;;  %vm1472_vm10 = vcmp.eq.f32.partialorder %v1446_v12, inf  ;;  %vm1474_vm14 = vcmp.eq.f32.partialorder %v1446_v12, 0.0 }
0x1076   :  { %1382 = vadd.xlane.f32.xlu0 %v1381_v30  ;;  %v1398_v32 = vmul.f32 %v1393_v31, %v1363_v24  ;;  %v4972_v49 = vpop.eup %4971  ;;  %v1399_v35 = vmul.f32 %v1393_v31, %v1364_v62  ;;  %v1319_v24 = vmax.f32 %v5932_v44, 0.0 }
0x1077   :  { %v1400_v8 = vsel %vm245_vm4, %v1396_v1, 0.0  ;;  %v1403_v4 = vsel %vm245_vm4, %v1397_v42, 0.0  ;;  %v1324_v29 = vadd.f32 1.0, %v4972_v49 }
0x1078   :  { %1385 = vadd.xlane.f32.xlu1 %v1384_v9  ;;  %1401 = vadd.xlane.f32.xlu2 %v1400_v8  ;;  %v1406_v5 = vsel %vm245_vm4, %v1398_v32, 0.0  ;;  %v1409_v16 = vsel %vm245_vm4, %v1399_v35, 0.0 }
0x1079   :  { %4973 = vlog2.f32 %v1324_v29 }
0x107e   :  { %1404 = vadd.xlane.f32.xlu0 %v1403_v4 }
0x107f   :  { %v4974_v33 = vpop.eup %4973 }
0x1080   :  { %1407 = vadd.xlane.f32.xlu1 %v1406_v5  ;;  %1410 = vadd.xlane.f32.xlu2 %v1409_v16  ;;  %v1326_v17 = vmul.f32 0.6931472, %v4974_v33 }
0x1082   :  { %v5948_v62 = vadd.f32 %v1326_v17, %v1319_v24 }
0x1088   :  { %1333 = vmax.xlane.f32.xlu1 %v1332_v58 }
0x1092   :  { %1538 = vperm.xlu0 %4807, %v5948_v62   ;;  %v1449_v18 = vpop.xlane.xlu1 %1448 }
0x1093   :  { %4975 = vrsqrt.f32 %v1449_v18  ;;  %vm1484_vm15 = vcmp.eq.f32.partialorder %v1449_v18, inf  ;;  %vm1486_vm3 = vcmp.eq.f32.partialorder %v1449_v18, 0.0 }
0x1094   :  { %4977 = vrsqrt.f32 %v1452_v10 }
0x1095   :  { %4979 = vrsqrt.f32 %v1446_v12 }
0x1096   :  { %4981 = vrsqrt.f32 %v5952_v36 }
0x1099   :  { %v4976_v40 = vpop.eup %4975 }
0x109a   :  { %4810 = vset.pattern.permute.xlu0 %v5293_v21  ;;  %v4978_v22 = vpop.eup %4977  ;;  %v1478_v13 = vmul.f32 %v4976_v40, %v1449_v18 }
0x109b   :  { %v4980_v47 = vpop.eup %4979  ;;  %v1490_v53 = vmul.f32 %v4978_v22, %v1452_v10 }
0x109c   :  { %v4982_v63 = vpop.eup %4981  ;;  %v1466_v54 = vmul.f32 %v4980_v47, %v1446_v12  ;;  %v1479_v19 = vmul.f32 %v4976_v40, %v1478_v13 }
0x109d   :  { %v1454_v56 = vmul.f32 %v4982_v63, %v5952_v36  ;;  %v1491_v59 = vmul.f32 %v4978_v22, %v1490_v53  ;;  %v1487_v53 = vand.u32 2147483648, %v1449_v18 }
0x109e   :  { %v1467_v34 = vmul.f32 %v4980_v47, %v1466_v54  ;;  %v1480_v48 = vmul.f32 0.5, %v1479_v19  ;;  %v1475_v54 = vand.u32 2147483648, %v1446_v12 }
0x109f   :  { %v1455_v45 = vmul.f32 %v4982_v63, %v1454_v56  ;;  %v1492_v28 = vmul.f32 0.5, %v1491_v59 }
0x10a0   :  { %v1468_v30 = vmul.f32 0.5, %v1467_v34  ;;  %v1481_v9 = vsub.f32 1.5, %v1480_v48  ;;  %v1463_v34 = vand.u32 2147483648, %v5952_v36 }
0x10a1   :  { %v1456_v1 = vmul.f32 0.5, %v1455_v45  ;;  %v1493_v31 = vsub.f32 1.5, %v1492_v28 }
0x10a2   :  { %v1469_v8 = vsub.f32 1.5, %v1468_v30  ;;  %v1482_v32 = vmul.f32 %v4976_v40, %v1481_v9 }
0x10a3   :  { %v1457_v42 = vsub.f32 1.5, %v1456_v1  ;;  %v1494_v49 = vmul.f32 %v4978_v22, %v1493_v31 }
0x10a4   :  { %v1470_v35 = vmul.f32 %v4980_v47, %v1469_v8  ;;  %v1483_v29 = vmul.f32 %v1482_v32, %v1449_v18 }
0x10a5   :  { %v1458_v5 = vmul.f32 %v4982_v63, %v1457_v42  ;;  %v1495_v33 = vmul.f32 %v1494_v49, %v1452_v10  ;;  %v1499_v63 = vand.u32 2147483648, %v1452_v10 }
0x10a6   :  { %v1471_v17 = vmul.f32 %v1470_v35, %v1446_v12  ;;  %v1485_v13 = vsel %vm1484_vm15, %v1449_v18, %v1483_v29  ;;  %vm1462_vm15 = vcmp.eq.f32.partialorder %v5952_v36, 0.0 }
0x10a7   :  { %v1459_v24 = vmul.f32 %v1458_v5, %v5952_v36  ;;  %v1497_v22 = vsel %vm1496_vm9, %v1452_v10, %v1495_v33  ;;  %v1488_v56 = vsel %vm1486_vm3, %v1487_v53, %v1485_v13 }
0x10a8   :  { %v1473_v47 = vsel %vm1472_vm10, %v1446_v12, %v1471_v17  ;;  %v1500_v45 = vsel %vm1498_vm7, %v1499_v63, %v1497_v22  ;;  %v1508_v18 = vperm.slane %v1488_v56, %v5545_v26 }
0x10a9   :  { %v1461_v59 = vsel %vm1460_vm12, %v5952_v36, %v1459_v24  ;;  %v1476_v48 = vsel %vm1474_vm14, %v1475_v54, %v1473_v47  ;;  %v1509_v32 = vperm.slane %v1500_v45, %v5554_v51  ;;  %vm7019_vm12 = vcmask 19456  }
0x10aa   :  { %v1464_v31 = vsel %vm1462_vm15, %v1463_v34, %v1461_v59  ;;  %v1506_v42 = vperm.slane %v1476_v48, %v5554_v51 }
0x10ab   :  { %v1505_v12 = vperm.slane %v1464_v31, %v5545_v26  ;;  %v1510_v49 = vsel %vm7015_vm0, %v1509_v32, %v1508_v18 }
0x10ad   :  { %v1507_v5 = vsel %vm7015_vm0, %v1506_v42, %v1505_v12 }
0x10ae   :  { %v1511_v33 = vsel %vm297_vm1, %v1510_v49, %v1507_v5  ;;  %v1513_v17 = vsel %vm310_vm8, %v1510_v49, %v1507_v5 }
0x10af   :  { %v1515_v63 = vsel %vm179_vm5, %v1511_v33, %v1513_v17 }
0x10e1   :  { %v1519_v4 = vpop.xlane.xlu0 %1518 }
0x10e2   :  { %4983 = vrsqrt.f32 %v1519_v4  ;;  %vm1527_vm9 = vcmp.eq.f32.partialorder %v1519_v4, inf  ;;  %v1530_v13 = vand.u32 2147483648, %v1519_v4  ;;  %vm1529_vm10 = vcmp.eq.f32.partialorder %v1519_v4, 0.0 }
0x10e3   :  { %v5956_v16 = vpop.xlane.xlu1 %1376  ;;  %v5958_v58 = vpop.xlane.xlu2 %1379 }
0x10e4   :  { %v1416_v48 = vperm.slane %v5956_v16, %v5545_v26 }
0x10e8   :  { %v4984_v40 = vpop.eup %4983 }
0x10e9   :  { %v1521_v19 = vmul.f32 %v4984_v40, %v1519_v4  ;;  %v1383_v1 = vpop.xlane.xlu0 %1382 }
0x10eb   :  { %v1522_v28 = vmul.f32 %v4984_v40, %v1521_v19  ;;  %v1386_v30 = vpop.xlane.xlu1 %1385  ;;  %v1402_v9 = vpop.xlane.xlu2 %1401  ;;  %v1328_v19 = vmul.f32 0.5, %v5932_v44 }
0x10ec   :  { %v1420_v59 = vperm.slane %v1386_v30, %v5554_v51  ;;  %v1428_v18 = vperm.slane %v1402_v9, %v5545_v26 }
0x10ed   :  { %v1523_v8 = vmul.f32 0.5, %v1522_v28  ;;  %v1419_v28 = vperm.slane %v1383_v1, %v5545_v26 }
0x10ef   :  { %v1524_v10 = vsub.f32 1.5, %v1523_v8  ;;  %v1421_v30 = vsel %vm7015_vm0, %v1420_v59, %v1419_v28 }
0x10f1   :  { %v1525_v35 = vmul.f32 %v4984_v40, %v1524_v10  ;;  %v1405_v22 = vpop.xlane.xlu0 %1404 }
0x10f2   :  { %v1429_v34 = vperm.slane %v1405_v22, %v5554_v51 }
0x10f3   :  { %v1408_v29 = vpop.xlane.xlu1 %1407  ;;  %v1526_v36 = vmul.f32 %v1525_v35, %v1519_v4  ;;  %v1411_v24 = vpop.xlane.xlu2 %1410 }
0x10f4   :  { %v1431_v54 = vperm.slane %v1408_v29, %v5545_v26  ;;  %v1432_v40 = vperm.slane %v1411_v24, %v5554_v51  ;;  %v1430_v32 = vsel %vm7015_vm0, %v1429_v34, %v1428_v18 }
0x10f5   :  { %v1528_v53 = vsel %vm1527_vm9, %v1519_v4, %v1526_v36  ;;  %v1417_v4 = vperm.slane %v5958_v58, %v5554_v51 }
0x10f6   :  { %v1531_v47 = vsel %vm1529_vm10, %v1530_v13, %v1528_v53  ;;  %v1433_v31 = vsel %vm7015_vm0, %v1432_v40, %v1431_v54 }
0x10f7   :  { %v1532_v56 = vmul.f32 %v1531_v47, %v1515_v63  ;;  %v1434_v16 = vsel %vm310_vm8, %v1433_v31, %v1430_v32  ;;  %v1418_v58 = vsel %vm7015_vm0, %v1417_v4, %v1416_v48 }
0x10f8   :  { %v1422_v1 = vsel %vm297_vm1, %v1421_v30, %v1418_v58 }
0x10f9   :  { %v1533_v45 = vmax.f32 %v1532_v56, 1e-08  ;;  %v1436_v12 = vsel %vm179_vm5, %v1422_v1, %v1434_v16 }
0x10fb   :  { %v1334_v8 = vpop.xlane.xlu1 %1333  ;;  %4985 = vrcp.f32 %v1533_v45 }
0x10fc   :  { %v1335_v42 = vsub.f32 %v5932_v44, %v1334_v8  ;;  %4987 = vtanh.f32 %v1328_v19 }
0x10fe   :  { %v1336_v10 = vmul.f32 1.442695, %v1335_v42 }
0x1100   :  { %4989 = vpow2.f32 %v1336_v10 }
0x1101   :  { %v4986_v9 = vpop.eup %4985 }
0x1102   :  { %v4988_v49 = vpop.eup %4987  ;;  %v1535_v35 = vmul.f32 %v4986_v9, %v1436_v12 }
0x1103   :  { %v1330_v29 = vadd.f32 1.0, %v4988_v49 }
0x1104   :  { %v1539_v5 = vpop.permute.xlu0 %1538 }
0x1105   :  { %v1541_v44 = vmul.f32 %v1539_v5, %v1535_v35  ;;  %v1331_v17 = vmul.f32 0.5, %v1330_v29 }
0x1106   :  { %v4990_v36 = vpop.eup %4989 }
0x1107   :  { %1339 = vrot.lane.b32.xlu1 %v4990_v36, %s5290_s2  ;;  %v1542_v33 = vsel %vm394_vm6, %v1541_v44, -inf  ;;  %v1572_v24 = vsub.f32 1.0, %v1331_v17 }
0x1108   :  { %1543 = vmax.xlane.f32.xlu2 %v1542_v33 }
0x110f   :  { %1575 = vperm.xlu1 %4809, %v1572_v24  }
0x1117   :  { %4811 = vset.pattern.permute.xlu1 %v5292_v20 }
0x1179   :  { %v1340_v13 = vpop.permute.xlu1 %1339 }
0x117a   :  { %v1342_v53 = vsel %vm7019_vm12, %v1340_v13, 0.0  ;;  %v1360_v13 = vadd.f32 1.0, %v5948_v62 }
0x117b   :  { %1343 = vadd.xlane.f32.xlu2 %v1342_v53  ;;  %v1544_v22 = vpop.xlane.xlu2 %1543 }
0x117c   :  { %v1545_v47 = vsub.f32 %v1541_v44, %v1544_v22 }
0x117e   :  { %v1546_v63 = vmul.f32 1.442695, %v1545_v47 }
0x1180   :  { %4991 = vpow2.f32 %v1546_v63 }
0x1181   :  { %v1576_v5 = vpop.permute.xlu1 %1575 }
0x1182   :  { %v1578_v33 = vmul.f32 %v1576_v5, %v5824_v41 }
0x1186   :  { %v4992_v54 = vpop.eup %4991 }
0x1187   :  { %v1548_v40 = vsel %vm394_vm6, %v4992_v54, 0.0 }
0x1188   :  { %1549 = vadd.xlane.f32.xlu2 %v1548_v40 }
0x11a0   :  { %1568 = vperm.xlu2 %4808, %v1331_v17  }
0x11a8   :  { %4812 = vset.pattern.permute.xlu2 %v5294_v46 }
0x11ee   :  { %v1344_v56 = vpop.xlane.xlu2 %1343 }
0x11ef   :  { %4993 = vrcp.f32 %v1344_v56  ;;  %v1356_v45 = vand.u32 2147483648, %v1344_v56  ;;  %v1354_v4 = vand.u32 2147483647, %v1344_v56  ;;  %vm1350_vm7 = vweird.f32 %v1344_v56 }
0x11f1   :  { %v1357_v31 = vor.u32 1.1754944e-38, %v1356_v45  ;;  %vm1355_vm15 = vcmp.eq.f32.partialorder %v1354_v4, 8.507059e+37 }
0x11f5   :  { %v4994_v19 = vpop.eup %4993 }
0x11f6   :  { %v1346_v59 = vmul.f32 %v4994_v19, %v1344_v56  ;;  %vm1351_vm3 = vweird.f32 %v4994_v19 }
0x11f7   :  { %vm1352_vm14 = vmor %vm1350_vm7, %vm1351_vm3 }
0x11f8   :  { %v1347_v34 = vsub.f32 1.0, %v1346_v59 }
0x11fa   :  { %v1348_v48 = vmul.f32 %v4994_v19, %v1347_v34 }
0x11fb   :  { %v1550_v28 = vpop.xlane.xlu2 %1549 }
0x11fc   :  { %4995 = vrcp.f32 %v1550_v28  ;;  %v1349_v18 = vadd.f32 %v4994_v19, %v1348_v48  ;;  %v1562_v58 = vand.u32 2147483648, %v1550_v28  ;;  %v1560_v9 = vand.u32 2147483647, %v1550_v28 }
0x11fd   :  { %vm1556_vm10 = vweird.f32 %v1550_v28 }
0x11fe   :  { %v1353_v8 = vsel %vm1352_vm14, %v4994_v19, %v1349_v18  ;;  %v1563_v49 = vor.u32 1.1754944e-38, %v1562_v58  ;;  %vm1561_vm3 = vcmp.eq.f32.partialorder %v1560_v9, 8.507059e+37 }
0x11ff   :  { %v1358_v42 = vsel %vm1355_vm15, %v1357_v31, %v1353_v8 }
0x1200   :  { %v1359_v30 = vmul.f32 %v4990_v36, %v1358_v42 }
0x1202   :  { %v4996_v32 = vpop.eup %4995  ;;  %1602 = vperm.xlu1 %4811, %v1359_v30  }
0x1203   :  { %v1552_v10 = vmul.f32 %v4996_v32, %v1550_v28  ;;  %vm1557_vm9 = vweird.f32 %v4996_v32  ;;  %v1569_v36 = vpop.permute.xlu2 %1568 }
0x1204   :  { %vm1558_vm12 = vmor %vm1556_vm10, %vm1557_vm9  ;;  %vm7012_vm10 = vcmask 1045509  }
0x1205   :  { %v1553_v16 = vsub.f32 1.0, %v1552_v10 }
0x1207   :  { %v1554_v1 = vmul.f32 %v4996_v32, %v1553_v16 }
0x1209   :  { %v1555_v12 = vadd.f32 %v4996_v32, %v1554_v1 }
0x120a   :  { %4817 = vset.pattern.permute.xlu1 %v5612_v50 }
0x120b   :  { %v1559_v35 = vsel %vm1558_vm12, %v4996_v32, %v1555_v12  ;;  %vm7011_vm12 = vcmask 1043456  }
0x120c   :  { %v1564_v44 = vsel %vm1561_vm3, %v1563_v49, %v1559_v35  ;;  %vm7020_vm3 = vcmask 261120  }
0x120d   :  { %v1565_v29 = vmul.f32 %v4992_v54, %v1564_v44 }
0x120f   :  { %v1571_v17 = vmul.f32 %v1569_v36, %v1565_v29 }
0x1211   :  { %v1579_v24 = vadd.f32 %v1578_v33, %v1571_v17 }
0x1213   :  { %1588 = vrot.lane.b32.xlu2 %v1579_v24, %s5298_s23  ;;  %1584 = vrot.lane.b32.xlu1 %v1579_v24, %s5297_s22 }
0x1214   :  { %1581 = vrot.lane.b32.xlu0 %v1579_v24, %s5296_s21 }
0x121b   :  { %1608 = vperm.xlu2 %4812, %v1359_v30   ;;  %1591 = vrot.lane.b32.xlu1 %v1579_v24, %s5295_s20 }
0x121c   :  { %1597 = vperm.xlu0 %4810, %v1359_v30  }
0x1223   :  { %4814 = vset.pattern.permute.xlu2 %v5609_v43 }
0x1224   :  { %4813 = vset.pattern.permute.xlu0 %v5299_v3 }
0x1225   :  { %1618 = vperm.xlu0 %4813, %v1360_v13  }
0x122d   :  { %4816 = vset.pattern.permute.xlu0 %v5609_v43 }
0x126d   :  { %v1589_v53 = vpop.permute.xlu2 %1588 }
0x1274   :  { %v1603_v41 = vpop.permute.xlu1 %1602 }
0x1275   :  { %v1609_v54 = vpop.permute.xlu2 %1608  ;;  %v1605_v59 = vmul.f32 %v1603_v41, %v1579_v24 }
0x1285   :  { %v1585_v22 = vpop.permute.xlu1 %1584 }
0x1286   :  { %v1582_v47 = vpop.permute.xlu0 %1581 }
0x1287   :  { %v1587_v40 = vsel %vm469_vm11, %v1582_v47, %v1585_v22 }
0x128d   :  { %v1592_v63 = vpop.permute.xlu1 %1591 }
0x128e   :  { %v1594_v56 = vsel %vm477_vm13, %v1589_v53, %v1592_v63  ;;  %v1598_v19 = vpop.permute.xlu0 %1597 }
0x128f   :  { %v1611_v62 = vmul.f32 %v1609_v54, %v1594_v56  ;;  %v1600_v34 = vmul.f32 %v1598_v19, %v1587_v40 }
0x1291   :  { %v1606_v45 = vadd.f32 %v1605_v59, %v1600_v34 }
0x1293   :  { %v1612_v48 = vadd.f32 %v1611_v62, %v1606_v45 }
0x1295   :  { %v1613_v4 = vmax.f32 %v1612_v48, 1e-30 }
0x1297   :  { %4997 = vlog2.f32 %v1613_v4  ;;  %v1619_v31 = vpop.permute.xlu0 %1618 }
0x129d   :  { %v4998_v28 = vpop.eup %4997 }
0x129e   :  { %v1615_v18 = vmul.f32 0.6931472, %v4998_v28 }
0x12a0   :  { %v1621_v8 = vmul.f32 %v1619_v31, %v1615_v18 }
0x12a2   :  { %v1622_v42 = vmul.f32 1.442695, %v1621_v8 }
0x12a4   :  { %4999 = vpow2.f32 %v1622_v42 }
0x12aa   :  { %v5000_v30 = vpop.eup %4999 }
0x12ab   :  { %v1624_v32 = vsel %vm394_vm6, %v5000_v30, 0.0 }
0x12ac   :  { %1625 = vadd.xlane.f32.xlu1 %v1624_v32 }
0x131f   :  { %v1626_v10 = vpop.xlane.xlu1 %1625 }
0x1320   :  { %v1627_v16 = vadd.f32 1e-16, %v1626_v10 }
0x1322   :  { %5001 = vrcp.f32 %v1627_v16  ;;  %v1639_v12 = vand.u32 2147483648, %v1627_v16  ;;  %v1637_v35 = vand.u32 2147483647, %v1627_v16  ;;  %vm1633_vm14 = vweird.f32 %v1627_v16 }
0x1324   :  { %v1640_v44 = vor.u32 1.1754944e-38, %v1639_v12  ;;  %vm1638_vm9 = vcmp.eq.f32.partialorder %v1637_v35, 8.507059e+37  ;;  %v4586_v12 = vsel %vm179_vm5, %v5637_v55, %v5847_v2  ;;  %v5222_v55 = vld [vmem:[%s7000_s4 + $0x18] sm:$0xff]  ;;  %v5223_v2 = vld [vmem:[%s7000_s4 + $0x10] sm:$0xff] }
0x1328   :  { %v5002_v58 = vpop.eup %5001 }
0x1329   :  { %v1629_v1 = vmul.f32 %v5002_v58, %v1627_v16  ;;  %vm1634_vm7 = vweird.f32 %v5002_v58 }
0x132a   :  { %vm1635_vm15 = vmor %vm1633_vm14, %vm1634_vm7  ;;  %vm7021_vm7 = vcmask 167056  }
0x132b   :  { %v1630_v9 = vsub.f32 1.0, %v1629_v1 }
0x132d   :  { %v1631_v49 = vmul.f32 %v5002_v58, %v1630_v9 }
0x132f   :  { %v1632_v5 = vadd.f32 %v5002_v58, %v1631_v49 }
0x1331   :  { %v1636_v29 = vsel %vm1635_vm15, %v5002_v58, %v1632_v5  ;;  %v5220_v5 = vld [vmem:[%s7000_s4 + $0x28] sm:$0xff] }
0x1332   :  { %v1641_v36 = vsel %vm1638_vm9, %v1640_v44, %v1636_v29  ;;  %v5221_v44 = vld [vmem:[%s7000_s4 + $0x20] sm:$0xff]  ;;  %v5224_v29 = vld [vmem:[%s7000_s4 + $0x8] sm:$0xff] }
0x1333   :  { %v6012_v33 = vmul.f32 %v5000_v30, %v1641_v36  ;;  %v5225_v36 = vld [vmem:[%s7000_s4] sm:$0xff] }
0x1335   :  { %v1695_v17 = vperm.slane %v6012_v33, 2  ;;  %v1656_v24 = vperm.slane %v6012_v33, 1  ;;  %v1643_v13 = vperm.slane %v6012_v33, 0 }
0x1337   :  { %1706 = vperm.xlu1 %4817, %v1695_v17   ;;  %1661 = vperm.xlu0 %4816, %v1656_v24  }
0x1338   :  { %1648 = vperm.xlu2 %4814, %v1643_v13  }
0x133f   :  { %4822 = vset.pattern.permute.xlu1 %v5289_v57 }
0x1340   :  { %4815 = vset.pattern.permute.xlu2 %v5612_v50 }
0x1348   :  { %1654 = vperm.xlu2 %4815, %v1643_v13  }
0x1350   :  { %1667 = vperm.xlu2 %4815, %v1656_v24  }
0x1358   :  { %1788 = vrot.lane.b32.xlu2 %v1287_v7, %s5291_s19 }
0x1359   :  { %4818 = vset.pattern.permute.xlu2 %v5609_v43 }
0x1392   :  { %v1649_v41 = vpop.permute.xlu2 %1648 }
0x1393   :  { %v1669_v53 = vmul.f32 %v1649_v41, %v5901_v23 }
0x1395   :  { %v1673_v63 = vsel %vm245_vm4, %v1669_v53, 0.0 }
0x13a2   :  { %v1655_v22 = vpop.permute.xlu2 %1654 }
0x13a3   :  { %v1670_v47 = vmul.f32 %v1655_v22, %v5921_v27 }
0x13a5   :  { %v1674_v54 = vsel %vm245_vm4, %v1670_v47, 0.0 }
0x13a6   :  { %v1675_v40 = vadd.f32 %v1674_v54, %v1673_v63 }
0x13a8   :  { %v1676_v56 = vrot.slane %v1675_v40, 4 }
0x13a9   :  { %v1662_v19 = vpop.permute.xlu0 %1661 }
0x13aa   :  { %v1677_v59 = vadd.f32 %v1676_v56, %v1675_v40  ;;  %v1671_v62 = vmul.f32 %v1662_v19, %v5926_v6  ;;  %v1668_v61 = vpop.permute.xlu2 %1667  ;;  %v1825_v19 = vrot.slane %v5867_v0, 6  ;;  %v1691_v0 = vmul.f32 0.5, %v5916_v11 }
0x13ab   :  { %v1672_v7 = vmul.f32 %v1668_v61, %v5905_v37 }
0x13ac   :  { %v1682_v34 = vsel %vm245_vm4, %v1671_v62, 0.0  ;;  %v1678_v48 = vrot.slane %v1677_v59, 2 }
0x13ad   :  { %v1683_v45 = vsel %vm245_vm4, %v1672_v7, 0.0  ;;  %v1708_v7 = vperm.slane %v6012_v33, 3 }
0x13ae   :  { %v1684_v4 = vadd.f32 %v1683_v45, %v1682_v34  ;;  %v1679_v18 = vadd.f32 %v1678_v48, %v1677_v59 }
0x13b0   :  { %v1685_v28 = vrot.slane %v1684_v4, 4  ;;  %v1680_v30 = vrot.slane %v1679_v18, 1 }
0x13b2   :  { %v1686_v31 = vadd.f32 %v1685_v28, %v1684_v4  ;;  %v1681_v10 = vadd.f32 %v1680_v30, %v1679_v18  ;;  %v1789_v1 = vpop.permute.xlu2 %1788 }
0x13b4   :  { %v1687_v8 = vrot.slane %v1686_v31, 2 }
0x13b6   :  { %v1688_v42 = vadd.f32 %v1687_v8, %v1686_v31 }
0x13b8   :  { %v1689_v32 = vrot.slane %v1688_v42, 1 }
0x13ba   :  { %v1690_v16 = vadd.f32 %v1689_v32, %v1688_v42  ;;  %v1707_v32 = vpop.permute.xlu1 %1706 }
0x13bc   :  { %v1786_v58 = vsel %vm297_vm1, %v1690_v16, %v1681_v10  ;;  %v4573_v9 = vsel %vm7012_vm10, %v1690_v16, %v1681_v10 }
0x13bd   :  { %v1791_v49 = vsel %vm245_vm4, %v1786_v58, %v1789_v1  ;;  %v6040_v35 = vsel %vm7011_vm12, %v4586_v12, %v4573_v9 }
0x13be   :  { %4750 = vmatmul.msk.f32.vlgmr.msrb.gmra.mxu3 %vm95_vm2, %v1791_v49  ;;  %v1732_v49 = vperm.slane %v5916_v11, 0 }
0x13bf   :  { %4033 = vmatpush.msrb.mxu3 %v5220_v5 }
0x13c1   :  { %4034 = vmatpush.msrb.mxu3 %v5221_v44  ;;  %v1731_v44 = vrot.slane %v5916_v11, 1 }
0x13c3   :  { %4035 = vmatpush.msrb.mxu3 %v5222_v55  ;;  %v1733_v55 = vperm.slane %v1731_v44, 0 }
0x13c5   :  { %4036 = vmatpush.msrb.mxu3 %v5223_v2 }
0x13c7   :  { %4037 = vmatpush.msrb.mxu3 %v5224_v29 }
0x13c9   :  { %4038 = vmatpush.msrb.mxu3 %v5225_v36  ;;  %v5226_v36 = vld [vmem:[%s7002_s6 + $0x18] sm:$0xff] }
0x1441   :  { %v1812_v24 = vpop.f32.mrf.mxu3 }
0x1442   :  { %v1816_v13 = vrot.slane %v1812_v24, 2  ;;  %v5227_v24 = vld [vmem:[%s7002_s6 + $0x10] sm:$0xff] }
0x1444   :  { %v1818_v41 = vadd.f32 %v1816_v13, %v5410_v15  ;;  %v5228_v13 = vld [vmem:[%s7002_s6 + $0x8] sm:$0xff] }
0x1446   :  { %5003 = vtanh.f32 %v1818_v41  ;;  %v1819_v22 = vmul.f32 0.5, %v1818_v41 }
0x1448   :  { %5005 = vtanh.f32 %v1819_v22 }
0x144c   :  { %v5004_v53 = vpop.eup %5003 }
0x144d   :  { %1829 = vrot.lane.b32.xlu0 %v5004_v53, %s5284_s1  ;;  %v5229_v53 = vld [vmem:[%s7002_s6] sm:$0xff] }
0x144e   :  { %v5006_v47 = vpop.eup %5005 }
0x144f   :  { %v1821_v63 = vadd.f32 1.0, %v5006_v47 }
0x1451   :  { %v1822_v54 = vmul.f32 0.5, %v1821_v63 }
0x1453   :  { %v1827_v59 = vmul.f32 %v1825_v19, %v1822_v54 }
0x14bf   :  { %v1830_v40 = vpop.permute.xlu0 %1829 }
0x14c0   :  { %v1832_v56 = vmul.f32 %v1830_v40, %v1822_v54  ;;  %v1737_v40 = vmul.f32 %v1732_v49, %v1707_v32 }
0x14c2   :  { %1834 = vrot.lane.b32.xlu2 %v1832_v56, %s5286_s5 }
0x151c   :  { %v1835_v62 = vpop.permute.xlu2 %1834 }
0x151d   :  { %v6065_v61 = vadd.f32 %v1835_v62, %v1827_v59 }
0x151f   :  { %5007 = vtanh.f32 %v6065_v61 }
0x1520   :  { %5009 = vtanh.f32 %v1691_v0 }
0x1525   :  { %v5008_v15 = vpop.eup %5007 }
0x1526   :  { %1840 = vrot.lane.b32.xlu0 %v5008_v15, %s5284_s1  ;;  %v5010_v48 = vpop.eup %5009 }
0x1527   :  { %v1693_v28 = vadd.f32 1.0, %v5010_v48 }
0x152e   :  { %1700 = vperm.xlu0 %4816, %v1695_v17   ;;  %v1694_v17 = vmul.f32 0.5, %v1693_v28 }
0x1530   :  { %v1723_v31 = vperm.slane %v1694_v17, 0  ;;  %v1722_v30 = vrot.slane %v1694_v17, 1 }
0x1532   :  { %v1728_v10 = vmul.f32 %v1723_v31, %v1707_v32  ;;  %v1724_v16 = vperm.slane %v1722_v30, 0 }
0x1534   :  { %v1741_v9 = vsub.f32 1.0, %v1728_v10 }
0x1536   :  { %4819 = vset.pattern.permute.xlu0 %v5612_v50 }
0x153e   :  { %1719 = vperm.xlu0 %4819, %v1708_v7  }
0x1546   :  { %4823 = vset.pattern.permute.xlu0 %v5293_v21 }
0x1598   :  { %v1841_v34 = vpop.permute.xlu0 %1840 }
0x1599   :  { %v6075_v45 = vmul.f32 %v1841_v34, %v1822_v54 }
0x159b   :  { %v1845_v4 = vrot.slane %v6075_v45, 6 }
0x159d   :  { %1846 = vrot.lane.b32.xlu2 %v1845_v4, %s5286_s5 }
0x15a0   :  { %v1701_v18 = vpop.permute.xlu0 %1700 }
0x15a1   :  { %v1727_v8 = vmul.f32 %v1723_v31, %v1701_v18  ;;  %v1736_v5 = vmul.f32 %v1732_v49, %v1701_v18 }
0x15a3   :  { %v1740_v42 = vsub.f32 1.0, %v1727_v8 }
0x15a5   :  { %1713 = vperm.xlu2 %4818, %v1708_v7  }
0x15ad   :  { %1748 = vrot.lane.b32.xlu2 %v1740_v42, %s5284_s1 }
0x15ae   :  { %4820 = vset.pattern.permute.xlu2 %v5288_v60 }
0x15b0   :  { %v1720_v58 = vpop.permute.xlu0 %1719 }
0x15b1   :  { %v1730_v1 = vmul.f32 %v1724_v16, %v1720_v58  ;;  %v1739_v2 = vmul.f32 %v1733_v55, %v1720_v58 }
0x15b3   :  { %v1743_v12 = vsub.f32 1.0, %v1730_v1 }
0x15b5   :  { %1750 = vrot.lane.b32.xlu2 %v1741_v9, %s5284_s1  ;;  %1754 = vrot.lane.b32.xlu1 %v1743_v12, %s5284_s1 }
0x15bd   :  { %1768 = vrot.lane.b32.xlu2 %v1736_v5, %s5291_s19 }
0x15c5   :  { %1774 = vrot.lane.b32.xlu2 %v1739_v2, %s5291_s19 }
0x15f7   :  { %v1847_v29 = vpop.permute.xlu2 %1846 }
0x15f8   :  { %4751 = vmatmul.msk.f32.vlgmr.msra.gmra.mxu2 %vm7020_vm3, %v1847_v29 }
0x15f9   :  { %4090 = vmatpush.msra.mxu2 %v5226_v36 }
0x15fb   :  { %4091 = vmatpush.msra.mxu2 %v5227_v24 }
0x15fd   :  { %4092 = vmatpush.msra.mxu2 %v5228_v13 }
0x15ff   :  { %v1714_v41 = vpop.permute.xlu2 %1713  ;;  %4093 = vmatpush.msra.mxu2 %v5229_v53 }
0x1600   :  { %v1729_v22 = vmul.f32 %v1724_v16, %v1714_v41  ;;  %v1738_v47 = vmul.f32 %v1733_v55, %v1714_v41 }
0x1602   :  { %1772 = vrot.lane.b32.xlu1 %v1738_v47, %s5291_s19  ;;  %v1742_v63 = vsub.f32 1.0, %v1729_v22 }
0x1604   :  { %1752 = vrot.lane.b32.xlu0 %v1742_v63, %s5284_s1 }
0x1607   :  { %v1749_v54 = vpop.permute.xlu2 %1748 }
0x1608   :  { %v1760_v59 = vmul.f32 %v1749_v54, %v5901_v23 }
0x160c   :  { %1770 = vrot.lane.b32.xlu0 %v1737_v40, %s5291_s19 }
0x160f   :  { %v1751_v56 = vpop.permute.xlu2 %1750 }
0x1610   :  { %v1761_v32 = vmul.f32 %v1751_v56, %v5921_v27 }
0x1617   :  { %v1769_v19 = vpop.permute.xlu2 %1768 }
0x1618   :  { %v6106_v62 = vadd.f32 %v1769_v19, %v1760_v59 }
0x161a   :  { %v1919_v15 = vadd.f32 1e-16, %v6106_v62 }
0x161c   :  { %v1995_v0 = vmul.f32 %v1919_v15, %v1919_v15 }
0x161e   :  { %v1999_v17 = vsel %vm245_vm4, %v1995_v0, 0.0 }
0x161f   :  { %v1775_v48 = vpop.permute.xlu2 %1774 }
0x1627   :  { %v1755_v7 = vpop.permute.xlu1 %1754 }
0x1628   :  { %v1763_v34 = vmul.f32 %v1755_v7, %v5905_v37 }
0x162a   :  { %v6110_v28 = vadd.f32 %v1775_v48, %v1763_v34 }
0x162c   :  { %2000 = vadd.xlane.f32.xlu1 %v1999_v17  ;;  %v1922_v18 = vadd.f32 1e-16, %v6110_v28 }
0x162e   :  { %v1998_v31 = vmul.f32 %v1922_v18, %v1922_v18 }
0x1630   :  { %v2008_v8 = vsel %vm245_vm4, %v1998_v31, 0.0 }
0x1634   :  { %2009 = vadd.xlane.f32.xlu1 %v2008_v8 }
0x1674   :  { %v1773_v49 = vpop.permute.xlu1 %1772 }
0x1676   :  { %v1753_v23 = vpop.permute.xlu0 %1752 }
0x1677   :  { %v1762_v12 = vmul.f32 %v1753_v23, %v5926_v6 }
0x167b   :  { %v1867_v42 = vpop.f32.mrf.mxu2 }
0x167c   :  { %v6116_v30 = vadd.f32 %v5913_v38, %v1867_v42  ;;  %v6126_v38 = vadd.f32 %v1773_v49, %v1762_v12 }
0x167e   :  { %v1771_v37 = vpop.permute.xlu0 %1770  ;;  %v1871_v10 = vrot.slane %v6116_v30, 6  ;;  %v1921_v27 = vadd.f32 1e-16, %v6126_v38 }
0x167f   :  { %v6120_v16 = vadd.f32 %v1771_v37, %v1761_v32 }
0x1680   :  { %1872 = vrot.lane.b32.xlu0 %v1871_v10, %s5287_s30  ;;  %v1997_v5 = vmul.f32 %v1921_v27, %v1921_v27 }
0x1681   :  { %v1920_v58 = vadd.f32 1e-16, %v6120_v16 }
0x1682   :  { %v2005_v44 = vsel %vm245_vm4, %v1997_v5, 0.0 }
0x1683   :  { %v1996_v1 = vmul.f32 %v1920_v58, %v1920_v58 }
0x1685   :  { %v2002_v9 = vsel %vm245_vm4, %v1996_v1, 0.0 }
0x1686   :  { %2003 = vadd.xlane.f32.xlu2 %v2002_v9 }
0x16aa   :  { %2006 = vadd.xlane.f32.xlu0 %v2005_v44 }
0x16f2   :  { %v1873_v55 = vpop.permute.xlu0 %1872 }
0x16f3   :  { %v6132_v2 = vsel %vm179_vm5, %v6116_v30, %v1873_v55 }
0x16f4   :  { %v1876_v29 = vadd.f32 1e-16, %v6132_v2  ;;  %v1878_v22 = vand.u32 2147483647, %v6132_v2  ;;  %v1890_v49 = vsel %vm7021_vm7, %v6132_v2, -inf  ;;  %v1877_v5 = vmax.f32 %v6132_v2, 0.0 }
0x16f6   :  { %1945 = vst [vmem:[#allocation1] sm:$0xff] %v1876_v29  ;;  %v2074_v36 = vmul.f32 %v1876_v29, %v1876_v29  ;;  %v1925_v24 = vperm.slane %v1876_v29, 0  ;;  %v1924_v6 = vrot.slane %v1876_v29, 1  ;;  %v1879_v56 = vsub.f32 0.0, %v1878_v22 }
0x16f8   :  { %v2075_v13 = vsel %vm394_vm6, %v2074_v36, 0.0  ;;  %v1930_v41 = vmul.f32 %v1925_v24, %v1920_v58  ;;  %v1929_v53 = vmul.f32 %v1925_v24, %v1919_v15  ;;  %v1926_v47 = vperm.slane %v1924_v6, 0  ;;  %v6157_v24 = vpop.xlane.xlu1 %2000 }
0x16f9   :  { %2076 = vadd.xlane.f32.xlu2 %v2075_v13  ;;  %v1880_v17 = vmul.f32 1.442695, %v1879_v56  ;;  %vm2018_vm3 = vcmp.eq.f32.partialorder %v6157_v24, inf }
0x16fa   :  { %v1936_v63 = vsel %vm245_vm4, %v1930_v41, 0.0  ;;  %v1933_v54 = vsel %vm245_vm4, %v1929_v53, 0.0  ;;  %v1931_v40 = vmul.f32 %v1926_v47, %v1921_v27  ;;  %v1932_v7 = vmul.f32 %v1926_v47, %v1922_v18  ;;  %v2004_v41 = vpop.xlane.xlu2 %2003 }
0x16fb   :  { %1937 = vadd.xlane.f32.xlu1 %v1936_v63  ;;  %1934 = vadd.xlane.f32.xlu0 %v1933_v54  ;;  %5011 = vpow2.f32 %v1880_v17  ;;  %vm2030_vm9 = vcmp.eq.f32.partialorder %v2004_v41, inf  ;;  %vm2032_vm10 = vcmp.eq.f32.partialorder %v2004_v41, 0.0 }
0x16fc   :  { %v1939_v0 = vsel %vm245_vm4, %v1931_v40, 0.0  ;;  %v1942_v8 = vsel %vm245_vm4, %v1932_v7, 0.0 }
0x16fd   :  { %v1947_v19 = vld [vmem:[#allocation1 + $0x2] ss:$9 sm:$0xff] }
0x16fe   :  { %v1950_v59 = vperm.slane %v1947_v19, 0  ;;  %v1949_v48 = vld [vmem:[#allocation1 + $0x3] ss:$9 sm:$0xff] }
0x16ff   :  { %v1951_v23 = vperm.slane %v1949_v48, 0 }
0x1700   :  { %v1954_v34 = vmul.f32 %v1950_v59, %v1919_v15  ;;  %v1955_v42 = vmul.f32 %v1950_v59, %v1920_v58  ;;  %v1886_v58 = vmul.f32 0.5, %v6132_v2  ;;  %v2010_v13 = vpop.xlane.xlu1 %2009 }
0x1701   :  { %1940 = vadd.xlane.f32.xlu2 %v1939_v0  ;;  %v1957_v32 = vmul.f32 %v1951_v23, %v1922_v18  ;;  %v1956_v37 = vmul.f32 %v1951_v23, %v1921_v27  ;;  %v5012_v1 = vpop.eup %5011  ;;  %vm2054_vm15 = vcmp.eq.f32.partialorder %v2010_v13, inf  ;;  %vm2056_vm12 = vcmp.eq.f32.partialorder %v2010_v13, 0.0 }
0x1702   :  { %v1958_v31 = vsel %vm245_vm4, %v1954_v34, 0.0  ;;  %v1961_v10 = vsel %vm245_vm4, %v1955_v42, 0.0  ;;  %v1882_v12 = vadd.f32 1.0, %v5012_v1 }
0x1703   :  { %1959 = vadd.xlane.f32.xlu1 %v1958_v31  ;;  %1943 = vadd.xlane.f32.xlu0 %v1942_v8  ;;  %v1967_v15 = vsel %vm245_vm4, %v1957_v32, 0.0  ;;  %v1964_v9 = vsel %vm245_vm4, %v1956_v37, 0.0 }
0x1704   :  { %5013 = vlog2.f32 %v1882_v12 }
0x1705   :  { %5015 = vtanh.f32 %v1886_v58 }
0x1709   :  { %1962 = vadd.xlane.f32.xlu2 %v1961_v10 }
0x170a   :  { %v5014_v18 = vpop.eup %5013 }
0x170b   :  { %1968 = vadd.xlane.f32.xlu1 %v1967_v15  ;;  %1965 = vadd.xlane.f32.xlu0 %v1964_v9  ;;  %v1884_v27 = vmul.f32 0.6931472, %v5014_v18  ;;  %v5016_v55 = vpop.eup %5015 }
0x170c   :  { %v1888_v29 = vadd.f32 1.0, %v5016_v55 }
0x170d   :  { %v6149_v44 = vadd.f32 %v1884_v27, %v1877_v5 }
0x170e   :  { %v6152_v36 = vmul.f32 0.5, %v1888_v29 }
0x1713   :  { %1891 = vmax.xlane.f32.xlu0 %v1890_v49 }
0x171d   :  { %v2007_v6 = vpop.xlane.xlu0 %2006 }
0x171e   :  { %5017 = vrsqrt.f32 %v2007_v6  ;;  %vm2042_vm14 = vcmp.eq.f32.partialorder %v2007_v6, inf  ;;  %vm2044_vm7 = vcmp.eq.f32.partialorder %v2007_v6, 0.0 }
0x171f   :  { %5019 = vrsqrt.f32 %v2010_v13 }
0x1720   :  { %5021 = vrsqrt.f32 %v2004_v41 }
0x1721   :  { %2096 = vperm.xlu2 %4820, %v6149_v44   ;;  %5023 = vrsqrt.f32 %v6157_v24 }
0x1724   :  { %v5018_v53 = vpop.eup %5017 }
0x1725   :  { %v5020_v22 = vpop.eup %5019  ;;  %v2036_v63 = vmul.f32 %v5018_v53, %v2007_v6 }
0x1726   :  { %v5022_v47 = vpop.eup %5021  ;;  %v2048_v40 = vmul.f32 %v5020_v22, %v2010_v13 }
0x1727   :  { %v5024_v54 = vpop.eup %5023  ;;  %v2024_v56 = vmul.f32 %v5022_v47, %v2004_v41  ;;  %v2037_v59 = vmul.f32 %v5018_v53, %v2036_v63  ;;  %v2045_v63 = vand.u32 2147483648, %v2007_v6 }
0x1728   :  { %v2012_v19 = vmul.f32 %v5024_v54, %v6157_v24  ;;  %v2049_v7 = vmul.f32 %v5020_v22, %v2048_v40  ;;  %v2033_v40 = vand.u32 2147483648, %v2004_v41 }
0x1729   :  { %4821 = vset.pattern.permute.xlu2 %v5289_v57  ;;  %v2025_v0 = vmul.f32 %v5022_v47, %v2024_v56  ;;  %v2038_v48 = vmul.f32 0.5, %v2037_v59 }
0x172a   :  { %2126 = vperm.xlu2 %4821, %v6152_v36   ;;  %v2013_v34 = vmul.f32 %v5024_v54, %v2012_v19  ;;  %v2050_v17 = vmul.f32 0.5, %v2049_v7  ;;  %v2021_v7 = vand.u32 2147483648, %v6157_v24 }
0x172b   :  { %v2026_v31 = vmul.f32 0.5, %v2025_v0  ;;  %v2039_v23 = vsub.f32 1.5, %v2038_v48 }
0x172c   :  { %v2014_v8 = vmul.f32 0.5, %v2013_v34  ;;  %v2051_v42 = vsub.f32 1.5, %v2050_v17 }
0x172d   :  { %v2027_v32 = vsub.f32 1.5, %v2026_v31  ;;  %v2040_v10 = vmul.f32 %v5018_v53, %v2039_v23 }
0x172e   :  { %v2015_v37 = vsub.f32 1.5, %v2014_v8  ;;  %v2052_v1 = vmul.f32 %v5020_v22, %v2051_v42 }
0x172f   :  { %v2028_v15 = vmul.f32 %v5022_v47, %v2027_v32  ;;  %v2041_v49 = vmul.f32 %v2040_v10, %v2007_v6 }
0x1730   :  { %v2016_v12 = vmul.f32 %v5024_v54, %v2015_v37  ;;  %v2053_v58 = vmul.f32 %v2052_v1, %v2010_v13  ;;  %v2057_v54 = vand.u32 2147483648, %v2010_v13 }
0x1731   :  { %v2029_v18 = vmul.f32 %v2028_v15, %v2004_v41  ;;  %v2043_v29 = vsel %vm2042_vm14, %v2007_v6, %v2041_v49  ;;  %vm2020_vm14 = vcmp.eq.f32.partialorder %v6157_v24, 0.0 }
0x1732   :  { %4824 = vset.pattern.permute.xlu2 %v5292_v20  ;;  %v2017_v55 = vmul.f32 %v2016_v12, %v6157_v24  ;;  %v2055_v22 = vsel %vm2054_vm15, %v2010_v13, %v2053_v58  ;;  %v2046_v56 = vsel %vm2044_vm7, %v2045_v63, %v2043_v29  ;;  %vm7022_vm15 = vcmask 19456  }
0x1733   :  { %v2031_v47 = vsel %vm2030_vm9, %v2004_v41, %v2029_v18  ;;  %v2058_v0 = vsel %vm2056_vm12, %v2057_v54, %v2055_v22  ;;  %v2066_v6 = vperm.slane %v2046_v56, %v5545_v26 }
0x1734   :  { %v2019_v59 = vsel %vm2018_vm3, %v6157_v24, %v2017_v55  ;;  %v2034_v34 = vsel %vm2032_vm10, %v2033_v40, %v2031_v47  ;;  %v2067_v37 = vperm.slane %v2058_v0, %v5554_v51 }
0x1735   :  { %v2022_v23 = vsel %vm2020_vm14, %v2021_v7, %v2019_v59  ;;  %v2064_v32 = vperm.slane %v2034_v34, %v5554_v51 }
0x1736   :  { %v2063_v41 = vperm.slane %v2022_v23, %v5545_v26  ;;  %v2068_v10 = vsel %vm7015_vm0, %v2067_v37, %v2066_v6 }
0x1738   :  { %v2065_v15 = vsel %vm7015_vm0, %v2064_v32, %v2063_v41 }
0x1739   :  { %v2069_v24 = vsel %vm297_vm1, %v2068_v10, %v2065_v15  ;;  %v2071_v49 = vsel %vm310_vm8, %v2068_v10, %v2065_v15 }
0x173a   :  { %v2073_v47 = vsel %vm179_vm5, %v2069_v24, %v2071_v49 }
0x176c   :  { %v2077_v9 = vpop.xlane.xlu2 %2076 }
0x176d   :  { %5025 = vrsqrt.f32 %v2077_v9  ;;  %vm2085_vm10 = vcmp.eq.f32.partialorder %v2077_v9, inf  ;;  %v2088_v55 = vand.u32 2147483648, %v2077_v9  ;;  %vm2087_vm12 = vcmp.eq.f32.partialorder %v2077_v9, 0.0 }
0x176e   :  { %v6161_v27 = vpop.xlane.xlu1 %1937  ;;  %v6163_v5 = vpop.xlane.xlu0 %1934 }
0x176f   :  { %v1975_v7 = vperm.slane %v6161_v27, %v5554_v51 }
0x1773   :  { %v5026_v53 = vpop.eup %5025 }
0x1774   :  { %v2079_v19 = vmul.f32 %v5026_v53, %v2077_v9  ;;  %v1941_v17 = vpop.xlane.xlu2 %1940 }
0x1775   :  { %v1977_v0 = vperm.slane %v1941_v17, %v5545_v26 }
0x1776   :  { %v2080_v48 = vmul.f32 %v5026_v53, %v2079_v19  ;;  %v1960_v31 = vpop.xlane.xlu1 %1959  ;;  %v1944_v8 = vpop.xlane.xlu0 %1943 }
0x1777   :  { %v1978_v56 = vperm.slane %v1944_v8, %v5554_v51  ;;  %v1986_v34 = vperm.slane %v1960_v31, %v5545_v26 }
0x1778   :  { %v2081_v42 = vmul.f32 0.5, %v2080_v48 }
0x1779   :  { %v1979_v23 = vsel %vm7015_vm0, %v1978_v56, %v1977_v0 }
0x177a   :  { %v2082_v13 = vsub.f32 1.5, %v2081_v42 }
0x177c   :  { %v2083_v1 = vmul.f32 %v5026_v53, %v2082_v13  ;;  %v1963_v63 = vpop.xlane.xlu2 %1962 }
0x177d   :  { %v1987_v19 = vperm.slane %v1963_v63, %v5554_v51 }
0x177e   :  { %v2084_v12 = vmul.f32 %v2083_v1, %v2077_v9  ;;  %v1969_v58 = vpop.xlane.xlu1 %1968  ;;  %v1966_v18 = vpop.xlane.xlu0 %1965 }
0x177f   :  { %v1990_v54 = vperm.slane %v1969_v58, %v5554_v51  ;;  %v1989_v53 = vperm.slane %v1966_v18, %v5545_v26  ;;  %v1988_v8 = vsel %vm7015_vm0, %v1987_v19, %v1986_v34 }
0x1780   :  { %v2086_v29 = vsel %vm2085_vm10, %v2077_v9, %v2084_v12  ;;  %v1974_v9 = vperm.slane %v6163_v5, %v5545_v26 }
0x1781   :  { %v2089_v22 = vsel %vm2087_vm12, %v2088_v55, %v2086_v29  ;;  %v1991_v48 = vsel %vm7015_vm0, %v1990_v54, %v1989_v53  ;;  %v2130_v29 = vsub.f32 1.0, %v6152_v36 }
0x1782   :  { %v2090_v40 = vmul.f32 %v2089_v22, %v2073_v47  ;;  %v1992_v32 = vsel %vm310_vm8, %v1991_v48, %v1988_v8  ;;  %v1976_v27 = vsel %vm7015_vm0, %v1975_v7, %v1974_v9 }
0x1783   :  { %v1980_v5 = vsel %vm297_vm1, %v1979_v23, %v1976_v27 }
0x1784   :  { %v2091_v59 = vmax.f32 %v2090_v40, 1e-08  ;;  %v1994_v31 = vsel %vm179_vm5, %v1980_v5, %v1992_v32  ;;  %v2097_v41 = vpop.permute.xlu2 %2096 }
0x1786   :  { %5027 = vrcp.f32 %v2091_v59  ;;  %v1892_v6 = vpop.xlane.xlu0 %1891 }
0x1787   :  { %v1893_v42 = vsub.f32 %v6132_v2, %v1892_v6 }
0x1789   :  { %v1894_v37 = vmul.f32 1.442695, %v1893_v42 }
0x178b   :  { %5029 = vpow2.f32 %v1894_v37 }
0x178c   :  { %v5028_v17 = vpop.eup %5027 }
0x178d   :  { %v2093_v13 = vmul.f32 %v5028_v17, %v1994_v31  ;;  %v2127_v31 = vpop.permute.xlu2 %2126 }
0x178f   :  { %v2099_v10 = vmul.f32 %v2097_v41, %v2093_v13 }
0x1791   :  { %v2100_v1 = vsel %vm394_vm6, %v2099_v10, -inf  ;;  %v5030_v15 = vpop.eup %5029 }
0x1792   :  { %2101 = vmax.xlane.f32.xlu1 %v2100_v1  ;;  %1897 = vrot.lane.b32.xlu0 %v5030_v15, %s5290_s2 }
0x1804   :  { %v1898_v2 = vpop.permute.xlu0 %1897 }
0x1805   :  { %v2102_v12 = vpop.xlane.xlu1 %2101  ;;  %v1900_v49 = vsel %vm7022_vm15, %v1898_v2, 0.0 }
0x1806   :  { %v2103_v24 = vsub.f32 %v2099_v10, %v2102_v12  ;;  %1901 = vadd.xlane.f32.xlu1 %v1900_v49 }
0x1808   :  { %v2104_v58 = vmul.f32 1.442695, %v2103_v24 }
0x180a   :  { %5031 = vpow2.f32 %v2104_v58 }
0x1810   :  { %v5032_v18 = vpop.eup %5031 }
0x1811   :  { %v2106_v55 = vsel %vm394_vm6, %v5032_v18, 0.0 }
0x1812   :  { %2107 = vadd.xlane.f32.xlu1 %v2106_v55 }
0x182b   :  { %2133 = vperm.xlu1 %4822, %v2130_v29  }
0x1833   :  { %4830 = vset.pattern.permute.xlu1 %v5609_v43 }
0x1879   :  { %v1902_v63 = vpop.xlane.xlu1 %1901 }
0x187a   :  { %5033 = vrcp.f32 %v1902_v63  ;;  %v1914_v53 = vand.u32 2147483648, %v1902_v63  ;;  %v1912_v19 = vand.u32 2147483647, %v1902_v63  ;;  %vm1908_vm3 = vweird.f32 %v1902_v63 }
0x187c   :  { %v1915_v7 = vor.u32 1.1754944e-38, %v1914_v53  ;;  %vm1913_vm14 = vcmp.eq.f32.partialorder %v1912_v19, 8.507059e+37 }
0x1880   :  { %v5034_v22 = vpop.eup %5033 }
0x1881   :  { %v1904_v47 = vmul.f32 %v5034_v22, %v1902_v63  ;;  %vm1909_vm9 = vweird.f32 %v5034_v22 }
0x1882   :  { %vm1910_vm7 = vmor %vm1908_vm3, %vm1909_vm9 }
0x1883   :  { %v1905_v54 = vsub.f32 1.0, %v1904_v47 }
0x1885   :  { %v2108_v40 = vpop.xlane.xlu1 %2107  ;;  %v1906_v56 = vmul.f32 %v5034_v22, %v1905_v54 }
0x1886   :  { %5035 = vrcp.f32 %v2108_v40  ;;  %v2120_v8 = vand.u32 2147483648, %v2108_v40  ;;  %v2118_v42 = vand.u32 2147483647, %v2108_v40  ;;  %vm2114_vm12 = vweird.f32 %v2108_v40 }
0x1887   :  { %v1907_v59 = vadd.f32 %v5034_v22, %v1906_v56 }
0x1888   :  { %v2121_v27 = vor.u32 1.1754944e-38, %v2120_v8  ;;  %vm2119_vm9 = vcmp.eq.f32.partialorder %v2118_v42, 8.507059e+37 }
0x1889   :  { %v1911_v9 = vsel %vm1910_vm7, %v5034_v22, %v1907_v59 }
0x188a   :  { %v1916_v36 = vsel %vm1913_vm14, %v1915_v7, %v1911_v9 }
0x188b   :  { %v1917_v34 = vmul.f32 %v5030_v15, %v1916_v36  ;;  %v1918_v15 = vadd.f32 1.0, %v6149_v44 }
0x188c   :  { %v5036_v0 = vpop.eup %5035 }
0x188d   :  { %v2110_v48 = vmul.f32 %v5036_v0, %v2108_v40  ;;  %2160 = vperm.xlu2 %4824, %v1917_v34   ;;  %2155 = vperm.xlu0 %4823, %v1917_v34   ;;  %vm2115_vm10 = vweird.f32 %v5036_v0 }
0x188e   :  { %vm2116_vm15 = vmor %vm2114_vm12, %vm2115_vm10  ;;  %vm7013_vm12 = vcmask 1047559  }
0x188f   :  { %v2111_v6 = vsub.f32 1.0, %v2110_v48 }
0x1891   :  { %v2112_v23 = vmul.f32 %v5036_v0, %v2111_v6 }
0x1893   :  { %v2113_v32 = vadd.f32 %v5036_v0, %v2112_v23 }
0x1895   :  { %v2117_v37 = vsel %vm2116_vm15, %v5036_v0, %v2113_v32  ;;  %4825 = vset.pattern.permute.xlu0 %v5294_v46  ;;  %4826 = vset.pattern.permute.xlu2 %v5299_v3  ;;  %vm7014_vm15 = vcmask 1045504  }
0x1896   :  { %v2122_v5 = vsel %vm2119_vm9, %v2121_v27, %v2117_v37  ;;  %vm7023_vm9 = vcmask 261120  }
0x1897   :  { %v2123_v17 = vmul.f32 %v5032_v18, %v2122_v5 }
0x1899   :  { %v2129_v41 = vmul.f32 %v2127_v31, %v2123_v17 }
0x189d   :  { %v2134_v13 = vpop.permute.xlu1 %2133 }
0x189e   :  { %v2136_v10 = vmul.f32 %v2134_v13, %v6012_v33 }
0x18a0   :  { %v2137_v1 = vadd.f32 %v2136_v10, %v2129_v41 }
0x18a2   :  { %2149 = vrot.lane.b32.xlu1 %v2137_v1, %s5295_s20  ;;  %2142 = vrot.lane.b32.xlu2 %v2137_v1, %s5297_s22 }
0x18a3   :  { %2139 = vrot.lane.b32.xlu0 %v2137_v1, %s5296_s21 }
0x18aa   :  { %2146 = vrot.lane.b32.xlu2 %v2137_v1, %s5298_s23 }
0x18ab   :  { %2166 = vperm.xlu0 %4825, %v1917_v34  }
0x18b2   :  { %2176 = vperm.xlu2 %4826, %v1918_v15  }
0x18b3   :  { %4828 = vset.pattern.permute.xlu0 %v5612_v50 }
0x18ba   :  { %4827 = vset.pattern.permute.xlu2 %v5609_v43 }
0x18e7   :  { %v2161_v2 = vpop.permute.xlu2 %2160 }
0x18e8   :  { %v2163_v55 = vmul.f32 %v2161_v2, %v2137_v1 }
0x18fc   :  { %v2143_v33 = vpop.permute.xlu2 %2142 }
0x18ff   :  { %v2156_v12 = vpop.permute.xlu0 %2155 }
0x1904   :  { %v2147_v29 = vpop.permute.xlu2 %2146 }
0x190c   :  { %v2177_v19 = vpop.permute.xlu2 %2176 }
0x1914   :  { %v2150_v58 = vpop.permute.xlu1 %2149 }
0x1915   :  { %v2140_v24 = vpop.permute.xlu0 %2139  ;;  %v2152_v63 = vsel %vm477_vm13, %v2147_v29, %v2150_v58 }
0x1916   :  { %v2145_v49 = vsel %vm469_vm11, %v2140_v24, %v2143_v33 }
0x1917   :  { %v2158_v18 = vmul.f32 %v2156_v12, %v2145_v49 }
0x1919   :  { %v2164_v47 = vadd.f32 %v2163_v55, %v2158_v18 }
0x191d   :  { %v2167_v22 = vpop.permute.xlu0 %2166 }
0x191e   :  { %v2169_v44 = vmul.f32 %v2167_v22, %v2152_v63 }
0x1920   :  { %v2170_v54 = vadd.f32 %v2169_v44, %v2164_v47 }
0x1922   :  { %v2171_v53 = vmax.f32 %v2170_v54, 1e-30 }
0x1924   :  { %5037 = vlog2.f32 %v2171_v53 }
0x192a   :  { %v5038_v40 = vpop.eup %5037 }
0x192b   :  { %v2173_v56 = vmul.f32 0.6931472, %v5038_v40 }
0x192d   :  { %v2179_v59 = vmul.f32 %v2177_v19, %v2173_v56 }
0x192f   :  { %v2180_v7 = vmul.f32 1.442695, %v2179_v59 }
0x1931   :  { %5039 = vpow2.f32 %v2180_v7 }
0x1937   :  { %v5040_v9 = vpop.eup %5039 }
0x1938   :  { %v2182_v36 = vsel %vm394_vm6, %v5040_v9, 0.0 }
0x1939   :  { %2183 = vadd.xlane.f32.xlu1 %v2182_v36 }
0x19ac   :  { %v2184_v0 = vpop.xlane.xlu1 %2183 }
0x19ad   :  { %v2185_v34 = vadd.f32 1e-16, %v2184_v0 }
0x19af   :  { %5041 = vrcp.f32 %v2185_v34  ;;  %v2197_v8 = vand.u32 2147483648, %v2185_v34  ;;  %v2195_v32 = vand.u32 2147483647, %v2185_v34  ;;  %vm2191_vm7 = vweird.f32 %v2185_v34 }
0x19b1   :  { %v2198_v37 = vor.u32 1.1754944e-38, %v2197_v8  ;;  %vm2196_vm10 = vcmp.eq.f32.partialorder %v2195_v32, 8.507059e+37 }
0x19b5   :  { %v5042_v48 = vpop.eup %5041 }
0x19b6   :  { %v2187_v6 = vmul.f32 %v5042_v48, %v2185_v34  ;;  %vm2192_vm3 = vweird.f32 %v5042_v48 }
0x19b7   :  { %vm2193_vm14 = vmor %vm2191_vm7, %vm2192_vm3  ;;  %vm7024_vm3 = vcmask 167056  }
0x19b8   :  { %v2188_v23 = vsub.f32 1.0, %v2187_v6 }
0x19ba   :  { %v2189_v42 = vmul.f32 %v5042_v48, %v2188_v23 }
0x19bc   :  { %v2190_v27 = vadd.f32 %v5042_v48, %v2189_v42 }
0x19be   :  { %v2194_v5 = vsel %vm2193_vm14, %v5042_v48, %v2190_v27 }
0x19bf   :  { %v2199_v17 = vsel %vm2196_vm10, %v2198_v37, %v2194_v5 }
0x19c0   :  { %v6216_v31 = vmul.f32 %v5040_v9, %v2199_v17 }
0x19c2   :  { %v2253_v13 = vperm.slane %v6216_v31, 2  ;;  %v2201_v41 = vperm.slane %v6216_v31, 0  ;;  %v2214_v10 = vperm.slane %v6216_v31, 1 }
0x19c4   :  { %2258 = vperm.xlu1 %4830, %v2253_v13   ;;  %2212 = vperm.xlu0 %4828, %v2201_v41  }
0x19c5   :  { %2206 = vperm.xlu2 %4827, %v2201_v41  }
0x19cc   :  { %2346 = vrot.lane.b32.xlu0 %v1845_v4, %s5291_s19  ;;  %4833 = vset.pattern.permute.xlu1 %v5289_v57 }
0x19cd   :  { %2219 = vperm.xlu2 %4827, %v2214_v10   ;;  %4831 = vset.pattern.permute.xlu0 %v5609_v43 }
0x19d5   :  { %4829 = vset.pattern.permute.xlu2 %v5612_v50 }
0x19dd   :  { %2225 = vperm.xlu2 %4829, %v2214_v10  }
0x1a1f   :  { %v2207_v1 = vpop.permute.xlu2 %2206 }
0x1a20   :  { %v2227_v2 = vmul.f32 %v2207_v1, %v6106_v62 }
0x1a22   :  { %v2231_v4 = vsel %vm245_vm4, %v2227_v2, 0.0 }
0x1a27   :  { %v2220_v15 = vpop.permute.xlu2 %2219 }
0x1a28   :  { %v2229_v12 = vmul.f32 %v2220_v15, %v6126_v38 }
0x1a2a   :  { %v2240_v18 = vsel %vm245_vm4, %v2229_v12, 0.0  ;;  %v2249_v12 = vmul.f32 0.5, %v6116_v30 }
0x1a36   :  { %v2213_v33 = vpop.permute.xlu0 %2212 }
0x1a37   :  { %v2228_v24 = vmul.f32 %v2213_v33, %v6120_v16  ;;  %v2226_v49 = vpop.permute.xlu2 %2225 }
0x1a38   :  { %v2230_v45 = vmul.f32 %v2226_v49, %v6110_v28 }
0x1a39   :  { %v2232_v58 = vsel %vm245_vm4, %v2228_v24, 0.0 }
0x1a3a   :  { %v2233_v55 = vadd.f32 %v2232_v58, %v2231_v4  ;;  %v2241_v29 = vsel %vm245_vm4, %v2230_v45, 0.0  ;;  %v2259_v4 = vpop.permute.xlu1 %2258 }
0x1a3b   :  { %v2242_v63 = vadd.f32 %v2241_v29, %v2240_v18 }
0x1a3c   :  { %v2234_v22 = vrot.slane %v2233_v55, 4 }
0x1a3d   :  { %v2243_v47 = vrot.slane %v2242_v63, 4 }
0x1a3e   :  { %v2235_v44 = vadd.f32 %v2234_v22, %v2233_v55  ;;  %v2347_v0 = vpop.permute.xlu0 %2346 }
0x1a3f   :  { %v2244_v54 = vadd.f32 %v2243_v47, %v2242_v63 }
0x1a40   :  { %v2236_v53 = vrot.slane %v2235_v44, 2 }
0x1a41   :  { %v2245_v40 = vrot.slane %v2244_v54, 2 }
0x1a42   :  { %v2237_v56 = vadd.f32 %v2236_v53, %v2235_v44 }
0x1a43   :  { %v2246_v19 = vadd.f32 %v2245_v40, %v2244_v54 }
0x1a44   :  { %v2238_v59 = vrot.slane %v2237_v56, 1 }
0x1a45   :  { %v2247_v7 = vrot.slane %v2246_v19, 1 }
0x1a46   :  { %v2239_v9 = vadd.f32 %v2238_v59, %v2237_v56 }
0x1a47   :  { %v2248_v36 = vadd.f32 %v2247_v7, %v2246_v19  ;;  %v2290_v19 = vperm.slane %v6116_v30, 0  ;;  %v2289_v7 = vrot.slane %v6116_v30, 1 }
0x1a49   :  { %v2344_v34 = vsel %vm297_vm1, %v2248_v36, %v2239_v9  ;;  %v4576_v48 = vsel %vm7013_vm12, %v2248_v36, %v2239_v9  ;;  %v2294_v59 = vmul.f32 %v2290_v19, %v2259_v4  ;;  %v2291_v9 = vperm.slane %v2289_v7, 0 }
0x1a4a   :  { %v2349_v6 = vsel %vm245_vm4, %v2344_v34, %v2347_v0  ;;  %v6242_v23 = vsel %vm7014_vm15, %v6040_v35, %v4576_v48  ;;  %v2380_v35 = vrot.slane %v6065_v61, 6  ;;  %v2266_v61 = vperm.slane %v6216_v31, 3 }
0x1a4b   :  { %4752 = vmatmul.msk.f32.vlgmr.msrb.gmra.mxu0 %vm95_vm2, %v2349_v6 }
0x1ac8   :  { %v2370_v8 = vpop.f32.mrf.mxu0 }
0x1ac9   :  { %v2373_v42 = vadd.f32 %v2370_v8, %v5408_v14 }
0x1acb   :  { %5043 = vtanh.f32 %v2373_v42  ;;  %v2374_v27 = vmul.f32 0.5, %v2373_v42 }
0x1acd   :  { %5045 = vtanh.f32 %v2374_v27 }
0x1ad1   :  { %v5044_v32 = vpop.eup %5043 }
0x1ad2   :  { %2384 = vrot.lane.b32.xlu2 %v5044_v32, %s5284_s1 }
0x1ad3   :  { %v5046_v37 = vpop.eup %5045 }
0x1ad4   :  { %v2376_v5 = vadd.f32 1.0, %v5046_v37 }
0x1ad6   :  { %v2377_v17 = vmul.f32 0.5, %v2376_v5 }
0x1ad8   :  { %v2382_v1 = vmul.f32 %v2380_v35, %v2377_v17 }
0x1b2c   :  { %v2385_v41 = vpop.permute.xlu2 %2384 }
0x1b2d   :  { %v2387_v10 = vmul.f32 %v2385_v41, %v2377_v17 }
0x1b2f   :  { %2389 = vrot.lane.b32.xlu0 %v2387_v10, %s5286_s5 }
0x1ba1   :  { %v2390_v15 = vpop.permute.xlu0 %2389 }
0x1ba2   :  { %v6249_v2 = vadd.f32 %v2390_v15, %v2382_v1 }
0x1ba4   :  { %5047 = vtanh.f32 %v6249_v2 }
0x1ba5   :  { %5049 = vtanh.f32 %v2249_v12 }
0x1baa   :  { %v5048_v33 = vpop.eup %5047 }
0x1bab   :  { %2395 = vrot.lane.b32.xlu2 %v5048_v33, %s5284_s1  ;;  %v5050_v24 = vpop.eup %5049 }
0x1bac   :  { %v2251_v49 = vadd.f32 1.0, %v5050_v24 }
0x1bae   :  { %v2252_v45 = vmul.f32 0.5, %v2251_v49 }
0x1bb0   :  { %v2281_v58 = vperm.slane %v2252_v45, 0 }
0x1bb2   :  { %v2285_v18 = vmul.f32 %v2281_v58, %v2259_v4 }
0x1bb3   :  { %2264 = vperm.xlu2 %4829, %v2253_v13   ;;  %v2280_v13 = vrot.slane %v2252_v45, 1 }
0x1bb4   :  { %v2298_v55 = vsub.f32 1.0, %v2285_v18 }
0x1bb5   :  { %v2282_v44 = vperm.slane %v2280_v13, 0 }
0x1bbb   :  { %2277 = vperm.xlu2 %4829, %v2266_v61  }
0x1bc3   :  { %2306 = vrot.lane.b32.xlu2 %v2298_v55, %s5284_s1 }
0x1bc4   :  { %4834 = vset.pattern.permute.xlu2 %v5289_v57 }
0x1c05   :  { %v2396_v29 = vpop.permute.xlu2 %2395 }
0x1c06   :  { %v6259_v63 = vmul.f32 %v2396_v29, %v2377_v17 }
0x1c08   :  { %2400 = vrot.lane.b32.xlu0 %v6259_v63, %s5286_s5 }
0x1c0d   :  { %v2265_v22 = vpop.permute.xlu2 %2264 }
0x1c0e   :  { %v2286_v47 = vmul.f32 %v2281_v58, %v2265_v22  ;;  %v2295_v42 = vmul.f32 %v2290_v19, %v2265_v22 }
0x1c10   :  { %2271 = vperm.xlu0 %4831, %v2266_v61   ;;  %v2299_v53 = vsub.f32 1.0, %v2286_v47  ;;  %v6287_v61 = vld [vmem:[%s7003_s7] ss:$0 sm:$0xff] }
0x1c15   :  { %v2278_v54 = vpop.permute.xlu2 %2277 }
0x1c16   :  { %v2288_v40 = vmul.f32 %v2282_v44, %v2278_v54  ;;  %v2297_v36 = vmul.f32 %v2291_v9, %v2278_v54 }
0x1c18   :  { %v2301_v56 = vsub.f32 1.0, %v2288_v40  ;;  %2308 = vrot.lane.b32.xlu0 %v2299_v53, %s5284_s1 }
0x1c19   :  { %4832 = vset.pattern.permute.xlu0 %v5288_v60 }
0x1c1a   :  { %2312 = vrot.lane.b32.xlu2 %v2301_v56, %s5284_s1 }
0x1c1d   :  { %v2307_v27 = vpop.permute.xlu2 %2306 }
0x1c1e   :  { %v2318_v5 = vmul.f32 %v2307_v27, %v6106_v62 }
0x1c20   :  { %2326 = vrot.lane.b32.xlu0 %v2294_v59, %s5291_s19 }
0x1c28   :  { %2332 = vrot.lane.b32.xlu0 %v2297_v36, %s5291_s19 }
0x1c74   :  { %v2313_v41 = vpop.permute.xlu2 %2312 }
0x1c75   :  { %v2321_v1 = vmul.f32 %v2313_v41, %v6110_v28 }
0x1c7a   :  { %v2401_v0 = vpop.permute.xlu0 %2400 }
0x1c7b   :  { %4753 = vmatmul.msk.f32.vlgmr.msrb.gmra.mxu1 %vm7023_vm9, %v2401_v0 }
0x1c82   :  { %v2272_v34 = vpop.permute.xlu0 %2271 }
0x1c83   :  { %v2287_v48 = vmul.f32 %v2282_v44, %v2272_v34  ;;  %v2296_v6 = vmul.f32 %v2291_v9, %v2272_v34 }
0x1c85   :  { %v2300_v8 = vsub.f32 1.0, %v2287_v48  ;;  %2330 = vrot.lane.b32.xlu2 %v2296_v6, %s5291_s19 }
0x1c87   :  { %2310 = vrot.lane.b32.xlu1 %v2300_v8, %s5284_s1 }
0x1c8a   :  { %v2309_v32 = vpop.permute.xlu0 %2308 }
0x1c8b   :  { %v2319_v18 = vmul.f32 %v2309_v32, %v6120_v16 }
0x1c8f   :  { %2328 = vrot.lane.b32.xlu1 %v2295_v42, %s5291_s19 }
0x1c92   :  { %v2327_v37 = vpop.permute.xlu0 %2326 }
0x1c93   :  { %v6275_v17 = vadd.f32 %v2327_v37, %v2318_v5 }
0x1c95   :  { %v2473_v10 = vadd.f32 1e-16, %v6275_v17 }
0x1c97   :  { %v2549_v12 = vmul.f32 %v2473_v10, %v2473_v10 }
0x1c99   :  { %v2553_v24 = vsel %vm245_vm4, %v2549_v12, 0.0 }
0x1c9a   :  { %v2333_v35 = vpop.permute.xlu0 %2332 }
0x1c9b   :  { %v6279_v15 = vadd.f32 %v2333_v35, %v2321_v1 }
0x1c9d   :  { %v2476_v33 = vadd.f32 1e-16, %v6279_v15 }
0x1c9f   :  { %v2552_v49 = vmul.f32 %v2476_v33, %v2476_v33 }
0x1ca1   :  { %v2562_v45 = vsel %vm245_vm4, %v2552_v49, 0.0 }
0x1cae   :  { %2554 = vadd.xlane.f32.xlu2 %v2553_v24 }
0x1cb6   :  { %2563 = vadd.xlane.f32.xlu2 %v2562_v45 }
0x1cdf   :  { %v2331_v54 = vpop.permute.xlu2 %2330 }
0x1cf8   :  { %v2421_v62 = vpop.f32.mrf.mxu1 }
0x1cf9   :  { %v6290_v28 = vadd.f32 %v6287_v61, %v2421_v62  ;;  %v2311_v4 = vpop.permute.xlu1 %2310 }
0x1cfa   :  { %v2320_v44 = vmul.f32 %v2311_v4, %v6126_v38 }
0x1cfb   :  { %v2425_v58 = vrot.slane %v6290_v28, 6 }
0x1cfc   :  { %v6300_v53 = vadd.f32 %v2331_v54, %v2320_v44 }
0x1cfd   :  { %2426 = vrot.lane.b32.xlu1 %v2425_v58, %s5287_s30 }
0x1cfe   :  { %v2475_v40 = vadd.f32 1e-16, %v6300_v53 }
0x1d00   :  { %v2551_v56 = vmul.f32 %v2475_v40, %v2475_v40 }
0x1d01   :  { %v2329_v55 = vpop.permute.xlu1 %2328 }
0x1d02   :  { %v6295_v29 = vadd.f32 %v2329_v55, %v2319_v18  ;;  %v2559_v19 = vsel %vm245_vm4, %v2551_v56, 0.0 }
0x1d04   :  { %v2474_v22 = vadd.f32 1e-16, %v6295_v29 }
0x1d06   :  { %v2550_v13 = vmul.f32 %v2474_v22, %v2474_v22 }
0x1d08   :  { %v2556_v47 = vsel %vm245_vm4, %v2550_v13, 0.0 }
0x1d09   :  { %2557 = vadd.xlane.f32.xlu0 %v2556_v47 }
0x1d27   :  { %2560 = vadd.xlane.f32.xlu1 %v2559_v19 }
0x1d6f   :  { %v2427_v16 = vpop.permute.xlu1 %2426 }
0x1d70   :  { %v6306_v59 = vsel %vm179_vm5, %v6290_v28, %v2427_v16  ;;  %v6326_v16 = vpop.xlane.xlu2 %2554 }
0x1d71   :  { %v2430_v7 = vadd.f32 1e-16, %v6306_v59  ;;  %v2432_v9 = vand.u32 2147483647, %v6306_v59  ;;  %vm2572_vm9 = vcmp.eq.f32.partialorder %v6326_v16, inf }
0x1d73   :  { %2499 = vst [vmem:[#allocation1] sm:$0xff] %v2430_v7  ;;  %v2628_v38 = vmul.f32 %v2430_v7, %v2430_v7  ;;  %v2479_v36 = vperm.slane %v2430_v7, 0  ;;  %v2478_v0 = vrot.slane %v2430_v7, 1  ;;  %v2433_v8 = vsub.f32 0.0, %v2432_v9 }
0x1d75   :  { %v2629_v34 = vsel %vm394_vm6, %v2628_v38, 0.0  ;;  %v2483_v48 = vmul.f32 %v2479_v36, %v2473_v10  ;;  %v2484_v6 = vmul.f32 %v2479_v36, %v2474_v22  ;;  %v2480_v42 = vperm.slane %v2478_v0, 0 }
0x1d76   :  { %2630 = vadd.xlane.f32.xlu0 %v2629_v34  ;;  %v2434_v5 = vmul.f32 1.442695, %v2433_v8 }
0x1d77   :  { %v2487_v32 = vsel %vm245_vm4, %v2483_v48, 0.0  ;;  %v2490_v27 = vsel %vm245_vm4, %v2484_v6, 0.0  ;;  %v2485_v37 = vmul.f32 %v2480_v42, %v2475_v40  ;;  %v2486_v35 = vmul.f32 %v2480_v42, %v2476_v33 }
0x1d78   :  { %2488 = vadd.xlane.f32.xlu2 %v2487_v32  ;;  %2491 = vadd.xlane.f32.xlu1 %v2490_v27  ;;  %5051 = vpow2.f32 %v2434_v5  ;;  %v2564_v9 = vpop.xlane.xlu2 %2563 }
0x1d79   :  { %v2493_v24 = vsel %vm245_vm4, %v2485_v37, 0.0  ;;  %v2496_v45 = vsel %vm245_vm4, %v2486_v35, 0.0  ;;  %vm2608_vm14 = vcmp.eq.f32.partialorder %v2564_v9, inf  ;;  %vm2610_vm12 = vcmp.eq.f32.partialorder %v2564_v9, 0.0 }
0x1d7a   :  { %v2501_v41 = vld [vmem:[#allocation1 + $0x2] ss:$9 sm:$0xff] }
0x1d7b   :  { %v2504_v1 = vperm.slane %v2501_v41, 0  ;;  %v2503_v12 = vld [vmem:[#allocation1 + $0x3] ss:$9 sm:$0xff] }
0x1d7c   :  { %v2505_v62 = vperm.slane %v2503_v12, 0  ;;  %v2558_v38 = vpop.xlane.xlu0 %2557 }
0x1d7d   :  { %v2508_v49 = vmul.f32 %v2504_v1, %v2473_v10  ;;  %v2509_v58 = vmul.f32 %v2504_v1, %v2474_v22  ;;  %v2444_v10 = vsel %vm7024_vm3, %v6306_v59, -inf  ;;  %vm2584_vm10 = vcmp.eq.f32.partialorder %v2558_v38, inf }
0x1d7e   :  { %2494 = vadd.xlane.f32.xlu0 %v2493_v24  ;;  %v2510_v18 = vmul.f32 %v2505_v62, %v2475_v40  ;;  %v5052_v55 = vpop.eup %5051  ;;  %v2511_v13 = vmul.f32 %v2505_v62, %v2476_v33  ;;  %v2431_v40 = vmax.f32 %v6306_v59, 0.0  ;;  %vm2586_vm15 = vcmp.eq.f32.partialorder %v2558_v38, 0.0 }
0x1d7f   :  { %v2512_v4 = vsel %vm245_vm4, %v2508_v49, 0.0  ;;  %v2515_v47 = vsel %vm245_vm4, %v2509_v58, 0.0  ;;  %v2436_v54 = vadd.f32 1.0, %v5052_v55 }
0x1d80   :  { %2497 = vadd.xlane.f32.xlu2 %v2496_v45  ;;  %2513 = vadd.xlane.f32.xlu1 %v2512_v4  ;;  %v2518_v44 = vsel %vm245_vm4, %v2510_v18, 0.0  ;;  %v2521_v56 = vsel %vm245_vm4, %v2511_v13, 0.0 }
0x1d81   :  { %5053 = vlog2.f32 %v2436_v54 }
0x1d86   :  { %2516 = vadd.xlane.f32.xlu0 %v2515_v47 }
0x1d87   :  { %v5054_v19 = vpop.eup %5053 }
0x1d88   :  { %2519 = vadd.xlane.f32.xlu2 %v2518_v44  ;;  %2522 = vadd.xlane.f32.xlu1 %v2521_v56  ;;  %v2438_v22 = vmul.f32 0.6931472, %v5054_v19 }
0x1d8a   :  { %v6322_v33 = vadd.f32 %v2438_v22, %v2431_v40 }
0x1d90   :  { %2445 = vmax.xlane.f32.xlu2 %v2444_v10 }
0x1d9a   :  { %2650 = vperm.xlu0 %4832, %v6322_v33   ;;  %v2561_v7 = vpop.xlane.xlu1 %2560 }
0x1d9b   :  { %5055 = vrsqrt.f32 %v2561_v7  ;;  %vm2596_vm7 = vcmp.eq.f32.partialorder %v2561_v7, inf  ;;  %vm2598_vm3 = vcmp.eq.f32.partialorder %v2561_v7, 0.0 }
0x1d9c   :  { %5057 = vrsqrt.f32 %v2564_v9 }
0x1d9d   :  { %5059 = vrsqrt.f32 %v2558_v38 }
0x1d9e   :  { %5061 = vrsqrt.f32 %v6326_v16 }
0x1da1   :  { %v5056_v36 = vpop.eup %5055 }
0x1da2   :  { %4835 = vset.pattern.permute.xlu0 %v5293_v21  ;;  %v5058_v0 = vpop.eup %5057  ;;  %v2590_v48 = vmul.f32 %v5056_v36, %v2561_v7 }
0x1da3   :  { %v5060_v34 = vpop.eup %5059  ;;  %v2602_v8 = vmul.f32 %v5058_v0, %v2564_v9 }
0x1da4   :  { %v5062_v6 = vpop.eup %5061  ;;  %v2578_v42 = vmul.f32 %v5060_v34, %v2558_v38  ;;  %v2591_v27 = vmul.f32 %v5056_v36, %v2590_v48  ;;  %v2599_v48 = vand.u32 2147483648, %v2561_v7 }
0x1da5   :  { %v2566_v32 = vmul.f32 %v5062_v6, %v6326_v16  ;;  %v2603_v37 = vmul.f32 %v5058_v0, %v2602_v8  ;;  %v2587_v8 = vand.u32 2147483648, %v2558_v38 }
0x1da6   :  { %v2579_v5 = vmul.f32 %v5060_v34, %v2578_v42  ;;  %v2592_v35 = vmul.f32 0.5, %v2591_v27 }
0x1da7   :  { %v2567_v41 = vmul.f32 %v5062_v6, %v2566_v32  ;;  %v2604_v1 = vmul.f32 0.5, %v2603_v37  ;;  %v2575_v37 = vand.u32 2147483648, %v6326_v16 }
0x1da8   :  { %v2580_v12 = vmul.f32 0.5, %v2579_v5  ;;  %v2593_v49 = vsub.f32 1.5, %v2592_v35 }
0x1da9   :  { %v2568_v24 = vmul.f32 0.5, %v2567_v41  ;;  %v2605_v45 = vsub.f32 1.5, %v2604_v1 }
0x1daa   :  { %v2581_v62 = vsub.f32 1.5, %v2580_v12  ;;  %v2594_v58 = vmul.f32 %v5056_v36, %v2593_v49 }
0x1dab   :  { %v2569_v4 = vsub.f32 1.5, %v2568_v24  ;;  %v2606_v18 = vmul.f32 %v5058_v0, %v2605_v45 }
0x1dac   :  { %v2582_v55 = vmul.f32 %v5060_v34, %v2581_v62  ;;  %v2595_v44 = vmul.f32 %v2594_v58, %v2561_v7 }
0x1dad   :  { %v2570_v47 = vmul.f32 %v5062_v6, %v2569_v4  ;;  %v2607_v10 = vmul.f32 %v2606_v18, %v2564_v9  ;;  %v2611_v6 = vand.u32 2147483648, %v2564_v9 }
0x1dae   :  { %v2583_v19 = vmul.f32 %v2582_v55, %v2558_v38  ;;  %v2597_v40 = vsel %vm2596_vm7, %v2561_v7, %v2595_v44  ;;  %vm2574_vm7 = vcmp.eq.f32.partialorder %v6326_v16, 0.0 }
0x1daf   :  { %v2571_v22 = vmul.f32 %v2570_v47, %v6326_v16  ;;  %v2609_v0 = vsel %vm2608_vm14, %v2564_v9, %v2607_v10  ;;  %v2600_v42 = vsel %vm2598_vm3, %v2599_v48, %v2597_v40  ;;  %vm7025_vm14 = vcmask 19456  }
0x1db0   :  { %v2585_v34 = vsel %vm2584_vm10, %v2558_v38, %v2583_v19  ;;  %v2612_v5 = vsel %vm2610_vm12, %v2611_v6, %v2609_v0  ;;  %v2620_v7 = vperm.slane %v2600_v42, %v5545_v26  ;;  %v2440_v42 = vmul.f32 0.5, %v6306_v59 }
0x1db1   :  { %v2573_v27 = vsel %vm2572_vm9, %v6326_v16, %v2571_v22  ;;  %v2588_v41 = vsel %vm2586_vm15, %v2587_v8, %v2585_v34  ;;  %v2621_v4 = vperm.slane %v2612_v5, %v5554_v51 }
0x1db2   :  { %v2576_v49 = vsel %vm2574_vm7, %v2575_v37, %v2573_v27  ;;  %v2618_v62 = vperm.slane %v2588_v41, %v5554_v51 }
0x1db3   :  { %v2617_v38 = vperm.slane %v2576_v49, %v5545_v26  ;;  %v2622_v58 = vsel %vm7015_vm0, %v2621_v4, %v2620_v7 }
0x1db5   :  { %v2619_v55 = vsel %vm7015_vm0, %v2618_v62, %v2617_v38 }
0x1db6   :  { %v2623_v44 = vsel %vm297_vm1, %v2622_v58, %v2619_v55  ;;  %v2625_v10 = vsel %vm310_vm8, %v2622_v58, %v2619_v55 }
0x1db7   :  { %v2627_v34 = vsel %vm179_vm5, %v2623_v44, %v2625_v10 }
0x1de9   :  { %v2631_v13 = vpop.xlane.xlu0 %2630 }
0x1dea   :  { %5063 = vrsqrt.f32 %v2631_v13  ;;  %vm2639_vm12 = vcmp.eq.f32.partialorder %v2631_v13, inf  ;;  %v2642_v22 = vand.u32 2147483648, %v2631_v13  ;;  %vm2641_vm15 = vcmp.eq.f32.partialorder %v2631_v13, 0.0 }
0x1deb   :  { %v6330_v54 = vpop.xlane.xlu1 %2491  ;;  %v6332_v56 = vpop.xlane.xlu2 %2488 }
0x1dec   :  { %v2529_v5 = vperm.slane %v6330_v54, %v5554_v51 }
0x1df0   :  { %v5064_v36 = vpop.eup %5063 }
0x1df1   :  { %v2633_v32 = vmul.f32 %v5064_v36, %v2631_v13  ;;  %v2495_v12 = vpop.xlane.xlu0 %2494 }
0x1df2   :  { %v2531_v41 = vperm.slane %v2495_v12, %v5545_v26 }
0x1df3   :  { %v2634_v35 = vmul.f32 %v5064_v36, %v2633_v32  ;;  %v2498_v1 = vpop.xlane.xlu2 %2497  ;;  %v2514_v24 = vpop.xlane.xlu1 %2513 }
0x1df4   :  { %v2532_v32 = vperm.slane %v2498_v1, %v5554_v51 }
0x1df5   :  { %v2635_v45 = vmul.f32 0.5, %v2634_v35  ;;  %v2540_v35 = vperm.slane %v2514_v24, %v5545_v26 }
0x1df7   :  { %v2636_v9 = vsub.f32 1.5, %v2635_v45  ;;  %v2533_v45 = vsel %vm7015_vm0, %v2532_v32, %v2531_v41 }
0x1df9   :  { %v2637_v18 = vmul.f32 %v5064_v36, %v2636_v9  ;;  %v2517_v48 = vpop.xlane.xlu0 %2516 }
0x1dfa   :  { %v2541_v27 = vperm.slane %v2517_v48, %v5554_v51 }
0x1dfb   :  { %v2520_v47 = vpop.xlane.xlu2 %2519  ;;  %v2638_v16 = vmul.f32 %v2637_v18, %v2631_v13  ;;  %v2523_v19 = vpop.xlane.xlu1 %2522 }
0x1dfc   :  { %v2544_v6 = vperm.slane %v2523_v19, %v5554_v51  ;;  %v2543_v36 = vperm.slane %v2520_v47, %v5545_v26  ;;  %v2542_v62 = vsel %vm7015_vm0, %v2541_v27, %v2540_v35 }
0x1dfd   :  { %v2640_v40 = vsel %vm2639_vm12, %v2631_v13, %v2638_v16  ;;  %v2528_v13 = vperm.slane %v6332_v56, %v5545_v26 }
0x1dfe   :  { %v2643_v0 = vsel %vm2641_vm15, %v2642_v22, %v2640_v40  ;;  %v2545_v7 = vsel %vm7015_vm0, %v2544_v6, %v2543_v36 }
0x1dff   :  { %v2644_v8 = vmul.f32 %v2643_v0, %v2627_v34  ;;  %v2546_v54 = vsel %vm310_vm8, %v2545_v7, %v2542_v62  ;;  %v2530_v56 = vsel %vm7015_vm0, %v2529_v5, %v2528_v13 }
0x1e00   :  { %v2534_v12 = vsel %vm297_vm1, %v2533_v45, %v2530_v56 }
0x1e01   :  { %v2645_v37 = vmax.f32 %v2644_v8, 1e-08  ;;  %v2548_v9 = vsel %vm179_vm5, %v2534_v12, %v2546_v54 }
0x1e03   :  { %v2446_v49 = vpop.xlane.xlu2 %2445  ;;  %5065 = vrcp.f32 %v2645_v37 }
0x1e04   :  { %5067 = vtanh.f32 %v2440_v42  ;;  %v2447_v1 = vsub.f32 %v6306_v59, %v2446_v49 }
0x1e06   :  { %v2448_v4 = vmul.f32 1.442695, %v2447_v1 }
0x1e08   :  { %5069 = vpow2.f32 %v2448_v4 }
0x1e09   :  { %v5066_v24 = vpop.eup %5065 }
0x1e0a   :  { %v5068_v38 = vpop.eup %5067  ;;  %v2647_v58 = vmul.f32 %v5066_v24, %v2548_v9 }
0x1e0b   :  { %v2442_v59 = vadd.f32 1.0, %v5068_v38 }
0x1e0c   :  { %v2651_v18 = vpop.permute.xlu0 %2650 }
0x1e0d   :  { %v2653_v55 = vmul.f32 %v2651_v18, %v2647_v58  ;;  %v2443_v44 = vmul.f32 0.5, %v2442_v59 }
0x1e0e   :  { %v5070_v47 = vpop.eup %5069 }
0x1e0f   :  { %2451 = vrot.lane.b32.xlu2 %v5070_v47, %s5290_s2  ;;  %v2654_v16 = vsel %vm394_vm6, %v2653_v55, -inf  ;;  %v2684_v10 = vsub.f32 1.0, %v2443_v44 }
0x1e10   :  { %2655 = vmax.xlane.f32.xlu1 %v2654_v16 }
0x1e17   :  { %2687 = vperm.xlu2 %4834, %v2684_v10   ;;  %v2472_v10 = vadd.f32 1.0, %v6322_v33 }
0x1e1f   :  { %4836 = vset.pattern.permute.xlu2 %v5292_v20 }
0x1e69   :  { %v2452_v19 = vpop.permute.xlu2 %2451 }
0x1e6a   :  { %v2454_v22 = vsel %vm7025_vm14, %v2452_v19, 0.0 }
0x1e6b   :  { %2455 = vadd.xlane.f32.xlu1 %v2454_v22 }
0x1e71   :  { %v2688_v18 = vpop.permute.xlu2 %2687 }
0x1e83   :  { %v2656_v40 = vpop.xlane.xlu1 %2655 }
0x1e84   :  { %v2657_v48 = vsub.f32 %v2653_v55, %v2656_v40 }
0x1e86   :  { %v2658_v0 = vmul.f32 1.442695, %v2657_v48 }
0x1e88   :  { %5071 = vpow2.f32 %v2658_v0 }
0x1e8e   :  { %v5072_v34 = vpop.eup %5071 }
0x1e8f   :  { %v2660_v6 = vsel %vm394_vm6, %v5072_v34, 0.0 }
0x1e90   :  { %2661 = vadd.xlane.f32.xlu1 %v2660_v6 }
0x1ea9   :  { %2680 = vperm.xlu1 %4833, %v2443_v44  }
0x1eb1   :  { %4837 = vset.pattern.permute.xlu1 %v5294_v46 }
0x1ede   :  { %v2456_v36 = vpop.xlane.xlu1 %2455 }
0x1edf   :  { %5073 = vrcp.f32 %v2456_v36  ;;  %v2468_v27 = vand.u32 2147483648, %v2456_v36  ;;  %v2466_v5 = vand.u32 2147483647, %v2456_v36  ;;  %vm2462_vm9 = vweird.f32 %v2456_v36 }
0x1ee1   :  { %v2469_v41 = vor.u32 1.1754944e-38, %v2468_v27  ;;  %vm2467_vm7 = vcmp.eq.f32.partialorder %v2466_v5, 8.507059e+37 }
0x1ee5   :  { %v5074_v8 = vpop.eup %5073 }
0x1ee6   :  { %v2458_v42 = vmul.f32 %v5074_v8, %v2456_v36  ;;  %vm2463_vm10 = vweird.f32 %v5074_v8 }
0x1ee7   :  { %vm2464_vm3 = vmor %vm2462_vm9, %vm2463_vm10 }
0x1ee8   :  { %v2459_v32 = vsub.f32 1.0, %v2458_v42 }
0x1eea   :  { %v2460_v37 = vmul.f32 %v5074_v8, %v2459_v32 }
0x1eec   :  { %v2461_v13 = vadd.f32 %v5074_v8, %v2460_v37 }
0x1eee   :  { %v2465_v35 = vsel %vm2464_vm3, %v5074_v8, %v2461_v13 }
0x1eef   :  { %v2470_v7 = vsel %vm2467_vm7, %v2469_v41, %v2465_v35 }
0x1ef0   :  { %v2471_v49 = vmul.f32 %v5070_v47, %v2470_v7  ;;  %v2690_v47 = vmul.f32 %v2688_v18, %v6216_v31 }
0x1ef2   :  { %2714 = vperm.xlu2 %4836, %v2471_v49  }
0x1efa   :  { %4845 = vset.pattern.permute.xlu2 %v5288_v60 }
0x1f03   :  { %v2662_v1 = vpop.xlane.xlu1 %2661 }
0x1f04   :  { %5075 = vrcp.f32 %v2662_v1  ;;  %v2674_v12 = vand.u32 2147483648, %v2662_v1  ;;  %vm2668_vm15 = vweird.f32 %v2662_v1  ;;  %v2672_v24 = vand.u32 2147483647, %v2662_v1 }
0x1f06   :  { %v2675_v38 = vor.u32 1.1754944e-38, %v2674_v12  ;;  %vm2673_vm10 = vcmp.eq.f32.partialorder %v2672_v24, 8.507059e+37 }
0x1f0a   :  { %v5076_v45 = vpop.eup %5075 }
0x1f0b   :  { %v2664_v62 = vmul.f32 %v5076_v45, %v2662_v1  ;;  %vm2669_vm12 = vweird.f32 %v5076_v45 }
0x1f0c   :  { %vm2670_vm14 = vmor %vm2668_vm15, %vm2669_vm12  ;;  %vm7026_vm15 = vcmask 261120  }
0x1f0d   :  { %v2665_v4 = vsub.f32 1.0, %v2664_v62 }
0x1f0f   :  { %v2666_v54 = vmul.f32 %v5076_v45, %v2665_v4 }
0x1f11   :  { %v2667_v56 = vadd.f32 %v5076_v45, %v2666_v54 }
0x1f13   :  { %v2671_v9 = vsel %vm2670_vm14, %v5076_v45, %v2667_v56  ;;  %vm7027_vm14 = vcmask 167056  }
0x1f14   :  { %v2676_v58 = vsel %vm2673_vm10, %v2675_v38, %v2671_v9 }
0x1f15   :  { %v2677_v55 = vmul.f32 %v5072_v34, %v2676_v58 }
0x1f1b   :  { %v2681_v59 = vpop.permute.xlu1 %2680 }
0x1f1c   :  { %v2683_v16 = vmul.f32 %v2681_v59, %v2677_v55 }
0x1f1e   :  { %v2691_v44 = vadd.f32 %v2690_v47, %v2683_v16 }
0x1f20   :  { %2700 = vrot.lane.b32.xlu1 %v2691_v44, %s5298_s23  ;;  %2696 = vrot.lane.b32.xlu2 %v2691_v44, %s5297_s22 }
0x1f21   :  { %2693 = vrot.lane.b32.xlu0 %v2691_v44, %s5296_s21 }
0x1f28   :  { %2720 = vperm.xlu1 %4837, %v2471_v49   ;;  %2703 = vrot.lane.b32.xlu2 %v2691_v44, %s5295_s20 }
0x1f29   :  { %2709 = vperm.xlu0 %4835, %v2471_v49  }
0x1f30   :  { %4839 = vset.pattern.permute.xlu1 %v5609_v43 }
0x1f31   :  { %4838 = vset.pattern.permute.xlu0 %v5299_v3 }
0x1f32   :  { %2730 = vperm.xlu0 %4838, %v2472_v10  }
0x1f3a   :  { %4841 = vset.pattern.permute.xlu0 %v5609_v43 }
0x1f4c   :  { %v2715_v31 = vpop.permute.xlu2 %2714 }
0x1f4d   :  { %v2717_v6 = vmul.f32 %v2715_v31, %v2691_v44 }
0x1f7a   :  { %v2697_v19 = vpop.permute.xlu2 %2696 }
0x1f82   :  { %v2704_v36 = vpop.permute.xlu2 %2703 }
0x1f92   :  { %v2701_v22 = vpop.permute.xlu1 %2700 }
0x1f93   :  { %v2694_v40 = vpop.permute.xlu0 %2693  ;;  %v2706_v33 = vsel %vm477_vm13, %v2701_v22, %v2704_v36 }
0x1f94   :  { %v2699_v48 = vsel %vm469_vm11, %v2694_v40, %v2697_v19 }
0x1f9a   :  { %v2721_v0 = vpop.permute.xlu1 %2720 }
0x1f9b   :  { %v2710_v34 = vpop.permute.xlu0 %2709  ;;  %v2723_v42 = vmul.f32 %v2721_v0, %v2706_v33 }
0x1f9c   :  { %v2712_v8 = vmul.f32 %v2710_v34, %v2699_v48 }
0x1f9e   :  { %v2718_v32 = vadd.f32 %v2717_v6, %v2712_v8 }
0x1fa0   :  { %v2724_v27 = vadd.f32 %v2723_v42, %v2718_v32 }
0x1fa2   :  { %v2725_v37 = vmax.f32 %v2724_v27, 1e-30 }
0x1fa4   :  { %5077 = vlog2.f32 %v2725_v37  ;;  %v2731_v41 = vpop.permute.xlu0 %2730 }
0x1faa   :  { %v5078_v5 = vpop.eup %5077 }
0x1fab   :  { %v2727_v13 = vmul.f32 0.6931472, %v5078_v5 }
0x1fad   :  { %v2733_v35 = vmul.f32 %v2731_v41, %v2727_v13 }
0x1faf   :  { %v2734_v7 = vmul.f32 1.442695, %v2733_v35 }
0x1fb1   :  { %5079 = vpow2.f32 %v2734_v7 }
0x1fb7   :  { %v5080_v49 = vpop.eup %5079 }
0x1fb8   :  { %v2736_v1 = vsel %vm394_vm6, %v5080_v49, 0.0 }
0x1fb9   :  { %2737 = vadd.xlane.f32.xlu2 %v2736_v1 }
0x202c   :  { %v2738_v45 = vpop.xlane.xlu2 %2737 }
0x202d   :  { %v2739_v62 = vadd.f32 1e-16, %v2738_v45 }
0x202f   :  { %5081 = vrcp.f32 %v2739_v62  ;;  %v2751_v12 = vand.u32 2147483648, %v2739_v62  ;;  %v2749_v9 = vand.u32 2147483647, %v2739_v62  ;;  %vm2745_vm3 = vweird.f32 %v2739_v62 }
0x2031   :  { %v2752_v58 = vor.u32 1.1754944e-38, %v2751_v12  ;;  %vm2750_vm12 = vcmp.eq.f32.partialorder %v2749_v9, 8.507059e+37 }
0x2035   :  { %v5082_v4 = vpop.eup %5081 }
0x2036   :  { %v2741_v54 = vmul.f32 %v5082_v4, %v2739_v62  ;;  %vm2746_vm9 = vweird.f32 %v5082_v4 }
0x2037   :  { %vm2747_vm7 = vmor %vm2745_vm3, %vm2746_vm9 }
0x2038   :  { %v2742_v56 = vsub.f32 1.0, %v2741_v54 }
0x203a   :  { %v2743_v24 = vmul.f32 %v5082_v4, %v2742_v56 }
0x203c   :  { %v2744_v38 = vadd.f32 %v5082_v4, %v2743_v24 }
0x203e   :  { %v2748_v18 = vsel %vm2747_vm7, %v5082_v4, %v2744_v38 }
0x203f   :  { %v2753_v55 = vsel %vm2750_vm12, %v2752_v58, %v2748_v18 }
0x2040   :  { %v6386_v59 = vmul.f32 %v5080_v49, %v2753_v55 }
0x2042   :  { %v2768_v47 = vperm.slane %v6386_v59, 1  ;;  %v2755_v16 = vperm.slane %v6386_v59, 0 }
0x2044   :  { %2773 = vperm.xlu0 %4841, %v2768_v47   ;;  %2760 = vperm.xlu1 %4839, %v2755_v16  }
0x204c   :  { %4840 = vset.pattern.permute.xlu1 %v5612_v50  ;;  %4843 = vset.pattern.permute.xlu0 %v5612_v50 }
0x2054   :  { %2766 = vperm.xlu1 %4840, %v2755_v16  }
0x205c   :  { %2779 = vperm.xlu1 %4840, %v2768_v47  }
0x2064   :  { %2900 = vrot.lane.b32.xlu1 %v6259_v63, %s5291_s19 }
0x2065   :  { %4842 = vset.pattern.permute.xlu1 %v5609_v43 }
0x20b6   :  { %v2761_v44 = vpop.permute.xlu1 %2760  ;;  %v2774_v48 = vpop.permute.xlu0 %2773 }
0x20b7   :  { %v2781_v10 = vmul.f32 %v2761_v44, %v6275_v17  ;;  %v2783_v6 = vmul.f32 %v2774_v48, %v6300_v53  ;;  %v2807_v44 = vperm.slane %v6386_v59, 2 }
0x20b9   :  { %v2785_v22 = vsel %vm245_vm4, %v2781_v10, 0.0  ;;  %v2794_v33 = vsel %vm245_vm4, %v2783_v6, 0.0  ;;  %v2820_v10 = vperm.slane %v6386_v59, 3 }
0x20c6   :  { %v2767_v31 = vpop.permute.xlu1 %2766 }
0x20c7   :  { %v2782_v19 = vmul.f32 %v2767_v31, %v6295_v29  ;;  %v2803_v31 = vmul.f32 0.5, %v6290_v28 }
0x20c9   :  { %v2786_v40 = vsel %vm245_vm4, %v2782_v19, 0.0  ;;  %v2937_v19 = vrot.slane %v6249_v2, 6 }
0x20ca   :  { %v2787_v0 = vadd.f32 %v2786_v40, %v2785_v22 }
0x20cc   :  { %v2788_v34 = vrot.slane %v2787_v0, 4 }
0x20ce   :  { %v2789_v36 = vadd.f32 %v2788_v34, %v2787_v0  ;;  %v2780_v8 = vpop.permute.xlu1 %2779 }
0x20cf   :  { %v2784_v63 = vmul.f32 %v2780_v8, %v6279_v15 }
0x20d0   :  { %v2790_v32 = vrot.slane %v2789_v36, 2 }
0x20d1   :  { %v2795_v42 = vsel %vm245_vm4, %v2784_v63, 0.0 }
0x20d2   :  { %v2796_v27 = vadd.f32 %v2795_v42, %v2794_v33  ;;  %v2791_v5 = vadd.f32 %v2790_v32, %v2789_v36 }
0x20d4   :  { %v2797_v37 = vrot.slane %v2796_v27, 4  ;;  %v2792_v7 = vrot.slane %v2791_v5, 1 }
0x20d6   :  { %v2798_v13 = vadd.f32 %v2797_v37, %v2796_v27  ;;  %v2793_v1 = vadd.f32 %v2792_v7, %v2791_v5  ;;  %v2901_v4 = vpop.permute.xlu1 %2900  ;;  %v2843_v7 = vrot.slane %v6290_v28, 1 }
0x20d8   :  { %v2799_v41 = vrot.slane %v2798_v13, 2 }
0x20da   :  { %v2800_v35 = vadd.f32 %v2799_v41, %v2798_v13 }
0x20dc   :  { %v2801_v49 = vrot.slane %v2800_v35, 1 }
0x20de   :  { %v2802_v45 = vadd.f32 %v2801_v49, %v2800_v35  ;;  %v2845_v49 = vperm.slane %v2843_v7, 0 }
0x20e0   :  { %v6404_v62 = vsel %vm297_vm1, %v2802_v45, %v2793_v1 }
0x20e1   :  { %v2903_v54 = vsel %vm245_vm4, %v6404_v62, %v2901_v4 }
0x20e2   :  { %4754 = vmatmul.msk.f32.vlgmr.msrb.gmra.mxu2 %vm95_vm2, %v2903_v54 }
0x2165   :  { %v2924_v56 = vpop.f32.mrf.mxu2 }
0x2166   :  { %v2928_v12 = vrot.slane %v2924_v56, 6  ;;  %v2844_v56 = vperm.slane %v6290_v28, 0 }
0x2168   :  { %v2930_v24 = vadd.f32 %v2928_v12, %v5408_v14 }
0x216a   :  { %5083 = vtanh.f32 %v2930_v24  ;;  %v2931_v38 = vmul.f32 0.5, %v2930_v24 }
0x216c   :  { %5085 = vtanh.f32 %v2931_v38 }
0x216d   :  { %5087 = vtanh.f32 %v2803_v31 }
0x2170   :  { %v5084_v9 = vpop.eup %5083 }
0x2171   :  { %2941 = vrot.lane.b32.xlu0 %v5084_v9, %s5284_s1 }
0x2172   :  { %v5086_v58 = vpop.eup %5085 }
0x2173   :  { %v2933_v18 = vadd.f32 1.0, %v5086_v58  ;;  %v5088_v40 = vpop.eup %5087 }
0x2174   :  { %v2805_v34 = vadd.f32 1.0, %v5088_v40 }
0x2175   :  { %v2934_v55 = vmul.f32 0.5, %v2933_v18 }
0x2176   :  { %v2806_v6 = vmul.f32 0.5, %v2805_v34 }
0x2177   :  { %v2939_v22 = vmul.f32 %v2937_v19, %v2934_v55 }
0x2178   :  { %v2834_v63 = vrot.slane %v2806_v6, 1  ;;  %v2835_v27 = vperm.slane %v2806_v6, 0 }
0x217a   :  { %v2836_v33 = vperm.slane %v2834_v63, 0 }
0x21e3   :  { %v2942_v47 = vpop.permute.xlu0 %2941 }
0x21e4   :  { %v2944_v16 = vmul.f32 %v2942_v47, %v2934_v55 }
0x21e6   :  { %2946 = vrot.lane.b32.xlu1 %v2944_v16, %s5286_s5 }
0x21ee   :  { %2812 = vperm.xlu1 %4842, %v2807_v44  }
0x21f6   :  { %2825 = vperm.xlu1 %4842, %v2820_v10  }
0x21fe   :  { %4844 = vset.pattern.permute.xlu1 %v5612_v50 }
0x2206   :  { %2831 = vperm.xlu1 %4844, %v2820_v10  }
0x220e   :  { %4849 = vset.pattern.permute.xlu1 %v5292_v20 }
0x2258   :  { %v2947_v48 = vpop.permute.xlu1 %2946 }
0x2259   :  { %v6418_v0 = vadd.f32 %v2947_v48, %v2939_v22 }
0x225b   :  { %5089 = vtanh.f32 %v6418_v0 }
0x2260   :  { %v2813_v36 = vpop.permute.xlu1 %2812 }
0x2261   :  { %v5090_v8 = vpop.eup %5089  ;;  %v2839_v37 = vmul.f32 %v2835_v27, %v2813_v36  ;;  %v2848_v58 = vmul.f32 %v2844_v56, %v2813_v36 }
0x2262   :  { %2952 = vrot.lane.b32.xlu0 %v5090_v8, %s5284_s1 }
0x2263   :  { %v2852_v5 = vsub.f32 1.0, %v2839_v37 }
0x2268   :  { %v2826_v42 = vpop.permute.xlu1 %2825 }
0x2269   :  { %v2841_v32 = vmul.f32 %v2836_v33, %v2826_v42  ;;  %v2850_v1 = vmul.f32 %v2845_v49, %v2826_v42 }
0x226a   :  { %2818 = vperm.xlu0 %4843, %v2807_v44  }
0x226b   :  { %v2854_v2 = vsub.f32 1.0, %v2841_v32 }
0x226d   :  { %2864 = vrot.lane.b32.xlu1 %v2854_v2, %s5284_s1 }
0x2272   :  { %2860 = vrot.lane.b32.xlu0 %v2852_v5, %s5284_s1 }
0x2273   :  { %4847 = vset.pattern.permute.xlu0 %v5289_v57 }
0x2278   :  { %v2832_v13 = vpop.permute.xlu1 %2831 }
0x2279   :  { %v2842_v41 = vmul.f32 %v2836_v33, %v2832_v13  ;;  %v2851_v18 = vmul.f32 %v2845_v49, %v2832_v13 }
0x227b   :  { %v2855_v35 = vsub.f32 1.0, %v2842_v41 }
0x227d   :  { %2866 = vrot.lane.b32.xlu0 %v2855_v35, %s5284_s1 }
0x2285   :  { %2884 = vrot.lane.b32.xlu0 %v2850_v1, %s5291_s19 }
0x22d4   :  { %v2953_v45 = vpop.permute.xlu0 %2952 }
0x22d5   :  { %v6428_v4 = vmul.f32 %v2953_v45, %v2934_v55 }
0x22d7   :  { %v2957_v54 = vrot.slane %v6428_v4, 2 }
0x22d9   :  { %2958 = vrot.lane.b32.xlu2 %v2957_v54, %s5286_s5 }
0x22dc   :  { %v2819_v12 = vpop.permute.xlu0 %2818 }
0x22dd   :  { %v2840_v24 = vmul.f32 %v2835_v27, %v2819_v12  ;;  %v2849_v9 = vmul.f32 %v2844_v56, %v2819_v12 }
0x22df   :  { %v2853_v38 = vsub.f32 1.0, %v2840_v24  ;;  %2882 = vrot.lane.b32.xlu1 %v2849_v9, %s5291_s19  ;;  %v2865_v48 = vpop.permute.xlu1 %2864 }
0x22e0   :  { %v2874_v35 = vmul.f32 %v2865_v48, %v6300_v53 }
0x22e1   :  { %2862 = vrot.lane.b32.xlu2 %v2853_v38, %s5284_s1 }
0x22e4   :  { %v2861_v16 = vpop.permute.xlu0 %2860 }
0x22e5   :  { %v2872_v44 = vmul.f32 %v2861_v16, %v6275_v17 }
0x22e9   :  { %2880 = vrot.lane.b32.xlu2 %v2848_v58, %s5291_s19 }
0x22ef   :  { %v2867_v22 = vpop.permute.xlu0 %2866 }
0x22f0   :  { %v2875_v34 = vmul.f32 %v2867_v22, %v6279_v15 }
0x22f1   :  { %2886 = vrot.lane.b32.xlu2 %v2851_v18, %s5291_s19 }
0x2333   :  { %v2959_v55 = vpop.permute.xlu2 %2958 }
0x2334   :  { %4755 = vmatmul.msk.f32.vlgmr.msra.gmra.mxu3 %vm7026_vm15, %v2959_v55 }
0x233b   :  { %v2863_v47 = vpop.permute.xlu2 %2862 }
0x233c   :  { %v2873_v17 = vmul.f32 %v2863_v47, %v6295_v29  ;;  %v2885_v29 = vpop.permute.xlu0 %2884 }
0x233d   :  { %v6463_v7 = vadd.f32 %v2885_v29, %v2874_v35 }
0x233f   :  { %v3033_v49 = vadd.f32 1e-16, %v6463_v7 }
0x2341   :  { %v3109_v1 = vmul.f32 %v3033_v49, %v3033_v49 }
0x2343   :  { %v2881_v10 = vpop.permute.xlu2 %2880  ;;  %v3117_v45 = vsel %vm245_vm4, %v3109_v1, 0.0 }
0x2344   :  { %v6441_v31 = vadd.f32 %v2881_v10, %v2872_v44 }
0x2346   :  { %v3031_v19 = vadd.f32 1e-16, %v6441_v31 }
0x2348   :  { %v3107_v40 = vmul.f32 %v3031_v19, %v3031_v19 }
0x234a   :  { %v3111_v6 = vsel %vm245_vm4, %v3107_v40, 0.0 }
0x234b   :  { %v2887_v36 = vpop.permute.xlu2 %2886  ;;  %3112 = vadd.xlane.f32.xlu0 %v3111_v6 }
0x234c   :  { %v6446_v8 = vadd.f32 %v2887_v36, %v2875_v34 }
0x234e   :  { %v3034_v63 = vadd.f32 1e-16, %v6446_v8 }
0x2350   :  { %v3110_v33 = vmul.f32 %v3034_v63, %v3034_v63 }
0x2351   :  { %v2883_v42 = vpop.permute.xlu1 %2882 }
0x2352   :  { %v6450_v32 = vadd.f32 %v2883_v42, %v2873_v17  ;;  %v3120_v27 = vsel %vm245_vm4, %v3110_v33, 0.0 }
0x2353   :  { %3121 = vadd.xlane.f32.xlu0 %v3120_v27 }
0x2354   :  { %v3032_v2 = vadd.f32 1e-16, %v6450_v32 }
0x2356   :  { %v3108_v15 = vmul.f32 %v3032_v2, %v3032_v2 }
0x2358   :  { %v3114_v37 = vsel %vm245_vm4, %v3108_v15, 0.0 }
0x2359   :  { %3115 = vadd.xlane.f32.xlu2 %v3114_v37 }
0x23b7   :  { %v2979_v5 = vpop.f32.mrf.mxu3 }
0x23b8   :  { %v6456_v13 = vadd.f32 %v6287_v61, %v2979_v5 }
0x23ba   :  { %v2983_v41 = vrot.slane %v6456_v13, 6 }
0x23bc   :  { %2984 = vrot.lane.b32.xlu1 %v2983_v41, %s5287_s30 }
0x23e6   :  { %3118 = vadd.xlane.f32.xlu1 %v3117_v45 }
0x242e   :  { %v2985_v56 = vpop.permute.xlu1 %2984 }
0x242f   :  { %v6469_v61 = vsel %vm179_vm5, %v6456_v13, %v2985_v56 }
0x2430   :  { %v2988_v12 = vadd.f32 1e-16, %v6469_v61  ;;  %v2990_v55 = vand.u32 2147483647, %v6469_v61 }
0x2432   :  { %3057 = vst [vmem:[#allocation1] sm:$0xff] %v2988_v12  ;;  %v3186_v24 = vmul.f32 %v2988_v12, %v2988_v12  ;;  %v3037_v9 = vperm.slane %v2988_v12, 0  ;;  %v3036_v38 = vrot.slane %v2988_v12, 1  ;;  %v2991_v22 = vsub.f32 0.0, %v2990_v55 }
0x2433   :  { %v3002_v12 = vsel %vm7027_vm14, %v6469_v61, -inf }
0x2434   :  { %v3187_v53 = vsel %vm394_vm6, %v3186_v24, 0.0  ;;  %v3042_v58 = vmul.f32 %v3037_v9, %v3032_v2  ;;  %v3041_v18 = vmul.f32 %v3037_v9, %v3031_v19  ;;  %v3038_v47 = vperm.slane %v3036_v38, 0 }
0x2435   :  { %3188 = vadd.xlane.f32.xlu2 %v3187_v53  ;;  %v2992_v33 = vmul.f32 1.442695, %v2991_v22  ;;  %v2989_v24 = vmax.f32 %v6469_v61, 0.0 }
0x2436   :  { %v3048_v16 = vsel %vm245_vm4, %v3042_v58, 0.0  ;;  %v3045_v44 = vsel %vm245_vm4, %v3041_v18, 0.0  ;;  %v3043_v10 = vmul.f32 %v3038_v47, %v3033_v49  ;;  %v3044_v34 = vmul.f32 %v3038_v47, %v3034_v63  ;;  %v6494_v18 = vpop.xlane.xlu0 %3112 }
0x2437   :  { %3049 = vadd.xlane.f32.xlu0 %v3048_v16  ;;  %3046 = vadd.xlane.f32.xlu1 %v3045_v44  ;;  %5091 = vpow2.f32 %v2992_v33  ;;  %v3116_v16 = vpop.xlane.xlu2 %3115  ;;  %vm3130_vm7 = vcmp.eq.f32.partialorder %v6494_v18, inf }
0x2438   :  { %v3051_v36 = vsel %vm245_vm4, %v3043_v10, 0.0  ;;  %v3054_v27 = vsel %vm245_vm4, %v3044_v34, 0.0  ;;  %vm3142_vm3 = vcmp.eq.f32.partialorder %v3116_v16, inf  ;;  %vm3144_vm14 = vcmp.eq.f32.partialorder %v3116_v16, 0.0 }
0x2439   :  { %v3059_v40 = vld [vmem:[#allocation1 + $0x2] ss:$9 sm:$0xff] }
0x243a   :  { %v3062_v48 = vperm.slane %v3059_v40, 0  ;;  %v3061_v6 = vld [vmem:[#allocation1 + $0x3] ss:$9 sm:$0xff] }
0x243b   :  { %v3063_v15 = vperm.slane %v3061_v6, 0 }
0x243c   :  { %v3066_v17 = vmul.f32 %v3062_v48, %v3031_v19  ;;  %v3067_v37 = vmul.f32 %v3062_v48, %v3032_v2  ;;  %v2998_v2 = vmul.f32 0.5, %v6469_v61 }
0x243d   :  { %3052 = vadd.xlane.f32.xlu2 %v3051_v36  ;;  %v3069_v5 = vmul.f32 %v3063_v15, %v3034_v63  ;;  %v3068_v29 = vmul.f32 %v3063_v15, %v3033_v49  ;;  %v5092_v45 = vpop.eup %5091 }
0x243e   :  { %v3070_v42 = vsel %vm245_vm4, %v3066_v17, 0.0  ;;  %v3073_v35 = vsel %vm245_vm4, %v3067_v37, 0.0  ;;  %v2994_v56 = vadd.f32 1.0, %v5092_v45  ;;  %v3122_v47 = vpop.xlane.xlu0 %3121 }
0x243f   :  { %3071 = vadd.xlane.f32.xlu0 %v3070_v42  ;;  %3055 = vadd.xlane.f32.xlu1 %v3054_v27  ;;  %v3079_v1 = vsel %vm245_vm4, %v3069_v5, 0.0  ;;  %v3076_v19 = vsel %vm245_vm4, %v3068_v29, 0.0  ;;  %vm3166_vm9 = vcmp.eq.f32.partialorder %v3122_v47, inf  ;;  %vm3168_vm15 = vcmp.eq.f32.partialorder %v3122_v47, 0.0 }
0x2440   :  { %5093 = vlog2.f32 %v2994_v56 }
0x2441   :  { %5095 = vtanh.f32 %v2998_v2 }
0x2445   :  { %3074 = vadd.xlane.f32.xlu2 %v3073_v35 }
0x2446   :  { %v5094_v63 = vpop.eup %5093 }
0x2447   :  { %3080 = vadd.xlane.f32.xlu0 %v3079_v1  ;;  %3077 = vadd.xlane.f32.xlu1 %v3076_v19  ;;  %v2996_v49 = vmul.f32 0.6931472, %v5094_v63  ;;  %v5096_v38 = vpop.eup %5095 }
0x2448   :  { %v3000_v53 = vadd.f32 1.0, %v5096_v38 }
0x2449   :  { %v6486_v9 = vadd.f32 %v2996_v49, %v2989_v24 }
0x244a   :  { %v6489_v58 = vmul.f32 0.5, %v3000_v53 }
0x244f   :  { %3003 = vmax.xlane.f32.xlu1 %v3002_v12 }
0x2459   :  { %v3119_v55 = vpop.xlane.xlu1 %3118 }
0x245a   :  { %5097 = vrsqrt.f32 %v3119_v55  ;;  %vm3154_vm10 = vcmp.eq.f32.partialorder %v3119_v55, inf  ;;  %vm3156_vm12 = vcmp.eq.f32.partialorder %v3119_v55, 0.0 }
0x245b   :  { %5099 = vrsqrt.f32 %v3122_v47 }
0x245c   :  { %5101 = vrsqrt.f32 %v3116_v16 }
0x245d   :  { %3208 = vperm.xlu2 %4845, %v6486_v9   ;;  %5103 = vrsqrt.f32 %v6494_v18 }
0x2460   :  { %v5098_v44 = vpop.eup %5097 }
0x2461   :  { %v5100_v10 = vpop.eup %5099  ;;  %v3148_v40 = vmul.f32 %v5098_v44, %v3119_v55 }
0x2462   :  { %v5102_v22 = vpop.eup %5101  ;;  %v3160_v34 = vmul.f32 %v5100_v10, %v3122_v47 }
0x2463   :  { %v5104_v48 = vpop.eup %5103  ;;  %v3136_v6 = vmul.f32 %v5102_v22, %v3116_v16  ;;  %v3149_v17 = vmul.f32 %v5098_v44, %v3148_v40 }
0x2464   :  { %v3124_v36 = vmul.f32 %v5104_v48, %v6494_v18  ;;  %v3161_v33 = vmul.f32 %v5100_v10, %v3160_v34 }
0x2465   :  { %4846 = vset.pattern.permute.xlu2 %v5289_v57  ;;  %v3137_v42 = vmul.f32 %v5102_v22, %v3136_v6  ;;  %v3150_v15 = vmul.f32 0.5, %v3149_v17  ;;  %v3157_v17 = vand.u32 2147483648, %v3119_v55 }
0x2466   :  { %3238 = vperm.xlu2 %4846, %v6489_v58   ;;  %v3125_v27 = vmul.f32 %v5104_v48, %v3124_v36  ;;  %v3162_v37 = vmul.f32 0.5, %v3161_v33  ;;  %v3145_v33 = vand.u32 2147483648, %v3116_v16 }
0x2467   :  { %v3138_v5 = vmul.f32 0.5, %v3137_v42  ;;  %v3151_v35 = vsub.f32 1.5, %v3150_v15 }
0x2468   :  { %v3126_v29 = vmul.f32 0.5, %v3125_v27  ;;  %v3163_v1 = vsub.f32 1.5, %v3162_v37  ;;  %v3133_v37 = vand.u32 2147483648, %v6494_v18 }
0x2469   :  { %v3139_v19 = vsub.f32 1.5, %v3138_v5  ;;  %v3152_v56 = vmul.f32 %v5098_v44, %v3151_v35 }
0x246a   :  { %v3127_v45 = vsub.f32 1.5, %v3126_v29  ;;  %v3164_v12 = vmul.f32 %v5100_v10, %v3163_v1 }
0x246b   :  { %v3140_v2 = vmul.f32 %v5102_v22, %v3139_v19  ;;  %v3153_v24 = vmul.f32 %v3152_v56, %v3119_v55 }
0x246c   :  { %v3128_v49 = vmul.f32 %v5104_v48, %v3127_v45  ;;  %v3165_v40 = vmul.f32 %v3164_v12, %v3122_v47  ;;  %v3169_v48 = vand.u32 2147483648, %v3122_v47 }
0x246d   :  { %v3141_v34 = vmul.f32 %v3140_v2, %v3116_v16  ;;  %v3155_v36 = vsel %vm3154_vm10, %v3119_v55, %v3153_v24  ;;  %vm3132_vm10 = vcmp.eq.f32.partialorder %v6494_v18, 0.0 }
0x246e   :  { %4848 = vset.pattern.permute.xlu2 %v5293_v21  ;;  %v3129_v6 = vmul.f32 %v3128_v49, %v6494_v18  ;;  %v3167_v10 = vsel %vm3166_vm9, %v3122_v47, %v3165_v40  ;;  %v3158_v27 = vsel %vm3156_vm12, %v3157_v17, %v3155_v36 }
0x246f   :  { %v3143_v22 = vsel %vm3142_vm3, %v3116_v16, %v3141_v34  ;;  %v3170_v5 = vsel %vm3168_vm15, %v3169_v48, %v3167_v10  ;;  %v3178_v55 = vperm.slane %v3158_v27, %v5545_v26 }
0x2470   :  { %v3131_v15 = vsel %vm3130_vm7, %v6494_v18, %v3129_v6  ;;  %v3146_v29 = vsel %vm3144_vm14, %v3145_v33, %v3143_v22  ;;  %v3179_v2 = vperm.slane %v3170_v5, %v5554_v51  ;;  %vm7028_vm7 = vcmask 19456  }
0x2471   :  { %v3134_v12 = vsel %vm3132_vm10, %v3133_v37, %v3131_v15  ;;  %v3176_v49 = vperm.slane %v3146_v29, %v5554_v51 }
0x2472   :  { %v3175_v16 = vperm.slane %v3134_v12, %v5545_v26  ;;  %v3180_v24 = vsel %vm7015_vm0, %v3179_v2, %v3178_v55 }
0x2474   :  { %v3177_v34 = vsel %vm7015_vm0, %v3176_v49, %v3175_v16 }
0x2475   :  { %v3181_v18 = vsel %vm297_vm1, %v3180_v24, %v3177_v34  ;;  %v3183_v17 = vsel %vm310_vm8, %v3180_v24, %v3177_v34 }
0x2476   :  { %v3185_v27 = vsel %vm179_vm5, %v3181_v18, %v3183_v17 }
0x24a8   :  { %v3189_v63 = vpop.xlane.xlu2 %3188 }
0x24a9   :  { %5105 = vrsqrt.f32 %v3189_v63  ;;  %vm3197_vm9 = vcmp.eq.f32.partialorder %v3189_v63, inf  ;;  %v3200_v10 = vand.u32 2147483648, %v3189_v63  ;;  %vm3199_vm3 = vcmp.eq.f32.partialorder %v3189_v63, 0.0 }
0x24aa   :  { %v6498_v38 = vpop.xlane.xlu1 %3046  ;;  %v6500_v53 = vpop.xlane.xlu0 %3049 }
0x24ab   :  { %v3086_v55 = vperm.slane %v6498_v38, %v5545_v26 }
0x24af   :  { %v5106_v44 = vpop.eup %5105 }
0x24b0   :  { %v3191_v42 = vmul.f32 %v5106_v44, %v3189_v63  ;;  %v3053_v45 = vpop.xlane.xlu2 %3052 }
0x24b2   :  { %v3192_v35 = vmul.f32 %v5106_v44, %v3191_v42  ;;  %v3056_v1 = vpop.xlane.xlu1 %3055  ;;  %v3072_v19 = vpop.xlane.xlu0 %3071 }
0x24b3   :  { %v3090_v5 = vperm.slane %v3056_v1, %v5554_v51  ;;  %v3098_v12 = vperm.slane %v3072_v19, %v5545_v26 }
0x24b4   :  { %v3193_v56 = vmul.f32 0.5, %v3192_v35 }
0x24b6   :  { %v3194_v47 = vsub.f32 1.5, %v3193_v56  ;;  %v3089_v56 = vperm.slane %v3053_v45, %v5545_v26 }
0x24b8   :  { %v3195_v40 = vmul.f32 %v5106_v44, %v3194_v47  ;;  %v3075_v33 = vpop.xlane.xlu2 %3074  ;;  %v3091_v1 = vsel %vm7015_vm0, %v3090_v5, %v3089_v56 }
0x24b9   :  { %v3099_v29 = vperm.slane %v3075_v33, %v5554_v51 }
0x24ba   :  { %v3196_v6 = vmul.f32 %v3195_v40, %v3189_v63  ;;  %v3078_v36 = vpop.xlane.xlu1 %3077  ;;  %v3081_v22 = vpop.xlane.xlu0 %3080 }
0x24bb   :  { %v3101_v15 = vperm.slane %v3078_v36, %v5545_v26  ;;  %v3102_v44 = vperm.slane %v3081_v22, %v5554_v51  ;;  %v3100_v16 = vsel %vm7015_vm0, %v3099_v29, %v3098_v12 }
0x24bc   :  { %v3198_v48 = vsel %vm3197_vm9, %v3189_v63, %v3196_v6  ;;  %v3087_v63 = vperm.slane %v6500_v53, %v5554_v51 }
0x24bd   :  { %v3201_v42 = vsel %vm3199_vm3, %v3200_v10, %v3198_v48  ;;  %v3103_v2 = vsel %vm7015_vm0, %v3102_v44, %v3101_v15  ;;  %v3242_v15 = vsub.f32 1.0, %v6489_v58 }
0x24be   :  { %v3202_v37 = vmul.f32 %v3201_v42, %v3185_v27  ;;  %v3104_v24 = vsel %vm310_vm8, %v3103_v2, %v3100_v16  ;;  %v3088_v40 = vsel %vm7015_vm0, %v3087_v63, %v3086_v55 }
0x24bf   :  { %v3092_v53 = vsel %vm297_vm1, %v3091_v1, %v3088_v40 }
0x24c0   :  { %v3203_v35 = vmax.f32 %v3202_v37, 1e-08  ;;  %v3106_v19 = vsel %vm179_vm5, %v3092_v53, %v3104_v24  ;;  %v3209_v6 = vpop.permute.xlu2 %3208 }
0x24c2   :  { %5107 = vrcp.f32 %v3203_v35  ;;  %v3004_v49 = vpop.xlane.xlu1 %3003 }
0x24c3   :  { %v3005_v47 = vsub.f32 %v6469_v61, %v3004_v49 }
0x24c5   :  { %v3006_v38 = vmul.f32 1.442695, %v3005_v47 }
0x24c7   :  { %5109 = vpow2.f32 %v3006_v38 }
0x24c8   :  { %v5108_v45 = vpop.eup %5107 }
0x24c9   :  { %v3205_v34 = vmul.f32 %v5108_v45, %v3106_v19 }
0x24cb   :  { %v3211_v36 = vmul.f32 %v3209_v6, %v3205_v34 }
0x24cd   :  { %v5110_v18 = vpop.eup %5109  ;;  %v3212_v61 = vsel %vm394_vm6, %v3211_v36, -inf }
0x24ce   :  { %3009 = vrot.lane.b32.xlu1 %v5110_v18, %s5290_s2  ;;  %3213 = vmax.xlane.f32.xlu0 %v3212_v61 }
0x2540   :  { %v3010_v17 = vpop.permute.xlu1 %3009 }
0x2541   :  { %v3214_v10 = vpop.xlane.xlu0 %3213  ;;  %v3012_v22 = vsel %vm7028_vm7, %v3010_v17, 0.0 }
0x2542   :  { %v3215_v48 = vsub.f32 %v3211_v36, %v3214_v10  ;;  %3013 = vadd.xlane.f32.xlu0 %v3012_v22 }
0x2544   :  { %v3216_v33 = vmul.f32 1.442695, %v3215_v48  ;;  %v3030_v48 = vadd.f32 1.0, %v6486_v9 }
0x2546   :  { %5111 = vpow2.f32 %v3216_v33 }
0x254c   :  { %v5112_v42 = vpop.eup %5111 }
0x254d   :  { %v3218_v27 = vsel %vm394_vm6, %v5112_v42, 0.0 }
0x254e   :  { %3219 = vadd.xlane.f32.xlu0 %v3218_v27 }
0x2562   :  { %3245 = vperm.xlu0 %4847, %v3242_v15  }
0x256a   :  { %4853 = vset.pattern.permute.xlu0 %v5612_v50 }
0x25b5   :  { %v3014_v44 = vpop.xlane.xlu0 %3013 }
0x25b6   :  { %5113 = vrcp.f32 %v3014_v44  ;;  %v3026_v35 = vand.u32 2147483648, %v3014_v44  ;;  %v3024_v63 = vand.u32 2147483647, %v3014_v44  ;;  %vm3020_vm15 = vweird.f32 %v3014_v44 }
0x25b8   :  { %v3027_v2 = vor.u32 1.1754944e-38, %v3026_v35  ;;  %vm3025_vm10 = vcmp.eq.f32.partialorder %v3024_v63, 8.507059e+37 }
0x25bc   :  { %v5114_v37 = vpop.eup %5113 }
0x25bd   :  { %v3016_v5 = vmul.f32 %v5114_v37, %v3014_v44  ;;  %vm3021_vm12 = vweird.f32 %v5114_v37 }
0x25be   :  { %vm3022_vm14 = vmor %vm3020_vm15, %vm3021_vm12 }
0x25bf   :  { %v3017_v29 = vsub.f32 1.0, %v3016_v5 }
0x25c1   :  { %v3018_v55 = vmul.f32 %v5114_v37, %v3017_v29  ;;  %v3220_v56 = vpop.xlane.xlu0 %3219 }
0x25c2   :  { %5115 = vrcp.f32 %v3220_v56  ;;  %v3232_v38 = vand.u32 2147483648, %v3220_v56  ;;  %v3230_v53 = vand.u32 2147483647, %v3220_v56  ;;  %vm3226_vm3 = vweird.f32 %v3220_v56 }
0x25c3   :  { %v3019_v12 = vadd.f32 %v5114_v37, %v3018_v55 }
0x25c4   :  { %v3233_v19 = vor.u32 1.1754944e-38, %v3232_v38  ;;  %vm3231_vm0 = vcmp.eq.f32.partialorder %v3230_v53, 8.507059e+37 }
0x25c5   :  { %v3023_v58 = vsel %vm3022_vm14, %v5114_v37, %v3019_v12 }
0x25c6   :  { %v3028_v49 = vsel %vm3025_vm10, %v3027_v2, %v3023_v58  ;;  %vm7029_vm10 = vcmask 261120  }
0x25c7   :  { %v3029_v47 = vmul.f32 %v5110_v18, %v3028_v49  ;;  %v3239_v18 = vpop.permute.xlu2 %3238 }
0x25c8   :  { %v5116_v1 = vpop.eup %5115 }
0x25c9   :  { %v3222_v16 = vmul.f32 %v5116_v1, %v3220_v56  ;;  %3272 = vperm.xlu1 %4849, %v3029_v47   ;;  %3267 = vperm.xlu2 %4848, %v3029_v47   ;;  %vm3227_vm9 = vweird.f32 %v5116_v1 }
0x25ca   :  { %vm3228_vm7 = vmor %vm3226_vm3, %vm3227_vm9  ;;  %vm7030_vm9 = vcmask 167056  }
0x25cb   :  { %v3223_v24 = vsub.f32 1.0, %v3222_v16 }
0x25cd   :  { %v3224_v40 = vmul.f32 %v5116_v1, %v3223_v24 }
0x25cf   :  { %v3225_v45 = vadd.f32 %v5116_v1, %v3224_v40 }
0x25d1   :  { %v3229_v34 = vsel %vm3228_vm7, %v5116_v1, %v3225_v45  ;;  %4851 = vset.pattern.permute.xlu1 %v5299_v3  ;;  %4850 = vset.pattern.permute.xlu2 %v5294_v46 }
0x25d2   :  { %v3234_v6 = vsel %vm3231_vm0, %v3233_v19, %v3229_v34 }
0x25d3   :  { %v3235_v36 = vmul.f32 %v5112_v42, %v3234_v6 }
0x25d4   :  { %v3246_v61 = vpop.permute.xlu0 %3245 }
0x25d5   :  { %v3241_v17 = vmul.f32 %v3239_v18, %v3235_v36  ;;  %v3248_v10 = vmul.f32 %v3246_v61, %v6386_v59 }
0x25d7   :  { %v3249_v22 = vadd.f32 %v3248_v10, %v3241_v17 }
0x25d9   :  { %3254 = vrot.lane.b32.xlu1 %v3249_v22, %s5297_s22  ;;  %3251 = vrot.lane.b32.xlu2 %v3249_v22, %s5296_s21 }
0x25e1   :  { %3261 = vrot.lane.b32.xlu1 %v3249_v22, %s5295_s20  ;;  %3258 = vrot.lane.b32.xlu2 %v3249_v22, %s5298_s23 }
0x25e9   :  { %3288 = vperm.xlu1 %4851, %v3030_v48   ;;  %3278 = vperm.xlu2 %4850, %v3029_v47  }
0x25f1   :  { %4852 = vset.pattern.permute.xlu1 %v5609_v43  ;;  %4855 = vset.pattern.permute.xlu2 %v5609_v43 }
0x2623   :  { %v3268_v33 = vpop.permute.xlu2 %3267 }
0x2633   :  { %v3252_v42 = vpop.permute.xlu2 %3251 }
0x263b   :  { %v3273_v59 = vpop.permute.xlu1 %3272  ;;  %v3259_v27 = vpop.permute.xlu2 %3258 }
0x263c   :  { %v3275_v5 = vmul.f32 %v3273_v59, %v3249_v22 }
0x2643   :  { %v3279_v35 = vpop.permute.xlu2 %3278 }
0x264b   :  { %v3255_v15 = vpop.permute.xlu1 %3254 }
0x264c   :  { %v3257_v44 = vsel %vm469_vm11, %v3252_v42, %v3255_v15 }
0x264d   :  { %v3270_v37 = vmul.f32 %v3268_v33, %v3257_v44 }
0x264f   :  { %v3276_v9 = vadd.f32 %v3275_v5, %v3270_v37 }
0x2653   :  { %v3262_v29 = vpop.permute.xlu1 %3261 }
0x2654   :  { %v3264_v55 = vsel %vm477_vm13, %v3259_v27, %v3262_v29 }
0x2655   :  { %v3281_v63 = vmul.f32 %v3279_v35, %v3264_v55 }
0x2657   :  { %v3282_v56 = vadd.f32 %v3281_v63, %v3276_v9 }
0x2659   :  { %v3283_v12 = vmax.f32 %v3282_v56, 1e-30 }
0x265b   :  { %5117 = vlog2.f32 %v3283_v12  ;;  %v3289_v49 = vpop.permute.xlu1 %3288 }
0x2661   :  { %v5118_v2 = vpop.eup %5117 }
0x2662   :  { %v3285_v58 = vmul.f32 0.6931472, %v5118_v2 }
0x2664   :  { %v3291_v47 = vmul.f32 %v3289_v49, %v3285_v58 }
0x2666   :  { %v3292_v1 = vmul.f32 1.442695, %v3291_v47 }
0x2668   :  { %5119 = vpow2.f32 %v3292_v1 }
0x266e   :  { %v5120_v16 = vpop.eup %5119 }
0x266f   :  { %v3294_v24 = vsel %vm394_vm6, %v5120_v16, 0.0 }
0x2670   :  { %3295 = vadd.xlane.f32.xlu2 %v3294_v24 }
0x26e3   :  { %v3296_v38 = vpop.xlane.xlu2 %3295 }
0x26e4   :  { %v3297_v40 = vadd.f32 1e-16, %v3296_v38 }
0x26e6   :  { %5121 = vrcp.f32 %v3297_v40  ;;  %v3309_v34 = vand.u32 2147483648, %v3297_v40  ;;  %v3307_v36 = vand.u32 2147483647, %v3297_v40  ;;  %vm3303_vm12 = vweird.f32 %v3297_v40 }
0x26e8   :  { %v3310_v61 = vor.u32 1.1754944e-38, %v3309_v34  ;;  %vm3308_vm14 = vcmp.eq.f32.partialorder %v3307_v36, 8.507059e+37 }
0x26ec   :  { %v5122_v53 = vpop.eup %5121 }
0x26ed   :  { %v3299_v45 = vmul.f32 %v5122_v53, %v3297_v40  ;;  %vm3304_vm0 = vweird.f32 %v5122_v53 }
0x26ee   :  { %vm3305_vm15 = vmor %vm3303_vm12, %vm3304_vm0 }
0x26ef   :  { %v3300_v19 = vsub.f32 1.0, %v3299_v45 }
0x26f1   :  { %v3301_v6 = vmul.f32 %v5122_v53, %v3300_v19 }
0x26f3   :  { %v3302_v18 = vadd.f32 %v5122_v53, %v3301_v6 }
0x26f5   :  { %v3306_v17 = vsel %vm3305_vm15, %v5122_v53, %v3302_v18 }
0x26f6   :  { %v3311_v10 = vsel %vm3308_vm14, %v3310_v61, %v3306_v17 }
0x26f7   :  { %v6553_v22 = vmul.f32 %v5120_v16, %v3311_v10 }
0x26f9   :  { %v3365_v48 = vperm.slane %v6553_v22, 2  ;;  %v3313_v33 = vperm.slane %v6553_v22, 0  ;;  %v3326_v42 = vperm.slane %v6553_v22, 1 }
0x26fb   :  { %3370 = vperm.xlu2 %4855, %v3365_v48   ;;  %3324 = vperm.xlu0 %4853, %v3313_v33  }
0x26fc   :  { %3318 = vperm.xlu1 %4852, %v3313_v33  }
0x2703   :  { %3458 = vrot.lane.b32.xlu0 %v2957_v54, %s5291_s19  ;;  %4859 = vset.pattern.permute.xlu2 %v5289_v57 }
0x2704   :  { %3331 = vperm.xlu1 %4852, %v3326_v42   ;;  %4856 = vset.pattern.permute.xlu0 %v5609_v43 }
0x270c   :  { %4854 = vset.pattern.permute.xlu1 %v5612_v50 }
0x2714   :  { %3337 = vperm.xlu1 %4854, %v3326_v42  }
0x276d   :  { %v3325_v59 = vpop.permute.xlu0 %3324 }
0x276e   :  { %v3319_v27 = vpop.permute.xlu1 %3318  ;;  %v3340_v15 = vmul.f32 %v3325_v59, %v6450_v32 }
0x276f   :  { %v3339_v44 = vmul.f32 %v3319_v27, %v6441_v31 }
0x2770   :  { %v3344_v37 = vsel %vm245_vm4, %v3340_v15, 0.0 }
0x2771   :  { %v3343_v5 = vsel %vm245_vm4, %v3339_v44, 0.0 }
0x2772   :  { %v3345_v4 = vadd.f32 %v3344_v37, %v3343_v5  ;;  %v3495_v37 = vrot.slane %v6418_v0, 6  ;;  %v3378_v0 = vperm.slane %v6553_v22, 3 }
0x2774   :  { %v3346_v29 = vrot.slane %v3345_v4, 4 }
0x2775   :  { %v3459_v19 = vpop.permute.xlu0 %3458 }
0x2776   :  { %v3332_v54 = vpop.permute.xlu1 %3331  ;;  %v3347_v55 = vadd.f32 %v3346_v29, %v3345_v4  ;;  %v3361_v29 = vmul.f32 0.5, %v6456_v13 }
0x2777   :  { %v3341_v35 = vmul.f32 %v3332_v54, %v6463_v7 }
0x2778   :  { %v3348_v2 = vrot.slane %v3347_v55, 2 }
0x2779   :  { %v3352_v56 = vsel %vm245_vm4, %v3341_v35, 0.0 }
0x277a   :  { %v3349_v47 = vadd.f32 %v3348_v2, %v3347_v55 }
0x277c   :  { %v3350_v24 = vrot.slane %v3349_v47, 1 }
0x277e   :  { %v3351_v53 = vadd.f32 %v3350_v24, %v3349_v47 }
0x2786   :  { %v3338_v9 = vpop.permute.xlu1 %3337 }
0x2787   :  { %v3342_v63 = vmul.f32 %v3338_v9, %v6446_v8 }
0x2789   :  { %v3353_v12 = vsel %vm245_vm4, %v3342_v63, 0.0 }
0x278a   :  { %v3354_v58 = vadd.f32 %v3353_v12, %v3352_v56  ;;  %v3371_v56 = vpop.permute.xlu2 %3370 }
0x278c   :  { %v3355_v49 = vrot.slane %v3354_v58, 4 }
0x278e   :  { %v3356_v1 = vadd.f32 %v3355_v49, %v3354_v58 }
0x2790   :  { %v3357_v16 = vrot.slane %v3356_v1, 2 }
0x2792   :  { %v3358_v38 = vadd.f32 %v3357_v16, %v3356_v1 }
0x2794   :  { %v3359_v40 = vrot.slane %v3358_v38, 1 }
0x2796   :  { %v3360_v45 = vadd.f32 %v3359_v40, %v3358_v38 }
0x2798   :  { %v3456_v34 = vsel %vm297_vm1, %v3360_v45, %v3351_v53  ;;  %v6576_v6 = vsel %vm310_vm8, %v3360_v45, %v3351_v53 }
0x2799   :  { %v3461_v36 = vsel %vm245_vm4, %v3456_v34, %v3459_v19  ;;  %v3402_v34 = vperm.slane %v6456_v13, 0 }
0x279a   :  { %4756 = vmatmul.msk.f32.vlgmr.msra.gmra.mxu1 %vm95_vm2, %v3461_v36 }
0x279b   :  { %v3406_v36 = vmul.f32 %v3402_v34, %v3371_v56 }
0x2817   :  { %v3482_v18 = vpop.f32.mrf.mxu1 }
0x2818   :  { %v3486_v61 = vrot.slane %v3482_v18, 4  ;;  %v3401_v18 = vrot.slane %v6456_v13, 1 }
0x281a   :  { %v3488_v17 = vadd.f32 %v3486_v61, %v5408_v14  ;;  %v3403_v61 = vperm.slane %v3401_v18, 0 }
0x281c   :  { %5123 = vtanh.f32 %v3488_v17  ;;  %v3489_v33 = vmul.f32 0.5, %v3488_v17 }
0x281e   :  { %5125 = vtanh.f32 %v3489_v33  ;;  %v4610_v33 = vld [vmem:[%s7004_s8] sm:$0xff] }
0x2822   :  { %v5124_v10 = vpop.eup %5123 }
0x2823   :  { %3499 = vrot.lane.b32.xlu1 %v5124_v10, %s5284_s1  ;;  %v4611_v10 = vld [vmem:[%s7004_s8 + $0x8] sm:$0xff] }
0x2824   :  { %v5126_v42 = vpop.eup %5125  ;;  %4632 = vmatpush.msrb.mxu0 %v4611_v10 }
0x2825   :  { %v3491_v59 = vadd.f32 1.0, %v5126_v42 }
0x2826   :  { %4633 = vmatpush.msrb.mxu0 %v4610_v33 }
0x2827   :  { %v3492_v27 = vmul.f32 0.5, %v3491_v59 }
0x2829   :  { %v3497_v5 = vmul.f32 %v3495_v37, %v3492_v27 }
0x2895   :  { %v3500_v15 = vpop.permute.xlu1 %3499 }
0x2896   :  { %v3502_v44 = vmul.f32 %v3500_v15, %v3492_v27 }
0x2898   :  { %3504 = vrot.lane.b32.xlu0 %v3502_v44, %s5286_s5 }
0x290a   :  { %v3505_v4 = vpop.permute.xlu0 %3504 }
0x290b   :  { %v6584_v54 = vadd.f32 %v3505_v4, %v3497_v5 }
0x290d   :  { %5127 = vtanh.f32 %v6584_v54 }
0x290e   :  { %5129 = vtanh.f32 %v3361_v29 }
0x2913   :  { %v5128_v35 = vpop.eup %5127 }
0x2914   :  { %3510 = vrot.lane.b32.xlu1 %v5128_v35, %s5284_s1  ;;  %v5130_v55 = vpop.eup %5129 }
0x2915   :  { %v3363_v9 = vadd.f32 1.0, %v5130_v55 }
0x2917   :  { %v3364_v63 = vmul.f32 0.5, %v3363_v9 }
0x2919   :  { %v3393_v12 = vperm.slane %v3364_v63, 0  ;;  %v3392_v16 = vrot.slane %v3364_v63, 1 }
0x291b   :  { %v3397_v2 = vmul.f32 %v3393_v12, %v3371_v56  ;;  %v3394_v38 = vperm.slane %v3392_v16, 0 }
0x291c   :  { %3376 = vperm.xlu1 %4854, %v3365_v48  }
0x291d   :  { %v3410_v58 = vsub.f32 1.0, %v3397_v2 }
0x2924   :  { %3389 = vperm.xlu1 %4854, %v3378_v0  }
0x292c   :  { %3418 = vrot.lane.b32.xlu1 %v3410_v58, %s5284_s1 }
0x292d   :  { %4858 = vset.pattern.permute.xlu1 %v5289_v57 }
0x2986   :  { %v3511_v49 = vpop.permute.xlu1 %3510 }
0x2987   :  { %v6594_v47 = vmul.f32 %v3511_v49, %v3492_v27 }
0x2989   :  { %v3515_v1 = vrot.slane %v6594_v47, 4 }
0x298b   :  { %3516 = vrot.lane.b32.xlu0 %v3515_v1, %s5286_s5 }
0x298e   :  { %v3377_v48 = vpop.permute.xlu1 %3376 }
0x298f   :  { %v3398_v24 = vmul.f32 %v3393_v12, %v3377_v48  ;;  %v3407_v37 = vmul.f32 %v3402_v34, %v3377_v48 }
0x2991   :  { %v3411_v45 = vsub.f32 1.0, %v3398_v24 }
0x2993   :  { %3383 = vperm.xlu0 %4856, %v3378_v0  }
0x2996   :  { %v3390_v40 = vpop.permute.xlu1 %3389 }
0x2997   :  { %v3400_v53 = vmul.f32 %v3394_v38, %v3390_v40  ;;  %v3409_v17 = vmul.f32 %v3403_v61, %v3390_v40 }
0x2999   :  { %v3413_v19 = vsub.f32 1.0, %v3400_v53 }
0x299b   :  { %3420 = vrot.lane.b32.xlu0 %v3411_v45, %s5284_s1  ;;  %3424 = vrot.lane.b32.xlu1 %v3413_v19, %s5284_s1  ;;  %v6637_v19 = vld [vmem:[%s7003_s7] ss:$0 sm:$0xff]  ;;  %s5300_s7 = smov 80  }
0x299c   :  { %4857 = vset.pattern.permute.xlu0 %v5288_v60 }
0x299e   :  { %v3419_v4 = vpop.permute.xlu1 %3418 }
0x299f   :  { %v3430_v35 = vmul.f32 %v3419_v4, %v6441_v31 }
0x29a3   :  { %3438 = vrot.lane.b32.xlu0 %v3406_v36, %s5291_s19 }
0x29ab   :  { %3444 = vrot.lane.b32.xlu0 %v3409_v17, %s5291_s19 }
0x29fd   :  { %v3517_v42 = vpop.permute.xlu0 %3516 }
0x29fe   :  { %4757 = vmatmul.msk.f32.vlgmr.msra.gmra.mxu0 %vm7029_vm10, %v3517_v42 }
0x2a05   :  { %v3384_v59 = vpop.permute.xlu0 %3383 }
0x2a06   :  { %v3399_v27 = vmul.f32 %v3394_v38, %v3384_v59  ;;  %v3408_v15 = vmul.f32 %v3403_v61, %v3384_v59  ;;  %4760 = vmatmul.msk.f32.vlgmr.msrb.gmra.mxu0 %vm245_vm4, %v6242_v23 }
0x2a08   :  { %v3412_v44 = vsub.f32 1.0, %v3399_v27  ;;  %3442 = vrot.lane.b32.xlu1 %v3408_v15, %s5291_s19 }
0x2a0a   :  { %3422 = vrot.lane.b32.xlu2 %v3412_v44, %s5284_s1 }
0x2a0d   :  { %v3421_v5 = vpop.permute.xlu0 %3420  ;;  %v3425_v9 = vpop.permute.xlu1 %3424 }
0x2a0e   :  { %v3433_v23 = vmul.f32 %v3425_v9, %v6446_v8  ;;  %v3431_v16 = vmul.f32 %v3421_v5, %v6450_v32 }
0x2a12   :  { %3440 = vrot.lane.b32.xlu2 %v3407_v37, %s5291_s19 }
0x2a15   :  { %v3439_v29 = vpop.permute.xlu0 %3438 }
0x2a16   :  { %v6620_v55 = vadd.f32 %v3439_v29, %v3430_v35 }
0x2a18   :  { %v3589_v63 = vadd.f32 1e-16, %v6620_v55 }
0x2a1a   :  { %v3665_v12 = vmul.f32 %v3589_v63, %v3589_v63 }
0x2a1c   :  { %v3669_v58 = vsel %vm245_vm4, %v3665_v12, 0.0 }
0x2a1d   :  { %v3445_v0 = vpop.permute.xlu0 %3444 }
0x2a1e   :  { %v6624_v56 = vadd.f32 %v3445_v0, %v3433_v23 }
0x2a20   :  { %v3592_v2 = vadd.f32 1e-16, %v6624_v56 }
0x2a22   :  { %v3668_v49 = vmul.f32 %v3592_v2, %v3592_v2 }
0x2a24   :  { %v3678_v48 = vsel %vm245_vm4, %v3668_v49, 0.0 }
0x2a32   :  { %3670 = vadd.xlane.f32.xlu1 %v3669_v58 }
0x2a3a   :  { %3679 = vadd.xlane.f32.xlu1 %v3678_v48 }
0x2a64   :  { %v3423_v31 = vpop.permute.xlu2 %3422 }
0x2a65   :  { %v3432_v18 = vmul.f32 %v3423_v31, %v6463_v7 }
0x2a6c   :  { %v3441_v24 = vpop.permute.xlu2 %3440 }
0x2a6d   :  { %v6630_v38 = vadd.f32 %v3441_v24, %v3431_v16 }
0x2a6f   :  { %v3590_v8 = vadd.f32 1e-16, %v6630_v38 }
0x2a71   :  { %v3666_v40 = vmul.f32 %v3590_v8, %v3590_v8 }
0x2a73   :  { %v3672_v53 = vsel %vm245_vm4, %v3666_v40, 0.0 }
0x2a74   :  { %3673 = vadd.xlane.f32.xlu0 %v3672_v53 }
0x2a7a   :  { %v3443_v36 = vpop.permute.xlu1 %3442 }
0x2a7b   :  { %v3537_v45 = vpop.f32.mrf.mxu0  ;;  %v6645_v61 = vadd.f32 %v3443_v36, %v3432_v18 }
0x2a7c   :  { %v6640_v34 = vadd.f32 %v6637_v19, %v3537_v45 }
0x2a7d   :  { %v3591_v17 = vadd.f32 1e-16, %v6645_v61 }
0x2a7e   :  { %v3541_v32 = vrot.slane %v6640_v34, 6 }
0x2a7f   :  { %v3667_v10 = vmul.f32 %v3591_v17, %v3591_v17 }
0x2a80   :  { %3542 = vrot.lane.b32.xlu2 %v3541_v32, %s5287_s30 }
0x2a81   :  { %v3675_v33 = vsel %vm245_vm4, %v3667_v10, 0.0 }
0x2aa9   :  { %3676 = vadd.xlane.f32.xlu2 %v3675_v33 }
0x2ada   :  { %v3543_v42 = vpop.permute.xlu2 %3542 }
0x2adb   :  { %v6651_v59 = vsel %vm179_vm5, %v6640_v34, %v3543_v42 }
0x2adc   :  { %v3546_v27 = vadd.f32 1e-16, %v6651_v59  ;;  %v3548_v15 = vand.u32 2147483647, %v6651_v59 }
0x2ade   :  { %3615 = vst [vmem:[#allocation1] sm:$0xff] %v3546_v27  ;;  %v3744_v44 = vmul.f32 %v3546_v27, %v3546_v27  ;;  %v3595_v7 = vperm.slane %v3546_v27, 0  ;;  %v3594_v37 = vrot.slane %v3546_v27, 1  ;;  %v3549_v35 = vsub.f32 0.0, %v3548_v15 }
0x2ae0   :  { %v3745_v5 = vsel %vm394_vm6, %v3744_v44, 0.0  ;;  %v3600_v4 = vmul.f32 %v3595_v7, %v3590_v8  ;;  %v3599_v29 = vmul.f32 %v3595_v7, %v3589_v63  ;;  %v3596_v9 = vperm.slane %v3594_v37, 0  ;;  %v6671_v37 = vpop.xlane.xlu1 %3670 }
0x2ae1   :  { %3746 = vadd.xlane.f32.xlu0 %v3745_v5  ;;  %v3550_v58 = vmul.f32 1.442695, %v3549_v35  ;;  %vm3688_vm12 = vcmp.eq.f32.partialorder %v6671_v37, inf }
0x2ae2   :  { %v3606_v0 = vsel %vm245_vm4, %v3600_v4, 0.0  ;;  %v3603_v23 = vsel %vm245_vm4, %v3599_v29, 0.0  ;;  %v3601_v12 = vmul.f32 %v3596_v9, %v3591_v17  ;;  %v3602_v31 = vmul.f32 %v3596_v9, %v3592_v2 }
0x2ae3   :  { %3607 = vadd.xlane.f32.xlu1 %v3606_v0  ;;  %3604 = vadd.xlane.f32.xlu2 %v3603_v23  ;;  %5131 = vpow2.f32 %v3550_v58 }
0x2ae4   :  { %v3609_v24 = vsel %vm245_vm4, %v3601_v12, 0.0  ;;  %v3612_v53 = vsel %vm245_vm4, %v3602_v31, 0.0 }
0x2ae5   :  { %v3617_v49 = vld [vmem:[#allocation1 + $0x2] ss:$9 sm:$0xff] }
0x2ae6   :  { %v3620_v48 = vperm.slane %v3617_v49, 0  ;;  %v3619_v16 = vld [vmem:[#allocation1 + $0x3] ss:$9 sm:$0xff] }
0x2ae7   :  { %v3621_v45 = vperm.slane %v3619_v16, 0  ;;  %v3674_v29 = vpop.xlane.xlu0 %3673 }
0x2ae8   :  { %v3624_v40 = vmul.f32 %v3620_v48, %v3589_v63  ;;  %v3625_v36 = vmul.f32 %v3620_v48, %v3590_v8  ;;  %v3560_v63 = vsel %vm7030_vm9, %v6651_v59, -inf  ;;  %v3680_v4 = vpop.xlane.xlu1 %3679  ;;  %vm3700_vm0 = vcmp.eq.f32.partialorder %v3674_v29, inf }
0x2ae9   :  { %3610 = vadd.xlane.f32.xlu0 %v3609_v24  ;;  %v3626_v18 = vmul.f32 %v3621_v45, %v3591_v17  ;;  %v5132_v10 = vpop.eup %5131  ;;  %v3627_v33 = vmul.f32 %v3621_v45, %v3592_v2  ;;  %v3547_v17 = vmax.f32 %v6651_v59, 0.0  ;;  %vm3724_vm7 = vcmp.eq.f32.partialorder %v3680_v4, inf }
0x2aea   :  { %v3628_v32 = vsel %vm245_vm4, %v3624_v40, 0.0  ;;  %v3631_v42 = vsel %vm245_vm4, %v3625_v36, 0.0  ;;  %v3552_v15 = vadd.f32 1.0, %v5132_v10  ;;  %vm3726_vm14 = vcmp.eq.f32.partialorder %v3680_v4, 0.0 }
0x2aeb   :  { %3613 = vadd.xlane.f32.xlu2 %v3612_v53  ;;  %3629 = vadd.xlane.f32.xlu1 %v3628_v32  ;;  %v3634_v27 = vsel %vm245_vm4, %v3626_v18, 0.0  ;;  %v3637_v44 = vsel %vm245_vm4, %v3627_v33, 0.0  ;;  %vm3702_vm10 = vcmp.eq.f32.partialorder %v3674_v29, 0.0  ;;  %vm3690_vm9 = vcmp.eq.f32.partialorder %v6671_v37, 0.0 }
0x2aec   :  { %5133 = vlog2.f32 %v3552_v15 }
0x2af1   :  { %3632 = vadd.xlane.f32.xlu0 %v3631_v42 }
0x2af2   :  { %v5134_v7 = vpop.eup %5133 }
0x2af3   :  { %3635 = vadd.xlane.f32.xlu2 %v3634_v27  ;;  %3638 = vadd.xlane.f32.xlu1 %v3637_v44  ;;  %v3554_v8 = vmul.f32 0.6931472, %v5134_v7 }
0x2af5   :  { %v6667_v2 = vadd.f32 %v3554_v8, %v3547_v17 }
0x2afb   :  { %3561 = vmax.xlane.f32.xlu2 %v3560_v63 }
0x2b05   :  { %3766 = vperm.xlu0 %4857, %v6667_v2  }
0x2b0d   :  { %4860 = vset.pattern.permute.xlu0 %v5293_v21 }
0x2b1c   :  { %v3677_v5 = vpop.xlane.xlu2 %3676 }
0x2b1d   :  { %5135 = vrsqrt.f32 %v3677_v5  ;;  %vm3712_vm3 = vcmp.eq.f32.partialorder %v3677_v5, inf  ;;  %vm3714_vm15 = vcmp.eq.f32.partialorder %v3677_v5, 0.0 }
0x2b1e   :  { %5137 = vrsqrt.f32 %v3680_v4 }
0x2b1f   :  { %5139 = vrsqrt.f32 %v3674_v29 }
0x2b20   :  { %5141 = vrsqrt.f32 %v6671_v37 }
0x2b23   :  { %v5136_v35 = vpop.eup %5135 }
0x2b24   :  { %v5138_v9 = vpop.eup %5137  ;;  %v3706_v23 = vmul.f32 %v5136_v35, %v3677_v5 }
0x2b25   :  { %v5140_v0 = vpop.eup %5139  ;;  %v3718_v58 = vmul.f32 %v5138_v9, %v3680_v4 }
0x2b26   :  { %v5142_v12 = vpop.eup %5141  ;;  %v3694_v49 = vmul.f32 %v5140_v0, %v3674_v29  ;;  %v3707_v31 = vmul.f32 %v5136_v35, %v3706_v23 }
0x2b27   :  { %v3682_v48 = vmul.f32 %v5142_v12, %v6671_v37  ;;  %v3719_v16 = vmul.f32 %v5138_v9, %v3718_v58 }
0x2b28   :  { %v3695_v24 = vmul.f32 %v5140_v0, %v3694_v49  ;;  %v3708_v53 = vmul.f32 0.5, %v3707_v31 }
0x2b29   :  { %v3683_v40 = vmul.f32 %v5142_v12, %v3682_v48  ;;  %v3720_v45 = vmul.f32 0.5, %v3719_v16  ;;  %v3715_v16 = vand.u32 2147483648, %v3677_v5 }
0x2b2a   :  { %v3696_v32 = vmul.f32 0.5, %v3695_v24  ;;  %v3709_v18 = vsub.f32 1.5, %v3708_v53  ;;  %v3703_v24 = vand.u32 2147483648, %v3674_v29 }
0x2b2b   :  { %v3684_v36 = vmul.f32 0.5, %v3683_v40  ;;  %v3721_v10 = vsub.f32 1.5, %v3720_v45 }
0x2b2c   :  { %v3697_v33 = vsub.f32 1.5, %v3696_v32  ;;  %v3710_v27 = vmul.f32 %v5136_v35, %v3709_v18  ;;  %v3691_v32 = vand.u32 2147483648, %v6671_v37 }
0x2b2d   :  { %v3685_v42 = vsub.f32 1.5, %v3684_v36  ;;  %v3722_v15 = vmul.f32 %v5138_v9, %v3721_v10 }
0x2b2e   :  { %v3698_v44 = vmul.f32 %v5140_v0, %v3697_v33  ;;  %v3711_v8 = vmul.f32 %v3710_v27, %v3677_v5 }
0x2b2f   :  { %v3686_v7 = vmul.f32 %v5142_v12, %v3685_v42  ;;  %v3723_v58 = vmul.f32 %v3722_v15, %v3680_v4  ;;  %v3727_v12 = vand.u32 2147483648, %v3680_v4 }
0x2b30   :  { %v3699_v49 = vmul.f32 %v3698_v44, %v3674_v29  ;;  %v3713_v31 = vsel %vm3712_vm3, %v3677_v5, %v3711_v8  ;;  %vm7031_vm3 = vcmask 130112  }
0x2b31   :  { %v3687_v48 = vmul.f32 %v3686_v7, %v6671_v37  ;;  %v3725_v9 = vsel %vm3724_vm7, %v3680_v4, %v3723_v58  ;;  %v3716_v40 = vsel %vm3714_vm15, %v3715_v16, %v3713_v31  ;;  %vm7032_vm7 = vmmov %vm7031_vm3 }
0x2b32   :  { %v3701_v0 = vsel %vm3700_vm0, %v3674_v29, %v3699_v49  ;;  %v3728_v36 = vsel %vm3726_vm14, %v3727_v12, %v3725_v9  ;;  %v3736_v42 = vperm.slane %v3716_v40, %v5545_v26  ;;  %vm7033_vm15 = vmmov %vm7031_vm3 }
0x2b33   :  { %v3689_v45 = vsel %vm3688_vm12, %v6671_v37, %v3687_v48  ;;  %v3704_v18 = vsel %vm3702_vm10, %v3703_v24, %v3701_v0  ;;  %v3737_v7 = vperm.slane %v3728_v36, %v5554_v51  ;;  %vm7034_vm14 = vmmov %vm7031_vm3 }
0x2b34   :  { %v3692_v15 = vsel %vm3690_vm9, %v3691_v32, %v3689_v45  ;;  %v3734_v8 = vperm.slane %v3704_v18, %v5554_v51  ;;  %v3556_v18 = vmul.f32 0.5, %v6651_v59  ;;  %vm7035_vm10 = vmmov %vm7031_vm3 }
0x2b35   :  { %v3733_v29 = vperm.slane %v3692_v15, %v5545_v26  ;;  %v3738_v58 = vsel %vm7031_vm3, %v3737_v7, %v3736_v42  ;;  %vm7036_vm9 = vmmov %vm7031_vm3  ;;  %vm7037_vm3 = vcmask 19456  }
0x2b37   :  { %v3735_v48 = vsel %vm7032_vm7, %v3734_v8, %v3733_v29 }
0x2b38   :  { %v3739_v16 = vsel %vm297_vm1, %v3738_v58, %v3735_v48  ;;  %v3741_v9 = vsel %vm310_vm8, %v3738_v58, %v3735_v48 }
0x2b39   :  { %v3743_v45 = vsel %vm179_vm5, %v3739_v16, %v3741_v9 }
0x2b54   :  { %v3747_v63 = vpop.xlane.xlu0 %3746 }
0x2b55   :  { %5143 = vrsqrt.f32 %v3747_v63  ;;  %vm3755_vm0 = vcmp.eq.f32.partialorder %v3747_v63, inf  ;;  %v3758_v0 = vand.u32 2147483648, %v3747_v63  ;;  %vm3757_vm12 = vcmp.eq.f32.partialorder %v3747_v63, 0.0 }
0x2b56   :  { %v6675_v17 = vpop.xlane.xlu2 %3604  ;;  %v6677_v23 = vpop.xlane.xlu1 %3607 }
0x2b5b   :  { %v5144_v35 = vpop.eup %5143 }
0x2b5c   :  { %v3749_v53 = vmul.f32 %v5144_v35, %v3747_v63  ;;  %v3611_v27 = vpop.xlane.xlu0 %3610 }
0x2b5d   :  { %v3647_v7 = vperm.slane %v3611_v27, %v5545_v26 }
0x2b5e   :  { %v3750_v10 = vmul.f32 %v5144_v35, %v3749_v53  ;;  %v3614_v33 = vpop.xlane.xlu2 %3613  ;;  %v3630_v5 = vpop.xlane.xlu1 %3629 }
0x2b5f   :  { %v3656_v8 = vperm.slane %v3630_v5, %v5545_v26 }
0x2b60   :  { %v3751_v44 = vmul.f32 0.5, %v3750_v10  ;;  %v3648_v10 = vperm.slane %v3614_v33, %v5554_v51 }
0x2b62   :  { %v3752_v4 = vsub.f32 1.5, %v3751_v44  ;;  %v3644_v44 = vperm.slane %v6675_v17, %v5545_v26  ;;  %v3649_v58 = vsel %vm7034_vm14, %v3648_v10, %v3647_v7 }
0x2b64   :  { %v3753_v49 = vmul.f32 %v5144_v35, %v3752_v4  ;;  %v3633_v40 = vpop.xlane.xlu0 %3632 }
0x2b65   :  { %v3657_v42 = vperm.slane %v3633_v40, %v5554_v51 }
0x2b66   :  { %v3754_v31 = vmul.f32 %v3753_v49, %v3747_v63  ;;  %v3636_v37 = vpop.xlane.xlu2 %3635  ;;  %v3639_v12 = vpop.xlane.xlu1 %3638 }
0x2b67   :  { %v3659_v32 = vperm.slane %v3636_v37, %v5545_v26  ;;  %v3660_v35 = vperm.slane %v3639_v12, %v5554_v51  ;;  %v3658_v49 = vsel %vm7035_vm10, %v3657_v42, %v3656_v8 }
0x2b68   :  { %v3756_v24 = vsel %vm3755_vm0, %v3747_v63, %v3754_v31  ;;  %v3645_v63 = vperm.slane %v6677_v23, %v5554_v51 }
0x2b69   :  { %v3759_v53 = vsel %vm3757_vm12, %v3758_v0, %v3756_v24  ;;  %v3661_v4 = vsel %vm7033_vm15, %v3660_v35, %v3659_v32 }
0x2b6a   :  { %v3760_v36 = vmul.f32 %v3759_v53, %v3743_v45  ;;  %v3662_v17 = vsel %vm310_vm8, %v3661_v4, %v3658_v49  ;;  %v3646_v23 = vsel %vm7036_vm9, %v3645_v63, %v3644_v44 }
0x2b6b   :  { %v3650_v27 = vsel %vm297_vm1, %v3649_v58, %v3646_v23 }
0x2b6c   :  { %v3761_v15 = vmax.f32 %v3760_v36, 1e-08  ;;  %v3664_v31 = vsel %vm179_vm5, %v3650_v27, %v3662_v17 }
0x2b6e   :  { %v3562_v29 = vpop.xlane.xlu2 %3561  ;;  %5145 = vrcp.f32 %v3761_v15 }
0x2b6f   :  { %5147 = vtanh.f32 %v3556_v18  ;;  %v3563_v33 = vsub.f32 %v6651_v59, %v3562_v29 }
0x2b71   :  { %v3564_v48 = vmul.f32 1.442695, %v3563_v33 }
0x2b73   :  { %5149 = vpow2.f32 %v3564_v48 }
0x2b74   :  { %v5146_v5 = vpop.eup %5145 }
0x2b75   :  { %v5148_v37 = vpop.eup %5147  ;;  %v3763_v16 = vmul.f32 %v5146_v5, %v3664_v31 }
0x2b76   :  { %v3558_v59 = vadd.f32 1.0, %v5148_v37 }
0x2b77   :  { %v3767_v9 = vpop.permute.xlu0 %3766 }
0x2b78   :  { %v3769_v0 = vmul.f32 %v3767_v9, %v3763_v16  ;;  %v3559_v40 = vmul.f32 0.5, %v3558_v59 }
0x2b79   :  { %v5150_v12 = vpop.eup %5149 }
0x2b7a   :  { %3567 = vrot.lane.b32.xlu2 %v5150_v12, %s5290_s2  ;;  %v3770_v24 = vsel %vm394_vm6, %v3769_v0, -inf  ;;  %v3800_v53 = vsub.f32 1.0, %v3559_v40 }
0x2b7b   :  { %3771 = vmax.xlane.f32.xlu1 %v3770_v24 }
0x2b82   :  { %3803 = vperm.xlu2 %4859, %v3800_v53  }
0x2b8a   :  { %4861 = vset.pattern.permute.xlu2 %v5292_v20 }
0x2bd4   :  { %v3568_v45 = vpop.permute.xlu2 %3567 }
0x2bd5   :  { %v3570_v32 = vsel %vm7037_vm3, %v3568_v45, 0.0 }
0x2bd6   :  { %3571 = vadd.xlane.f32.xlu1 %v3570_v32 }
0x2bee   :  { %v3772_v35 = vpop.xlane.xlu1 %3771 }
0x2bef   :  { %v3773_v36 = vsub.f32 %v3769_v0, %v3772_v35 }
0x2bf1   :  { %v3774_v18 = vmul.f32 1.442695, %v3773_v36  ;;  %v3588_v36 = vadd.f32 1.0, %v6667_v2 }
0x2bf3   :  { %5151 = vpow2.f32 %v3774_v18 }
0x2bf9   :  { %v5152_v10 = vpop.eup %5151 }
0x2bfa   :  { %v3776_v42 = vsel %vm394_vm6, %v5152_v10, 0.0 }
0x2bfb   :  { %3777 = vadd.xlane.f32.xlu1 %v3776_v42 }
0x2c14   :  { %3796 = vperm.xlu1 %4858, %v3559_v40  }
0x2c1c   :  { %4862 = vset.pattern.permute.xlu1 %v5294_v46 }
0x2c49   :  { %v3572_v15 = vpop.xlane.xlu1 %3571 }
0x2c4a   :  { %5153 = vrcp.f32 %v3572_v15  ;;  %v3584_v8 = vand.u32 2147483648, %v3572_v15  ;;  %v3582_v29 = vand.u32 2147483647, %v3572_v15  ;;  %vm3578_vm0 = vweird.f32 %v3572_v15 }
0x2c4c   :  { %v3585_v58 = vor.u32 1.1754944e-38, %v3584_v8  ;;  %vm3583_vm15 = vcmp.eq.f32.partialorder %v3582_v29, 8.507059e+37 }
0x2c50   :  { %v5154_v44 = vpop.eup %5153 }
0x2c51   :  { %v3574_v63 = vmul.f32 %v5154_v44, %v3572_v15  ;;  %vm3579_vm7 = vweird.f32 %v5154_v44 }
0x2c52   :  { %vm3580_vm12 = vmor %vm3578_vm0, %vm3579_vm7 }
0x2c53   :  { %v3575_v7 = vsub.f32 1.0, %v3574_v63 }
0x2c55   :  { %v3576_v4 = vmul.f32 %v5154_v44, %v3575_v7 }
0x2c57   :  { %v3577_v33 = vadd.f32 %v5154_v44, %v3576_v4 }
0x2c59   :  { %v3581_v49 = vsel %vm3580_vm12, %v5154_v44, %v3577_v33 }
0x2c5a   :  { %v3586_v48 = vsel %vm3583_vm15, %v3585_v58, %v3581_v49 }
0x2c5b   :  { %v3587_v17 = vmul.f32 %v5150_v12, %v3586_v48  ;;  %v3804_v12 = vpop.permute.xlu2 %3803 }
0x2c5d   :  { %3830 = vperm.xlu2 %4861, %v3587_v17  }
0x2c65   :  { %4870 = vset.pattern.permute.xlu2 %v5288_v60  ;;  %v3806_v60 = vmul.f32 %v3804_v12, %v6553_v22 }
0x2c6e   :  { %v3778_v23 = vpop.xlane.xlu1 %3777 }
0x2c6f   :  { %5155 = vrcp.f32 %v3778_v23  ;;  %v3790_v9 = vand.u32 2147483648, %v3778_v23  ;;  %vm3784_vm10 = vweird.f32 %v3778_v23  ;;  %v3788_v0 = vand.u32 2147483647, %v3778_v23 }
0x2c71   :  { %v3791_v24 = vor.u32 1.1754944e-38, %v3790_v9  ;;  %vm3789_vm3 = vcmp.eq.f32.partialorder %v3788_v0, 8.507059e+37 }
0x2c75   :  { %v5156_v27 = vpop.eup %5155 }
0x2c76   :  { %v3780_v5 = vmul.f32 %v5156_v27, %v3778_v23  ;;  %vm3785_vm14 = vweird.f32 %v5156_v27 }
0x2c77   :  { %vm3786_vm9 = vmor %vm3784_vm10, %vm3785_vm14  ;;  %vm7038_vm14 = vcmask 1045509   ;;  %vm7039_vm10 = vcmask 1043456  }
0x2c78   :  { %v3781_v31 = vsub.f32 1.0, %v3780_v5 }
0x2c7a   :  { %v3782_v37 = vmul.f32 %v5156_v27, %v3781_v31 }
0x2c7c   :  { %v3783_v16 = vadd.f32 %v5156_v27, %v3782_v37 }
0x2c7e   :  { %v3787_v59 = vsel %vm3786_vm9, %v5156_v27, %v3783_v16  ;;  %vm7040_vm9 = vcmask 261120  }
0x2c7f   :  { %v3792_v40 = vsel %vm3789_vm3, %v3791_v24, %v3787_v59  ;;  %vm7041_vm3 = vcmask 167056  }
0x2c80   :  { %v3793_v53 = vmul.f32 %v5152_v10, %v3792_v40 }
0x2c86   :  { %v3797_v45 = vpop.permute.xlu1 %3796 }
0x2c87   :  { %v3799_v32 = vmul.f32 %v3797_v45, %v3793_v53 }
0x2c89   :  { %v3807_v35 = vadd.f32 %v3806_v60, %v3799_v32 }
0x2c8b   :  { %3816 = vrot.lane.b32.xlu1 %v3807_v35, %s5298_s23  ;;  %3812 = vrot.lane.b32.xlu2 %v3807_v35, %s5297_s22 }
0x2c8c   :  { %3809 = vrot.lane.b32.xlu0 %v3807_v35, %s5296_s21 }
0x2c93   :  { %3836 = vperm.xlu1 %4862, %v3587_v17   ;;  %3819 = vrot.lane.b32.xlu2 %v3807_v35, %s5295_s20 }
0x2c94   :  { %3825 = vperm.xlu0 %4860, %v3587_v17  }
0x2c9b   :  { %4864 = vset.pattern.permute.xlu1 %v5609_v43 }
0x2c9c   :  { %4863 = vset.pattern.permute.xlu0 %v5299_v3 }
0x2c9d   :  { %3846 = vperm.xlu0 %4863, %v3588_v36  }
0x2ca5   :  { %4866 = vset.pattern.permute.xlu0 %v5609_v43 }
0x2cb7   :  { %v3831_v22 = vpop.permute.xlu2 %3830 }
0x2cb8   :  { %v3833_v7 = vmul.f32 %v3831_v22, %v3807_v35 }
0x2ce5   :  { %v3813_v18 = vpop.permute.xlu2 %3812 }
0x2ced   :  { %v3820_v8 = vpop.permute.xlu2 %3819 }
0x2cfd   :  { %v3817_v10 = vpop.permute.xlu1 %3816 }
0x2cfe   :  { %v3810_v42 = vpop.permute.xlu0 %3809  ;;  %v3822_v2 = vsel %vm477_vm13, %v3817_v10, %v3820_v8 }
0x2cff   :  { %v3815_v44 = vsel %vm469_vm11, %v3810_v42, %v3813_v18 }
0x2d05   :  { %v3837_v15 = vpop.permute.xlu1 %3836 }
0x2d06   :  { %v3826_v63 = vpop.permute.xlu0 %3825  ;;  %v3839_v29 = vmul.f32 %v3837_v15, %v3822_v2 }
0x2d07   :  { %v3828_v4 = vmul.f32 %v3826_v63, %v3815_v44 }
0x2d09   :  { %v3834_v33 = vadd.f32 %v3833_v7, %v3828_v4 }
0x2d0b   :  { %v3840_v58 = vadd.f32 %v3839_v29, %v3834_v33 }
0x2d0d   :  { %v3841_v49 = vmax.f32 %v3840_v58, 1e-30 }
0x2d0f   :  { %5157 = vlog2.f32 %v3841_v49  ;;  %v3847_v23 = vpop.permute.xlu0 %3846 }
0x2d15   :  { %v5158_v48 = vpop.eup %5157 }
0x2d16   :  { %v3843_v17 = vmul.f32 0.6931472, %v5158_v48 }
0x2d18   :  { %v3849_v27 = vmul.f32 %v3847_v23, %v3843_v17 }
0x2d1a   :  { %v3850_v5 = vmul.f32 1.442695, %v3849_v27 }
0x2d1c   :  { %5159 = vpow2.f32 %v3850_v5 }
0x2d22   :  { %v5160_v31 = vpop.eup %5159 }
0x2d23   :  { %v3852_v37 = vsel %vm394_vm6, %v5160_v31, 0.0 }
0x2d24   :  { %3853 = vadd.xlane.f32.xlu2 %v3852_v37 }
0x2d97   :  { %v3854_v16 = vpop.xlane.xlu2 %3853 }
0x2d98   :  { %v3855_v9 = vadd.f32 1e-16, %v3854_v16 }
0x2d9a   :  { %5161 = vrcp.f32 %v3855_v9  ;;  %v3867_v40 = vand.u32 2147483648, %v3855_v9  ;;  %v3865_v53 = vand.u32 2147483647, %v3855_v9  ;;  %vm3861_vm0 = vweird.f32 %v3855_v9 }
0x2d9c   :  { %v3868_v60 = vor.u32 1.1754944e-38, %v3867_v40  ;;  %vm3866_vm15 = vcmp.eq.f32.partialorder %v3865_v53, 8.507059e+37  ;;  %v4591_v53 = vsel %vm179_vm5, %v6404_v62, %v6576_v6 }
0x2da0   :  { %v5162_v0 = vpop.eup %5161 }
0x2da1   :  { %v3857_v59 = vmul.f32 %v5162_v0, %v3855_v9  ;;  %vm3862_vm7 = vweird.f32 %v5162_v0 }
0x2da2   :  { %vm3863_vm12 = vmor %vm3861_vm0, %vm3862_vm7 }
0x2da3   :  { %v3858_v24 = vsub.f32 1.0, %v3857_v59 }
0x2da5   :  { %v3859_v12 = vmul.f32 %v5162_v0, %v3858_v24 }
0x2da7   :  { %v3860_v45 = vadd.f32 %v5162_v0, %v3859_v12 }
0x2da9   :  { %v3864_v32 = vsel %vm3863_vm12, %v5162_v0, %v3860_v45 }
0x2daa   :  { %v3869_v35 = vsel %vm3866_vm15, %v3868_v60, %v3864_v32 }
0x2dab   :  { %v6731_v36 = vmul.f32 %v5160_v31, %v3869_v35 }
0x2dad   :  { %v3884_v22 = vperm.slane %v6731_v36, 1  ;;  %v3871_v18 = vperm.slane %v6731_v36, 0 }
0x2daf   :  { %3889 = vperm.xlu0 %4866, %v3884_v22   ;;  %3876 = vperm.xlu1 %4864, %v3871_v18  }
0x2db7   :  { %4865 = vset.pattern.permute.xlu1 %v5612_v50  ;;  %4868 = vset.pattern.permute.xlu0 %v5612_v50 }
0x2dbf   :  { %3882 = vperm.xlu1 %4865, %v3871_v18  }
0x2dc7   :  { %3895 = vperm.xlu1 %4865, %v3884_v22  }
0x2dcf   :  { %4016 = vrot.lane.b32.xlu1 %v3515_v1, %s5291_s19 }
0x2dd0   :  { %4867 = vset.pattern.permute.xlu1 %v5609_v43 }
0x2e21   :  { %v3877_v10 = vpop.permute.xlu1 %3876  ;;  %v3890_v8 = vpop.permute.xlu0 %3889 }
0x2e22   :  { %v3897_v42 = vmul.f32 %v3877_v10, %v6620_v55  ;;  %v3899_v29 = vmul.f32 %v3890_v8, %v6645_v61  ;;  %v4053_v8 = vrot.slane %v6584_v54, 6 }
0x2e24   :  { %v3901_v63 = vsel %vm245_vm4, %v3897_v42, 0.0  ;;  %v3910_v58 = vsel %vm245_vm4, %v3899_v29, 0.0 }
0x2e31   :  { %v3883_v15 = vpop.permute.xlu1 %3882 }
0x2e32   :  { %v3898_v44 = vmul.f32 %v3883_v15, %v6630_v38 }
0x2e34   :  { %v3902_v7 = vsel %vm245_vm4, %v3898_v44, 0.0 }
0x2e35   :  { %v3903_v4 = vadd.f32 %v3902_v7, %v3901_v63  ;;  %v3923_v63 = vperm.slane %v6731_v36, 2  ;;  %v3936_v7 = vperm.slane %v6731_v36, 3 }
0x2e37   :  { %v3904_v2 = vrot.slane %v3903_v4, 4 }
0x2e39   :  { %v3905_v33 = vadd.f32 %v3904_v2, %v3903_v4  ;;  %v3896_v47 = vpop.permute.xlu1 %3895 }
0x2e3a   :  { %v3900_v1 = vmul.f32 %v3896_v47, %v6624_v56 }
0x2e3b   :  { %v3906_v48 = vrot.slane %v3905_v33, 2 }
0x2e3c   :  { %v3911_v49 = vsel %vm245_vm4, %v3900_v1, 0.0 }
0x2e3d   :  { %v3912_v17 = vadd.f32 %v3911_v49, %v3910_v58  ;;  %v3907_v27 = vadd.f32 %v3906_v48, %v3905_v33 }
0x2e3f   :  { %v3913_v23 = vrot.slane %v3912_v17, 4  ;;  %v3908_v37 = vrot.slane %v3907_v27, 1 }
0x2e41   :  { %v3914_v5 = vadd.f32 %v3913_v23, %v3912_v17  ;;  %v3909_v0 = vadd.f32 %v3908_v37, %v3907_v27  ;;  %v4017_v40 = vpop.permute.xlu1 %4016 }
0x2e43   :  { %v3915_v31 = vrot.slane %v3914_v5, 2 }
0x2e45   :  { %v3916_v16 = vadd.f32 %v3915_v31, %v3914_v5 }
0x2e47   :  { %v3917_v9 = vrot.slane %v3916_v16, 1 }
0x2e49   :  { %v3918_v59 = vadd.f32 %v3917_v9, %v3916_v16 }
0x2e4b   :  { %v4014_v24 = vsel %vm297_vm1, %v3918_v59, %v3909_v0  ;;  %v4580_v12 = vsel %vm7038_vm14, %v3918_v59, %v3909_v0  ;;  %v3959_v0 = vrot.slane %v6640_v34, 1 }
0x2e4c   :  { %v4019_v45 = vsel %vm245_vm4, %v4014_v24, %v4017_v40  ;;  %v6756_v60 = vsel %vm7039_vm10, %v4591_v53, %v4580_v12 }
0x2e4d   :  { %4758 = vmatmul.msk.f32.vlgmr.msrb.gmra.mxu3 %vm95_vm2, %v4019_v45  ;;  %v3961_v59 = vperm.slane %v3959_v0, 0  ;;  %v3960_v45 = vperm.slane %v6640_v34, 0 }
0x2ed0   :  { %v4040_v32 = vpop.f32.mrf.mxu3 }
0x2ed1   :  { %v4044_v35 = vrot.slane %v4040_v32, 2 }
0x2ed3   :  { %v4046_v22 = vadd.f32 %v4044_v35, %v5408_v14  ;;  %v3919_v14 = vmul.f32 0.5, %v6640_v34 }
0x2ed5   :  { %5163 = vtanh.f32 %v4046_v22  ;;  %v4047_v10 = vmul.f32 0.5, %v4046_v22 }
0x2ed7   :  { %5165 = vtanh.f32 %v4047_v10 }
0x2ed8   :  { %5167 = vtanh.f32 %v3919_v14 }
0x2edb   :  { %v5164_v18 = vpop.eup %5163 }
0x2edc   :  { %4057 = vrot.lane.b32.xlu0 %v5164_v18, %s5284_s1 }
0x2edd   :  { %v5166_v42 = vpop.eup %5165 }
0x2ede   :  { %v4049_v15 = vadd.f32 1.0, %v5166_v42  ;;  %v5168_v2 = vpop.eup %5167 }
0x2edf   :  { %v3921_v47 = vadd.f32 1.0, %v5168_v2 }
0x2ee0   :  { %v4050_v62 = vmul.f32 0.5, %v4049_v15 }
0x2ee1   :  { %v3922_v1 = vmul.f32 0.5, %v3921_v47 }
0x2ee2   :  { %v4055_v4 = vmul.f32 %v4053_v8, %v4050_v62 }
0x2ee3   :  { %v3950_v48 = vrot.slane %v3922_v1, 1  ;;  %v3951_v27 = vperm.slane %v3922_v1, 0 }
0x2f4e   :  { %v4058_v6 = vpop.permute.xlu0 %4057 }
0x2f4f   :  { %v4060_v44 = vmul.f32 %v4058_v6, %v4050_v62 }
0x2f51   :  { %4062 = vrot.lane.b32.xlu1 %v4060_v44, %s5286_s5 }
0x2f59   :  { %3928 = vperm.xlu1 %4867, %v3923_v63  }
0x2f61   :  { %3941 = vperm.xlu1 %4867, %v3936_v7  }
0x2f69   :  { %4869 = vset.pattern.permute.xlu1 %v5612_v50 }
0x2f71   :  { %3947 = vperm.xlu1 %4869, %v3936_v7  }
0x2f79   :  { %4874 = vset.pattern.permute.xlu1 %v5292_v20  ;;  %v3952_v20 = vperm.slane %v3950_v48, 0 }
0x2fc3   :  { %v4063_v29 = vpop.permute.xlu1 %4062 }
0x2fc4   :  { %v6768_v33 = vadd.f32 %v4063_v29, %v4055_v4 }
0x2fc6   :  { %5169 = vtanh.f32 %v6768_v33 }
0x2fcb   :  { %v3929_v58 = vpop.permute.xlu1 %3928 }
0x2fcc   :  { %v5170_v49 = vpop.eup %5169  ;;  %v3955_v5 = vmul.f32 %v3951_v27, %v3929_v58  ;;  %v3964_v10 = vmul.f32 %v3960_v45, %v3929_v58 }
0x2fcd   :  { %4068 = vrot.lane.b32.xlu0 %v5170_v49, %s5284_s1 }
0x2fce   :  { %v3968_v31 = vsub.f32 1.0, %v3955_v5 }
0x2fd3   :  { %v3942_v17 = vpop.permute.xlu1 %3941 }
0x2fd4   :  { %v3957_v23 = vmul.f32 %v3952_v20, %v3942_v17  ;;  %v3966_v24 = vmul.f32 %v3961_v59, %v3942_v17 }
0x2fd5   :  { %3934 = vperm.xlu0 %4868, %v3923_v63  }
0x2fd6   :  { %v3970_v54 = vsub.f32 1.0, %v3957_v23 }
0x2fd8   :  { %3980 = vrot.lane.b32.xlu1 %v3970_v54, %s5284_s1 }
0x2fdd   :  { %3976 = vrot.lane.b32.xlu0 %v3968_v31, %s5284_s1 }
0x2fde   :  { %4872 = vset.pattern.permute.xlu0 %v5289_v57 }
0x2fe3   :  { %v3948_v37 = vpop.permute.xlu1 %3947 }
0x2fe4   :  { %v3958_v16 = vmul.f32 %v3952_v20, %v3948_v37  ;;  %v3967_v42 = vmul.f32 %v3961_v59, %v3948_v37 }
0x2fe6   :  { %v3971_v9 = vsub.f32 1.0, %v3958_v16 }
0x2fe8   :  { %3982 = vrot.lane.b32.xlu0 %v3971_v9, %s5284_s1 }
0x2ff0   :  { %4000 = vrot.lane.b32.xlu0 %v3966_v24, %s5291_s19 }
0x303f   :  { %v4069_v40 = vpop.permute.xlu0 %4068 }
0x3040   :  { %v6778_v12 = vmul.f32 %v4069_v40, %v4050_v62 }
0x3042   :  { %v4073_v53 = vrot.slane %v6778_v12, 6 }
0x3044   :  { %4074 = vrot.lane.b32.xlu2 %v4073_v53, %s5286_s5 }
0x3047   :  { %v3935_v32 = vpop.permute.xlu0 %3934 }
0x3048   :  { %v3956_v35 = vmul.f32 %v3951_v27, %v3935_v32  ;;  %v3965_v22 = vmul.f32 %v3960_v45, %v3935_v32 }
0x304a   :  { %v3969_v18 = vsub.f32 1.0, %v3956_v35  ;;  %3998 = vrot.lane.b32.xlu1 %v3965_v22, %s5291_s19  ;;  %v3981_v2 = vpop.permute.xlu1 %3980 }
0x304b   :  { %v3990_v16 = vmul.f32 %v3981_v2, %v6645_v61 }
0x304c   :  { %3978 = vrot.lane.b32.xlu2 %v3969_v18, %s5284_s1 }
0x304f   :  { %v3977_v6 = vpop.permute.xlu0 %3976 }
0x3050   :  { %v3988_v44 = vmul.f32 %v3977_v6, %v6620_v55 }
0x3054   :  { %3996 = vrot.lane.b32.xlu2 %v3964_v10, %s5291_s19 }
0x305a   :  { %v3983_v8 = vpop.permute.xlu0 %3982 }
0x305b   :  { %v3991_v29 = vmul.f32 %v3983_v8, %v6624_v56 }
0x305c   :  { %4002 = vrot.lane.b32.xlu2 %v3967_v42, %s5291_s19 }
0x309e   :  { %v4075_v15 = vpop.permute.xlu2 %4074 }
0x309f   :  { %4759 = vmatmul.msk.f32.vlgmr.msra.gmra.mxu2 %vm7040_vm9, %v4075_v15 }
0x30a6   :  { %v3979_v62 = vpop.permute.xlu2 %3978 }
0x30a7   :  { %v3989_v55 = vmul.f32 %v3979_v62, %v6630_v38  ;;  %v4001_v38 = vpop.permute.xlu0 %4000 }
0x30a8   :  { %v6811_v9 = vadd.f32 %v4001_v38, %v3990_v16 }
0x30aa   :  { %v4149_v0 = vadd.f32 1e-16, %v6811_v9 }
0x30ac   :  { %v4225_v59 = vmul.f32 %v4149_v0, %v4149_v0 }
0x30ae   :  { %v3997_v63 = vpop.permute.xlu2 %3996  ;;  %v4233_v24 = vsel %vm245_vm4, %v4225_v59, 0.0 }
0x30af   :  { %v6791_v7 = vadd.f32 %v3997_v63, %v3988_v44 }
0x30b1   :  { %v4147_v14 = vadd.f32 1e-16, %v6791_v7 }
0x30b3   :  { %v4223_v4 = vmul.f32 %v4147_v14, %v4147_v14 }
0x30b5   :  { %v4227_v47 = vsel %vm245_vm4, %v4223_v4, 0.0 }
0x30b6   :  { %v4003_v1 = vpop.permute.xlu2 %4002  ;;  %4228 = vadd.xlane.f32.xlu0 %v4227_v47 }
0x30b7   :  { %v6796_v58 = vadd.f32 %v4003_v1, %v3991_v29 }
0x30b9   :  { %v4150_v49 = vadd.f32 1e-16, %v6796_v58 }
0x30bb   :  { %v4226_v48 = vmul.f32 %v4150_v49, %v4150_v49 }
0x30bc   :  { %v3999_v20 = vpop.permute.xlu1 %3998 }
0x30bd   :  { %v6800_v17 = vadd.f32 %v3999_v20, %v3989_v55  ;;  %v4236_v23 = vsel %vm245_vm4, %v4226_v48, 0.0 }
0x30be   :  { %4237 = vadd.xlane.f32.xlu0 %v4236_v23 }
0x30bf   :  { %v4148_v27 = vadd.f32 1e-16, %v6800_v17 }
0x30c1   :  { %v4224_v56 = vmul.f32 %v4148_v27, %v4148_v27 }
0x30c3   :  { %v4230_v54 = vsel %vm245_vm4, %v4224_v56, 0.0 }
0x30c4   :  { %4231 = vadd.xlane.f32.xlu2 %v4230_v54 }
0x3122   :  { %v4095_v5 = vpop.f32.mrf.mxu2 }
0x3123   :  { %v6806_v31 = vadd.f32 %v6637_v19, %v4095_v5 }
0x3125   :  { %v4099_v37 = vrot.slane %v6806_v31, 6 }
0x3127   :  { %4100 = vrot.lane.b32.xlu1 %v4099_v37, %s5287_s30 }
0x3151   :  { %4234 = vadd.xlane.f32.xlu1 %v4233_v24 }
0x3199   :  { %v4101_v40 = vpop.permute.xlu1 %4100 }
0x319a   :  { %v6817_v19 = vsel %vm179_vm5, %v6806_v31, %v4101_v40 }
0x319b   :  { %v4104_v45 = vadd.f32 1e-16, %v6817_v19  ;;  %v4106_v42 = vand.u32 2147483647, %v6817_v19  ;;  %v4118_v24 = vsel %vm7041_vm3, %v6817_v19, -inf  ;;  %v4105_v40 = vmax.f32 %v6817_v19, 0.0 }
0x319d   :  { %4173 = vst [vmem:[#allocation1] sm:$0xff] %v4104_v45  ;;  %v4302_v32 = vmul.f32 %v4104_v45, %v4104_v45  ;;  %v4153_v35 = vperm.slane %v4104_v45, 0  ;;  %v4152_v22 = vrot.slane %v4104_v45, 1  ;;  %v4107_v63 = vsub.f32 0.0, %v4106_v42  ;;  %v4232_v42 = vpop.xlane.xlu2 %4231 }
0x319e   :  { %vm4258_vm12 = vcmp.eq.f32.partialorder %v4232_v42, inf  ;;  %vm4260_vm9 = vcmp.eq.f32.partialorder %v4232_v42, 0.0 }
0x319f   :  { %v4303_v61 = vsel %vm394_vm6, %v4302_v32, 0.0  ;;  %v4158_v18 = vmul.f32 %v4153_v35, %v4148_v27  ;;  %v4157_v10 = vmul.f32 %v4153_v35, %v4147_v14  ;;  %v4154_v15 = vperm.slane %v4152_v22, 0 }
0x31a0   :  { %4304 = vadd.xlane.f32.xlu2 %v4303_v61  ;;  %v4108_v55 = vmul.f32 1.442695, %v4107_v63  ;;  %v6842_v61 = vpop.xlane.xlu0 %4228 }
0x31a1   :  { %v4164_v62 = vsel %vm245_vm4, %v4158_v18, 0.0  ;;  %v4161_v6 = vsel %vm245_vm4, %v4157_v10, 0.0  ;;  %v4159_v44 = vmul.f32 %v4154_v15, %v4149_v0  ;;  %v4160_v2 = vmul.f32 %v4154_v15, %v4150_v49 }
0x31a2   :  { %4165 = vadd.xlane.f32.xlu0 %v4164_v62  ;;  %4162 = vadd.xlane.f32.xlu1 %v4161_v6  ;;  %5171 = vpow2.f32 %v4108_v55  ;;  %vm4246_vm15 = vcmp.eq.f32.partialorder %v6842_v61, inf  ;;  %vm4248_vm3 = vcmp.eq.f32.partialorder %v6842_v61, 0.0 }
0x31a3   :  { %v4167_v47 = vsel %vm245_vm4, %v4159_v44, 0.0  ;;  %v4170_v20 = vsel %vm245_vm4, %v4160_v2, 0.0 }
0x31a4   :  { %v4175_v8 = vld [vmem:[#allocation1 + $0x2] ss:$9 sm:$0xff] }
0x31a5   :  { %v4178_v4 = vperm.slane %v4175_v8, 0  ;;  %v4177_v29 = vld [vmem:[#allocation1 + $0x3] ss:$9 sm:$0xff] }
0x31a6   :  { %v4179_v23 = vperm.slane %v4177_v29, 0 }
0x31a7   :  { %v4182_v1 = vmul.f32 %v4178_v4, %v4147_v14  ;;  %v4183_v56 = vmul.f32 %v4178_v4, %v4148_v27  ;;  %v4114_v27 = vmul.f32 0.5, %v6817_v19 }
0x31a8   :  { %4168 = vadd.xlane.f32.xlu2 %v4167_v47  ;;  %v4185_v54 = vmul.f32 %v4179_v23, %v4150_v49  ;;  %v4184_v5 = vmul.f32 %v4179_v23, %v4149_v0  ;;  %v5172_v16 = vpop.eup %5171  ;;  %v4238_v10 = vpop.xlane.xlu0 %4237 }
0x31a9   :  { %v4186_v48 = vsel %vm245_vm4, %v4182_v1, 0.0  ;;  %v4189_v37 = vsel %vm245_vm4, %v4183_v56, 0.0  ;;  %v4110_v59 = vadd.f32 1.0, %v5172_v16  ;;  %vm4282_vm0 = vcmp.eq.f32.partialorder %v4238_v10, inf }
0x31aa   :  { %4187 = vadd.xlane.f32.xlu0 %v4186_v48  ;;  %4171 = vadd.xlane.f32.xlu1 %v4170_v20  ;;  %v4195_v38 = vsel %vm245_vm4, %v4185_v54, 0.0  ;;  %v4192_v14 = vsel %vm245_vm4, %v4184_v5, 0.0  ;;  %vm4284_vm10 = vcmp.eq.f32.partialorder %v4238_v10, 0.0 }
0x31ab   :  { %5173 = vlog2.f32 %v4110_v59 }
0x31ac   :  { %5175 = vtanh.f32 %v4114_v27 }
0x31b0   :  { %4190 = vadd.xlane.f32.xlu2 %v4189_v37 }
0x31b1   :  { %v5174_v49 = vpop.eup %5173 }
0x31b2   :  { %4196 = vadd.xlane.f32.xlu0 %v4195_v38  ;;  %4193 = vadd.xlane.f32.xlu1 %v4192_v14  ;;  %v4112_v0 = vmul.f32 0.6931472, %v5174_v49  ;;  %v5176_v32 = vpop.eup %5175 }
0x31b3   :  { %v4116_v35 = vadd.f32 1.0, %v5176_v32 }
0x31b4   :  { %v6834_v45 = vadd.f32 %v4112_v0, %v4105_v40 }
0x31b5   :  { %v6837_v22 = vmul.f32 0.5, %v4116_v35 }
0x31ba   :  { %4119 = vmax.xlane.f32.xlu1 %v4118_v24 }
0x31c4   :  { %v4235_v18 = vpop.xlane.xlu1 %4234 }
0x31c5   :  { %5177 = vrsqrt.f32 %v4235_v18  ;;  %vm4270_vm7 = vcmp.eq.f32.partialorder %v4235_v18, inf  ;;  %vm4272_vm14 = vcmp.eq.f32.partialorder %v4235_v18, 0.0 }
0x31c6   :  { %5179 = vrsqrt.f32 %v4238_v10 }
0x31c7   :  { %5181 = vrsqrt.f32 %v4232_v42 }
0x31c8   :  { %4324 = vperm.xlu2 %4870, %v6834_v45   ;;  %5183 = vrsqrt.f32 %v6842_v61 }
0x31cb   :  { %v5178_v15 = vpop.eup %5177 }
0x31cc   :  { %v5180_v62 = vpop.eup %5179  ;;  %v4264_v44 = vmul.f32 %v5178_v15, %v4235_v18 }
0x31cd   :  { %v5182_v6 = vpop.eup %5181 }
0x31ce   :  { %v5184_v63 = vpop.eup %5183  ;;  %v4252_v8 = vmul.f32 %v5182_v6, %v4232_v42 }
0x31cf   :  { %v4240_v4 = vmul.f32 %v5184_v63, %v6842_v61 }
0x31d0   :  { %4871 = vset.pattern.permute.xlu2 %v5289_v57  ;;  %v4276_v57 = vmul.f32 %v5180_v62, %v4238_v10  ;;  %v4253_v29 = vmul.f32 %v5182_v6, %v4252_v8 }
0x31d1   :  { %4354 = vperm.xlu2 %4871, %v6837_v22   ;;  %v4241_v47 = vmul.f32 %v5184_v63, %v4240_v4 }
0x31d2   :  { %v4277_v2 = vmul.f32 %v5180_v62, %v4276_v57  ;;  %v4254_v48 = vmul.f32 0.5, %v4253_v29  ;;  %v4261_v57 = vand.u32 2147483648, %v4232_v42 }
0x31d3   :  { %v4242_v20 = vmul.f32 0.5, %v4241_v47 }
0x31d4   :  { %v4278_v55 = vmul.f32 0.5, %v4277_v2  ;;  %v4255_v54 = vsub.f32 1.5, %v4254_v48  ;;  %v4249_v2 = vand.u32 2147483648, %v6842_v61 }
0x31d5   :  { %v4243_v5 = vsub.f32 1.5, %v4242_v20 }
0x31d6   :  { %v4279_v56 = vsub.f32 1.5, %v4278_v55  ;;  %v4256_v14 = vmul.f32 %v5182_v6, %v4255_v54 }
0x31d7   :  { %v4244_v59 = vmul.f32 %v5184_v63, %v4243_v5  ;;  %v4285_v63 = vand.u32 2147483648, %v4238_v10 }
0x31d8   :  { %v4280_v38 = vmul.f32 %v5180_v62, %v4279_v56  ;;  %v4257_v40 = vmul.f32 %v4256_v14, %v4232_v42 }
0x31d9   :  { %4873 = vset.pattern.permute.xlu2 %v5293_v21  ;;  %v4265_v21 = vmul.f32 %v5178_v15, %v4264_v44  ;;  %v4245_v32 = vmul.f32 %v4244_v59, %v6842_v61  ;;  %v4273_v44 = vand.u32 2147483648, %v4235_v18 }
0x31da   :  { %v4281_v0 = vmul.f32 %v4280_v38, %v4238_v10  ;;  %v4259_v6 = vsel %vm4258_vm12, %v4232_v42, %v4257_v40 }
0x31db   :  { %v4266_v1 = vmul.f32 0.5, %v4265_v21  ;;  %v4247_v21 = vsel %vm4246_vm15, %v6842_v61, %v4245_v32  ;;  %v4262_v47 = vsel %vm4260_vm9, %v4261_v57, %v4259_v6 }
0x31dc   :  { %v4283_v62 = vsel %vm4282_vm0, %v4238_v10, %v4281_v0  ;;  %v4292_v5 = vperm.slane %v4262_v47, %v5554_v51 }
0x31dd   :  { %v4267_v23 = vsub.f32 1.5, %v4266_v1  ;;  %v4286_v29 = vsel %vm4284_vm10, %v4285_v63, %v4283_v62 }
0x31de   :  { %v4295_v54 = vperm.slane %v4286_v29, %v5554_v51 }
0x31df   :  { %v4268_v37 = vmul.f32 %v5178_v15, %v4267_v23  ;;  %v4250_v23 = vsel %vm4248_vm3, %v4249_v2, %v4247_v21 }
0x31e0   :  { %v4291_v42 = vperm.slane %v4250_v23, %v5545_v26 }
0x31e1   :  { %v4269_v24 = vmul.f32 %v4268_v37, %v4235_v18 }
0x31e3   :  { %v4271_v35 = vsel %vm4270_vm7, %v4235_v18, %v4269_v24  ;;  %vm7042_vm7 = vcmask 130112  }
0x31e4   :  { %v4274_v8 = vsel %vm4272_vm14, %v4273_v44, %v4271_v35  ;;  %vm7043_vm0 = vmmov %vm7042_vm7 }
0x31e5   :  { %v4294_v20 = vperm.slane %v4274_v8, %v5545_v26  ;;  %v4293_v14 = vsel %vm7043_vm0, %v4292_v5, %v4291_v42  ;;  %vm7044_vm14 = vmmov %vm7043_vm0 }
0x31e6   :  { %vm7045_vm10 = vmmov %vm7043_vm0 }
0x31e7   :  { %v4296_v37 = vsel %vm7042_vm7, %v4295_v54, %v4294_v20  ;;  %vm7046_vm9 = vmmov %vm7043_vm0 }
0x31e8   :  { %v4297_v61 = vsel %vm297_vm1, %v4296_v37, %v4293_v14  ;;  %v4299_v0 = vsel %vm310_vm8, %v4296_v37, %v4293_v14  ;;  %vm7047_vm3 = vmmov %vm7043_vm0 }
0x31e9   :  { %v4301_v6 = vsel %vm179_vm5, %v4297_v61, %v4299_v0 }
0x3213   :  { %v4305_v16 = vpop.xlane.xlu2 %4304 }
0x3214   :  { %5185 = vrsqrt.f32 %v4305_v16  ;;  %vm4313_vm12 = vcmp.eq.f32.partialorder %v4305_v16, inf  ;;  %v4316_v40 = vand.u32 2147483648, %v4305_v16  ;;  %vm4315_vm15 = vcmp.eq.f32.partialorder %v4305_v16, 0.0 }
0x3215   :  { %v6846_v27 = vpop.xlane.xlu1 %4162  ;;  %v6848_v49 = vpop.xlane.xlu0 %4165 }
0x3216   :  { %v4202_v2 = vperm.slane %v6846_v27, %v5545_v26 }
0x321a   :  { %v5186_v15 = vpop.eup %5185 }
0x321b   :  { %v4307_v4 = vmul.f32 %v5186_v15, %v4305_v16  ;;  %v4169_v18 = vpop.xlane.xlu2 %4168 }
0x321c   :  { %v4205_v29 = vperm.slane %v4169_v18, %v5545_v26 }
0x321d   :  { %v4308_v1 = vmul.f32 %v5186_v15, %v4307_v4  ;;  %v4172_v55 = vpop.xlane.xlu1 %4171  ;;  %v4188_v48 = vpop.xlane.xlu0 %4187 }
0x321e   :  { %v4206_v8 = vperm.slane %v4172_v55, %v5554_v51  ;;  %v4214_v47 = vperm.slane %v4188_v48, %v5545_v26 }
0x321f   :  { %v4309_v56 = vmul.f32 0.5, %v4308_v1 }
0x3220   :  { %v4207_v55 = vsel %vm7045_vm10, %v4206_v8, %v4205_v29 }
0x3221   :  { %v4310_v10 = vsub.f32 1.5, %v4309_v56 }
0x3223   :  { %v4311_v38 = vmul.f32 %v5186_v15, %v4310_v10  ;;  %v4191_v44 = vpop.xlane.xlu2 %4190 }
0x3224   :  { %v4215_v4 = vperm.slane %v4191_v44, %v5554_v51 }
0x3225   :  { %v4312_v59 = vmul.f32 %v4311_v38, %v4305_v16  ;;  %v4194_v24 = vpop.xlane.xlu1 %4193  ;;  %v4197_v32 = vpop.xlane.xlu0 %4196 }
0x3226   :  { %v4217_v63 = vperm.slane %v4194_v24, %v5545_v26  ;;  %v4218_v15 = vperm.slane %v4197_v32, %v5554_v51  ;;  %v4216_v56 = vsel %vm7046_vm9, %v4215_v4, %v4214_v47 }
0x3227   :  { %v4314_v35 = vsel %vm4313_vm12, %v4305_v16, %v4312_v59  ;;  %v4203_v16 = vperm.slane %v6848_v49, %v5554_v51 }
0x3228   :  { %v4317_v62 = vsel %vm4315_vm15, %v4316_v40, %v4314_v35  ;;  %v4219_v1 = vsel %vm7044_vm14, %v4218_v15, %v4217_v63  ;;  %v4358_v40 = vsub.f32 1.0, %v6837_v22 }
0x3229   :  { %v4318_v57 = vmul.f32 %v4317_v62, %v4301_v6  ;;  %v4220_v54 = vsel %vm310_vm8, %v4219_v1, %v4216_v56  ;;  %v4204_v5 = vsel %vm7047_vm3, %v4203_v16, %v4202_v2  ;;  %vm7048_vm8 = vcmask 19456  }
0x322a   :  { %v4208_v51 = vsel %vm297_vm1, %v4207_v55, %v4204_v5 }
0x322b   :  { %v4319_v21 = vmax.f32 %v4318_v57, 1e-08  ;;  %v4222_v26 = vsel %vm179_vm5, %v4208_v51, %v4220_v54  ;;  %v4325_v18 = vpop.permute.xlu2 %4324 }
0x322d   :  { %5187 = vrcp.f32 %v4319_v21  ;;  %v4120_v20 = vpop.xlane.xlu1 %4119 }
0x322e   :  { %v4121_v23 = vsub.f32 %v6817_v19, %v4120_v20 }
0x3230   :  { %v4122_v27 = vmul.f32 1.442695, %v4121_v23 }
0x3232   :  { %5189 = vpow2.f32 %v4122_v27 }
0x3233   :  { %v5188_v49 = vpop.eup %5187  ;;  %v4355_v51 = vpop.permute.xlu2 %4354 }
0x3234   :  { %v4321_v48 = vmul.f32 %v5188_v49, %v4222_v26 }
0x3236   :  { %v4327_v10 = vmul.f32 %v4325_v18, %v4321_v48 }
0x3238   :  { %v5190_v42 = vpop.eup %5189  ;;  %v4328_v19 = vsel %vm394_vm6, %v4327_v10, -inf }
0x3239   :  { %4125 = vrot.lane.b32.xlu1 %v5190_v42, %s5290_s2  ;;  %4329 = vmax.xlane.f32.xlu0 %v4328_v19 }
0x32ab   :  { %v4126_v37 = vpop.permute.xlu1 %4125 }
0x32ac   :  { %v4128_v38 = vsel %vm7048_vm8, %v4126_v37, 0.0  ;;  %v4330_v14 = vpop.xlane.xlu0 %4329 }
0x32ad   :  { %v4331_v59 = vsub.f32 %v4327_v10, %v4330_v14  ;;  %4129 = vadd.xlane.f32.xlu0 %v4128_v38 }
0x32af   :  { %v4332_v24 = vmul.f32 1.442695, %v4331_v59 }
0x32b1   :  { %5191 = vpow2.f32 %v4332_v24 }
0x32b7   :  { %v5192_v61 = vpop.eup %5191 }
0x32b8   :  { %v4334_v0 = vsel %vm394_vm6, %v5192_v61, 0.0 }
0x32b9   :  { %4335 = vadd.xlane.f32.xlu0 %v4334_v0 }
0x32cd   :  { %4361 = vperm.xlu0 %4872, %v4358_v40  }
0x32d5   :  { %4878 = vset.pattern.permute.xlu0 %v5612_v50 }
0x3320   :  { %v4130_v32 = vpop.xlane.xlu0 %4129 }
0x3321   :  { %5193 = vrcp.f32 %v4130_v32  ;;  %v4142_v6 = vand.u32 2147483648, %v4130_v32  ;;  %v4140_v15 = vand.u32 2147483647, %v4130_v32  ;;  %vm4136_vm0 = vweird.f32 %v4130_v32 }
0x3323   :  { %v4143_v4 = vor.u32 1.1754944e-38, %v4142_v6  ;;  %vm4141_vm15 = vcmp.eq.f32.partialorder %v4140_v15, 8.507059e+37 }
0x3327   :  { %v5194_v35 = vpop.eup %5193 }
0x3328   :  { %v4132_v44 = vmul.f32 %v5194_v35, %v4130_v32  ;;  %vm4137_vm7 = vweird.f32 %v5194_v35 }
0x3329   :  { %vm4138_vm12 = vmor %vm4136_vm0, %vm4137_vm7  ;;  %vm7050_vm0 = vcmask 1045504  }
0x332a   :  { %v4133_v62 = vsub.f32 1.0, %v4132_v44 }
0x332c   :  { %v4134_v63 = vmul.f32 %v5194_v35, %v4133_v62  ;;  %v4336_v57 = vpop.xlane.xlu0 %4335 }
0x332d   :  { %5195 = vrcp.f32 %v4336_v57  ;;  %v4348_v1 = vand.u32 2147483648, %v4336_v57  ;;  %v4346_v23 = vand.u32 2147483647, %v4336_v57  ;;  %vm4342_vm10 = vweird.f32 %v4336_v57 }
0x332e   :  { %v4135_v8 = vadd.f32 %v5194_v35, %v4134_v63 }
0x332f   :  { %v4349_v56 = vor.u32 1.1754944e-38, %v4348_v1  ;;  %vm4347_vm3 = vcmp.eq.f32.partialorder %v4346_v23, 8.507059e+37 }
0x3330   :  { %v4139_v22 = vsel %vm4138_vm12, %v5194_v35, %v4135_v8  ;;  %vm7051_vm12 = vcmask 1047559  }
0x3331   :  { %v4144_v21 = vsel %vm4141_vm15, %v4143_v4, %v4139_v22  ;;  %vm7052_vm15 = vmmov %vm7050_vm0 }
0x3332   :  { %v4145_v2 = vmul.f32 %v5190_v42, %v4144_v21 }
0x3333   :  { %v5196_v16 = vpop.eup %5195 }
0x3334   :  { %v4338_v29 = vmul.f32 %v5196_v16, %v4336_v57  ;;  %4388 = vperm.xlu1 %4874, %v4145_v2   ;;  %4383 = vperm.xlu2 %4873, %v4145_v2   ;;  %vm4343_vm14 = vweird.f32 %v5196_v16 }
0x3335   :  { %vm4344_vm9 = vmor %vm4342_vm10, %vm4343_vm14  ;;  %vm4690_vm10 = vcmask 654336  }
0x3336   :  { %v4339_v47 = vsub.f32 1.0, %v4338_v29  ;;  %vm7054_vm14 = vmmov %vm7050_vm0 }
0x3338   :  { %v4340_v20 = vmul.f32 %v5196_v16, %v4339_v47 }
0x333a   :  { %v4341_v55 = vadd.f32 %v5196_v16, %v4340_v20 }
0x333c   :  { %v4345_v54 = vsel %vm4344_vm9, %v5196_v16, %v4341_v55  ;;  %4876 = vset.pattern.permute.xlu1 %v5299_v3  ;;  %4875 = vset.pattern.permute.xlu2 %v5294_v46  ;;  %v4146_v3 = vadd.f32 1.0, %v6834_v45  ;;  %vm4692_vm9 = vcmask 785408  }
0x333d   :  { %v4350_v27 = vsel %vm4347_vm3, %v4349_v56, %v4345_v54  ;;  %vm4694_vm3 = vcmask 916480  }
0x333e   :  { %v4351_v5 = vmul.f32 %v5192_v61, %v4350_v27 }
0x333f   :  { %v4362_v49 = vpop.permute.xlu0 %4361 }
0x3340   :  { %v4357_v26 = vmul.f32 %v4355_v51, %v4351_v5  ;;  %v4364_v48 = vmul.f32 %v4362_v49, %v6731_v36  ;;  %v4635_v51 = vpop.f32.mrf.mxu0 }
0x3342   :  { %v4365_v18 = vadd.f32 %v4364_v48, %v4357_v26  ;;  %v4517_v26 = vrot.slane %v6806_v31, 1 }
0x3344   :  { %4370 = vrot.lane.b32.xlu1 %v4365_v18, %s5297_s22  ;;  %4367 = vrot.lane.b32.xlu2 %v4365_v18, %s5296_s21  ;;  %v6917_v48 = vperm.slane %v4517_v26, 0  ;;  %s4722_s22 = sshll.u32 %s7007_s11, 4  ;;  %s4723_s22 = int_to_ptr.hbm [resolvable:$true] %s4722_s22 }
0x334c   :  { %4377 = vrot.lane.b32.xlu1 %v4365_v18, %s5295_s20  ;;  %4374 = vrot.lane.b32.xlu2 %v4365_v18, %s5298_s23  ;;  %s5303_s23 = smov [#allocation2]  }
0x334d   :  { %s4705_s26 = sshll.u32 %s5303_s23, 4  ;;  %s4706_s26 = int_to_ptr.vmem [resolvable:$true] %s4705_s26 }
0x3354   :  { %4404 = vperm.xlu1 %4876, %v4146_v3   ;;  %4394 = vperm.xlu2 %4875, %v4145_v2  }
0x335c   :  { %4877 = vset.pattern.permute.xlu1 %v5609_v43  ;;  %4881 = vset.pattern.permute.xlu2 %v5609_v43 }
0x338e   :  { %v4384_v46 = vpop.permute.xlu2 %4383 }
0x339e   :  { %v4368_v10 = vpop.permute.xlu2 %4367 }
0x33a6   :  { %v4389_v36 = vpop.permute.xlu1 %4388  ;;  %v4375_v42 = vpop.permute.xlu2 %4374 }
0x33a7   :  { %v4391_v14 = vmul.f32 %v4389_v36, %v4365_v18  ;;  %v4477_v18 = vmul.f32 0.5, %v6806_v31 }
0x33ae   :  { %v4395_v24 = vpop.permute.xlu2 %4394 }
0x33b6   :  { %v4371_v19 = vpop.permute.xlu1 %4370 }
0x33b7   :  { %v4373_v37 = vsel %vm469_vm11, %v4368_v10, %v4371_v19  ;;  %v4597_v10 = vrot.slane %v6116_v30, 2 }
0x33b8   :  { %v4386_v38 = vmul.f32 %v4384_v46, %v4373_v37 }
0x33ba   :  { %v4392_v45 = vadd.f32 %v4391_v14, %v4386_v38 }
0x33be   :  { %v4378_v59 = vpop.permute.xlu1 %4377 }
0x33bf   :  { %v4380_v61 = vsel %vm477_vm13, %v4375_v42, %v4378_v59  ;;  %v4604_v42 = vsel %vm179_vm5, %v5472_v39, %v755_v52 }
0x33c0   :  { %v4397_v0 = vmul.f32 %v4395_v24, %v4380_v61 }
0x33c2   :  { %v4398_v40 = vadd.f32 %v4397_v0, %v4392_v45 }
0x33c4   :  { %v4399_v32 = vmax.f32 %v4398_v40, 1e-30 }
0x33c6   :  { %5197 = vlog2.f32 %v4399_v32  ;;  %v4405_v62 = vpop.permute.xlu1 %4404 }
0x33cc   :  { %v5198_v35 = vpop.eup %5197 }
0x33cd   :  { %v4401_v44 = vmul.f32 0.6931472, %v5198_v35 }
0x33cf   :  { %v4407_v6 = vmul.f32 %v4405_v62, %v4401_v44 }
0x33d1   :  { %v4408_v63 = vmul.f32 1.442695, %v4407_v6 }
0x33d3   :  { %5199 = vpow2.f32 %v4408_v63 }
0x33d9   :  { %v5200_v15 = vpop.eup %5199 }
0x33da   :  { %v4410_v57 = vsel %vm394_vm6, %v5200_v15, 0.0  ;;  %vm7049_vm6 = vcmask 1043456  }
0x33db   :  { %4411 = vadd.xlane.f32.xlu2 %v4410_v57 }
0x344e   :  { %v4412_v8 = vpop.xlane.xlu2 %4411 }
0x344f   :  { %v4413_v4 = vadd.f32 1e-16, %v4412_v8 }
0x3451   :  { %5201 = vrcp.f32 %v4413_v4  ;;  %v4425_v16 = vand.u32 2147483648, %v4413_v4  ;;  %v4423_v47 = vand.u32 2147483647, %v4413_v4  ;;  %vm4419_vm13 = vweird.f32 %v4413_v4 }
0x3452   :  { %5203 = vtanh.f32 %v4477_v18 }
0x3453   :  { %v4426_v20 = vor.u32 1.1754944e-38, %v4425_v16  ;;  %vm4424_vm7 = vcmp.eq.f32.partialorder %v4423_v47, 8.507059e+37 }
0x3457   :  { %v5202_v22 = vpop.eup %5201 }
0x3458   :  { %v4415_v21 = vmul.f32 %v5202_v22, %v4413_v4  ;;  %vm4420_vm11 = vweird.f32 %v5202_v22  ;;  %v5204_v46 = vpop.eup %5203 }
0x3459   :  { %vm4421_vm8 = vmor %vm4419_vm13, %vm4420_vm11  ;;  %v4479_v19 = vadd.f32 1.0, %v5204_v46 }
0x345a   :  { %v4416_v2 = vsub.f32 1.0, %v4415_v21 }
0x345b   :  { %v4480_v61 = vmul.f32 0.5, %v4479_v19 }
0x345c   :  { %v4417_v29 = vmul.f32 %v5202_v22, %v4416_v2 }
0x345d   :  { %v4509_v45 = vperm.slane %v4480_v61, 0  ;;  %v4508_v40 = vrot.slane %v4480_v61, 1 }
0x345e   :  { %v4418_v1 = vadd.f32 %v5202_v22, %v4417_v29 }
0x345f   :  { %v4510_v62 = vperm.slane %v4508_v40, 0 }
0x3460   :  { %v4422_v23 = vsel %vm4421_vm8, %v5202_v22, %v4418_v1 }
0x3461   :  { %v4427_v55 = vsel %vm4424_vm7, %v4426_v20, %v4422_v23  ;;  %v4518_v20 = vperm.slane %v6806_v31, 0 }
0x3462   :  { %v6901_v56 = vmul.f32 %v5200_v15, %v4427_v55 }
0x3464   :  { %v4494_v54 = vperm.slane %v6901_v56, 3  ;;  %v4429_v27 = vperm.slane %v6901_v56, 0  ;;  %v4442_v5 = vperm.slane %v6901_v56, 1  ;;  %v4481_v49 = vperm.slane %v6901_v56, 2 }
0x3466   :  { %4499 = vperm.xlu2 %4881, %v4494_v54   ;;  %4440 = vperm.xlu0 %4878, %v4429_v27  }
0x3467   :  { %4434 = vperm.xlu1 %4877, %v4429_v27  }
0x346e   :  { %4672 = vrot.lane.b32.xlu2 %v4073_v53, %s5291_s19  ;;  %4880 = vset.pattern.permute.xlu0 %v5609_v43  ;;  %v4684_v43 = vrot.slane %v6901_v56, 2 }
0x346f   :  { %4643 = vrot.lane.b32.xlu0 %v4635_v51, %s5287_s30  ;;  %4447 = vperm.xlu1 %4877, %v4442_v5  }
0x3477   :  { %4486 = vperm.xlu0 %4880, %v4481_v49   ;;  %4879 = vset.pattern.permute.xlu1 %v5612_v50 }
0x347f   :  { %4453 = vperm.xlu1 %4879, %v4442_v5   ;;  %4882 = vset.pattern.permute.xlu0 %v5612_v50  ;;  %v4595_v50 = vrot.slane %v5916_v11, 4 }
0x3481   :  { %v4605_v37 = vsel %vm7049_vm6, %v4604_v42, %v4595_v50 }
0x3482   :  { %v4606_v38 = vsel %vm7050_vm0, %v4605_v37, %v4597_v10 }
0x3487   :  { %4492 = vperm.xlu1 %4879, %v4481_v49  }
0x34c0   :  { %v4500_v12 = vpop.permute.xlu2 %4499 }
0x34c1   :  { %v4524_v53 = vmul.f32 %v6917_v48, %v4500_v12  ;;  %v4515_v6 = vmul.f32 %v4510_v62, %v4500_v12 }
0x34c3   :  { %4558 = vrot.lane.b32.xlu2 %v4524_v53, %s5291_s19  ;;  %v4528_v4 = vsub.f32 1.0, %v4515_v6 }
0x34c8   :  { %v4673_v53 = vpop.permute.xlu2 %4672 }
0x34cb   :  { %4685 = vrot.lane.b32.xlu2 %v4684_v43, %s5287_s30 }
0x34d8   :  { %v4441_v3 = vpop.permute.xlu0 %4440 }
0x34d9   :  { %v4435_v36 = vpop.permute.xlu1 %4434  ;;  %v4456_v59 = vmul.f32 %v4441_v3, %v6800_v17 }
0x34da   :  { %v4455_v24 = vmul.f32 %v4435_v36, %v6791_v7 }
0x34db   :  { %v4460_v30 = vsel %vm245_vm4, %v4456_v59, 0.0 }
0x34dc   :  { %v4459_v25 = vsel %vm245_vm4, %v4455_v24, 0.0 }
0x34dd   :  { %v4461_v0 = vadd.f32 %v4460_v30, %v4459_v25  ;;  %v4602_v30 = vrot.slane %v6806_v31, 2 }
0x34df   :  { %v4462_v44 = vrot.slane %v4461_v0, 4 }
0x34e1   :  { %v4644_v14 = vpop.permute.xlu0 %4643  ;;  %v4448_v39 = vpop.permute.xlu1 %4447  ;;  %v4463_v15 = vadd.f32 %v4462_v44, %v4461_v0  ;;  %v4676_v44 = vrot.slane %v6768_v33, 6 }
0x34e2   :  { %v6934_v11 = vadd.f32 %v4644_v14, %v4606_v38  ;;  %v4457_v63 = vmul.f32 %v4448_v39, %v6811_v9 }
0x34e3   :  { %v4464_v2 = vrot.slane %v4463_v15, 2 }
0x34e4   :  { %v4468_v22 = vsel %vm245_vm4, %v4457_v63, 0.0 }
0x34e5   :  { %v4465_v47 = vadd.f32 %v4464_v2, %v4463_v15 }
0x34e7   :  { %v4466_v27 = vrot.slane %v4465_v47, 1 }
0x34e9   :  { %v4487_v52 = vpop.permute.xlu0 %4486  ;;  %v4467_v26 = vadd.f32 %v4466_v27, %v4465_v47 }
0x34ea   :  { %v4513_v32 = vmul.f32 %v4509_v45, %v4487_v52  ;;  %v4522_v55 = vmul.f32 %v4518_v20, %v4487_v52 }
0x34ec   :  { %v4526_v35 = vsub.f32 1.0, %v4513_v32 }
0x34ee   :  { %4534 = vrot.lane.b32.xlu0 %v4526_v35, %s5284_s1 }
0x34f1   :  { %v4454_v57 = vpop.permute.xlu1 %4453 }
0x34f2   :  { %v4458_v8 = vmul.f32 %v4454_v57, %v6796_v58 }
0x34f4   :  { %v4469_v21 = vsel %vm245_vm4, %v4458_v8, 0.0 }
0x34f5   :  { %v4470_v16 = vadd.f32 %v4469_v21, %v4468_v22 }
0x34f6   :  { %4538 = vrot.lane.b32.xlu0 %v4528_v4, %s5284_s1 }
0x34f7   :  { %v4471_v29 = vrot.slane %v4470_v16, 4 }
0x34f9   :  { %v4472_v1 = vadd.f32 %v4471_v29, %v4470_v16  ;;  %v4493_v49 = vpop.permute.xlu1 %4492 }
0x34fa   :  { %v4523_v3 = vmul.f32 %v4518_v20, %v4493_v49  ;;  %v4514_v24 = vmul.f32 %v4509_v45, %v4493_v49 }
0x34fb   :  { %v4473_v23 = vrot.slane %v4472_v1, 2 }
0x34fc   :  { %v4527_v61 = vsub.f32 1.0, %v4514_v24 }
0x34fd   :  { %v4474_v5 = vadd.f32 %v4473_v23, %v4472_v1 }
0x34fe   :  { %4554 = vrot.lane.b32.xlu0 %v4522_v55, %s5291_s19 }
0x34ff   :  { %v4475_v51 = vrot.slane %v4474_v5, 1 }
0x3501   :  { %v4476_v12 = vadd.f32 %v4475_v51, %v4474_v5 }
0x3503   :  { %v4584_v43 = vsel %vm7051_vm12, %v4476_v12, %v4467_v26  ;;  %v4670_v18 = vsel %vm297_vm1, %v4476_v12, %v4467_v26  ;;  %vm7053_vm1 = vmmov %vm7049_vm6 }
0x3504   :  { %v4593_v50 = vsel %vm7052_vm15, %v6756_v60, %v4584_v43  ;;  %v6951_v46 = vsel %vm245_vm4, %v4670_v18, %v4673_v53 }
0x3505   :  { %4761 = vmatmul.msk.f32.gmra.mxu0 %vm245_vm4, %v4593_v50 }
0x3506   :  { %4556 = vrot.lane.b32.xlu0 %v4523_v3, %s5291_s19 }
0x350e   :  { %4681 = vrot.lane.b32.xlu0 %v6901_v56, %s5300_s7 }
0x351d   :  { %v4559_v19 = vpop.permute.xlu2 %4558 }
0x3525   :  { %v4686_v4 = vpop.permute.xlu2 %4685 }
0x3560   :  { %v4535_v10 = vpop.permute.xlu0 %4534 }
0x3561   :  { %v4546_v60 = vmul.f32 %v4535_v10, %v6791_v7  ;;  %v4607_v7 = vsel %vm179_vm5, %v6290_v28, %v2983_v41  ;;  %v4651_v41 = vmul.f32 0.5, %v6934_v11  ;;  %vm4667_vm5 = vcmask 64512  }
0x3568   :  { %v4539_v36 = vpop.permute.xlu0 %4538 }
0x3569   :  { %v4548_v42 = vmul.f32 %v4539_v36, %v6811_v9  ;;  %v4600_v9 = vrot.slane %v6640_v34, 4 }
0x356b   :  { %v4568_v37 = vadd.f32 %v4559_v19, %v4548_v42  ;;  %v4608_v25 = vsel %vm7053_vm1, %v4607_v7, %v4600_v9 }
0x356c   :  { %v4609_v0 = vsel %vm7054_vm14, %v4608_v25, %v4602_v30 }
0x356d   :  { %4699 = vst.msk [vmem:[#allocation4 + $0x10] sm:$0xff] %vm245_vm4, %v4568_v37 }
0x3570   :  { %v4555_v38 = vpop.permute.xlu0 %4554 }
0x3571   :  { %v4566_v14 = vadd.f32 %v4555_v38, %v4546_v60 }
0x3573   :  { %4697 = vst.msk [vmem:[#allocation4] sm:$0xff] %vm245_vm4, %v4566_v14 }
0x3578   :  { %v4557_v35 = vpop.permute.xlu0 %4556 }
0x3582   :  { %v4638_v59 = vpop.f32.mrf.mxu0 }
0x3583   :  { %4645 = vrot.lane.b32.xlu1 %v4638_v59, %s5287_s30  ;;  %s5301_s30 = smov 16  }
0x358b   :  { %4505 = vperm.xlu1 %4879, %v4494_v54  }
0x3593   :  { %4536 = vrot.lane.b32.xlu1 %v4527_v61, %s5284_s1 }
0x35f5   :  { %v4646_v39 = vpop.permute.xlu1 %4645 }
0x35f6   :  { %v4650_v56 = vadd.f32 %v4646_v39, %v4609_v0 }
0x35f8   :  { %v4652_v54 = vmul.f32 0.5, %v4650_v56 }
0x35fa   :  { %5205 = vtanh.f32 %v4652_v54 }
0x35fb   :  { %5207 = vtanh.f32 %v4651_v41 }
0x35fd   :  { %v4506_v45 = vpop.permute.xlu1 %4505 }
0x35fe   :  { %v4516_v52 = vmul.f32 %v4510_v62, %v4506_v45  ;;  %v4525_v62 = vmul.f32 %v6917_v48, %v4506_v45 }
0x3600   :  { %v5206_v40 = vpop.eup %5205  ;;  %v4529_v32 = vsub.f32 1.0, %v4516_v52 }
0x3601   :  { %v4656_v34 = vadd.f32 1.0, %v5206_v40  ;;  %v5208_v63 = vpop.eup %5207 }
0x3602   :  { %4540 = vrot.lane.b32.xlu1 %v4529_v32, %s5284_s1  ;;  %v4655_v15 = vadd.f32 1.0, %v5208_v63 }
0x3603   :  { %v4658_v31 = vmul.f32 0.5, %v4656_v34 }
0x3604   :  { %v4657_v57 = vmul.f32 0.5, %v4655_v15 }
0x3605   :  { %4663 = vrot.lane.b32.xlu0 %v4658_v31, %s5286_s5  ;;  %v4537_v13 = vpop.permute.xlu1 %4536 }
0x3606   :  { %v4547_v28 = vmul.f32 %v4537_v13, %v6800_v17  ;;  %v4682_v17 = vpop.permute.xlu0 %4681 }
0x3608   :  { %v4567_v6 = vadd.f32 %v4557_v35, %v4547_v28 }
0x360a   :  { %4698 = vst.msk [vmem:[#allocation4 + $0x8] sm:$0xff] %vm245_vm4, %v4567_v6  ;;  %4677 = vrot.lane.b32.xlu1 %v4676_v44, %s5301_s30 }
0x3612   :  { %4560 = vrot.lane.b32.xlu1 %v4525_v62, %s5291_s19 }
0x361a   :  { %4661 = vrot.lane.b32.xlu1 %v4657_v57, %s5286_s5  ;;  %s5302_s5 = smov [#allocation4]  }
0x361b   :  { %s4720_s19 = sshll.u32 %s5302_s5, 4  ;;  %s4721_s19 = int_to_ptr.vmem [resolvable:$true] %s4720_s19 }
0x3674   :  { %v4541_v11 = vpop.permute.xlu1 %4540 }
0x3675   :  { %v4549_v16 = vmul.f32 %v4541_v11, %v6796_v58 }
0x3677   :  { %v4664_v8 = vpop.permute.xlu0 %4663 }
0x3678   :  { %4669 = vst.msk [vmem:[#allocation2 + $0x8] sm:$0xff] %vm4667_vm5, %v4664_v8 }
0x367c   :  { %v4678_v33 = vpop.permute.xlu1 %4677 }
0x367d   :  { %v4689_v48 = vsel %vm95_vm2, %v6951_v46, %v4678_v33 }
0x367e   :  { %v4691_v22 = vsel %vm4690_vm10, %v4689_v48, %v4682_v17 }
0x367f   :  { %v4693_v21 = vsel %vm4692_vm9, %v4691_v22, %v4686_v4 }
0x3680   :  { %v4695_v2 = vsel %vm4694_vm3, %v4693_v21, 0.0 }
0x3681   :  { %4696 = vst [vmem:[%s7006_s10] sm:$0x3] %v4695_v2  ;;  %s4707_s10 = sshll.u32 %s7005_s9, 4  ;;  %s4708_s10 = int_to_ptr.hbm [resolvable:$true] %s4707_s10 }
0x3684   :  { %v4561_v29 = vpop.permute.xlu1 %4560 }
0x3685   :  { %v4569_v47 = vadd.f32 %v4561_v29, %v4549_v16 }
0x3687   :  { %4700 = vst.msk [vmem:[#allocation4 + $0x18] sm:$0xff] %vm245_vm4, %v4569_v47 }
0x3688   :  { %4728 = dma.vmem_to_hbm [thread:$0]  %s4721_s19, 512, %s4723_s22, [#allocation5], %s5304_s27, %s5304_s27, %s5305_s28  }
0x368c   :  { %v4662_v1 = vpop.permute.xlu1 %4661 }
0x368d   :  { %4668 = vst.msk [vmem:[#allocation2] sm:$0xff] %vm4667_vm5, %v4662_v1 }
0x368e   :  { %4713 = dma.vmem_to_hbm [thread:$0]  %s4706_s26, 256, %s4708_s10, [#allocation3], %s5304_s27, %s5304_s27, %s5305_s28  }
0x368f   :  { %5280 = dma.done.wait [#allocation3], 256  }
0x3690   :  { %5281 = vsyncadd [#allocation3], 4294967040 }
0x3691   :  { %5282 = dma.done.wait [#allocation5], 512  }
0x3692   :  { %5283 = vsyncadd [#allocation5], 4294966784 }
0x3693   :  { %4739 = vsyncpa [#allocation3], 1 }
0x3694   :  { %4740 = vsyncpa [#allocation5], 1 }

</bundles_post_ra>
